<compile_context>
chip_gen: v6e
topology: v6e:2x2x1
jax: 0.10.0
libtpu: 0.0.40
codegen_flags: <defaults>
</compile_context>

<pallas_src>
import functools

import jax
import jax.numpy as jnp
from jax.experimental import pallas as pl
from jax.experimental.pallas import tpu as pltpu

LEAKY_SLOPE = 0.2   # config.LEAKY_RELU_SLOPE assumed 0.2 (standard DCGAN value)
BN_EPS = 1e-5       # nn.BatchNorm2d default eps
LANE = 128
BATCH_ALIGN = 16    # bf16 scratch -> every slice start on a packed-sublane tile


def _round_up(x, m):
    return (x + m - 1) // m * m


# -----------------------------------------------------------------------------
# Fused kernel: all three DiscBlocks in a single pallas_call.
# -----------------------------------------------------------------------------
def fused_disc_kernel(p1_ref, w1_ref, b1_ref,
                      w2_ref, b2_ref, g2_ref, be2_ref,
                      w3_ref, b3_ref, g3_ref, be3_ref,
                      m2_ref, m3_ref,
                      o_ref,
                      a1_ref,
                      *, nb, hs, no2, inv_n2, inv_n3):
    f32 = jnp.float32
    bf16 = jnp.bfloat16
    c1p = a1_ref.shape[1]                        # padded conv-1 output channels
    c2p = w2_ref.shape[1]                        # padded conv-2 output channels
    grp = hs * hs * nb                           # rows per parity group of a1
    acc_rows = ((no2 - 1) * hs + no2) * nb       # spatially padded layer-2 rows

    def leaky(x):
        return jnp.maximum(x, LEAKY_SLOPE * x)

    def masked_bn(x, m, inv_n, gamma, beta):
        # Train-mode BN (biased variance), centered two-pass form.  Statistics
        # are restricted to real rows (m is 1.0 on real rows, 0.0 on batch-pad
        # and spatial-garbage rows); normalization is applied to every row.
        mean = jnp.sum(x * m, axis=0, keepdims=True) * inv_n
        d = x - mean
        var = jnp.sum(d * d * m, axis=0, keepdims=True) * inv_n
        return d * jax.lax.rsqrt(var + BN_EPS) * gamma + beta

    # ---- Block 1: Conv2d(1, H, 10, 2) + LeakyReLU (no BatchNorm) ------------
    # bf16 MXU matmul over the prebuilt parity-ordered patches, f32 epilogue,
    # bf16 store to the VMEM-resident activation scratch.
    h1 = jnp.dot(p1_ref[...], w1_ref[...], preferred_element_type=f32)
    a1_ref[...] = leaky(h1 + b1_ref[...]).astype(bf16)

    # ---- Block 2: Conv2d(H, 2H, 4, 2) + BatchNorm + LeakyReLU ---------------
    # 16 accumulated MXU matmuls, one per (ki, kj) kernel tap.  The parity row
    # ordering of a1 makes every tap a single contiguous nb-aligned slice.
    h2 = None
    for ki in range(4):
        for kj in range(4):
            g = (ki % 2) * 2 + (kj % 2)                          # parity group
            src = g * grp + ((ki // 2) * hs + (kj // 2)) * nb    # in-group shift
            part = jnp.dot(
                a1_ref[src:src + acc_rows, :],
                w2_ref[(ki * 4 + kj) * c1p:(ki * 4 + kj + 1) * c1p, :],
                preferred_element_type=f32)
            h2 = part if h2 is None else h2 + part
    h2 = leaky(masked_bn(h2 + b2_ref[...], m2_ref[...], inv_n2,
                         g2_ref[...], be2_ref[...]))
    a2 = h2.astype(bf16)

    # ---- Block 3: Conv2d(2H, out, 4, 2) + BatchNorm (no activation) ---------
    # The 4x4 kernel covers the whole 4x4 map (1x1 output): accumulate 16
    # per-position matmuls straight from a2 (no lane concatenation).
    h3 = None
    for p in range(no2 * no2):
        oh, ow = p // no2, p % no2
        part = jnp.dot(
            a2[(oh * hs + ow) * nb:(oh * hs + ow + 1) * nb, :],
            w3_ref[p * c2p:(p + 1) * c2p, :],
            preferred_element_type=f32)
        h3 = part if h3 is None else h3 + part
    o_ref[...] = masked_bn(h3 + b3_ref[...], m3_ref[...], inv_n3,
                           g3_ref[...], be3_ref[...])


# -----------------------------------------------------------------------------
# Host-side glue (layer-1 im2col + parameter packing).
# -----------------------------------------------------------------------------
def im2col_l1_parity(x_nhwc, k, s):
    """Layer-1 patches; rows ordered (h%2, w%2, h//2, w//2, n), patch (ki,kj,cin)."""
    n, h, w, c = x_nhwc.shape
    oh = (h - k) // s + 1
    ow = (w - k) // s + 1
    assert oh % 2 == 0 and ow % 2 == 0
    cols = []
    for ki in range(k):
        for kj in range(k):
            cols.append(x_nhwc[:, ki:ki + s * oh:s, kj:kj + s * ow:s, :])  # [n,oh,ow,c]
    p = jnp.stack(cols, axis=3).reshape(n, oh, ow, k * k * c)
    p = p.reshape(n, oh // 2, 2, ow // 2, 2, k * k * c)   # [n, h', ph, w', pw, K]
    p = jnp.transpose(p, (2, 4, 1, 3, 0, 5))              # [ph, pw, h', w', n, K]
    return p.reshape(2 * 2 * (oh // 2) * (ow // 2) * n, k * k * c), oh, ow


def conv_w_padded(w, cin_pad, cout_pad):
    """PyTorch conv weight [Co, Ci, kh, kw] -> [(kh*kw*cin_pad), cout_pad],
    row-blocked by (kh, kw); padded rows/cols are zero."""
    co, ci, kh, kw = w.shape
    wt = jnp.transpose(w, (2, 3, 1, 0))                       # [kh, kw, ci, co]
    wt = jnp.pad(wt, ((0, 0), (0, 0), (0, cin_pad - ci), (0, cout_pad - co)))
    return wt.reshape(kh * kw * cin_pad, cout_pad)


def pack_params(raw):
    """Pack PyTorch-layout parameters into padded, kernel-ready arrays."""
    c1 = raw[0]["w"].shape[0]
    c2 = raw[1]["w"].shape[0]
    c3 = raw[2]["w"].shape[0]
    c1p, c2p, c3p = (_round_up(c, LANE) for c in (c1, c2, c3))

    def vec(v, cp, fill=0.0):
        v = jnp.pad(v, (0, cp - v.shape[0]), constant_values=fill)
        return v[None, :].astype(jnp.float32)

    # Layer 1: pad the whole reduction dim (kh*kw*cin = 100) up to 128.
    w1 = conv_w_padded(raw[0]["w"], raw[0]["w"].shape[1], c1p)          # [100, c1p]
    w1 = jnp.pad(w1, ((0, _round_up(w1.shape[0], LANE) - w1.shape[0]), (0, 0)))
    # Layers 2/3: pad input channels inside each (ki,kj) block so the weight
    # row blocks line up with the lane-dense (padded-channel) activations.
    w2 = conv_w_padded(raw[1]["w"], c1p, c2p)                           # [16*c1p, c2p]
    w3 = conv_w_padded(raw[2]["w"], c2p, c3p)                           # [16*c2p, c3p]
    return dict(
        w1=w1.astype(jnp.bfloat16), b1=vec(raw[0]["b"], c1p),
        w2=w2.astype(jnp.bfloat16), b2=vec(raw[1]["b"], c2p),
        g2=vec(raw[1]["gamma"], c2p, 1.0), be2=vec(raw[1]["beta"], c2p),
        w3=w3.astype(jnp.bfloat16), b3=vec(raw[2]["b"], c3p),
        g3=vec(raw[2]["gamma"], c3p, 1.0), be3=vec(raw[2]["beta"], c3p),
    )


def init_params(key, hidden=32, in_ch=1, out_ch=1):
    shapes = [
        (hidden, in_ch, 10, 10),        # input_layer:  Conv2d(1, H, 10, 2)
        (hidden * 2, hidden, 4, 4),     # middle:       Conv2d(H, 2H, 4, 2)
        (out_ch, hidden * 2, 4, 4),     # final_layer:  Conv2d(2H, out, 4, 2)
    ]
    raw = []
    for s in shapes:
        key, kw_, kb_ = jax.random.split(key, 3)
        raw.append(dict(
            w=jax.random.normal(kw_, s, jnp.float32) * 0.05,
            b=jax.random.normal(kb_, (s[0],), jnp.float32) * 0.01,
            gamma=jnp.ones((s[0],), jnp.float32),    # BatchNorm2d affine defaults
            beta=jnp.zeros((s[0],), jnp.float32),
        ))
    return pack_params(raw)


@functools.partial(jax.jit, static_argnames=("out_ch",))
def discriminator_forward(x_nchw, params, out_ch=1):
    """x_nchw: [N, 1, 28, 28] -> [N, out_ch, 1, 1] (train-mode BN, like the module)."""
    x = jnp.transpose(x_nchw, (0, 2, 3, 1)).astype(jnp.float32)     # NCHW -> NHWC
    assert x.shape[1:] == (28, 28, 1), "kernel is specialised to MNIST 28x28x1"
    nb_real = x.shape[0]
    nb = _round_up(nb_real, BATCH_ALIGN)
    if nb != nb_real:
        # Zero-pad the batch; BN statistics are masked to the real rows below.
        x = jnp.pad(x, ((0, nb - nb_real), (0, 0), (0, 0), (0, 0)))

    # Layer-1 im2col (parity-grouped rows): the only HBM intermediate, bf16,
    # reduction dim padded 100 -> 128.
    p1, oh1, ow1 = im2col_l1_parity(x, k=10, s=2)
    k1p = params["w1"].shape[0]
    p1 = jnp.pad(p1, ((0, 0), (0, k1p - p1.shape[1]))).astype(jnp.bfloat16)

    hs = oh1 // 2                        # parity sub-map side (5)
    no2 = (oh1 - 4) // 2 + 1             # layer-2 output side (4)
    assert no2 == 4, "final 4x4 conv must reduce the map to 1x1"

    c1p = params["w1"].shape[1]
    c3p = params["w3"].shape[1]
    acc_rows = ((no2 - 1) * hs + no2) * nb

    # BN-statistic validity masks (1.0 on real rows, 0.0 on pad/garbage rows).
    r2 = jnp.arange(acc_rows)
    m2 = ((((r2 // nb) % hs) < no2) & ((r2 % nb) < nb_real)).astype(jnp.float32)[:, None]
    m3 = (jnp.arange(nb) < nb_real).astype(jnp.float32)[:, None]

    kernel = functools.partial(
        fused_disc_kernel, nb=nb, hs=hs, no2=no2,
        inv_n2=1.0 / float(no2 * no2 * nb_real), inv_n3=1.0 / float(nb_real))
    vmem = pl.BlockSpec(memory_space=pltpu.MemorySpace.VMEM)
    out = pl.pallas_call(
        kernel,
        out_shape=jax.ShapeDtypeStruct((nb, c3p), jnp.float32),
        in_specs=[vmem] * 13,
        out_specs=vmem,
        scratch_shapes=[
            pltpu.VMEM((oh1 * ow1 * nb, c1p), jnp.bfloat16),   # layer-1 activation
        ],
        compiler_params=pltpu.CompilerParams(vmem_limit_bytes=32 * 1024 * 1024),
    )(p1, params["w1"], params["b1"],
      params["w2"], params["b2"], params["g2"], params["be2"],
      params["w3"], params["b3"], params["g3"], params["be3"],
      m2, m3)

    return out[:nb_real, :out_ch].reshape(nb_real, out_ch, 1, 1)


if __name__ == "__main__":
    key = jax.random.PRNGKey(0)
    k_x, k_p = jax.random.split(key)
    # MNIST-shaped input (28x28 is required by the kernel_size=10 first conv);
    # hidden_units scaled down to 32 to keep the example small.
    x = jax.random.normal(k_x, (2, 1, 28, 28), jnp.float32)
    params = init_params(k_p, hidden=32, in_ch=1, out_ch=1)

    y = discriminator_forward(x, params, out_ch=1)
    jax.block_until_ready(y)
    assert y.shape == (2, 1, 1, 1), y.shape
    assert bool(jnp.all(jnp.isfinite(y))), "non-finite output"
    print("KERNEL_OK")
</pallas_src>

<mosaic_0001>
module attributes {stable_mosaic.version = 11 : i64} {
  func.func @fused_disc_kernel(%arg0: memref<1600x128xbf16, #tpu.memory_space<vmem>>, %arg1: memref<128x128xbf16, #tpu.memory_space<vmem>>, %arg2: memref<1x128xf32, #tpu.memory_space<vmem>>, %arg3: memref<2048x128xbf16, #tpu.memory_space<vmem>>, %arg4: memref<1x128xf32, #tpu.memory_space<vmem>>, %arg5: memref<1x128xf32, #tpu.memory_space<vmem>>, %arg6: memref<1x128xf32, #tpu.memory_space<vmem>>, %arg7: memref<2048x128xbf16, #tpu.memory_space<vmem>>, %arg8: memref<1x128xf32, #tpu.memory_space<vmem>>, %arg9: memref<1x128xf32, #tpu.memory_space<vmem>>, %arg10: memref<1x128xf32, #tpu.memory_space<vmem>>, %arg11: memref<304x1xf32, #tpu.memory_space<vmem>>, %arg12: memref<16x1xf32, #tpu.memory_space<vmem>>, %arg13: memref<16x128xf32, #tpu.memory_space<vmem>>, %arg14: memref<1600x128xbf16, #tpu.memory_space<vmem>>) attributes {dimension_semantics = [], scalar_prefetch = 0 : i64, scratch_operands = 1 : i64, tpu.core_type = #tpu.core_type<tc>} {
    %c0 = arith.constant 0 : index
    %c0_0 = arith.constant 0 : index
    %0 = vector.load %arg0[%c0, %c0_0] : memref<1600x128xbf16, #tpu.memory_space<vmem>>, vector<1600x128xbf16>
    %c0_1 = arith.constant 0 : index
    %c0_2 = arith.constant 0 : index
    %1 = vector.load %arg1[%c0_1, %c0_2] : memref<128x128xbf16, #tpu.memory_space<vmem>>, vector<128x128xbf16>
    %cst = arith.constant dense<0.000000e+00> : vector<1600x128xf32>
    %2 = tpu.matmul %0, %1, %cst {dimension_numbers = #tpu.dot_dimension_numbers<[1], [0], [0], [1], [0, 0, 1, 1], [], []>} : vector<1600x128xbf16>, vector<128x128xbf16>, vector<1600x128xf32> -> vector<1600x128xf32>
    %c0_3 = arith.constant 0 : index
    %c0_4 = arith.constant 0 : index
    %3 = vector.load %arg2[%c0_3, %c0_4] : memref<1x128xf32, #tpu.memory_space<vmem>>, vector<1x128xf32>
    %4 = vector.broadcast %3 : vector<1x128xf32> to vector<1600x128xf32>
    %5 = arith.addf %2, %4 : vector<1600x128xf32>
    %cst_5 = arith.constant 2.000000e-01 : f32
    %6 = vector.broadcast %cst_5 : f32 to vector<1600x128xf32>
    %7 = arith.mulf %6, %5 : vector<1600x128xf32>
    %8 = arith.maximumf %5, %7 : vector<1600x128xf32>
    %9 = arith.truncf %8 : vector<1600x128xf32> to vector<1600x128xbf16>
    %c0_6 = arith.constant 0 : index
    %c0_7 = arith.constant 0 : index
    %10 = vector.load %arg14[%c0_6, %c0_7] : memref<1600x128xbf16, #tpu.memory_space<vmem>>, vector<1600x128xbf16>
    tpu.vector_store %arg14[%c0_6, %c0_7], %9 {strides = array<i32>} : memref<1600x128xbf16, #tpu.memory_space<vmem>>, vector<1600x128xbf16>,
    %c0_8 = arith.constant 0 : index
    %c0_9 = arith.constant 0 : index
    %11 = vector.load %arg14[%c0_8, %c0_9] : memref<1600x128xbf16, #tpu.memory_space<vmem>>, vector<304x128xbf16>
    %c0_10 = arith.constant 0 : index
    %c0_11 = arith.constant 0 : index
    %12 = vector.load %arg3[%c0_10, %c0_11] : memref<2048x128xbf16, #tpu.memory_space<vmem>>, vector<128x128xbf16>
    %cst_12 = arith.constant dense<0.000000e+00> : vector<304x128xf32>
    %13 = tpu.matmul %11, %12, %cst_12 {dimension_numbers = #tpu.dot_dimension_numbers<[1], [0], [0], [1], [0, 0, 1, 1], [], []>} : vector<304x128xbf16>, vector<128x128xbf16>, vector<304x128xf32> -> vector<304x128xf32>
    %c400 = arith.constant 400 : index
    %c0_13 = arith.constant 0 : index
    %14 = vector.load %arg14[%c400, %c0_13] : memref<1600x128xbf16, #tpu.memory_space<vmem>>, vector<304x128xbf16>
    %c128 = arith.constant 128 : index
    %c0_14 = arith.constant 0 : index
    %15 = vector.load %arg3[%c128, %c0_14] : memref<2048x128xbf16, #tpu.memory_space<vmem>>, vector<128x128xbf16>
    %cst_15 = arith.constant dense<0.000000e+00> : vector<304x128xf32>
    %16 = tpu.matmul %14, %15, %cst_15 {dimension_numbers = #tpu.dot_dimension_numbers<[1], [0], [0], [1], [0, 0, 1, 1], [], []>} : vector<304x128xbf16>, vector<128x128xbf16>, vector<304x128xf32> -> vector<304x128xf32>
    %17 = arith.addf %13, %16 : vector<304x128xf32>
    %c16 = arith.constant 16 : index
    %c0_16 = arith.constant 0 : index
    %18 = vector.load %arg14[%c16, %c0_16] : memref<1600x128xbf16, #tpu.memory_space<vmem>>, vector<304x128xbf16>
    %c256 = arith.constant 256 : index
    %c0_17 = arith.constant 0 : index
    %19 = vector.load %arg3[%c256, %c0_17] : memref<2048x128xbf16, #tpu.memory_space<vmem>>, vector<128x128xbf16>
    %cst_18 = arith.constant dense<0.000000e+00> : vector<304x128xf32>
    %20 = tpu.matmul %18, %19, %cst_18 {dimension_numbers = #tpu.dot_dimension_numbers<[1], [0], [0], [1], [0, 0, 1, 1], [], []>} : vector<304x128xbf16>, vector<128x128xbf16>, vector<304x128xf32> -> vector<304x128xf32>
    %21 = arith.addf %17, %20 : vector<304x128xf32>
    %c416 = arith.constant 416 : index
    %c0_19 = arith.constant 0 : index
    %22 = vector.load %arg14[%c416, %c0_19] : memref<1600x128xbf16, #tpu.memory_space<vmem>>, vector<304x128xbf16>
    %c384 = arith.constant 384 : index
    %c0_20 = arith.constant 0 : index
    %23 = vector.load %arg3[%c384, %c0_20] : memref<2048x128xbf16, #tpu.memory_space<vmem>>, vector<128x128xbf16>
    %cst_21 = arith.constant dense<0.000000e+00> : vector<304x128xf32>
    %24 = tpu.matmul %22, %23, %cst_21 {dimension_numbers = #tpu.dot_dimension_numbers<[1], [0], [0], [1], [0, 0, 1, 1], [], []>} : vector<304x128xbf16>, vector<128x128xbf16>, vector<304x128xf32> -> vector<304x128xf32>
    %25 = arith.addf %21, %24 : vector<304x128xf32>
    %c800 = arith.constant 800 : index
    %c0_22 = arith.constant 0 : index
    %26 = vector.load %arg14[%c800, %c0_22] : memref<1600x128xbf16, #tpu.memory_space<vmem>>, vector<304x128xbf16>
    %c512 = arith.constant 512 : index
    %c0_23 = arith.constant 0 : index
    %27 = vector.load %arg3[%c512, %c0_23] : memref<2048x128xbf16, #tpu.memory_space<vmem>>, vector<128x128xbf16>
    %cst_24 = arith.constant dense<0.000000e+00> : vector<304x128xf32>
    %28 = tpu.matmul %26, %27, %cst_24 {dimension_numbers = #tpu.dot_dimension_numbers<[1], [0], [0], [1], [0, 0, 1, 1], [], []>} : vector<304x128xbf16>, vector<128x128xbf16>, vector<304x128xf32> -> vector<304x128xf32>
    %29 = arith.addf %25, %28 : vector<304x128xf32>
    %c1200 = arith.constant 1200 : index
    %c0_25 = arith.constant 0 : index
    %30 = vector.load %arg14[%c1200, %c0_25] : memref<1600x128xbf16, #tpu.memory_space<vmem>>, vector<304x128xbf16>
    %c640 = arith.constant 640 : index
    %c0_26 = arith.constant 0 : index
    %31 = vector.load %arg3[%c640, %c0_26] : memref<2048x128xbf16, #tpu.memory_space<vmem>>, vector<128x128xbf16>
    %cst_27 = arith.constant dense<0.000000e+00> : vector<304x128xf32>
    %32 = tpu.matmul %30, %31, %cst_27 {dimension_numbers = #tpu.dot_dimension_numbers<[1], [0], [0], [1], [0, 0, 1, 1], [], []>} : vector<304x128xbf16>, vector<128x128xbf16>, vector<304x128xf32> -> vector<304x128xf32>
    %33 = arith.addf %29, %32 : vector<304x128xf32>
    %c816 = arith.constant 816 : index
    %c0_28 = arith.constant 0 : index
    %34 = vector.load %arg14[%c816, %c0_28] : memref<1600x128xbf16, #tpu.memory_space<vmem>>, vector<304x128xbf16>
    %c768 = arith.constant 768 : index
    %c0_29 = arith.constant 0 : index
    %35 = vector.load %arg3[%c768, %c0_29] : memref<2048x128xbf16, #tpu.memory_space<vmem>>, vector<128x128xbf16>
    %cst_30 = arith.constant dense<0.000000e+00> : vector<304x128xf32>
    %36 = tpu.matmul %34, %35, %cst_30 {dimension_numbers = #tpu.dot_dimension_numbers<[1], [0], [0], [1], [0, 0, 1, 1], [], []>} : vector<304x128xbf16>, vector<128x128xbf16>, vector<304x128xf32> -> vector<304x128xf32>
    %37 = arith.addf %33, %36 : vector<304x128xf32>
    %c1216 = arith.constant 1216 : index
    %c0_31 = arith.constant 0 : index
    %38 = vector.load %arg14[%c1216, %c0_31] : memref<1600x128xbf16, #tpu.memory_space<vmem>>, vector<304x128xbf16>
    %c896 = arith.constant 896 : index
    %c0_32 = arith.constant 0 : index
    %39 = vector.load %arg3[%c896, %c0_32] : memref<2048x128xbf16, #tpu.memory_space<vmem>>, vector<128x128xbf16>
    %cst_33 = arith.constant dense<0.000000e+00> : vector<304x128xf32>
    %40 = tpu.matmul %38, %39, %cst_33 {dimension_numbers = #tpu.dot_dimension_numbers<[1], [0], [0], [1], [0, 0, 1, 1], [], []>} : vector<304x128xbf16>, vector<128x128xbf16>, vector<304x128xf32> -> vector<304x128xf32>
    %41 = arith.addf %37, %40 : vector<304x128xf32>
    %c80 = arith.constant 80 : index
    %c0_34 = arith.constant 0 : index
    %42 = vector.load %arg14[%c80, %c0_34] : memref<1600x128xbf16, #tpu.memory_space<vmem>>, vector<304x128xbf16>
    %c1024 = arith.constant 1024 : index
    %c0_35 = arith.constant 0 : index
    %43 = vector.load %arg3[%c1024, %c0_35] : memref<2048x128xbf16, #tpu.memory_space<vmem>>, vector<128x128xbf16>
    %cst_36 = arith.constant dense<0.000000e+00> : vector<304x128xf32>
    %44 = tpu.matmul %42, %43, %cst_36 {dimension_numbers = #tpu.dot_dimension_numbers<[1], [0], [0], [1], [0, 0, 1, 1], [], []>} : vector<304x128xbf16>, vector<128x128xbf16>, vector<304x128xf32> -> vector<304x128xf32>
    %45 = arith.addf %41, %44 : vector<304x128xf32>
    %c480 = arith.constant 480 : index
    %c0_37 = arith.constant 0 : index
    %46 = vector.load %arg14[%c480, %c0_37] : memref<1600x128xbf16, #tpu.memory_space<vmem>>, vector<304x128xbf16>
    %c1152 = arith.constant 1152 : index
    %c0_38 = arith.constant 0 : index
    %47 = vector.load %arg3[%c1152, %c0_38] : memref<2048x128xbf16, #tpu.memory_space<vmem>>, vector<128x128xbf16>
    %cst_39 = arith.constant dense<0.000000e+00> : vector<304x128xf32>
    %48 = tpu.matmul %46, %47, %cst_39 {dimension_numbers = #tpu.dot_dimension_numbers<[1], [0], [0], [1], [0, 0, 1, 1], [], []>} : vector<304x128xbf16>, vector<128x128xbf16>, vector<304x128xf32> -> vector<304x128xf32>
    %49 = arith.addf %45, %48 : vector<304x128xf32>
    %c96 = arith.constant 96 : index
    %c0_40 = arith.constant 0 : index
    %50 = vector.load %arg14[%c96, %c0_40] : memref<1600x128xbf16, #tpu.memory_space<vmem>>, vector<304x128xbf16>
    %c1280 = arith.constant 1280 : index
    %c0_41 = arith.constant 0 : index
    %51 = vector.load %arg3[%c1280, %c0_41] : memref<2048x128xbf16, #tpu.memory_space<vmem>>, vector<128x128xbf16>
    %cst_42 = arith.constant dense<0.000000e+00> : vector<304x128xf32>
    %52 = tpu.matmul %50, %51, %cst_42 {dimension_numbers = #tpu.dot_dimension_numbers<[1], [0], [0], [1], [0, 0, 1, 1], [], []>} : vector<304x128xbf16>, vector<128x128xbf16>, vector<304x128xf32> -> vector<304x128xf32>
    %53 = arith.addf %49, %52 : vector<304x128xf32>
    %c496 = arith.constant 496 : index
    %c0_43 = arith.constant 0 : index
    %54 = vector.load %arg14[%c496, %c0_43] : memref<1600x128xbf16, #tpu.memory_space<vmem>>, vector<304x128xbf16>
    %c1408 = arith.constant 1408 : index
    %c0_44 = arith.constant 0 : index
    %55 = vector.load %arg3[%c1408, %c0_44] : memref<2048x128xbf16, #tpu.memory_space<vmem>>, vector<128x128xbf16>
    %cst_45 = arith.constant dense<0.000000e+00> : vector<304x128xf32>
    %56 = tpu.matmul %54, %55, %cst_45 {dimension_numbers = #tpu.dot_dimension_numbers<[1], [0], [0], [1], [0, 0, 1, 1], [], []>} : vector<304x128xbf16>, vector<128x128xbf16>, vector<304x128xf32> -> vector<304x128xf32>
    %57 = arith.addf %53, %56 : vector<304x128xf32>
    %c880 = arith.constant 880 : index
    %c0_46 = arith.constant 0 : index
    %58 = vector.load %arg14[%c880, %c0_46] : memref<1600x128xbf16, #tpu.memory_space<vmem>>, vector<304x128xbf16>
    %c1536 = arith.constant 1536 : index
    %c0_47 = arith.constant 0 : index
    %59 = vector.load %arg3[%c1536, %c0_47] : memref<2048x128xbf16, #tpu.memory_space<vmem>>, vector<128x128xbf16>
    %cst_48 = arith.constant dense<0.000000e+00> : vector<304x128xf32>
    %60 = tpu.matmul %58, %59, %cst_48 {dimension_numbers = #tpu.dot_dimension_numbers<[1], [0], [0], [1], [0, 0, 1, 1], [], []>} : vector<304x128xbf16>, vector<128x128xbf16>, vector<304x128xf32> -> vector<304x128xf32>
    %61 = arith.addf %57, %60 : vector<304x128xf32>
    %c1280_49 = arith.constant 1280 : index
    %c0_50 = arith.constant 0 : index
    %62 = vector.load %arg14[%c1280_49, %c0_50] : memref<1600x128xbf16, #tpu.memory_space<vmem>>, vector<304x128xbf16>
    %c1664 = arith.constant 1664 : index
    %c0_51 = arith.constant 0 : index
    %63 = vector.load %arg3[%c1664, %c0_51] : memref<2048x128xbf16, #tpu.memory_space<vmem>>, vector<128x128xbf16>
    %cst_52 = arith.constant dense<0.000000e+00> : vector<304x128xf32>
    %64 = tpu.matmul %62, %63, %cst_52 {dimension_numbers = #tpu.dot_dimension_numbers<[1], [0], [0], [1], [0, 0, 1, 1], [], []>} : vector<304x128xbf16>, vector<128x128xbf16>, vector<304x128xf32> -> vector<304x128xf32>
    %65 = arith.addf %61, %64 : vector<304x128xf32>
    %c896_53 = arith.constant 896 : index
    %c0_54 = arith.constant 0 : index
    %66 = vector.load %arg14[%c896_53, %c0_54] : memref<1600x128xbf16, #tpu.memory_space<vmem>>, vector<304x128xbf16>
    %c1792 = arith.constant 1792 : index
    %c0_55 = arith.constant 0 : index
    %67 = vector.load %arg3[%c1792, %c0_55] : memref<2048x128xbf16, #tpu.memory_space<vmem>>, vector<128x128xbf16>
    %cst_56 = arith.constant dense<0.000000e+00> : vector<304x128xf32>
    %68 = tpu.matmul %66, %67, %cst_56 {dimension_numbers = #tpu.dot_dimension_numbers<[1], [0], [0], [1], [0, 0, 1, 1], [], []>} : vector<304x128xbf16>, vector<128x128xbf16>, vector<304x128xf32> -> vector<304x128xf32>
    %69 = arith.addf %65, %68 : vector<304x128xf32>
    %c1296 = arith.constant 1296 : index
    %c0_57 = arith.constant 0 : index
    %70 = vector.load %arg14[%c1296, %c0_57] : memref<1600x128xbf16, #tpu.memory_space<vmem>>, vector<304x128xbf16>
    %c1920 = arith.constant 1920 : index
    %c0_58 = arith.constant 0 : index
    %71 = vector.load %arg3[%c1920, %c0_58] : memref<2048x128xbf16, #tpu.memory_space<vmem>>, vector<128x128xbf16>
    %cst_59 = arith.constant dense<0.000000e+00> : vector<304x128xf32>
    %72 = tpu.matmul %70, %71, %cst_59 {dimension_numbers = #tpu.dot_dimension_numbers<[1], [0], [0], [1], [0, 0, 1, 1], [], []>} : vector<304x128xbf16>, vector<128x128xbf16>, vector<304x128xf32> -> vector<304x128xf32>
    %73 = arith.addf %69, %72 : vector<304x128xf32>
    %c0_60 = arith.constant 0 : index
    %c0_61 = arith.constant 0 : index
    %74 = vector.load %arg4[%c0_60, %c0_61] : memref<1x128xf32, #tpu.memory_space<vmem>>, vector<1x128xf32>
    %75 = vector.broadcast %74 : vector<1x128xf32> to vector<304x128xf32>
    %76 = arith.addf %73, %75 : vector<304x128xf32>
    %c0_62 = arith.constant 0 : index
    %c0_63 = arith.constant 0 : index
    %77 = vector.load %arg11[%c0_62, %c0_63] : memref<304x1xf32, #tpu.memory_space<vmem>>, vector<304x1xf32>
    %c0_64 = arith.constant 0 : index
    %c0_65 = arith.constant 0 : index
    %78 = vector.load %arg5[%c0_64, %c0_65] : memref<1x128xf32, #tpu.memory_space<vmem>>, vector<1x128xf32>
    %c0_66 = arith.constant 0 : index
    %c0_67 = arith.constant 0 : index
    %79 = vector.load %arg6[%c0_66, %c0_67] : memref<1x128xf32, #tpu.memory_space<vmem>>, vector<1x128xf32>
    %80 = vector.broadcast %77 : vector<304x1xf32> to vector<304x128xf32>
    %81 = arith.mulf %76, %80 : vector<304x128xf32>
    %cst_68 = arith.constant dense<0.000000e+00> : vector<128xf32>
    %82 = vector.multi_reduction <add>, %81, %cst_68 [0] : vector<304x128xf32> to vector<128xf32>
    %83 = vector.shape_cast %82 : vector<128xf32> to vector<1x128xf32>
    %cst_69 = arith.constant 3.125000e-02 : f32
    %84 = vector.broadcast %cst_69 : f32 to vector<1x128xf32>
    %85 = arith.mulf %83, %84 : vector<1x128xf32>
    %86 = vector.broadcast %85 : vector<1x128xf32> to vector<304x128xf32>
    %87 = arith.subf %76, %86 : vector<304x128xf32>
    %88 = arith.mulf %87, %87 : vector<304x128xf32>
    %89 = vector.broadcast %77 : vector<304x1xf32> to vector<304x128xf32>
    %90 = arith.mulf %88, %89 : vector<304x128xf32>
    %cst_70 = arith.constant dense<0.000000e+00> : vector<128xf32>
    %91 = vector.multi_reduction <add>, %90, %cst_70 [0] : vector<304x128xf32> to vector<128xf32>
    %92 = vector.shape_cast %91 : vector<128xf32> to vector<1x128xf32>
    %cst_71 = arith.constant 3.125000e-02 : f32
    %93 = vector.broadcast %cst_71 : f32 to vector<1x128xf32>
    %94 = arith.mulf %92, %93 : vector<1x128xf32>
    %cst_72 = arith.constant 9.99999974E-6 : f32
    %95 = vector.broadcast %cst_72 : f32 to vector<1x128xf32>
    %96 = arith.addf %94, %95 : vector<1x128xf32>
    %97 = math.rsqrt %96 : vector<1x128xf32>
    %98 = vector.broadcast %97 : vector<1x128xf32> to vector<304x128xf32>
    %99 = arith.mulf %87, %98 : vector<304x128xf32>
    %100 = vector.broadcast %78 : vector<1x128xf32> to vector<304x128xf32>
    %101 = arith.mulf %99, %100 : vector<304x128xf32>
    %102 = vector.broadcast %79 : vector<1x128xf32> to vector<304x128xf32>
    %103 = arith.addf %101, %102 : vector<304x128xf32>
    %cst_73 = arith.constant 2.000000e-01 : f32
    %104 = vector.broadcast %cst_73 : f32 to vector<304x128xf32>
    %105 = arith.mulf %104, %103 : vector<304x128xf32>
    %106 = arith.maximumf %103, %105 : vector<304x128xf32>
    %107 = arith.truncf %106 : vector<304x128xf32> to vector<304x128xbf16>
    %108 = vector.extract_strided_slice %107 {offsets = [0, 0], sizes = [16, 128], strides = [1, 1]} : vector<304x128xbf16> to vector<16x128xbf16>
    %c0_74 = arith.constant 0 : index
    %c0_75 = arith.constant 0 : index
    %109 = vector.load %arg7[%c0_74, %c0_75] : memref<2048x128xbf16, #tpu.memory_space<vmem>>, vector<128x128xbf16>
    %cst_76 = arith.constant dense<0.000000e+00> : vector<16x128xf32>
    %110 = tpu.matmul %108, %109, %cst_76 {dimension_numbers = #tpu.dot_dimension_numbers<[1], [0], [0], [1], [0, 0, 1, 1], [], []>} : vector<16x128xbf16>, vector<128x128xbf16>, vector<16x128xf32> -> vector<16x128xf32>
    %111 = vector.extract_strided_slice %107 {offsets = [16, 0], sizes = [16, 128], strides = [1, 1]} : vector<304x128xbf16> to vector<16x128xbf16>
    %c128_77 = arith.constant 128 : index
    %c0_78 = arith.constant 0 : index
    %112 = vector.load %arg7[%c128_77, %c0_78] : memref<2048x128xbf16, #tpu.memory_space<vmem>>, vector<128x128xbf16>
    %cst_79 = arith.constant dense<0.000000e+00> : vector<16x128xf32>
    %113 = tpu.matmul %111, %112, %cst_79 {dimension_numbers = #tpu.dot_dimension_numbers<[1], [0], [0], [1], [0, 0, 1, 1], [], []>} : vector<16x128xbf16>, vector<128x128xbf16>, vector<16x128xf32> -> vector<16x128xf32>
    %114 = arith.addf %110, %113 : vector<16x128xf32>
    %115 = vector.extract_strided_slice %107 {offsets = [32, 0], sizes = [16, 128], strides = [1, 1]} : vector<304x128xbf16> to vector<16x128xbf16>
    %c256_80 = arith.constant 256 : index
    %c0_81 = arith.constant 0 : index
    %116 = vector.load %arg7[%c256_80, %c0_81] : memref<2048x128xbf16, #tpu.memory_space<vmem>>, vector<128x128xbf16>
    %cst_82 = arith.constant dense<0.000000e+00> : vector<16x128xf32>
    %117 = tpu.matmul %115, %116, %cst_82 {dimension_numbers = #tpu.dot_dimension_numbers<[1], [0], [0], [1], [0, 0, 1, 1], [], []>} : vector<16x128xbf16>, vector<128x128xbf16>, vector<16x128xf32> -> vector<16x128xf32>
    %118 = arith.addf %114, %117 : vector<16x128xf32>
    %119 = vector.extract_strided_slice %107 {offsets = [48, 0], sizes = [16, 128], strides = [1, 1]} : vector<304x128xbf16> to vector<16x128xbf16>
    %c384_83 = arith.constant 384 : index
    %c0_84 = arith.constant 0 : index
    %120 = vector.load %arg7[%c384_83, %c0_84] : memref<2048x128xbf16, #tpu.memory_space<vmem>>, vector<128x128xbf16>
    %cst_85 = arith.constant dense<0.000000e+00> : vector<16x128xf32>
    %121 = tpu.matmul %119, %120, %cst_85 {dimension_numbers = #tpu.dot_dimension_numbers<[1], [0], [0], [1], [0, 0, 1, 1], [], []>} : vector<16x128xbf16>, vector<128x128xbf16>, vector<16x128xf32> -> vector<16x128xf32>
    %122 = arith.addf %118, %121 : vector<16x128xf32>
    %123 = vector.extract_strided_slice %107 {offsets = [80, 0], sizes = [16, 128], strides = [1, 1]} : vector<304x128xbf16> to vector<16x128xbf16>
    %c512_86 = arith.constant 512 : index
    %c0_87 = arith.constant 0 : index
    %124 = vector.load %arg7[%c512_86, %c0_87] : memref<2048x128xbf16, #tpu.memory_space<vmem>>, vector<128x128xbf16>
    %cst_88 = arith.constant dense<0.000000e+00> : vector<16x128xf32>
    %125 = tpu.matmul %123, %124, %cst_88 {dimension_numbers = #tpu.dot_dimension_numbers<[1], [0], [0], [1], [0, 0, 1, 1], [], []>} : vector<16x128xbf16>, vector<128x128xbf16>, vector<16x128xf32> -> vector<16x128xf32>
    %126 = arith.addf %122, %125 : vector<16x128xf32>
    %127 = vector.extract_strided_slice %107 {offsets = [96, 0], sizes = [16, 128], strides = [1, 1]} : vector<304x128xbf16> to vector<16x128xbf16>
    %c640_89 = arith.constant 640 : index
    %c0_90 = arith.constant 0 : index
    %128 = vector.load %arg7[%c640_89, %c0_90] : memref<2048x128xbf16, #tpu.memory_space<vmem>>, vector<128x128xbf16>
    %cst_91 = arith.constant dense<0.000000e+00> : vector<16x128xf32>
    %129 = tpu.matmul %127, %128, %cst_91 {dimension_numbers = #tpu.dot_dimension_numbers<[1], [0], [0], [1], [0, 0, 1, 1], [], []>} : vector<16x128xbf16>, vector<128x128xbf16>, vector<16x128xf32> -> vector<16x128xf32>
    %130 = arith.addf %126, %129 : vector<16x128xf32>
    %131 = vector.extract_strided_slice %107 {offsets = [112, 0], sizes = [16, 128], strides = [1, 1]} : vector<304x128xbf16> to vector<16x128xbf16>
    %c768_92 = arith.constant 768 : index
    %c0_93 = arith.constant 0 : index
    %132 = vector.load %arg7[%c768_92, %c0_93] : memref<2048x128xbf16, #tpu.memory_space<vmem>>, vector<128x128xbf16>
    %cst_94 = arith.constant dense<0.000000e+00> : vector<16x128xf32>
    %133 = tpu.matmul %131, %132, %cst_94 {dimension_numbers = #tpu.dot_dimension_numbers<[1], [0], [0], [1], [0, 0, 1, 1], [], []>} : vector<16x128xbf16>, vector<128x128xbf16>, vector<16x128xf32> -> vector<16x128xf32>
    %134 = arith.addf %130, %133 : vector<16x128xf32>
    %135 = vector.extract_strided_slice %107 {offsets = [128, 0], sizes = [16, 128], strides = [1, 1]} : vector<304x128xbf16> to vector<16x128xbf16>
    %c896_95 = arith.constant 896 : index
    %c0_96 = arith.constant 0 : index
    %136 = vector.load %arg7[%c896_95, %c0_96] : memref<2048x128xbf16, #tpu.memory_space<vmem>>, vector<128x128xbf16>
    %cst_97 = arith.constant dense<0.000000e+00> : vector<16x128xf32>
    %137 = tpu.matmul %135, %136, %cst_97 {dimension_numbers = #tpu.dot_dimension_numbers<[1], [0], [0], [1], [0, 0, 1, 1], [], []>} : vector<16x128xbf16>, vector<128x128xbf16>, vector<16x128xf32> -> vector<16x128xf32>
    %138 = arith.addf %134, %137 : vector<16x128xf32>
    %139 = vector.extract_strided_slice %107 {offsets = [160, 0], sizes = [16, 128], strides = [1, 1]} : vector<304x128xbf16> to vector<16x128xbf16>
    %c1024_98 = arith.constant 1024 : index
    %c0_99 = arith.constant 0 : index
    %140 = vector.load %arg7[%c1024_98, %c0_99] : memref<2048x128xbf16, #tpu.memory_space<vmem>>, vector<128x128xbf16>
    %cst_100 = arith.constant dense<0.000000e+00> : vector<16x128xf32>
    %141 = tpu.matmul %139, %140, %cst_100 {dimension_numbers = #tpu.dot_dimension_numbers<[1], [0], [0], [1], [0, 0, 1, 1], [], []>} : vector<16x128xbf16>, vector<128x128xbf16>, vector<16x128xf32> -> vector<16x128xf32>
    %142 = arith.addf %138, %141 : vector<16x128xf32>
    %143 = vector.extract_strided_slice %107 {offsets = [176, 0], sizes = [16, 128], strides = [1, 1]} : vector<304x128xbf16> to vector<16x128xbf16>
    %c1152_101 = arith.constant 1152 : index
    %c0_102 = arith.constant 0 : index
    %144 = vector.load %arg7[%c1152_101, %c0_102] : memref<2048x128xbf16, #tpu.memory_space<vmem>>, vector<128x128xbf16>
    %cst_103 = arith.constant dense<0.000000e+00> : vector<16x128xf32>
    %145 = tpu.matmul %143, %144, %cst_103 {dimension_numbers = #tpu.dot_dimension_numbers<[1], [0], [0], [1], [0, 0, 1, 1], [], []>} : vector<16x128xbf16>, vector<128x128xbf16>, vector<16x128xf32> -> vector<16x128xf32>
    %146 = arith.addf %142, %145 : vector<16x128xf32>
    %147 = vector.extract_strided_slice %107 {offsets = [192, 0], sizes = [16, 128], strides = [1, 1]} : vector<304x128xbf16> to vector<16x128xbf16>
    %c1280_104 = arith.constant 1280 : index
    %c0_105 = arith.constant 0 : index
    %148 = vector.load %arg7[%c1280_104, %c0_105] : memref<2048x128xbf16, #tpu.memory_space<vmem>>, vector<128x128xbf16>
    %cst_106 = arith.constant dense<0.000000e+00> : vector<16x128xf32>
    %149 = tpu.matmul %147, %148, %cst_106 {dimension_numbers = #tpu.dot_dimension_numbers<[1], [0], [0], [1], [0, 0, 1, 1], [], []>} : vector<16x128xbf16>, vector<128x128xbf16>, vector<16x128xf32> -> vector<16x128xf32>
    %150 = arith.addf %146, %149 : vector<16x128xf32>
    %151 = vector.extract_strided_slice %107 {offsets = [208, 0], sizes = [16, 128], strides = [1, 1]} : vector<304x128xbf16> to vector<16x128xbf16>
    %c1408_107 = arith.constant 1408 : index
    %c0_108 = arith.constant 0 : index
    %152 = vector.load %arg7[%c1408_107, %c0_108] : memref<2048x128xbf16, #tpu.memory_space<vmem>>, vector<128x128xbf16>
    %cst_109 = arith.constant dense<0.000000e+00> : vector<16x128xf32>
    %153 = tpu.matmul %151, %152, %cst_109 {dimension_numbers = #tpu.dot_dimension_numbers<[1], [0], [0], [1], [0, 0, 1, 1], [], []>} : vector<16x128xbf16>, vector<128x128xbf16>, vector<16x128xf32> -> vector<16x128xf32>
    %154 = arith.addf %150, %153 : vector<16x128xf32>
    %155 = vector.extract_strided_slice %107 {offsets = [240, 0], sizes = [16, 128], strides = [1, 1]} : vector<304x128xbf16> to vector<16x128xbf16>
    %c1536_110 = arith.constant 1536 : index
    %c0_111 = arith.constant 0 : index
    %156 = vector.load %arg7[%c1536_110, %c0_111] : memref<2048x128xbf16, #tpu.memory_space<vmem>>, vector<128x128xbf16>
    %cst_112 = arith.constant dense<0.000000e+00> : vector<16x128xf32>
    %157 = tpu.matmul %155, %156, %cst_112 {dimension_numbers = #tpu.dot_dimension_numbers<[1], [0], [0], [1], [0, 0, 1, 1], [], []>} : vector<16x128xbf16>, vector<128x128xbf16>, vector<16x128xf32> -> vector<16x128xf32>
    %158 = arith.addf %154, %157 : vector<16x128xf32>
    %159 = vector.extract_strided_slice %107 {offsets = [256, 0], sizes = [16, 128], strides = [1, 1]} : vector<304x128xbf16> to vector<16x128xbf16>
    %c1664_113 = arith.constant 1664 : index
    %c0_114 = arith.constant 0 : index
    %160 = vector.load %arg7[%c1664_113, %c0_114] : memref<2048x128xbf16, #tpu.memory_space<vmem>>, vector<128x128xbf16>
    %cst_115 = arith.constant dense<0.000000e+00> : vector<16x128xf32>
    %161 = tpu.matmul %159, %160, %cst_115 {dimension_numbers = #tpu.dot_dimension_numbers<[1], [0], [0], [1], [0, 0, 1, 1], [], []>} : vector<16x128xbf16>, vector<128x128xbf16>, vector<16x128xf32> -> vector<16x128xf32>
    %162 = arith.addf %158, %161 : vector<16x128xf32>
    %163 = vector.extract_strided_slice %107 {offsets = [272, 0], sizes = [16, 128], strides = [1, 1]} : vector<304x128xbf16> to vector<16x128xbf16>
    %c1792_116 = arith.constant 1792 : index
    %c0_117 = arith.constant 0 : index
    %164 = vector.load %arg7[%c1792_116, %c0_117] : memref<2048x128xbf16, #tpu.memory_space<vmem>>, vector<128x128xbf16>
    %cst_118 = arith.constant dense<0.000000e+00> : vector<16x128xf32>
    %165 = tpu.matmul %163, %164, %cst_118 {dimension_numbers = #tpu.dot_dimension_numbers<[1], [0], [0], [1], [0, 0, 1, 1], [], []>} : vector<16x128xbf16>, vector<128x128xbf16>, vector<16x128xf32> -> vector<16x128xf32>
    %166 = arith.addf %162, %165 : vector<16x128xf32>
    %167 = vector.extract_strided_slice %107 {offsets = [288, 0], sizes = [16, 128], strides = [1, 1]} : vector<304x128xbf16> to vector<16x128xbf16>
    %c1920_119 = arith.constant 1920 : index
    %c0_120 = arith.constant 0 : index
    %168 = vector.load %arg7[%c1920_119, %c0_120] : memref<2048x128xbf16, #tpu.memory_space<vmem>>, vector<128x128xbf16>
    %cst_121 = arith.constant dense<0.000000e+00> : vector<16x128xf32>
    %169 = tpu.matmul %167, %168, %cst_121 {dimension_numbers = #tpu.dot_dimension_numbers<[1], [0], [0], [1], [0, 0, 1, 1], [], []>} : vector<16x128xbf16>, vector<128x128xbf16>, vector<16x128xf32> -> vector<16x128xf32>
    %170 = arith.addf %166, %169 : vector<16x128xf32>
    %c0_122 = arith.constant 0 : index
    %c0_123 = arith.constant 0 : index
    %171 = vector.load %arg8[%c0_122, %c0_123] : memref<1x128xf32, #tpu.memory_space<vmem>>, vector<1x128xf32>
    %172 = vector.broadcast %171 : vector<1x128xf32> to vector<16x128xf32>
    %173 = arith.addf %170, %172 : vector<16x128xf32>
    %c0_124 = arith.constant 0 : index
    %c0_125 = arith.constant 0 : index
    %174 = vector.load %arg12[%c0_124, %c0_125] : memref<16x1xf32, #tpu.memory_space<vmem>>, vector<16x1xf32>
    %c0_126 = arith.constant 0 : index
    %c0_127 = arith.constant 0 : index
    %175 = vector.load %arg9[%c0_126, %c0_127] : memref<1x128xf32, #tpu.memory_space<vmem>>, vector<1x128xf32>
    %c0_128 = arith.constant 0 : index
    %c0_129 = arith.constant 0 : index
    %176 = vector.load %arg10[%c0_128, %c0_129] : memref<1x128xf32, #tpu.memory_space<vmem>>, vector<1x128xf32>
    %177 = vector.broadcast %174 : vector<16x1xf32> to vector<16x128xf32>
    %178 = arith.mulf %173, %177 : vector<16x128xf32>
    %cst_130 = arith.constant dense<0.000000e+00> : vector<128xf32>
    %179 = vector.multi_reduction <add>, %178, %cst_130 [0] : vector<16x128xf32> to vector<128xf32>
    %180 = vector.shape_cast %179 : vector<128xf32> to vector<1x128xf32>
    %cst_131 = arith.constant 5.000000e-01 : f32
    %181 = vector.broadcast %cst_131 : f32 to vector<1x128xf32>
    %182 = arith.mulf %180, %181 : vector<1x128xf32>
    %183 = vector.broadcast %182 : vector<1x128xf32> to vector<16x128xf32>
    %184 = arith.subf %173, %183 : vector<16x128xf32>
    %185 = arith.mulf %184, %184 : vector<16x128xf32>
    %186 = vector.broadcast %174 : vector<16x1xf32> to vector<16x128xf32>
    %187 = arith.mulf %185, %186 : vector<16x128xf32>
    %cst_132 = arith.constant dense<0.000000e+00> : vector<128xf32>
    %188 = vector.multi_reduction <add>, %187, %cst_132 [0] : vector<16x128xf32> to vector<128xf32>
    %189 = vector.shape_cast %188 : vector<128xf32> to vector<1x128xf32>
    %cst_133 = arith.constant 5.000000e-01 : f32
    %190 = vector.broadcast %cst_133 : f32 to vector<1x128xf32>
    %191 = arith.mulf %189, %190 : vector<1x128xf32>
    %cst_134 = arith.constant 9.99999974E-6 : f32
    %192 = vector.broadcast %cst_134 : f32 to vector<1x128xf32>
    %193 = arith.addf %191, %192 : vector<1x128xf32>
    %194 = math.rsqrt %193 : vector<1x128xf32>
    %195 = vector.broadcast %194 : vector<1x128xf32> to vector<16x128xf32>
    %196 = arith.mulf %184, %195 : vector<16x128xf32>
    %197 = vector.broadcast %175 : vector<1x128xf32> to vector<16x128xf32>
    %198 = arith.mulf %196, %197 : vector<16x128xf32>
    %199 = vector.broadcast %176 : vector<1x128xf32> to vector<16x128xf32>
    %200 = arith.addf %198, %199 : vector<16x128xf32>
    %c0_135 = arith.constant 0 : index
    %c0_136 = arith.constant 0 : index
    %201 = vector.load %arg13[%c0_135, %c0_136] : memref<16x128xf32, #tpu.memory_space<vmem>>, vector<16x128xf32>
    tpu.vector_store %arg13[%c0_135, %c0_136], %200 {strides = array<i32>} : memref<16x128xf32, #tpu.memory_space<vmem>>, vector<16x128xf32>,
    return
  }
}

</mosaic_0001>

<bundles_post_ra>
// kernel: discriminator_forward.1
= control target key start
LH: loop header
LB: loop body
LE: loop exit
PB: predicated region body
PF: predicated region fallthrough
CT: control target
= control target key end

     0   :  { %v22612_v35 = vmov 0.0   ;;  %vm17630_vm0 = vmmov 0   ;;  %s22598_s1 = inlined_call_operand.vmem [shape: bf16[128,128], index: 1, kind: input, shape index: {}]   ;;  %s22599_s0 = inlined_call_operand.vmem [shape: bf16[1600,128], index: 0, kind: input, shape index: {}]   ;;  %s22600_s3 = inlined_call_operand.vmem [shape: bf16[2048,128], index: 3, kind: input, shape index: {}]   ;;  %s22601_s2 = inlined_call_operand.vmem [shape: f32[1,128], index: 2, kind: input, shape index: {}]   ;;  %s22602_s11 = inlined_call_operand.vmem [shape: f32[304,1], index: 11, kind: input, shape index: {}]   ;;  %s22603_s12 = inlined_call_operand.vmem [shape: f32[16,1], index: 12, kind: input, shape index: {}]   ;;  %s22604_s7 = inlined_call_operand.vmem [shape: bf16[2048,128], index: 7, kind: input, shape index: {}]   ;;  %s22605_s4 = inlined_call_operand.vmem [shape: f32[1,128], index: 4, kind: input, shape index: {}]   ;;  %s22606_s5 = inlined_call_operand.vmem [shape: f32[1,128], index: 5, kind: input, shape index: {}]   ;;  %s22607_s6 = inlined_call_operand.vmem [shape: f32[1,128], index: 6, kind: input, shape index: {}]   ;;  %s22608_s8 = inlined_call_operand.vmem [shape: f32[1,128], index: 8, kind: input, shape index: {}]   ;;  %s22609_s9 = inlined_call_operand.vmem [shape: f32[1,128], index: 9, kind: input, shape index: {}]   ;;  %s22610_s10 = inlined_call_operand.vmem [shape: f32[1,128], index: 10, kind: input, shape index: {}]   ;;  %s22611_s13 = inlined_call_operand.vmem [shape: f32[16,128], index: 13, kind: output, shape index: {}]  }
   0x1   :  { %v16954_v0 = vld [vmem:[%s22598_s1 + $0x38] sm:$0xff]   ;;  %v16955_v1 = vld [vmem:[%s22598_s1 + $0x30] sm:$0xff]   ;;  %v16956_v2 = vld [vmem:[%s22598_s1 + $0x28] sm:$0xff]   ;;  %15157 = vmatprep.subr.bf16.mxu1 %v22612_v35  ;;  %15173 = vmatprep.mubr.msk.bf16.mxu1 %vm17630_vm0, %v22612_v35 }
   0x2   :  { %14941 = vmatprep.subr.bf16.mxu0 %v16954_v0  ;;  %v16957_v3 = vld [vmem:[%s22598_s1 + $0x20] sm:$0xff]   ;;  %v16958_v5 = vld [vmem:[%s22598_s1 + $0x18] sm:$0xff]   ;;  %v16959_v6 = vld [vmem:[%s22598_s1 + $0x10] sm:$0xff]  }
   0x3   :  { %14942 = vmatpush3.bf16.msra.mxu0 %v16954_v0  ;;  %v16962_v4 = vld [vmem:[%s22599_s0] sm:$0xff]   ;;  %v16960_v7 = vld [vmem:[%s22598_s1 + $0x8] sm:$0xff]   ;;  %v16964_v10 = vld [vmem:[%s22599_s0 + $0x10] sm:$0xff]  }
   0x4   :  { %14943 = vmatprep.subr.bf16.mxu0 %v16955_v1  ;;  %14957 = vmatprep.mubr.bf16.mxu0 %v16962_v4  ;;  %v16961_v8 = vld [vmem:[%s22598_s1] sm:$0xff]   ;;  %v16963_v9 = vld [vmem:[%s22599_s0 + $0x8] sm:$0xff]   ;;  %v16965_v11 = vld [vmem:[%s22599_s0 + $0x18] sm:$0xff]  }
   0x5   :  { %v16966_v12 = vld [vmem:[%s22599_s0 + $0x20] sm:$0xff]   ;;  %v16967_v13 = vld [vmem:[%s22599_s0 + $0x28] sm:$0xff]   ;;  %v16968_v14 = vld [vmem:[%s22599_s0 + $0x30] sm:$0xff]  }
   0x6   :  { %v16969_v15 = vld [vmem:[%s22599_s0 + $0x38] sm:$0xff]   ;;  %v16970_v16 = vld [vmem:[%s22599_s0 + $0x40] sm:$0xff]   ;;  %v16971_v17 = vld [vmem:[%s22599_s0 + $0x48] sm:$0xff]  }
   0x7   :  { %14944 = vmatpush3.bf16.msra.mxu0 %v16955_v1  ;;  %v16972_v18 = vld [vmem:[%s22599_s0 + $0x50] sm:$0xff]   ;;  %v16973_v19 = vld [vmem:[%s22599_s0 + $0x58] sm:$0xff]   ;;  %v16974_v20 = vld [vmem:[%s22599_s0 + $0x60] sm:$0xff]  }
   0x8   :  { %14945 = vmatprep.subr.bf16.mxu0 %v16956_v2  ;;  %v16975_v21 = vld [vmem:[%s22599_s0 + $0x68] sm:$0xff]   ;;  %v16976_v22 = vld [vmem:[%s22599_s0 + $0x70] sm:$0xff]   ;;  %v16977_v23 = vld [vmem:[%s22599_s0 + $0x78] sm:$0xff]  }
   0x9   :  { %v16978_v24 = vld [vmem:[%s22599_s0 + $0x80] sm:$0xff]   ;;  %v16979_v25 = vld [vmem:[%s22599_s0 + $0x88] sm:$0xff]   ;;  %v16980_v26 = vld [vmem:[%s22599_s0 + $0x90] sm:$0xff]  }
   0xa   :  { %v16981_v27 = vld [vmem:[%s22599_s0 + $0x98] sm:$0xff]   ;;  %v16982_v28 = vld [vmem:[%s22599_s0 + $0xa0] sm:$0xff]   ;;  %v16983_v29 = vld [vmem:[%s22599_s0 + $0xa8] sm:$0xff]  }
   0xb   :  { %14946 = vmatpush3.bf16.msra.mxu0 %v16956_v2  ;;  %v16984_v30 = vld [vmem:[%s22599_s0 + $0xb0] sm:$0xff]   ;;  %v16985_v31 = vld [vmem:[%s22599_s0 + $0xb8] sm:$0xff]   ;;  %v16986_v32 = vld [vmem:[%s22599_s0 + $0xc0] sm:$0xff]  }
   0xc   :  { %14947 = vmatprep.subr.bf16.mxu0 %v16957_v3  ;;  %v16987_v33 = vld [vmem:[%s22599_s0 + $0xc8] sm:$0xff]   ;;  %v16988_v34 = vld [vmem:[%s22599_s0 + $0xd0] sm:$0xff]   ;;  %v17018_v36 = vld [vmem:[%s22600_s3 + $0xf8] sm:$0xff]  }
   0xd   :  { %v16989_v37 = vld [vmem:[%s22599_s0 + $0xd8] sm:$0xff]   ;;  %v16990_v38 = vld [vmem:[%s22599_s0 + $0xe0] sm:$0xff]   ;;  %v16991_v39 = vld [vmem:[%s22599_s0 + $0xe8] sm:$0xff]  }
   0xe   :  { %v16992_v40 = vld [vmem:[%s22599_s0 + $0xf0] sm:$0xff]   ;;  %v16993_v41 = vld [vmem:[%s22599_s0 + $0xf8] sm:$0xff]   ;;  %v16994_v42 = vld [vmem:[%s22599_s0 + $0x100] sm:$0xff]  }
   0xf   :  { %14948 = vmatpush3.bf16.msra.mxu0 %v16957_v3  ;;  %v16995_v43 = vld [vmem:[%s22599_s0 + $0x108] sm:$0xff]   ;;  %v16996_v44 = vld [vmem:[%s22599_s0 + $0x110] sm:$0xff]   ;;  %v16997_v45 = vld [vmem:[%s22599_s0 + $0x118] sm:$0xff]  }
  0x10   :  { %14949 = vmatprep.subr.bf16.mxu0 %v16958_v5  ;;  %v16998_v46 = vld [vmem:[%s22599_s0 + $0x120] sm:$0xff]   ;;  %v16999_v47 = vld [vmem:[%s22599_s0 + $0x128] sm:$0xff]   ;;  %v17000_v48 = vld [vmem:[%s22599_s0 + $0x130] sm:$0xff]  }
  0x11   :  { %v17001_v49 = vld [vmem:[%s22599_s0 + $0x138] sm:$0xff]   ;;  %v17002_v50 = vld [vmem:[%s22599_s0 + $0x140] sm:$0xff]   ;;  %v17031_v51 = vld [vmem:[%s22600_s3 + $0xf0] sm:$0xff]  }
  0x12   :  { %v17036_v52 = vld [vmem:[%s22600_s3 + $0x78] sm:$0xff]   ;;  %v17037_v53 = vld [vmem:[%s22600_s3 + $0x70] sm:$0xff]   ;;  %v17003_v54 = vld [vmem:[%s22599_s0 + $0x148] sm:$0xff]  }
  0x13   :  { %14950 = vmatpush3.bf16.msra.mxu0 %v16958_v5  ;;  %15158 = vmatpush3.bf16.msra.mxu1 %v17036_v52  ;;  %v17004_v55 = vld [vmem:[%s22599_s0 + $0x150] sm:$0xff]   ;;  %v17040_v56 = vld [vmem:[%s22600_s3 + $0x68] sm:$0xff]   ;;  %v17041_v57 = vld [vmem:[%s22600_s3 + $0x60] sm:$0xff]  }
  0x14   :  { %14951 = vmatprep.subr.bf16.mxu0 %v16959_v6  ;;  %15159 = vmatprep.subr.bf16.mxu1 %v22612_v35  ;;  %v17005_v58 = vld [vmem:[%s22599_s0 + $0x158] sm:$0xff]   ;;  %v17006_v59 = vld [vmem:[%s22599_s0 + $0x160] sm:$0xff]   ;;  %v17045_v61 = vld [vmem:[%s22600_s3 + $0x50] sm:$0xff]  }
  0x15   :  { %v17044_v60 = vld [vmem:[%s22600_s3 + $0x58] sm:$0xff]   ;;  %v17007_v62 = vld [vmem:[%s22599_s0 + $0x168] sm:$0xff]   ;;  %v17008_v63 = vld [vmem:[%s22599_s0 + $0x170] sm:$0xff]  }
  0x16   :  { %v17048_v0 = vld [vmem:[%s22600_s3 + $0x48] sm:$0xff]   ;;  %v17049_v1 = vld [vmem:[%s22600_s3 + $0x40] sm:$0xff]   ;;  %v17009_v2 = vld [vmem:[%s22599_s0 + $0x178] sm:$0xff]  }
  0x17   :  { %14952 = vmatpush3.bf16.msra.mxu0 %v16959_v6  ;;  %15160 = vmatpush3.bf16.msra.mxu1 %v17037_v53  ;;  %v17010_v3 = vld [vmem:[%s22599_s0 + $0x180] sm:$0xff]   ;;  %v17011_v4 = vld [vmem:[%s22599_s0 + $0x188] sm:$0xff]   ;;  %v17012_v5 = vld [vmem:[%s22599_s0 + $0x190] sm:$0xff]  }
  0x18   :  { %14953 = vmatprep.subr.bf16.mxu0 %v16960_v7  ;;  %15161 = vmatprep.subr.bf16.mxu1 %v22612_v35  ;;  %v17926_v6 = vld [vmem:[%s22601_s2] ss:$0 sm:$0xff]  ;;  %v17017_v53 = vld [vmem:[%s22599_s0 + $0x1b8] sm:$0xff]  }
  0x1b   :  { %14954 = vmatpush3.bf16.msra.mxu0 %v16960_v7  ;;  %15162 = vmatpush3.bf16.msra.mxu1 %v17040_v56 }
  0x1c   :  { %14955 = vmatprep.subr.bf16.mxu0 %v16961_v8  ;;  %15163 = vmatprep.subr.bf16.mxu1 %v22612_v35 }
  0x1f   :  { %14956 = vmatpush3.bf16.msra.mxu0 %v16961_v8  ;;  %15164 = vmatpush3.bf16.msra.mxu1 %v17041_v57  ;;  %v17019_v57 = vld [vmem:[%s22599_s0 + $0x1c0] sm:$0xff]  }
  0x20   :  { %15433 = vmatprep.subr.bf16.mxu0 %v22612_v35  ;;  %15165 = vmatprep.subr.bf16.mxu1 %v22612_v35 }
  0x22   :  { %14958 = vmatmul.mubr.bf16.vlgmr.msra.gmra.mxu0 %v16963_v9 }
  0x23   :  { %14961 = vmatprep.mubr.bf16.mxu0 %v16964_v10  ;;  %15434 = vmatpush3.bf16.msra.mxu0 %v17018_v36 }
  0x24   :  { %15435 = vmatprep.subr.bf16.mxu0 %v22612_v35  ;;  %15166 = vmatpush3.bf16.msra.mxu1 %v17044_v60 }
  0x25   :  { %15167 = vmatprep.subr.bf16.mxu1 %v22612_v35 }
  0x27   :  { %15436 = vmatpush3.bf16.msra.mxu0 %v17031_v51 }
  0x28   :  { %15437 = vmatprep.subr.bf16.mxu0 %v22612_v35  ;;  %15168 = vmatpush3.bf16.msra.mxu1 %v17045_v61 }
  0x29   :  { %15169 = vmatprep.subr.bf16.mxu1 %v22612_v35 }
  0x2a   :  { %14962 = vmatmul.mubr.bf16.gmra.mxu0 %v16965_v11 }
  0x2b   :  { %14965 = vmatprep.mubr.bf16.mxu0 %v16966_v12  ;;  %v17013_v12 = vld [vmem:[%s22599_s0 + $0x198] sm:$0xff]  }
  0x2c   :  { %15170 = vmatpush3.bf16.msra.mxu1 %v17048_v0 }
  0x2d   :  { %15171 = vmatprep.subr.bf16.mxu1 %v22612_v35 }
  0x30   :  { %15172 = vmatpush3.bf16.msra.mxu1 %v17049_v1 }
  0x31   :  { %15249 = vmatprep.subr.bf16.mxu1 %v22612_v35 }
  0x32   :  { %14966 = vmatmul.mubr.bf16.gmra.mxu0 %v16967_v13 }
  0x33   :  { %14969 = vmatprep.mubr.bf16.mxu0 %v16968_v14 }
  0x3a   :  { %14970 = vmatmul.mubr.bf16.gmra.mxu0 %v16969_v15  ;;  %v17014_v15 = vld [vmem:[%s22599_s0 + $0x1a0] sm:$0xff]  }
  0x3b   :  { %14973 = vmatprep.mubr.bf16.mxu0 %v16970_v16 }
  0x42   :  { %14974 = vmatmul.mubr.bf16.gmra.mxu0 %v16971_v17 }
  0x43   :  { %14977 = vmatprep.mubr.bf16.mxu0 %v16972_v18 }
  0x4a   :  { %14978 = vmatmul.mubr.bf16.gmra.mxu0 %v16973_v19 }
  0x4b   :  { %14981 = vmatprep.mubr.bf16.mxu0 %v16974_v20  ;;  %v17055_v20 = vld [vmem:[%s22600_s3 + $0xe8] sm:$0xff]  }
  0x4c   :  { %15438 = vmatpush3.bf16.msra.mxu0 %v17055_v20 }
  0x4d   :  { %15439 = vmatprep.subr.bf16.mxu0 %v22612_v35 }
  0x52   :  { %14982 = vmatmul.mubr.bf16.gmra.mxu0 %v16975_v21 }
  0x53   :  { %14985 = vmatprep.mubr.bf16.mxu0 %v16976_v22 }
  0x5a   :  { %14986 = vmatmul.mubr.bf16.gmra.mxu0 %v16977_v23 }
  0x5b   :  { %14989 = vmatprep.mubr.bf16.mxu0 %v16978_v24 }
  0x62   :  { %14990 = vmatmul.mubr.bf16.gmra.mxu0 %v16979_v25 }
  0x63   :  { %14993 = vmatprep.mubr.bf16.mxu0 %v16980_v26 }
  0x6a   :  { %14994 = vmatmul.mubr.bf16.gmra.mxu0 %v16981_v27 }
  0x6b   :  { %14997 = vmatprep.mubr.bf16.mxu0 %v16982_v28 }
  0x72   :  { %14998 = vmatmul.mubr.bf16.gmra.mxu0 %v16983_v29 }
  0x73   :  { %15001 = vmatprep.mubr.bf16.mxu0 %v16984_v30 }
  0x7a   :  { %15002 = vmatmul.mubr.bf16.gmra.mxu0 %v16985_v31 }
  0x7b   :  { %15005 = vmatprep.mubr.bf16.mxu0 %v16986_v32  ;;  %v17015_v32 = vld [vmem:[%s22599_s0 + $0x1a8] sm:$0xff]  }
  0x82   :  { %15006 = vmatmul.mubr.bf16.gmra.mxu0 %v16987_v33 }
  0x83   :  { %15009 = vmatprep.mubr.bf16.mxu0 %v16988_v34 }
  0x8a   :  { %15010 = vmatmul.mubr.bf16.gmra.mxu0 %v16989_v37  ;;  %v17016_v37 = vld [vmem:[%s22599_s0 + $0x1b0] sm:$0xff]  }
  0x8b   :  { %15013 = vmatprep.mubr.bf16.mxu0 %v16990_v38 }
  0x92   :  { %15014 = vmatmul.mubr.bf16.gmra.mxu0 %v16991_v39 }
  0x93   :  { %15017 = vmatprep.mubr.bf16.mxu0 %v16992_v40 }
  0x9a   :  { %15018 = vmatmul.mubr.bf16.gmra.mxu0 %v16993_v41 }
  0x9b   :  { %15021 = vmatprep.mubr.bf16.mxu0 %v16994_v42 }
  0xa2   :  { %15022 = vmatmul.mubr.bf16.gmra.mxu0 %v16995_v43 }
  0xa3   :  { %15025 = vmatprep.mubr.bf16.mxu0 %v16996_v44 }
  0xaa   :  { %15026 = vmatmul.mubr.bf16.gmra.mxu0 %v16997_v45 }
  0xab   :  { %15029 = vmatprep.mubr.bf16.mxu0 %v16998_v46 }
  0xb2   :  { %15030 = vmatmul.mubr.bf16.gmra.mxu0 %v16999_v47 }
  0xb3   :  { %15033 = vmatprep.mubr.bf16.mxu0 %v17000_v48 }
  0xba   :  { %15034 = vmatmul.mubr.bf16.gmra.mxu0 %v17001_v49 }
  0xbb   :  { %15037 = vmatprep.mubr.bf16.mxu0 %v17002_v50 }
  0xc2   :  { %15038 = vmatmul.mubr.bf16.gmra.mxu0 %v17003_v54 }
  0xc3   :  { %15041 = vmatprep.mubr.bf16.mxu0 %v17004_v55 }
  0xca   :  { %15042 = vmatmul.mubr.bf16.gmra.mxu0 %v17005_v58 }
  0xcb   :  { %15045 = vmatprep.mubr.bf16.mxu0 %v17006_v59 }
  0xd2   :  { %15046 = vmatmul.mubr.bf16.gmra.mxu0 %v17007_v62 }
  0xd3   :  { %15049 = vmatprep.mubr.bf16.mxu0 %v17008_v63 }
  0xda   :  { %15050 = vmatmul.mubr.bf16.gmra.mxu0 %v17009_v2 }
  0xdb   :  { %15053 = vmatprep.mubr.bf16.mxu0 %v17010_v3 }
  0xe2   :  { %v14959_v7 = vpop.f32.mrf.mxu0  ;;  %15054 = vmatmul.mubr.bf16.gmra.mxu0 %v17011_v4 }
  0xe3   :  { %v959_v8 = vadd.f32 %v14959_v7, %v17926_v6  ;;  %15057 = vmatprep.mubr.bf16.mxu0 %v17012_v5 }
  0xe4   :  { %v950_v9 = vpop.f32.mrf.mxu0 }
  0xe5   :  { %v951_v10 = vadd.f32 %v17926_v6, %v950_v9  ;;  %v1751_v13 = vmul.f32 0.2, %v959_v8 }
  0xe6   :  { %v14960_v11 = vpop.f32.mrf.mxu0 }
  0xe7   :  { %v962_v14 = vadd.f32 %v14960_v11, %v17926_v6  ;;  %v1749_v17 = vmul.f32 0.2, %v951_v10  ;;  %v1951_v22 = vmax.f32 %v959_v8, %v1751_v13 }
  0xe8   :  { %v953_v16 = vpop.f32.mrf.mxu0 }
  0xe9   :  { %v1752_v18 = vmul.f32 0.2, %v962_v14  ;;  %v954_v19 = vadd.f32 %v17926_v6, %v953_v16  ;;  %v1949_v27 = vmax.f32 %v951_v10, %v1749_v17  ;;  %v17020_v10 = vld [vmem:[%s22599_s0 + $0x1c8] sm:$0xff]  }
  0xea   :  { %v14963_v21 = vpop.f32.mrf.mxu0  ;;  %15058 = vmatmul.mubr.bf16.gmra.mxu0 %v17013_v12 }
  0xeb   :  { %v1952_v23 = vmax.f32 %v962_v14, %v1752_v18  ;;  %v1750_v24 = vmul.f32 0.2, %v954_v19  ;;  %v975_v25 = vadd.f32 %v14963_v21, %v17926_v6  ;;  %15061 = vmatprep.mubr.bf16.mxu0 %v17014_v15  ;;  %v17021_v14 = vld [vmem:[%s22599_s0 + $0x1d0] sm:$0xff]  }
  0xec   :  { %v966_v26 = vpop.f32.mrf.mxu0 }
  0xed   :  { %v13666_v28 = vpack.c.bf16 %v1952_v23, %v1951_v22  ;;  %v1950_v29 = vmax.f32 %v954_v19, %v1750_v24  ;;  %v967_v30 = vadd.f32 %v17926_v6, %v966_v26  ;;  %v1755_v34 = vmul.f32 0.2, %v975_v25 }
  0xee   :  { %v14964_v31 = vpop.f32.mrf.mxu0 }
  0xef   :  { %14158 = vst [vmem:[#allocation2 + $0x8] sm:$0xff] %v13666_v28   ;;  %v13661_v33 = vpack.c.bf16 %v1950_v29, %v1949_v27  ;;  %v978_v36 = vadd.f32 %v14964_v31, %v17926_v6  ;;  %v1753_v39 = vmul.f32 0.2, %v967_v30  ;;  %v1955_v43 = vmax.f32 %v975_v25, %v1755_v34  ;;  %v17023_v34 = vld [vmem:[%s22599_s0 + $0x1e0] sm:$0xff]  }
  0xf0   :  { %v969_v38 = vpop.f32.mrf.mxu0 }
  0xf1   :  { %13662 = vst [vmem:[#allocation2] sm:$0xff] %v13661_v33   ;;  %v1756_v40 = vmul.f32 0.2, %v978_v36  ;;  %v970_v41 = vadd.f32 %v17926_v6, %v969_v38  ;;  %v1953_v48 = vmax.f32 %v967_v30, %v1753_v39  ;;  %v17022_v30 = vld [vmem:[%s22599_s0 + $0x1d8] sm:$0xff]  }
  0xf2   :  { %v14967_v42 = vpop.f32.mrf.mxu0  ;;  %15062 = vmatmul.mubr.bf16.gmra.mxu0 %v17015_v32 }
  0xf3   :  { %v1956_v44 = vmax.f32 %v978_v36, %v1756_v40  ;;  %v1754_v45 = vmul.f32 0.2, %v970_v41  ;;  %v991_v46 = vadd.f32 %v14967_v42, %v17926_v6  ;;  %15065 = vmatprep.mubr.bf16.mxu0 %v17016_v37 }
  0xf4   :  { %v982_v47 = vpop.f32.mrf.mxu0 }
  0xf5   :  { %v13676_v49 = vpack.c.bf16 %v1956_v44, %v1955_v43  ;;  %v1954_v50 = vmax.f32 %v970_v41, %v1754_v45  ;;  %v983_v51 = vadd.f32 %v17926_v6, %v982_v47  ;;  %v1759_v55 = vmul.f32 0.2, %v991_v46 }
  0xf6   :  { %v14968_v52 = vpop.f32.mrf.mxu0 }
  0xf7   :  { %14160 = vst [vmem:[#allocation2 + $0x18] sm:$0xff] %v13676_v49   ;;  %v13671_v54 = vpack.c.bf16 %v1954_v50, %v1953_v48  ;;  %v994_v56 = vadd.f32 %v14968_v52, %v17926_v6  ;;  %v1757_v59 = vmul.f32 0.2, %v983_v51  ;;  %v1959_v63 = vmax.f32 %v991_v46, %v1759_v55  ;;  %v17025_v55 = vld [vmem:[%s22599_s0 + $0x1f0] sm:$0xff]  }
  0xf8   :  { %v985_v58 = vpop.f32.mrf.mxu0 }
  0xf9   :  { %14159 = vst [vmem:[#allocation2 + $0x10] sm:$0xff] %v13671_v54   ;;  %v1760_v60 = vmul.f32 0.2, %v994_v56  ;;  %v986_v61 = vadd.f32 %v17926_v6, %v985_v58  ;;  %v1957_v4 = vmax.f32 %v983_v51, %v1757_v59  ;;  %v17024_v51 = vld [vmem:[%s22599_s0 + $0x1e8] sm:$0xff]  }
  0xfa   :  { %v14971_v62 = vpop.f32.mrf.mxu0  ;;  %15066 = vmatmul.mubr.bf16.gmra.mxu0 %v17017_v53 }
  0xfb   :  { %v1960_v0 = vmax.f32 %v994_v56, %v1760_v60  ;;  %v1758_v1 = vmul.f32 0.2, %v986_v61  ;;  %v1007_v2 = vadd.f32 %v14971_v62, %v17926_v6  ;;  %15069 = vmatprep.mubr.bf16.mxu0 %v17019_v57 }
  0xfc   :  { %v998_v3 = vpop.f32.mrf.mxu0 }
  0xfd   :  { %v13686_v5 = vpack.c.bf16 %v1960_v0, %v1959_v63  ;;  %v1958_v7 = vmax.f32 %v986_v61, %v1758_v1  ;;  %v999_v8 = vadd.f32 %v17926_v6, %v998_v3  ;;  %v1763_v12 = vmul.f32 0.2, %v1007_v2 }
  0xfe   :  { %v14972_v9 = vpop.f32.mrf.mxu0 }
  0xff   :  { %14162 = vst [vmem:[#allocation2 + $0x28] sm:$0xff] %v13686_v5   ;;  %v13681_v11 = vpack.c.bf16 %v1958_v7, %v1957_v4  ;;  %v1010_v13 = vadd.f32 %v14972_v9, %v17926_v6  ;;  %v1761_v16 = vmul.f32 0.2, %v999_v8  ;;  %v1963_v20 = vmax.f32 %v1007_v2, %v1763_v12  ;;  %v17027_v12 = vld [vmem:[%s22599_s0 + $0x200] sm:$0xff]  }
 0x100   :  { %v1001_v15 = vpop.f32.mrf.mxu0 }
 0x101   :  { %14161 = vst [vmem:[#allocation2 + $0x20] sm:$0xff] %v13681_v11   ;;  %v1764_v17 = vmul.f32 0.2, %v1010_v13  ;;  %v1002_v18 = vadd.f32 %v17926_v6, %v1001_v15  ;;  %v1961_v25 = vmax.f32 %v999_v8, %v1761_v16  ;;  %v17026_v8 = vld [vmem:[%s22599_s0 + $0x1f8] sm:$0xff]  }
 0x102   :  { %v14975_v19 = vpop.f32.mrf.mxu0  ;;  %15070 = vmatmul.mubr.bf16.gmra.mxu0 %v17020_v10 }
 0x103   :  { %v1964_v21 = vmax.f32 %v1010_v13, %v1764_v17  ;;  %v1762_v22 = vmul.f32 0.2, %v1002_v18  ;;  %v1023_v23 = vadd.f32 %v14975_v19, %v17926_v6  ;;  %15073 = vmatprep.mubr.bf16.mxu0 %v17021_v14  ;;  %v17078_v17 = vld [vmem:[%s22600_s3 + $0xe0] sm:$0xff]  }
 0x104   :  { %v1014_v24 = vpop.f32.mrf.mxu0  ;;  %15440 = vmatpush3.bf16.msra.mxu0 %v17078_v17 }
 0x105   :  { %v13696_v26 = vpack.c.bf16 %v1964_v21, %v1963_v20  ;;  %v1962_v27 = vmax.f32 %v1002_v18, %v1762_v22  ;;  %v1015_v28 = vadd.f32 %v17926_v6, %v1014_v24  ;;  %v1767_v32 = vmul.f32 0.2, %v1023_v23  ;;  %15441 = vmatprep.subr.bf16.mxu0 %v22612_v35 }
 0x106   :  { %v14976_v29 = vpop.f32.mrf.mxu0 }
 0x107   :  { %14164 = vst [vmem:[#allocation2 + $0x38] sm:$0xff] %v13696_v26   ;;  %v13691_v31 = vpack.c.bf16 %v1962_v27, %v1961_v25  ;;  %v1026_v33 = vadd.f32 %v14976_v29, %v17926_v6  ;;  %v1765_v37 = vmul.f32 0.2, %v1015_v28  ;;  %v1967_v41 = vmax.f32 %v1023_v23, %v1767_v32  ;;  %v17028_v29 = vld [vmem:[%s22599_s0 + $0x208] sm:$0xff]  }
 0x108   :  { %v1017_v36 = vpop.f32.mrf.mxu0 }
 0x109   :  { %14163 = vst [vmem:[#allocation2 + $0x30] sm:$0xff] %v13691_v31   ;;  %v1768_v38 = vmul.f32 0.2, %v1026_v33  ;;  %v1018_v39 = vadd.f32 %v17926_v6, %v1017_v36  ;;  %v1965_v46 = vmax.f32 %v1015_v28, %v1765_v37 }
 0x10a   :  { %v14979_v40 = vpop.f32.mrf.mxu0  ;;  %15074 = vmatmul.mubr.bf16.gmra.mxu0 %v17022_v30 }
 0x10b   :  { %v1968_v42 = vmax.f32 %v1026_v33, %v1768_v38  ;;  %v1766_v43 = vmul.f32 0.2, %v1018_v39  ;;  %v1039_v44 = vadd.f32 %v14979_v40, %v17926_v6  ;;  %15077 = vmatprep.mubr.bf16.mxu0 %v17023_v34  ;;  %v17029_v33 = vld [vmem:[%s22599_s0 + $0x210] sm:$0xff]  }
 0x10c   :  { %v1030_v45 = vpop.f32.mrf.mxu0 }
 0x10d   :  { %v13706_v47 = vpack.c.bf16 %v1968_v42, %v1967_v41  ;;  %v1966_v48 = vmax.f32 %v1018_v39, %v1766_v43  ;;  %v1031_v49 = vadd.f32 %v17926_v6, %v1030_v45  ;;  %v1771_v53 = vmul.f32 0.2, %v1039_v44  ;;  %v17086_v39 = vld [vmem:[%s22600_s3 + $0xd8] sm:$0xff]  }
 0x10e   :  { %v14980_v50 = vpop.f32.mrf.mxu0  ;;  %15442 = vmatpush3.bf16.msra.mxu0 %v17086_v39 }
 0x10f   :  { %14166 = vst [vmem:[#allocation2 + $0x48] sm:$0xff] %v13706_v47   ;;  %v13701_v52 = vpack.c.bf16 %v1966_v48, %v1965_v46  ;;  %v1042_v54 = vadd.f32 %v14980_v50, %v17926_v6  ;;  %v1769_v57 = vmul.f32 0.2, %v1031_v49  ;;  %v1971_v61 = vmax.f32 %v1039_v44, %v1771_v53  ;;  %15443 = vmatprep.subr.bf16.mxu0 %v22612_v35  ;;  %v17088_v50 = vld [vmem:[%s22600_s3 + $0xd0] sm:$0xff]  }
 0x110   :  { %v1033_v56 = vpop.f32.mrf.mxu0 }
 0x111   :  { %14165 = vst [vmem:[#allocation2 + $0x40] sm:$0xff] %v13701_v52   ;;  %v1772_v58 = vmul.f32 0.2, %v1042_v54  ;;  %v1034_v59 = vadd.f32 %v17926_v6, %v1033_v56  ;;  %v1969_v2 = vmax.f32 %v1031_v49, %v1769_v57  ;;  %v17030_v52 = vld [vmem:[%s22599_s0 + $0x218] sm:$0xff]   ;;  %v17032_v56 = vld [vmem:[%s22599_s0 + $0x220] sm:$0xff]  }
 0x112   :  { %v14983_v60 = vpop.f32.mrf.mxu0  ;;  %15078 = vmatmul.mubr.bf16.gmra.mxu0 %v17024_v51 }
 0x113   :  { %v1972_v62 = vmax.f32 %v1042_v54, %v1772_v58  ;;  %v1770_v63 = vmul.f32 0.2, %v1034_v59  ;;  %v1055_v0 = vadd.f32 %v14983_v60, %v17926_v6  ;;  %15081 = vmatprep.mubr.bf16.mxu0 %v17025_v55  ;;  %15444 = vmatpush3.bf16.msra.mxu0 %v17088_v50 }
 0x114   :  { %v1046_v1 = vpop.f32.mrf.mxu0  ;;  %15445 = vmatprep.subr.bf16.mxu0 %v22612_v35 }
 0x115   :  { %v13716_v3 = vpack.c.bf16 %v1972_v62, %v1971_v61  ;;  %v1970_v4 = vmax.f32 %v1034_v59, %v1770_v63  ;;  %v1047_v5 = vadd.f32 %v17926_v6, %v1046_v1  ;;  %v1775_v10 = vmul.f32 0.2, %v1055_v0  ;;  %v17092_v61 = vld [vmem:[%s22600_s3 + $0xc8] sm:$0xff]  }
 0x116   :  { %v14984_v7 = vpop.f32.mrf.mxu0 }
 0x117   :  { %14168 = vst [vmem:[#allocation2 + $0x58] sm:$0xff] %v13716_v3   ;;  %v13711_v9 = vpack.c.bf16 %v1970_v4, %v1969_v2  ;;  %v1058_v11 = vadd.f32 %v14984_v7, %v17926_v6  ;;  %v1773_v14 = vmul.f32 0.2, %v1047_v5  ;;  %v1975_v19 = vmax.f32 %v1055_v0, %v1775_v10  ;;  %15446 = vmatpush3.bf16.msra.mxu0 %v17092_v61 }
 0x118   :  { %v1049_v13 = vpop.f32.mrf.mxu0  ;;  %15447 = vmatprep.subr.bf16.mxu0 %v22612_v35 }
 0x119   :  { %14167 = vst [vmem:[#allocation2 + $0x50] sm:$0xff] %v13711_v9   ;;  %v1776_v15 = vmul.f32 0.2, %v1058_v11  ;;  %v1050_v16 = vadd.f32 %v17926_v6, %v1049_v13  ;;  %v1973_v24 = vmax.f32 %v1047_v5, %v1773_v14  ;;  %v17093_v9 = vld [vmem:[%s22600_s3 + $0xc0] sm:$0xff]  }
 0x11a   :  { %v14987_v18 = vpop.f32.mrf.mxu0  ;;  %15082 = vmatmul.mubr.bf16.gmra.mxu0 %v17026_v8 }
 0x11b   :  { %v1976_v20 = vmax.f32 %v1058_v11, %v1776_v15  ;;  %v1774_v21 = vmul.f32 0.2, %v1050_v16  ;;  %v1071_v22 = vadd.f32 %v14987_v18, %v17926_v6  ;;  %15085 = vmatprep.mubr.bf16.mxu0 %v17027_v12  ;;  %v17033_v11 = vld [vmem:[%s22599_s0 + $0x228] sm:$0xff]   ;;  %v17034_v15 = vld [vmem:[%s22599_s0 + $0x230] sm:$0xff]   ;;  %15448 = vmatpush3.bf16.msra.mxu0 %v17093_v9  ;;  %v17043_v9 = vld [vmem:[%s22599_s0 + $0x258] sm:$0xff]  }
 0x11c   :  { %v1062_v23 = vpop.f32.mrf.mxu0  ;;  %15617 = vmatprep.subr.bf16.mxu0 %v22612_v35 }
 0x11d   :  { %v13726_v25 = vpack.c.bf16 %v1976_v20, %v1975_v19  ;;  %v1974_v26 = vmax.f32 %v1050_v16, %v1774_v21  ;;  %v1063_v27 = vadd.f32 %v17926_v6, %v1062_v23  ;;  %v1779_v31 = vmul.f32 0.2, %v1071_v22 }
 0x11e   :  { %v14988_v28 = vpop.f32.mrf.mxu0 }
 0x11f   :  { %14170 = vst [vmem:[#allocation2 + $0x68] sm:$0xff] %v13726_v25   ;;  %v13721_v30 = vpack.c.bf16 %v1974_v26, %v1973_v24  ;;  %v1074_v32 = vadd.f32 %v14988_v28, %v17926_v6  ;;  %v1777_v34 = vmul.f32 0.2, %v1063_v27  ;;  %v1979_v41 = vmax.f32 %v1071_v22, %v1779_v31 }
 0x120   :  { %v1065_v36 = vpop.f32.mrf.mxu0 }
 0x121   :  { %14169 = vst [vmem:[#allocation2 + $0x60] sm:$0xff] %v13721_v30   ;;  %v1780_v37 = vmul.f32 0.2, %v1074_v32  ;;  %v1066_v38 = vadd.f32 %v17926_v6, %v1065_v36  ;;  %v1977_v46 = vmax.f32 %v1063_v27, %v1777_v34  ;;  %v17035_v30 = vld [vmem:[%s22599_s0 + $0x238] sm:$0xff]  }
 0x122   :  { %v14991_v40 = vpop.f32.mrf.mxu0  ;;  %15086 = vmatmul.mubr.bf16.gmra.mxu0 %v17028_v29 }
 0x123   :  { %v1980_v42 = vmax.f32 %v1074_v32, %v1780_v37  ;;  %v1778_v43 = vmul.f32 0.2, %v1066_v38  ;;  %v1087_v44 = vadd.f32 %v14991_v40, %v17926_v6  ;;  %15089 = vmatprep.mubr.bf16.mxu0 %v17029_v33  ;;  %v17038_v32 = vld [vmem:[%s22599_s0 + $0x240] sm:$0xff]  }
 0x124   :  { %v1078_v45 = vpop.f32.mrf.mxu0 }
 0x125   :  { %v13736_v47 = vpack.c.bf16 %v1980_v42, %v1979_v41  ;;  %v1978_v48 = vmax.f32 %v1066_v38, %v1778_v43  ;;  %v1079_v49 = vadd.f32 %v17926_v6, %v1078_v45  ;;  %v1783_v54 = vmul.f32 0.2, %v1087_v44 }
 0x126   :  { %v14992_v51 = vpop.f32.mrf.mxu0 }
 0x127   :  { %14172 = vst [vmem:[#allocation2 + $0x78] sm:$0xff] %v13736_v47   ;;  %v13731_v53 = vpack.c.bf16 %v1978_v48, %v1977_v46  ;;  %v1090_v55 = vadd.f32 %v14992_v51, %v17926_v6  ;;  %v1781_v57 = vmul.f32 0.2, %v1079_v49  ;;  %v1983_v63 = vmax.f32 %v1087_v44, %v1783_v54  ;;  %v17039_v51 = vld [vmem:[%s22599_s0 + $0x248] sm:$0xff]  }
 0x128   :  { %v1081_v58 = vpop.f32.mrf.mxu0 }
 0x129   :  { %14171 = vst [vmem:[#allocation2 + $0x70] sm:$0xff] %v13731_v53   ;;  %v1784_v59 = vmul.f32 0.2, %v1090_v55  ;;  %v1082_v60 = vadd.f32 %v17926_v6, %v1081_v58  ;;  %v1981_v4 = vmax.f32 %v1079_v49, %v1781_v57  ;;  %v17042_v53 = vld [vmem:[%s22599_s0 + $0x250] sm:$0xff]  }
 0x12a   :  { %v14995_v62 = vpop.f32.mrf.mxu0  ;;  %15090 = vmatmul.mubr.bf16.gmra.mxu0 %v17030_v52 }
 0x12b   :  { %v1984_v0 = vmax.f32 %v1090_v55, %v1784_v59  ;;  %v1782_v1 = vmul.f32 0.2, %v1082_v60  ;;  %v1103_v2 = vadd.f32 %v14995_v62, %v17926_v6  ;;  %15093 = vmatprep.mubr.bf16.mxu0 %v17032_v56 }
 0x12c   :  { %v1094_v3 = vpop.f32.mrf.mxu0 }
 0x12d   :  { %v13746_v5 = vpack.c.bf16 %v1984_v0, %v1983_v63  ;;  %v1982_v7 = vmax.f32 %v1082_v60, %v1782_v1  ;;  %v1095_v8 = vadd.f32 %v17926_v6, %v1094_v3  ;;  %v1787_v13 = vmul.f32 0.2, %v1103_v2 }
 0x12e   :  { %v14996_v10 = vpop.f32.mrf.mxu0 }
 0x12f   :  { %14174 = vst [vmem:[#allocation2 + $0x88] sm:$0xff] %v13746_v5   ;;  %v13741_v12 = vpack.c.bf16 %v1982_v7, %v1981_v4  ;;  %v1106_v14 = vadd.f32 %v14996_v10, %v17926_v6  ;;  %v1785_v16 = vmul.f32 0.2, %v1095_v8  ;;  %v1987_v21 = vmax.f32 %v1103_v2, %v1787_v13  ;;  %v17046_v13 = vld [vmem:[%s22599_s0 + $0x260] sm:$0xff]  }
 0x130   :  { %v1097_v17 = vpop.f32.mrf.mxu0 }
 0x131   :  { %14173 = vst [vmem:[#allocation2 + $0x80] sm:$0xff] %v13741_v12   ;;  %v1788_v18 = vmul.f32 0.2, %v1106_v14  ;;  %v1098_v19 = vadd.f32 %v17926_v6, %v1097_v17  ;;  %v1985_v26 = vmax.f32 %v1095_v8, %v1785_v16 }
 0x132   :  { %v14999_v20 = vpop.f32.mrf.mxu0  ;;  %15094 = vmatmul.mubr.bf16.gmra.mxu0 %v17033_v11 }
 0x133   :  { %v1988_v22 = vmax.f32 %v1106_v14, %v1788_v18  ;;  %v1786_v23 = vmul.f32 0.2, %v1098_v19  ;;  %v1119_v24 = vadd.f32 %v14999_v20, %v17926_v6  ;;  %15097 = vmatprep.mubr.bf16.mxu0 %v17034_v15 }
 0x134   :  { %v1110_v25 = vpop.f32.mrf.mxu0 }
 0x135   :  { %v13756_v27 = vpack.c.bf16 %v1988_v22, %v1987_v21  ;;  %v1986_v28 = vmax.f32 %v1098_v19, %v1786_v23  ;;  %v1111_v29 = vadd.f32 %v17926_v6, %v1110_v25  ;;  %v1791_v34 = vmul.f32 0.2, %v1119_v24 }
 0x136   :  { %v15000_v31 = vpop.f32.mrf.mxu0 }
 0x137   :  { %14176 = vst [vmem:[#allocation2 + $0x98] sm:$0xff] %v13756_v27   ;;  %v13751_v33 = vpack.c.bf16 %v1986_v28, %v1985_v26  ;;  %v1122_v36 = vadd.f32 %v15000_v31, %v17926_v6  ;;  %v1789_v37 = vmul.f32 0.2, %v1111_v29  ;;  %v1991_v42 = vmax.f32 %v1119_v24, %v1791_v34  ;;  %v17047_v28 = vld [vmem:[%s22599_s0 + $0x268] sm:$0xff]  }
 0x138   :  { %v1113_v38 = vpop.f32.mrf.mxu0 }
 0x139   :  { %14175 = vst [vmem:[#allocation2 + $0x90] sm:$0xff] %v13751_v33   ;;  %v1792_v39 = vmul.f32 0.2, %v1122_v36  ;;  %v1114_v40 = vadd.f32 %v17926_v6, %v1113_v38  ;;  %v1989_v47 = vmax.f32 %v1111_v29, %v1789_v37 }
 0x13a   :  { %v15003_v41 = vpop.f32.mrf.mxu0  ;;  %15098 = vmatmul.mubr.bf16.gmra.mxu0 %v17035_v30  ;;  %v17050_v30 = vld [vmem:[%s22599_s0 + $0x270] sm:$0xff]  }
 0x13b   :  { %v1992_v43 = vmax.f32 %v1122_v36, %v1792_v39  ;;  %v1790_v44 = vmul.f32 0.2, %v1114_v40  ;;  %v1135_v45 = vadd.f32 %v15003_v41, %v17926_v6  ;;  %15101 = vmatprep.mubr.bf16.mxu0 %v17038_v32 }
 0x13c   :  { %v1126_v46 = vpop.f32.mrf.mxu0 }
 0x13d   :  { %v13766_v48 = vpack.c.bf16 %v1992_v43, %v1991_v42  ;;  %v1990_v49 = vmax.f32 %v1114_v40, %v1790_v44  ;;  %v1127_v50 = vadd.f32 %v17926_v6, %v1126_v46  ;;  %v1795_v55 = vmul.f32 0.2, %v1135_v45 }
 0x13e   :  { %v15004_v52 = vpop.f32.mrf.mxu0 }
 0x13f   :  { %14178 = vst [vmem:[#allocation2 + $0xa8] sm:$0xff] %v13766_v48   ;;  %v13761_v54 = vpack.c.bf16 %v1990_v49, %v1989_v47  ;;  %v1138_v56 = vadd.f32 %v15004_v52, %v17926_v6  ;;  %v1793_v58 = vmul.f32 0.2, %v1127_v50  ;;  %v1995_v62 = vmax.f32 %v1135_v45, %v1795_v55  ;;  %v18096_v49 = vld [vmem:[%s22601_s2] ss:$0 sm:$0xff] }
 0x140   :  { %v1129_v57 = vpop.f32.mrf.mxu0 }
 0x141   :  { %14177 = vst [vmem:[#allocation2 + $0xa0] sm:$0xff] %v13761_v54   ;;  %v1796_v59 = vmul.f32 0.2, %v1138_v56  ;;  %v1130_v60 = vadd.f32 %v17926_v6, %v1129_v57  ;;  %v1993_v3 = vmax.f32 %v1127_v50, %v1793_v58  ;;  %v17054_v57 = vld [vmem:[%s22599_s0 + $0x280] sm:$0xff]  }
 0x142   :  { %v15007_v61 = vpop.f32.mrf.mxu0  ;;  %15102 = vmatmul.mubr.bf16.gmra.mxu0 %v17039_v51  ;;  %v17052_v51 = vld [vmem:[%s22599_s0 + $0x278] sm:$0xff]  }
 0x143   :  { %v1996_v63 = vmax.f32 %v1138_v56, %v1796_v59  ;;  %v1794_v0 = vmul.f32 0.2, %v1130_v60  ;;  %v1151_v1 = vadd.f32 %v15007_v61, %v17926_v6  ;;  %15105 = vmatprep.mubr.bf16.mxu0 %v17042_v53 }
 0x144   :  { %v1142_v2 = vpop.f32.mrf.mxu0 }
 0x145   :  { %v13776_v4 = vpack.c.bf16 %v1996_v63, %v1995_v62  ;;  %v1994_v5 = vmax.f32 %v1130_v60, %v1794_v0  ;;  %v1143_v7 = vadd.f32 %v17926_v6, %v1142_v2  ;;  %v1799_v11 = vmul.f32 0.2, %v1151_v1  ;;  %v17061_v62 = vld [vmem:[%s22600_s3 + $0x30] sm:$0xff]  }
 0x146   :  { %v15008_v8 = vpop.f32.mrf.mxu0 }
 0x147   :  { %14180 = vst [vmem:[#allocation2 + $0xb8] sm:$0xff] %v13776_v4   ;;  %v13771_v10 = vpack.c.bf16 %v1994_v5, %v1993_v3  ;;  %v1154_v12 = vadd.f32 %v15008_v8, %v17926_v6  ;;  %v1797_v14 = vmul.f32 0.2, %v1143_v7  ;;  %v1999_v19 = vmax.f32 %v1151_v1, %v1799_v11  ;;  %v17069_v11 = vld [vmem:[%s22600_s3 + $0x28] sm:$0xff]  }
 0x148   :  { %v1145_v15 = vpop.f32.mrf.mxu0 }
 0x149   :  { %14179 = vst [vmem:[#allocation2 + $0xb0] sm:$0xff] %v13771_v10   ;;  %v1800_v16 = vmul.f32 0.2, %v1154_v12  ;;  %v1146_v17 = vadd.f32 %v17926_v6, %v1145_v15  ;;  %v1997_v24 = vmax.f32 %v1143_v7, %v1797_v14  ;;  %v17056_v10 = vld [vmem:[%s22599_s0 + $0x288] sm:$0xff]  }
 0x14a   :  { %v15011_v18 = vpop.f32.mrf.mxu0  ;;  %15106 = vmatmul.mubr.bf16.gmra.mxu0 %v17043_v9 }
 0x14b   :  { %v2000_v20 = vmax.f32 %v1154_v12, %v1800_v16  ;;  %v1798_v21 = vmul.f32 0.2, %v1146_v17  ;;  %v1167_v22 = vadd.f32 %v15011_v18, %v17926_v6  ;;  %15109 = vmatprep.mubr.bf16.mxu0 %v17046_v13  ;;  %v17058_v13 = vld [vmem:[%s22599_s0 + $0x290] sm:$0xff]  }
 0x14c   :  { %v1158_v23 = vpop.f32.mrf.mxu0 }
 0x14d   :  { %v13786_v25 = vpack.c.bf16 %v2000_v20, %v1999_v19  ;;  %v1998_v26 = vmax.f32 %v1146_v17, %v1798_v21  ;;  %v1159_v27 = vadd.f32 %v17926_v6, %v1158_v23  ;;  %v1803_v32 = vmul.f32 0.2, %v1167_v22  ;;  %v17079_v17 = vld [vmem:[%s22600_s3 + $0x20] sm:$0xff]  }
 0x14e   :  { %v15012_v29 = vpop.f32.mrf.mxu0 }
 0x14f   :  { %14182 = vst [vmem:[#allocation2 + $0xc8] sm:$0xff] %v13786_v25   ;;  %v13781_v31 = vpack.c.bf16 %v1998_v26, %v1997_v24  ;;  %v1170_v33 = vadd.f32 %v15012_v29, %v17926_v6  ;;  %v1801_v34 = vmul.f32 0.2, %v1159_v27  ;;  %v2003_v40 = vmax.f32 %v1167_v22, %v1803_v32 }
 0x150   :  { %v1161_v36 = vpop.f32.mrf.mxu0 }
 0x151   :  { %14181 = vst [vmem:[#allocation2 + $0xc0] sm:$0xff] %v13781_v31   ;;  %v1804_v37 = vmul.f32 0.2, %v1170_v33  ;;  %v1162_v38 = vadd.f32 %v17926_v6, %v1161_v36  ;;  %v2001_v44 = vmax.f32 %v1159_v27, %v1801_v34  ;;  %v17087_v34 = vld [vmem:[%s22600_s3 + $0x18] sm:$0xff]  }
 0x152   :  { %v15015_v39 = vpop.f32.mrf.mxu0  ;;  %15110 = vmatmul.mubr.bf16.gmra.mxu0 %v17047_v28 }
 0x153   :  { %v2004_v41 = vmax.f32 %v1170_v33, %v1804_v37  ;;  %v1802_v42 = vmul.f32 0.2, %v1162_v38  ;;  %v1183_v43 = vadd.f32 %v15015_v39, %v17926_v6  ;;  %15113 = vmatprep.mubr.bf16.mxu0 %v17050_v30  ;;  %v17053_v6 = vld [vmem:[%s22600_s3 + $0x38] sm:$0xff]   ;;  %v17062_v37 = vld [vmem:[%s22599_s0 + $0x2a0] sm:$0xff]  }
 0x154   :  { %v1174_v45 = vpop.f32.mrf.mxu0  ;;  %v17059_v33 = vld [vmem:[%s22599_s0 + $0x298] sm:$0xff]  }
 0x155   :  { %v13796_v46 = vpack.c.bf16 %v2004_v41, %v2003_v40  ;;  %v2002_v47 = vmax.f32 %v1162_v38, %v1802_v42  ;;  %v1807_v48 = vmul.f32 0.2, %v1183_v43  ;;  %v1175_v50 = vadd.f32 %v18096_v49, %v1174_v45  ;;  %v17096_v41 = vld [vmem:[%s22600_s3 + $0x10] sm:$0xff]  }
 0x156   :  { %v15016_v52 = vpop.f32.mrf.mxu0  ;;  %v17051_v53 = vld [vmem:[#allocation2 + $0xc8] sm:$0xff]  }
 0x157   :  { %14184 = vst [vmem:[#allocation2 + $0xd8] sm:$0xff] %v13796_v46   ;;  %v13791_v54 = vpack.c.bf16 %v2002_v47, %v2001_v44  ;;  %v1805_v55 = vmul.f32 0.2, %v1175_v50  ;;  %v1186_v56 = vadd.f32 %v18096_v49, %v15016_v52  ;;  %15174 = vmatmul.mubr.bf16.vlgmr.msra.gmra.mxu1 %v17051_v53  ;;  %v2007_v59 = vmax.f32 %v1183_v43, %v1807_v48 }
 0x158   :  { %v1177_v58 = vpop.f32.mrf.mxu0  ;;  %15250 = vmatpush3.bf16.msra.mxu1 %v17053_v6  ;;  %15177 = vmatprep.mubr.msk.bf16.mxu1 %vm17630_vm0, %v22612_v35 }
 0x159   :  { %14183 = vst [vmem:[#allocation2 + $0xd0] sm:$0xff] %v13791_v54   ;;  %v1808_v60 = vmul.f32 0.2, %v1186_v56  ;;  %v1178_v61 = vadd.f32 %v18096_v49, %v1177_v58  ;;  %15251 = vmatprep.subr.bf16.mxu1 %v22612_v35  ;;  %v2005_v0 = vmax.f32 %v1175_v50, %v1805_v55  ;;  %v17065_v58 = vld [vmem:[%s22599_s0 + $0x2b0] sm:$0xff]  }
 0x15a   :  { %v15019_v63 = vpop.f32.mrf.mxu0  ;;  %15114 = vmatmul.mubr.bf16.gmra.mxu0 %v17052_v51 }
 0x15b   :  { %v2008_v1 = vmax.f32 %v1186_v56, %v1808_v60  ;;  %v1806_v2 = vmul.f32 0.2, %v1178_v61  ;;  %v1199_v3 = vadd.f32 %v18096_v49, %v15019_v63  ;;  %15117 = vmatprep.mubr.bf16.mxu0 %v17054_v57  ;;  %v17063_v57 = vld [vmem:[%s22599_s0 + $0x2a8] sm:$0xff]  }
 0x15c   :  { %v1190_v4 = vpop.f32.mrf.mxu0  ;;  %15252 = vmatpush3.bf16.msra.mxu1 %v17061_v62 }
 0x15d   :  { %v13806_v5 = vpack.c.bf16 %v2008_v1, %v2007_v59  ;;  %v2006_v7 = vmax.f32 %v1178_v61, %v1806_v2  ;;  %v1811_v8 = vmul.f32 0.2, %v1199_v3  ;;  %v1191_v9 = vadd.f32 %v18096_v49, %v1190_v4  ;;  %15253 = vmatprep.subr.bf16.mxu1 %v22612_v35  ;;  %v17103_v59 = vld [vmem:[%s22600_s3 + $0x8] sm:$0xff]   ;;  %v17108_v2 = vld [vmem:[%s22600_s3] sm:$0xff]  }
 0x15e   :  { %v15020_v12 = vpop.f32.mrf.mxu0  ;;  %v17060_v43 = vld [vmem:[#allocation2 + $0xd8] sm:$0xff]  }
 0x15f   :  { %14186 = vst [vmem:[#allocation2 + $0xe8] sm:$0xff] %v13806_v5   ;;  %v13801_v14 = vpack.c.bf16 %v2006_v7, %v2005_v0  ;;  %v1809_v15 = vmul.f32 0.2, %v1191_v9  ;;  %v1202_v16 = vadd.f32 %v18096_v49, %v15020_v12  ;;  %v2011_v20 = vmax.f32 %v1199_v3, %v1811_v8 }
 0x160   :  { %v1193_v18 = vpop.f32.mrf.mxu0  ;;  %v17057_v19 = vld [vmem:[#allocation2 + $0xd0] sm:$0xff]   ;;  %15254 = vmatpush3.bf16.msra.mxu1 %v17069_v11 }
 0x161   :  { %14185 = vst [vmem:[#allocation2 + $0xe0] sm:$0xff] %v13801_v14   ;;  %v1812_v21 = vmul.f32 0.2, %v1202_v16  ;;  %v1194_v22 = vadd.f32 %v18096_v49, %v1193_v18  ;;  %15178 = vmatmul.mubr.bf16.gmra.mxu1 %v17057_v19  ;;  %v2009_v24 = vmax.f32 %v1191_v9, %v1809_v15  ;;  %15255 = vmatprep.subr.bf16.mxu1 %v22612_v35  ;;  %v17068_v19 = vld [vmem:[%s22599_s0 + $0x2c0] sm:$0xff]  }
 0x162   :  { %v15023_v23 = vpop.f32.mrf.mxu0  ;;  %15118 = vmatmul.mubr.bf16.gmra.mxu0 %v17056_v10  ;;  %15181 = vmatprep.mubr.msk.bf16.mxu1 %vm17630_vm0, %v22612_v35 }
 0x163   :  { %v2012_v25 = vmax.f32 %v1202_v16, %v1812_v21  ;;  %v1810_v26 = vmul.f32 0.2, %v1194_v22  ;;  %v1215_v27 = vadd.f32 %v18096_v49, %v15023_v23  ;;  %15121 = vmatprep.mubr.bf16.mxu0 %v17058_v13 }
 0x164   :  { %v1206_v28 = vpop.f32.mrf.mxu0  ;;  %15256 = vmatpush3.bf16.msra.mxu1 %v17079_v17  ;;  %v17066_v17 = vld [vmem:[%s22599_s0 + $0x2b8] sm:$0xff]  }
 0x165   :  { %v13816_v29 = vpack.c.bf16 %v2012_v25, %v2011_v20  ;;  %v2010_v30 = vmax.f32 %v1194_v22, %v1810_v26  ;;  %v1815_v31 = vmul.f32 0.2, %v1215_v27  ;;  %v1207_v32 = vadd.f32 %v18096_v49, %v1206_v28  ;;  %15257 = vmatprep.subr.bf16.mxu1 %v22612_v35 }
 0x166   :  { %v15024_v36 = vpop.f32.mrf.mxu0 }
 0x167   :  { %14188 = vst [vmem:[#allocation2 + $0xf8] sm:$0xff] %v13816_v29   ;;  %v13811_v38 = vpack.c.bf16 %v2010_v30, %v2009_v24  ;;  %v1813_v39 = vmul.f32 0.2, %v1207_v32  ;;  %v1218_v40 = vadd.f32 %v18096_v49, %v15024_v36  ;;  %v2015_v44 = vmax.f32 %v1215_v27, %v1815_v31  ;;  %v17067_v24 = vld [vmem:[#allocation2 + $0xe8] sm:$0xff]  }
 0x168   :  { %v1209_v42 = vpop.f32.mrf.mxu0  ;;  %15258 = vmatpush3.bf16.msra.mxu1 %v17087_v34  ;;  %v17064_v61 = vld [vmem:[#allocation2 + $0xe0] sm:$0xff]  }
 0x169   :  { %14187 = vst [vmem:[#allocation2 + $0xf0] sm:$0xff] %v13811_v38   ;;  %v1816_v45 = vmul.f32 0.2, %v1218_v40  ;;  %v1210_v46 = vadd.f32 %v18096_v49, %v1209_v42  ;;  %15182 = vmatmul.mubr.bf16.gmra.mxu1 %v17060_v43  ;;  %v2013_v48 = vmax.f32 %v1207_v32, %v1813_v39  ;;  %15259 = vmatprep.subr.bf16.mxu1 %v22612_v35  ;;  %v17070_v39 = vld [vmem:[%s22599_s0 + $0x2c8] sm:$0xff]  }
 0x16a   :  { %v15027_v47 = vpop.f32.mrf.mxu0  ;;  %15122 = vmatmul.mubr.bf16.gmra.mxu0 %v17059_v33  ;;  %15185 = vmatprep.mubr.msk.bf16.mxu1 %vm17630_vm0, %v22612_v35 }
 0x16b   :  { %v2016_v50 = vmax.f32 %v1218_v40, %v1816_v45  ;;  %v1814_v51 = vmul.f32 0.2, %v1210_v46  ;;  %v1231_v6 = vadd.f32 %v18096_v49, %v15027_v47  ;;  %15125 = vmatprep.mubr.bf16.mxu0 %v17062_v37 }
 0x16c   :  { %v1222_v52 = vpop.f32.mrf.mxu0  ;;  %15260 = vmatpush3.bf16.msra.mxu1 %v17096_v41  ;;  %v17072_v41 = vld [vmem:[%s22599_s0 + $0x2d0] sm:$0xff]  }
 0x16d   :  { %v13826_v53 = vpack.c.bf16 %v2016_v50, %v2015_v44  ;;  %v2014_v54 = vmax.f32 %v1210_v46, %v1814_v51  ;;  %v1819_v55 = vmul.f32 0.2, %v1231_v6  ;;  %v1223_v56 = vadd.f32 %v18096_v49, %v1222_v52  ;;  %15261 = vmatprep.subr.bf16.mxu1 %v22612_v35 }
 0x16e   :  { %v15028_v60 = vpop.f32.mrf.mxu0 }
 0x16f   :  { %14190 = vst [vmem:[#allocation2 + $0x108] sm:$0xff] %v13826_v53   ;;  %v13821_v62 = vpack.c.bf16 %v2014_v54, %v2013_v48  ;;  %v1817_v63 = vmul.f32 0.2, %v1223_v56  ;;  %v1234_v0 = vadd.f32 %v18096_v49, %v15028_v60  ;;  %v2019_v3 = vmax.f32 %v1231_v6, %v1819_v55 }
 0x170   :  { %v1225_v1 = vpop.f32.mrf.mxu0  ;;  %15262 = vmatpush3.bf16.msra.mxu1 %v17103_v59  ;;  %v17071_v46 = vld [vmem:[#allocation2 + $0xf0] sm:$0xff]  }
 0x171   :  { %14189 = vst [vmem:[#allocation2 + $0x100] sm:$0xff] %v13821_v62   ;;  %v1820_v4 = vmul.f32 0.2, %v1234_v0  ;;  %v1226_v5 = vadd.f32 %v18096_v49, %v1225_v1  ;;  %15186 = vmatmul.mubr.bf16.gmra.mxu1 %v17064_v61  ;;  %v2017_v8 = vmax.f32 %v1223_v56, %v1817_v63  ;;  %15263 = vmatprep.subr.bf16.mxu1 %v22612_v35  ;;  %v17073_v56 = vld [vmem:[%s22599_s0 + $0x2d8] sm:$0xff]   ;;  %v17075_v62 = vld [vmem:[%s22599_s0 + $0x2e0] sm:$0xff]  }
 0x172   :  { %v15031_v7 = vpop.f32.mrf.mxu0  ;;  %15126 = vmatmul.mubr.bf16.gmra.mxu0 %v17063_v57  ;;  %15189 = vmatprep.mubr.msk.bf16.mxu1 %vm17630_vm0, %v22612_v35 }
 0x173   :  { %v2020_v9 = vmax.f32 %v1234_v0, %v1820_v4  ;;  %v1818_v10 = vmul.f32 0.2, %v1226_v5  ;;  %v1247_v11 = vadd.f32 %v18096_v49, %v15031_v7  ;;  %15129 = vmatprep.mubr.bf16.mxu0 %v17065_v58 }
 0x174   :  { %v1238_v12 = vpop.f32.mrf.mxu0  ;;  %15264 = vmatpush3.bf16.msra.mxu1 %v17108_v2 }
 0x175   :  { %v13836_v13 = vpack.c.bf16 %v2020_v9, %v2019_v3  ;;  %v2018_v14 = vmax.f32 %v1226_v5, %v1818_v10  ;;  %v1823_v15 = vmul.f32 0.2, %v1247_v11  ;;  %v1239_v16 = vadd.f32 %v18096_v49, %v1238_v12  ;;  %15341 = vmatprep.subr.bf16.mxu1 %v22612_v35  ;;  %v17074_v3 = vld [vmem:[#allocation2 + $0xf8] sm:$0xff]  }
 0x176   :  { %v15032_v18 = vpop.f32.mrf.mxu0 }
 0x177   :  { %14192 = vst [vmem:[#allocation2 + $0x118] sm:$0xff] %v13836_v13   ;;  %v13831_v20 = vpack.c.bf16 %v2018_v14, %v2017_v8  ;;  %v1821_v21 = vmul.f32 0.2, %v1239_v16  ;;  %v1250_v22 = vadd.f32 %v18096_v49, %v15032_v18  ;;  %v2023_v25 = vmax.f32 %v1247_v11, %v1823_v15 }
 0x178   :  { %v1241_v23 = vpop.f32.mrf.mxu0 }
 0x179   :  { %14191 = vst [vmem:[#allocation2 + $0x110] sm:$0xff] %v13831_v20   ;;  %v1824_v26 = vmul.f32 0.2, %v1250_v22  ;;  %v1242_v27 = vadd.f32 %v18096_v49, %v1241_v23  ;;  %15190 = vmatmul.mubr.bf16.gmra.mxu1 %v17067_v24  ;;  %v2021_v29 = vmax.f32 %v1239_v16, %v1821_v21  ;;  %v17080_v23 = vld [vmem:[%s22599_s0 + $0x2f0] sm:$0xff]  }
 0x17a   :  { %v15035_v28 = vpop.f32.mrf.mxu0  ;;  %15130 = vmatmul.mubr.bf16.gmra.mxu0 %v17066_v17  ;;  %15193 = vmatprep.mubr.msk.bf16.mxu1 %vm17630_vm0, %v22612_v35 }
 0x17b   :  { %v2024_v30 = vmax.f32 %v1250_v22, %v1824_v26  ;;  %v1822_v31 = vmul.f32 0.2, %v1242_v27  ;;  %v1263_v32 = vadd.f32 %v18096_v49, %v15035_v28  ;;  %15133 = vmatprep.mubr.bf16.mxu0 %v17068_v19  ;;  %v17076_v19 = vld [vmem:[%s22599_s0 + $0x2e8] sm:$0xff]  }
 0x17c   :  { %v1254_v33 = vpop.f32.mrf.mxu0 }
 0x17d   :  { %v13846_v34 = vpack.c.bf16 %v2024_v30, %v2023_v25  ;;  %v2022_v36 = vmax.f32 %v1242_v27, %v1822_v31  ;;  %v1827_v37 = vmul.f32 0.2, %v1263_v32  ;;  %v1255_v38 = vadd.f32 %v18096_v49, %v1254_v33  ;;  %v17077_v25 = vld [vmem:[#allocation2 + $0x100] sm:$0xff]  }
 0x17e   :  { %v15036_v40 = vpop.f32.mrf.mxu0 }
 0x17f   :  { %14194 = vst [vmem:[#allocation2 + $0x128] sm:$0xff] %v13846_v34   ;;  %v13841_v42 = vpack.c.bf16 %v2022_v36, %v2021_v29  ;;  %v1825_v43 = vmul.f32 0.2, %v1255_v38  ;;  %v1266_v44 = vadd.f32 %v18096_v49, %v15036_v40  ;;  %v2027_v47 = vmax.f32 %v1263_v32, %v1827_v37  ;;  %v17081_v36 = vld [vmem:[%s22599_s0 + $0x2f8] sm:$0xff]  }
 0x180   :  { %v1257_v45 = vpop.f32.mrf.mxu0 }
 0x181   :  { %14193 = vst [vmem:[#allocation2 + $0x120] sm:$0xff] %v13841_v42   ;;  %v1828_v48 = vmul.f32 0.2, %v1266_v44  ;;  %v1258_v50 = vadd.f32 %v18096_v49, %v1257_v45  ;;  %15194 = vmatmul.mubr.bf16.gmra.mxu1 %v17071_v46  ;;  %v2025_v6 = vmax.f32 %v1255_v38, %v1825_v43  ;;  %v17083_v42 = vld [vmem:[%s22599_s0 + $0x300] sm:$0xff]  }
 0x182   :  { %v15039_v51 = vpop.f32.mrf.mxu0  ;;  %15134 = vmatmul.mubr.bf16.gmra.mxu0 %v17070_v39  ;;  %15197 = vmatprep.mubr.msk.bf16.mxu1 %vm17630_vm0, %v22612_v35 }
 0x183   :  { %v2028_v52 = vmax.f32 %v1266_v44, %v1828_v48  ;;  %v1826_v53 = vmul.f32 0.2, %v1258_v50  ;;  %v1279_v54 = vadd.f32 %v18096_v49, %v15039_v51  ;;  %15137 = vmatprep.mubr.bf16.mxu0 %v17072_v41 }
 0x184   :  { %v1270_v55 = vpop.f32.mrf.mxu0 }
 0x185   :  { %v13856_v57 = vpack.c.bf16 %v2028_v52, %v2027_v47  ;;  %v2026_v58 = vmax.f32 %v1258_v50, %v1826_v53  ;;  %v1831_v59 = vmul.f32 0.2, %v1279_v54  ;;  %v1271_v60 = vadd.f32 %v18096_v49, %v1270_v55  ;;  %v17082_v47 = vld [vmem:[#allocation2 + $0x108] sm:$0xff]  }
 0x186   :  { %v15040_v61 = vpop.f32.mrf.mxu0 }
 0x187   :  { %14196 = vst [vmem:[#allocation2 + $0x138] sm:$0xff] %v13856_v57   ;;  %v13851_v63 = vpack.c.bf16 %v2026_v58, %v2025_v6  ;;  %v1829_v0 = vmul.f32 0.2, %v1271_v60  ;;  %v1282_v1 = vadd.f32 %v18096_v49, %v15040_v61  ;;  %v2031_v4 = vmax.f32 %v1279_v54, %v1831_v59  ;;  %v17084_v57 = vld [vmem:[%s22599_s0 + $0x308] sm:$0xff]  }
 0x188   :  { %v1273_v2 = vpop.f32.mrf.mxu0 }
 0x189   :  { %14195 = vst [vmem:[#allocation2 + $0x130] sm:$0xff] %v13851_v63   ;;  %v1832_v5 = vmul.f32 0.2, %v1282_v1  ;;  %v1274_v7 = vadd.f32 %v18096_v49, %v1273_v2  ;;  %15198 = vmatmul.mubr.bf16.gmra.mxu1 %v17074_v3  ;;  %v2029_v9 = vmax.f32 %v1271_v60, %v1829_v0  ;;  %v17089_v63 = vld [vmem:[%s22599_s0 + $0x310] sm:$0xff]  }
 0x18a   :  { %v15043_v8 = vpop.f32.mrf.mxu0  ;;  %15138 = vmatmul.mubr.bf16.gmra.mxu0 %v17073_v56  ;;  %15201 = vmatprep.mubr.msk.bf16.mxu1 %vm17630_vm0, %v22612_v35 }
 0x18b   :  { %v2032_v10 = vmax.f32 %v1282_v1, %v1832_v5  ;;  %v1830_v11 = vmul.f32 0.2, %v1274_v7  ;;  %v1295_v12 = vadd.f32 %v18096_v49, %v15043_v8  ;;  %15141 = vmatprep.mubr.bf16.mxu0 %v17075_v62 }
 0x18c   :  { %v1286_v13 = vpop.f32.mrf.mxu0 }
 0x18d   :  { %v13866_v14 = vpack.c.bf16 %v2032_v10, %v2031_v4  ;;  %v2030_v15 = vmax.f32 %v1274_v7, %v1830_v11  ;;  %v1835_v16 = vmul.f32 0.2, %v1295_v12  ;;  %v1287_v17 = vadd.f32 %v18096_v49, %v1286_v13  ;;  %v17085_v4 = vld [vmem:[#allocation2 + $0x110] sm:$0xff]  }
 0x18e   :  { %v15044_v18 = vpop.f32.mrf.mxu0 }
 0x18f   :  { %14198 = vst [vmem:[#allocation2 + $0x148] sm:$0xff] %v13866_v14   ;;  %v13861_v20 = vpack.c.bf16 %v2030_v15, %v2029_v9  ;;  %v1833_v21 = vmul.f32 0.2, %v1287_v17  ;;  %v1298_v22 = vadd.f32 %v18096_v49, %v15044_v18  ;;  %v2035_v26 = vmax.f32 %v1295_v12, %v1835_v16  ;;  %v17090_v15 = vld [vmem:[%s22599_s0 + $0x318] sm:$0xff]  }
 0x190   :  { %v1289_v24 = vpop.f32.mrf.mxu0 }
 0x191   :  { %14197 = vst [vmem:[#allocation2 + $0x140] sm:$0xff] %v13861_v20   ;;  %v1836_v27 = vmul.f32 0.2, %v1298_v22  ;;  %v1290_v28 = vadd.f32 %v18096_v49, %v1289_v24  ;;  %15202 = vmatmul.mubr.bf16.gmra.mxu1 %v17077_v25  ;;  %v2033_v30 = vmax.f32 %v1287_v17, %v1833_v21  ;;  %v17091_v21 = vld [vmem:[#allocation2 + $0x118] sm:$0xff]  }
 0x192   :  { %v15047_v29 = vpop.f32.mrf.mxu0  ;;  %15142 = vmatmul.mubr.bf16.gmra.mxu0 %v17076_v19  ;;  %15205 = vmatprep.mubr.msk.bf16.mxu1 %vm17630_vm0, %v22612_v35 }
 0x193   :  { %v2036_v31 = vmax.f32 %v1298_v22, %v1836_v27  ;;  %v1834_v32 = vmul.f32 0.2, %v1290_v28  ;;  %v1311_v33 = vadd.f32 %v18096_v49, %v15047_v29  ;;  %15145 = vmatprep.mubr.bf16.mxu0 %v17080_v23 }
 0x194   :  { %v1302_v34 = vpop.f32.mrf.mxu0 }
 0x195   :  { %v13876_v37 = vpack.c.bf16 %v2036_v31, %v2035_v26  ;;  %v2034_v38 = vmax.f32 %v1290_v28, %v1834_v32  ;;  %v1839_v39 = vmul.f32 0.2, %v1311_v33  ;;  %v1303_v40 = vadd.f32 %v18096_v49, %v1302_v34 }
 0x196   :  { %v15048_v41 = vpop.f32.mrf.mxu0 }
 0x197   :  { %14200 = vst [vmem:[#allocation2 + $0x158] sm:$0xff] %v13876_v37   ;;  %v13871_v43 = vpack.c.bf16 %v2034_v38, %v2033_v30  ;;  %v1837_v44 = vmul.f32 0.2, %v1303_v40  ;;  %v1314_v45 = vadd.f32 %v18096_v49, %v15048_v41  ;;  %v2039_v48 = vmax.f32 %v1311_v33, %v1839_v39  ;;  %v17094_v41 = vld [vmem:[#allocation2 + $0xd0] sm:$0xff]  }
 0x198   :  { %v1305_v46 = vpop.f32.mrf.mxu0 }
 0x199   :  { %14199 = vst [vmem:[#allocation2 + $0x150] sm:$0xff] %v13871_v43   ;;  %v1840_v50 = vmul.f32 0.2, %v1314_v45  ;;  %v1306_v51 = vadd.f32 %v18096_v49, %v1305_v46  ;;  %15206 = vmatmul.mubr.bf16.gmra.mxu1 %v17082_v47  ;;  %v2037_v52 = vmax.f32 %v1303_v40, %v1837_v44  ;;  %v17132_v46 = vld [vmem:[%s22600_s3 + $0x178] sm:$0xff]  }
 0x19a   :  { %v15051_v6 = vpop.f32.mrf.mxu0  ;;  %15146 = vmatmul.mubr.bf16.gmra.mxu0 %v17081_v36  ;;  %15209 = vmatprep.mubr.msk.bf16.mxu1 %vm17630_vm0, %v22612_v35 }
 0x19b   :  { %v2040_v53 = vmax.f32 %v1314_v45, %v1840_v50  ;;  %v1838_v54 = vmul.f32 0.2, %v1306_v51  ;;  %v1327_v55 = vadd.f32 %v18096_v49, %v15051_v6  ;;  %15149 = vmatprep.mubr.bf16.mxu0 %v17083_v42  ;;  %v17095_v45 = vld [vmem:[#allocation2 + $0x120] sm:$0xff]  }
 0x19c   :  { %v1318_v56 = vpop.f32.mrf.mxu0 }
 0x19d   :  { %v13886_v58 = vpack.c.bf16 %v2040_v53, %v2039_v48  ;;  %v2038_v59 = vmax.f32 %v1306_v51, %v1838_v54  ;;  %v1843_v60 = vmul.f32 0.2, %v1327_v55  ;;  %v1319_v61 = vadd.f32 %v18096_v49, %v1318_v56 }
 0x19e   :  { %v15052_v62 = vpop.f32.mrf.mxu0 }
 0x19f   :  { %14202 = vst [vmem:[#allocation2 + $0x168] sm:$0xff] %v13886_v58   ;;  %v13881_v0 = vpack.c.bf16 %v2038_v59, %v2037_v52  ;;  %v1841_v1 = vmul.f32 0.2, %v1319_v61  ;;  %v1330_v2 = vadd.f32 %v18096_v49, %v15052_v62  ;;  %v2043_v5 = vmax.f32 %v1327_v55, %v1843_v60 }
 0x1a0   :  { %v1321_v3 = vpop.f32.mrf.mxu0 }
 0x1a1   :  { %14201 = vst [vmem:[#allocation2 + $0x160] sm:$0xff] %v13881_v0   ;;  %v1844_v7 = vmul.f32 0.2, %v1330_v2  ;;  %v1322_v8 = vadd.f32 %v18096_v49, %v1321_v3  ;;  %15210 = vmatmul.mubr.bf16.gmra.mxu1 %v17085_v4  ;;  %v2041_v10 = vmax.f32 %v1319_v61, %v1841_v1  ;;  %v17098_v3 = vld [vmem:[#allocation2 + $0x128] sm:$0xff]  }
 0x1a2   :  { %v15055_v9 = vpop.f32.mrf.mxu0  ;;  %15150 = vmatmul.mubr.bf16.gmra.mxu0 %v17084_v57  ;;  %15213 = vmatprep.mubr.msk.bf16.mxu1 %vm17630_vm0, %v22612_v35  ;;  %v17134_v57 = vld [vmem:[%s22600_s3 + $0x170] sm:$0xff]   ;;  %v17137_v4 = vld [vmem:[%s22600_s3 + $0x168] sm:$0xff]  }
 0x1a3   :  { %v2044_v11 = vmax.f32 %v1330_v2, %v1844_v7  ;;  %v1842_v12 = vmul.f32 0.2, %v1322_v8  ;;  %v1343_v13 = vadd.f32 %v18096_v49, %v15055_v9  ;;  %15153 = vmatprep.mubr.bf16.mxu0 %v17089_v63  ;;  %v17097_v2 = vld [vmem:[#allocation2 + $0xd8] sm:$0xff]   ;;  %v18284_v9 = vld [vmem:[%s22601_s2] ss:$0 sm:$0xff] }
 0x1a4   :  { %v1334_v14 = vpop.f32.mrf.mxu0 }
 0x1a5   :  { %v13896_v16 = vpack.c.bf16 %v2044_v11, %v2043_v5  ;;  %v2042_v17 = vmax.f32 %v1322_v8, %v1842_v12  ;;  %v1847_v18 = vmul.f32 0.2, %v1343_v13  ;;  %v1335_v19 = vadd.f32 %v18096_v49, %v1334_v14 }
 0x1a6   :  { %v15056_v20 = vpop.f32.mrf.mxu0 }
 0x1a7   :  { %14204 = vst [vmem:[#allocation2 + $0x178] sm:$0xff] %v13896_v16   ;;  %v13891_v22 = vpack.c.bf16 %v2042_v17, %v2041_v10  ;;  %v1845_v23 = vmul.f32 0.2, %v1335_v19  ;;  %v1346_v24 = vadd.f32 %v18096_v49, %v15056_v20  ;;  %v2047_v26 = vmax.f32 %v1343_v13, %v1847_v18  ;;  %v17138_v16 = vld [vmem:[%s22600_s3 + $0x160] sm:$0xff]  }
 0x1a8   :  { %v1337_v25 = vpop.f32.mrf.mxu0 }
 0x1a9   :  { %14203 = vst [vmem:[#allocation2 + $0x170] sm:$0xff] %v13891_v22   ;;  %v1848_v27 = vmul.f32 0.2, %v1346_v24  ;;  %v1338_v28 = vadd.f32 %v18096_v49, %v1337_v25  ;;  %15214 = vmatmul.mubr.bf16.gmra.mxu1 %v17091_v21  ;;  %v2045_v30 = vmax.f32 %v1335_v19, %v1845_v23  ;;  %v17099_v25 = vld [vmem:[#allocation2 + $0xe0] sm:$0xff]  }
 0x1aa   :  { %v15059_v29 = vpop.f32.mrf.mxu0  ;;  %15154 = vmatmul.mubr.bf16.gmra.mxu0 %v17090_v15  ;;  %15217 = vmatprep.mubr.msk.bf16.mxu1 %vm17630_vm0, %v22612_v35 }
 0x1ab   :  { %v2048_v31 = vmax.f32 %v1346_v24, %v1848_v27  ;;  %v1846_v32 = vmul.f32 0.2, %v1338_v28  ;;  %v1359_v33 = vadd.f32 %v18096_v49, %v15059_v29  ;;  %15449 = vmatprep.mubr.msk.bf16.mxu0 %vm17630_vm0, %v22612_v35 }
 0x1ac   :  { %v1350_v34 = vpop.f32.mrf.mxu0 }
 0x1ad   :  { %v13906_v36 = vpack.c.bf16 %v2048_v31, %v2047_v26  ;;  %v2046_v37 = vmax.f32 %v1338_v28, %v1846_v32  ;;  %v1851_v38 = vmul.f32 0.2, %v1359_v33  ;;  %v1351_v39 = vadd.f32 %v18096_v49, %v1350_v34  ;;  %v17100_v26 = vld [vmem:[#allocation2 + $0x130] sm:$0xff]   ;;  %v17141_v28 = vld [vmem:[%s22600_s3 + $0x158] sm:$0xff]  }
 0x1ae   :  { %v15060_v40 = vpop.f32.mrf.mxu0 }
 0x1af   :  { %14206 = vst [vmem:[#allocation2 + $0x188] sm:$0xff] %v13906_v36   ;;  %v13901_v42 = vpack.c.bf16 %v2046_v37, %v2045_v30  ;;  %v1849_v43 = vmul.f32 0.2, %v1351_v39  ;;  %v1362_v44 = vadd.f32 %v18096_v49, %v15060_v40  ;;  %v2051_v48 = vmax.f32 %v1359_v33, %v1851_v38 }
 0x1b0   :  { %v1353_v47 = vpop.f32.mrf.mxu0 }
 0x1b1   :  { %14205 = vst [vmem:[#allocation2 + $0x180] sm:$0xff] %v13901_v42   ;;  %v1852_v50 = vmul.f32 0.2, %v1362_v44  ;;  %v1354_v51 = vadd.f32 %v18096_v49, %v1353_v47  ;;  %15218 = vmatmul.mubr.bf16.gmra.mxu1 %v17095_v45  ;;  %v2049_v52 = vmax.f32 %v1351_v39, %v1849_v43  ;;  %v17143_v39 = vld [vmem:[%s22600_s3 + $0x150] sm:$0xff]   ;;  %v17101_v45 = vld [vmem:[#allocation2 + $0xe8] sm:$0xff]  }
 0x1b2   :  { %v15063_v6 = vpop.f32.mrf.mxu0  ;;  %15450 = vmatmul.mubr.bf16.vlgmr.msra.gmra.mxu0 %v17094_v41  ;;  %15221 = vmatprep.mubr.msk.bf16.mxu1 %vm17630_vm0, %v22612_v35 }
 0x1b3   :  { %v2052_v53 = vmax.f32 %v1362_v44, %v1852_v50  ;;  %v1850_v54 = vmul.f32 0.2, %v1354_v51  ;;  %v1375_v55 = vadd.f32 %v18096_v49, %v15063_v6  ;;  %15453 = vmatprep.mubr.msk.bf16.mxu0 %vm17630_vm0, %v22612_v35  ;;  %15618 = vmatpush3.bf16.msra.mxu0 %v17132_v46  ;;  %v17102_v50 = vld [vmem:[#allocation2 + $0x138] sm:$0xff]  }
 0x1b4   :  { %v1366_v56 = vpop.f32.mrf.mxu0  ;;  %15619 = vmatprep.subr.bf16.mxu0 %v22612_v35 }
 0x1b5   :  { %v13916_v58 = vpack.c.bf16 %v2052_v53, %v2051_v48  ;;  %v2050_v59 = vmax.f32 %v1354_v51, %v1850_v54  ;;  %v1855_v60 = vmul.f32 0.2, %v1375_v55  ;;  %v1367_v61 = vadd.f32 %v18096_v49, %v1366_v56  ;;  %v17146_v51 = vld [vmem:[%s22600_s3 + $0x148] sm:$0xff]  }
 0x1b6   :  { %v15064_v62 = vpop.f32.mrf.mxu0 }
 0x1b7   :  { %14208 = vst [vmem:[#allocation2 + $0x198] sm:$0xff] %v13916_v58   ;;  %v13911_v63 = vpack.c.bf16 %v2050_v59, %v2049_v52  ;;  %v1853_v0 = vmul.f32 0.2, %v1367_v61  ;;  %v1378_v1 = vadd.f32 %v18096_v49, %v15064_v62  ;;  %15620 = vmatpush3.bf16.msra.mxu0 %v17134_v57  ;;  %v2055_v7 = vmax.f32 %v1375_v55, %v1855_v60 }
 0x1b8   :  { %v1369_v5 = vpop.f32.mrf.mxu0  ;;  %15621 = vmatprep.subr.bf16.mxu0 %v22612_v35 }
 0x1b9   :  { %14207 = vst [vmem:[#allocation2 + $0x190] sm:$0xff] %v13911_v63   ;;  %v1856_v8 = vmul.f32 0.2, %v1378_v1  ;;  %v1370_v10 = vadd.f32 %v18284_v9, %v1369_v5  ;;  %15222 = vmatmul.mubr.bf16.gmra.mxu1 %v17098_v3  ;;  %v2053_v11 = vmax.f32 %v1367_v61, %v1853_v0  ;;  %v17147_v61 = vld [vmem:[%s22600_s3 + $0x140] sm:$0xff]   ;;  %v17104_v3 = vld [vmem:[#allocation2 + $0xf0] sm:$0xff]  }
 0x1ba   :  { %v15067_v49 = vpop.f32.mrf.mxu0  ;;  %15454 = vmatmul.mubr.bf16.gmra.mxu0 %v17097_v2  ;;  %15225 = vmatprep.mubr.msk.bf16.mxu1 %vm17630_vm0, %v22612_v35 }
 0x1bb   :  { %v2056_v12 = vmax.f32 %v1378_v1, %v1856_v8  ;;  %v1854_v13 = vmul.f32 0.2, %v1370_v10  ;;  %v1391_v14 = vadd.f32 %v18284_v9, %v15067_v49  ;;  %15457 = vmatprep.mubr.msk.bf16.mxu0 %vm17630_vm0, %v22612_v35  ;;  %15622 = vmatpush3.bf16.msra.mxu0 %v17137_v4  ;;  %v17105_v4 = vld [vmem:[#allocation2 + $0x140] sm:$0xff]  }
 0x1bc   :  { %v1382_v15 = vpop.f32.mrf.mxu0  ;;  %15623 = vmatprep.subr.bf16.mxu0 %v22612_v35 }
 0x1bd   :  { %v13926_v17 = vpack.c.bf16 %v2056_v12, %v2055_v7  ;;  %v2054_v18 = vmax.f32 %v1370_v10, %v1854_v13  ;;  %v1859_v19 = vmul.f32 0.2, %v1391_v14  ;;  %v1383_v20 = vadd.f32 %v18284_v9, %v1382_v15 }
 0x1be   :  { %v15068_v21 = vpop.f32.mrf.mxu0 }
 0x1bf   :  { %14210 = vst [vmem:[#allocation2 + $0x1a8] sm:$0xff] %v13926_v17   ;;  %v13921_v22 = vpack.c.bf16 %v2054_v18, %v2053_v11  ;;  %v1857_v23 = vmul.f32 0.2, %v1383_v20  ;;  %v1394_v24 = vadd.f32 %v18284_v9, %v15068_v21  ;;  %15624 = vmatpush3.bf16.msra.mxu0 %v17138_v16  ;;  %v2059_v29 = vmax.f32 %v1391_v14, %v1859_v19 }
 0x1c0   :  { %v1385_v27 = vpop.f32.mrf.mxu0  ;;  %15625 = vmatprep.subr.bf16.mxu0 %v22612_v35 }
 0x1c1   :  { %14209 = vst [vmem:[#allocation2 + $0x1a0] sm:$0xff] %v13921_v22   ;;  %v1860_v30 = vmul.f32 0.2, %v1394_v24  ;;  %v1386_v31 = vadd.f32 %v18284_v9, %v1385_v27  ;;  %15226 = vmatmul.mubr.bf16.gmra.mxu1 %v17100_v26  ;;  %v2057_v33 = vmax.f32 %v1383_v20, %v1857_v23 }
 0x1c2   :  { %v15071_v32 = vpop.f32.mrf.mxu0  ;;  %15458 = vmatmul.mubr.bf16.gmra.mxu0 %v17099_v25  ;;  %15229 = vmatprep.mubr.msk.bf16.mxu1 %vm17630_vm0, %v22612_v35  ;;  %v17107_v25 = vld [vmem:[#allocation2 + $0x148] sm:$0xff]  }
 0x1c3   :  { %v2060_v34 = vmax.f32 %v1394_v24, %v1860_v30  ;;  %v1858_v36 = vmul.f32 0.2, %v1386_v31  ;;  %v1407_v37 = vadd.f32 %v18284_v9, %v15071_v32  ;;  %15461 = vmatprep.mubr.msk.bf16.mxu0 %vm17630_vm0, %v22612_v35  ;;  %15626 = vmatpush3.bf16.msra.mxu0 %v17141_v28  ;;  %v17106_v24 = vld [vmem:[#allocation2 + $0xf8] sm:$0xff]  }
 0x1c4   :  { %v1398_v38 = vpop.f32.mrf.mxu0  ;;  %15627 = vmatprep.subr.bf16.mxu0 %v22612_v35 }
 0x1c5   :  { %v13936_v40 = vpack.c.bf16 %v2060_v34, %v2059_v29  ;;  %v2058_v41 = vmax.f32 %v1386_v31, %v1858_v36  ;;  %v1863_v42 = vmul.f32 0.2, %v1407_v37  ;;  %v1399_v43 = vadd.f32 %v18284_v9, %v1398_v38 }
 0x1c6   :  { %v15072_v44 = vpop.f32.mrf.mxu0 }
 0x1c7   :  { %14212 = vst [vmem:[#allocation2 + $0x1b8] sm:$0xff] %v13936_v40   ;;  %v13931_v46 = vpack.c.bf16 %v2058_v41, %v2057_v33  ;;  %v1861_v47 = vmul.f32 0.2, %v1399_v43  ;;  %v1410_v48 = vadd.f32 %v18284_v9, %v15072_v44  ;;  %15628 = vmatpush3.bf16.msra.mxu0 %v17143_v39  ;;  %v2063_v52 = vmax.f32 %v1407_v37, %v1863_v42 }
 0x1c8   :  { %v1401_v6 = vpop.f32.mrf.mxu0  ;;  %15629 = vmatprep.subr.bf16.mxu0 %v22612_v35 }
 0x1c9   :  { %14211 = vst [vmem:[#allocation2 + $0x1b0] sm:$0xff] %v13931_v46   ;;  %v1864_v53 = vmul.f32 0.2, %v1410_v48  ;;  %v1402_v54 = vadd.f32 %v18284_v9, %v1401_v6  ;;  %15230 = vmatmul.mubr.bf16.gmra.mxu1 %v17102_v50  ;;  %v2061_v56 = vmax.f32 %v1399_v43, %v1861_v47  ;;  %v17110_v46 = vld [vmem:[#allocation2 + $0x150] sm:$0xff]  }
 0x1ca   :  { %v15075_v55 = vpop.f32.mrf.mxu0  ;;  %15462 = vmatmul.mubr.bf16.gmra.mxu0 %v17101_v45  ;;  %15233 = vmatprep.mubr.msk.bf16.mxu1 %vm17630_vm0, %v22612_v35  ;;  %v17109_v45 = vld [vmem:[#allocation2 + $0x100] sm:$0xff]  }
 0x1cb   :  { %v2064_v57 = vmax.f32 %v1410_v48, %v1864_v53  ;;  %v1862_v58 = vmul.f32 0.2, %v1402_v54  ;;  %v1423_v59 = vadd.f32 %v18284_v9, %v15075_v55  ;;  %15465 = vmatprep.mubr.msk.bf16.mxu0 %vm17630_vm0, %v22612_v35  ;;  %15630 = vmatpush3.bf16.msra.mxu0 %v17146_v51 }
 0x1cc   :  { %v1414_v60 = vpop.f32.mrf.mxu0  ;;  %15631 = vmatprep.subr.bf16.mxu0 %v22612_v35 }
 0x1cd   :  { %v13946_v62 = vpack.c.bf16 %v2064_v57, %v2063_v52  ;;  %v2062_v63 = vmax.f32 %v1402_v54, %v1862_v58  ;;  %v1867_v0 = vmul.f32 0.2, %v1423_v59  ;;  %v1415_v1 = vadd.f32 %v18284_v9, %v1414_v60 }
 0x1ce   :  { %v15076_v2 = vpop.f32.mrf.mxu0 }
 0x1cf   :  { %14214 = vst [vmem:[#allocation2 + $0x1c8] sm:$0xff] %v13946_v62   ;;  %v13941_v5 = vpack.c.bf16 %v2062_v63, %v2061_v56  ;;  %v1865_v7 = vmul.f32 0.2, %v1415_v1  ;;  %v1426_v8 = vadd.f32 %v18284_v9, %v15076_v2  ;;  %15632 = vmatpush3.bf16.msra.mxu0 %v17147_v61  ;;  %v2067_v49 = vmax.f32 %v1423_v59, %v1867_v0  ;;  %v17112_v2 = vld [vmem:[#allocation2 + $0x158] sm:$0xff]  }
 0x1d0   :  { %v1417_v10 = vpop.f32.mrf.mxu0  ;;  %15801 = vmatprep.subr.bf16.mxu0 %v22612_v35 }
 0x1d1   :  { %14213 = vst [vmem:[#allocation2 + $0x1c0] sm:$0xff] %v13941_v5   ;;  %v1868_v11 = vmul.f32 0.2, %v1426_v8  ;;  %v1418_v12 = vadd.f32 %v18284_v9, %v1417_v10  ;;  %15234 = vmatmul.mubr.bf16.gmra.mxu1 %v17105_v4  ;;  %v2065_v14 = vmax.f32 %v1415_v1, %v1865_v7  ;;  %v17111_v1 = vld [vmem:[#allocation2 + $0x108] sm:$0xff]  }
 0x1d2   :  { %v15079_v13 = vpop.f32.mrf.mxu0  ;;  %15466 = vmatmul.mubr.bf16.gmra.mxu0 %v17104_v3  ;;  %15237 = vmatprep.mubr.msk.bf16.mxu1 %vm17630_vm0, %v22612_v35 }
 0x1d3   :  { %v2068_v15 = vmax.f32 %v1426_v8, %v1868_v11  ;;  %v1866_v16 = vmul.f32 0.2, %v1418_v12  ;;  %v1439_v17 = vadd.f32 %v18284_v9, %v15079_v13  ;;  %15469 = vmatprep.mubr.msk.bf16.mxu0 %vm17630_vm0, %v22612_v35 }
 0x1d4   :  { %v1430_v18 = vpop.f32.mrf.mxu0 }
 0x1d5   :  { %v13956_v19 = vpack.c.bf16 %v2068_v15, %v2067_v49  ;;  %v2066_v20 = vmax.f32 %v1418_v12, %v1866_v16  ;;  %v1871_v21 = vmul.f32 0.2, %v1439_v17  ;;  %v1431_v22 = vadd.f32 %v18284_v9, %v1430_v18 }
 0x1d6   :  { %v15080_v23 = vpop.f32.mrf.mxu0 }
 0x1d7   :  { %14216 = vst [vmem:[#allocation2 + $0x1d8] sm:$0xff] %v13956_v19   ;;  %v13951_v26 = vpack.c.bf16 %v2066_v20, %v2065_v14  ;;  %v1869_v27 = vmul.f32 0.2, %v1431_v22  ;;  %v1442_v28 = vadd.f32 %v18284_v9, %v15080_v23  ;;  %v2071_v30 = vmax.f32 %v1439_v17, %v1871_v21  ;;  %v17115_v21 = vld [vmem:[%s22600_s3 + $0xb8] sm:$0xff]   ;;  %v17113_v23 = vld [vmem:[#allocation2 + $0x110] sm:$0xff]  }
 0x1d8   :  { %v1433_v29 = vpop.f32.mrf.mxu0 }
 0x1d9   :  { %14215 = vst [vmem:[#allocation2 + $0x1d0] sm:$0xff] %v13951_v26   ;;  %v1872_v31 = vmul.f32 0.2, %v1442_v28  ;;  %v1434_v32 = vadd.f32 %v18284_v9, %v1433_v29  ;;  %15238 = vmatmul.mubr.bf16.gmra.mxu1 %v17107_v25  ;;  %v2069_v34 = vmax.f32 %v1431_v22, %v1869_v27 }
 0x1da   :  { %v15083_v33 = vpop.f32.mrf.mxu0  ;;  %15470 = vmatmul.mubr.bf16.gmra.mxu0 %v17106_v24  ;;  %15241 = vmatprep.mubr.msk.bf16.mxu1 %vm17630_vm0, %v22612_v35  ;;  %v17114_v24 = vld [vmem:[#allocation2] sm:$0xff]  }
 0x1db   :  { %v2072_v36 = vmax.f32 %v1442_v28, %v1872_v31  ;;  %v1870_v37 = vmul.f32 0.2, %v1434_v32  ;;  %v1455_v38 = vadd.f32 %v18284_v9, %v15083_v33  ;;  %15473 = vmatprep.mubr.msk.bf16.mxu0 %vm17630_vm0, %v22612_v35 }
 0x1dc   :  { %v1446_v39 = vpop.f32.mrf.mxu0 }
 0x1dd   :  { %v13966_v40 = vpack.c.bf16 %v2072_v36, %v2071_v30  ;;  %v2070_v41 = vmax.f32 %v1434_v32, %v1870_v37  ;;  %v1875_v42 = vmul.f32 0.2, %v1455_v38  ;;  %v1447_v43 = vadd.f32 %v18284_v9, %v1446_v39  ;;  %v17120_v32 = vld [vmem:[%s22600_s3 + $0xb0] sm:$0xff]  }
 0x1de   :  { %v15084_v44 = vpop.f32.mrf.mxu0 }
 0x1df   :  { %14218 = vst [vmem:[#allocation2 + $0x1e8] sm:$0xff] %v13966_v40   ;;  %v13961_v47 = vpack.c.bf16 %v2070_v41, %v2069_v34  ;;  %v1873_v48 = vmul.f32 0.2, %v1447_v43  ;;  %v1458_v50 = vadd.f32 %v18284_v9, %v15084_v44  ;;  %v2075_v6 = vmax.f32 %v1455_v38, %v1875_v42 }
 0x1e0   :  { %v1449_v51 = vpop.f32.mrf.mxu0 }
 0x1e1   :  { %14217 = vst [vmem:[#allocation2 + $0x1e0] sm:$0xff] %v13961_v47   ;;  %v1876_v52 = vmul.f32 0.2, %v1458_v50  ;;  %v1450_v53 = vadd.f32 %v18284_v9, %v1449_v51  ;;  %15242 = vmatmul.mubr.bf16.gmra.mxu1 %v17110_v46  ;;  %v2073_v55 = vmax.f32 %v1447_v43, %v1873_v48  ;;  %v17117_v46 = vld [vmem:[#allocation2 + $0x8] sm:$0xff]  }
 0x1e2   :  { %v15087_v54 = vpop.f32.mrf.mxu0  ;;  %15474 = vmatmul.mubr.bf16.gmra.mxu0 %v17109_v45  ;;  %15245 = vmatprep.mubr.msk.bf16.mxu1 %vm17630_vm0, %v22612_v35  ;;  %v17116_v45 = vld [vmem:[#allocation2 + $0x118] sm:$0xff]   ;;  %v17125_v47 = vld [vmem:[%s22600_s3 + $0xa8] sm:$0xff]  }
 0x1e3   :  { %v2076_v56 = vmax.f32 %v1458_v50, %v1876_v52  ;;  %v1874_v57 = vmul.f32 0.2, %v1450_v53  ;;  %v1471_v58 = vadd.f32 %v18284_v9, %v15087_v54  ;;  %15477 = vmatprep.mubr.msk.bf16.mxu0 %vm17630_vm0, %v22612_v35 }
 0x1e4   :  { %v1462_v59 = vpop.f32.mrf.mxu0 }
 0x1e5   :  { %v13976_v60 = vpack.c.bf16 %v2076_v56, %v2075_v6  ;;  %v2074_v61 = vmax.f32 %v1450_v53, %v1874_v57  ;;  %v1879_v62 = vmul.f32 0.2, %v1471_v58  ;;  %v1463_v63 = vadd.f32 %v18284_v9, %v1462_v59 }
 0x1e6   :  { %v15088_v0 = vpop.f32.mrf.mxu0 }
 0x1e7   :  { %14220 = vst [vmem:[#allocation2 + $0x1f8] sm:$0xff] %v13976_v60   ;;  %v13971_v3 = vpack.c.bf16 %v2074_v61, %v2073_v55  ;;  %v1877_v4 = vmul.f32 0.2, %v1463_v63  ;;  %v1474_v5 = vadd.f32 %v18284_v9, %v15088_v0  ;;  %v2079_v8 = vmax.f32 %v1471_v58, %v1879_v62  ;;  %v17133_v61 = vld [vmem:[%s22600_s3 + $0xa0] sm:$0xff]  }
 0x1e8   :  { %v1465_v7 = vpop.f32.mrf.mxu0 }
 0x1e9   :  { %14219 = vst [vmem:[#allocation2 + $0x1f0] sm:$0xff] %v13971_v3   ;;  %v1880_v10 = vmul.f32 0.2, %v1474_v5  ;;  %v1466_v49 = vadd.f32 %v18284_v9, %v1465_v7  ;;  %15246 = vmatmul.mubr.bf16.gmra.mxu1 %v17112_v2  ;;  %v2077_v12 = vmax.f32 %v1463_v63, %v1877_v4  ;;  %v17119_v3 = vld [vmem:[#allocation2 + $0x10] sm:$0xff]  }
 0x1ea   :  { %v15091_v11 = vpop.f32.mrf.mxu0  ;;  %15478 = vmatmul.mubr.bf16.gmra.mxu0 %v17111_v1  ;;  %15265 = vmatprep.mubr.msk.bf16.mxu1 %vm17630_vm0, %v22612_v35 }
 0x1eb   :  { %v2080_v13 = vmax.f32 %v1474_v5, %v1880_v10  ;;  %v1878_v14 = vmul.f32 0.2, %v1466_v49  ;;  %v1487_v15 = vadd.f32 %v18284_v9, %v15091_v11  ;;  %15481 = vmatprep.mubr.msk.bf16.mxu0 %vm17630_vm0, %v22612_v35  ;;  %v17142_v10 = vld [vmem:[%s22600_s3 + $0x98] sm:$0xff]  }
 0x1ec   :  { %v1478_v16 = vpop.f32.mrf.mxu0 }
 0x1ed   :  { %v13986_v17 = vpack.c.bf16 %v2080_v13, %v2079_v8  ;;  %v2078_v18 = vmax.f32 %v1466_v49, %v1878_v14  ;;  %v1883_v19 = vmul.f32 0.2, %v1487_v15  ;;  %v1479_v20 = vadd.f32 %v18284_v9, %v1478_v16  ;;  %v17118_v8 = vld [vmem:[#allocation2 + $0x120] sm:$0xff]  }
 0x1ee   :  { %v15092_v22 = vpop.f32.mrf.mxu0 }
 0x1ef   :  { %14222 = vst [vmem:[#allocation2 + $0x208] sm:$0xff] %v13986_v17   ;;  %v13981_v25 = vpack.c.bf16 %v2078_v18, %v2077_v12  ;;  %v1881_v26 = vmul.f32 0.2, %v1479_v20  ;;  %v1490_v27 = vadd.f32 %v18284_v9, %v15092_v22  ;;  %v2083_v29 = vmax.f32 %v1487_v15, %v1883_v19  ;;  %v17150_v15 = vld [vmem:[%s22600_s3 + $0x90] sm:$0xff]  }
 0x1f0   :  { %v1481_v28 = vpop.f32.mrf.mxu0 }
 0x1f1   :  { %14221 = vst [vmem:[#allocation2 + $0x200] sm:$0xff] %v13981_v25   ;;  %v1884_v30 = vmul.f32 0.2, %v1490_v27  ;;  %v1482_v31 = vadd.f32 %v18284_v9, %v1481_v28  ;;  %15266 = vmatmul.mubr.bf16.vlgmr.msra.gmra.mxu1 %v17114_v24  ;;  %v2081_v34 = vmax.f32 %v1479_v20, %v1881_v26  ;;  %v17122_v26 = vld [vmem:[#allocation2 + $0x18] sm:$0xff]  }
 0x1f2   :  { %v15095_v33 = vpop.f32.mrf.mxu0  ;;  %15482 = vmatmul.mubr.bf16.gmra.mxu0 %v17113_v23  ;;  %15342 = vmatpush3.bf16.msra.mxu1 %v17115_v21 }
 0x1f3   :  { %v2084_v36 = vmax.f32 %v1490_v27, %v1884_v30  ;;  %v1882_v37 = vmul.f32 0.2, %v1482_v31  ;;  %v1503_v38 = vadd.f32 %v18284_v9, %v15095_v33  ;;  %15485 = vmatprep.mubr.msk.bf16.mxu0 %vm17630_vm0, %v22612_v35  ;;  %15269 = vmatprep.mubr.msk.bf16.mxu1 %vm17630_vm0, %v22612_v35  ;;  %v17121_v30 = vld [vmem:[#allocation2 + $0x128] sm:$0xff]  }
 0x1f4   :  { %v1494_v39 = vpop.f32.mrf.mxu0  ;;  %15343 = vmatprep.subr.bf16.mxu1 %v22612_v35 }
 0x1f5   :  { %v13996_v40 = vpack.c.bf16 %v2084_v36, %v2083_v29  ;;  %v2082_v41 = vmax.f32 %v1482_v31, %v1882_v37  ;;  %v1887_v42 = vmul.f32 0.2, %v1503_v38  ;;  %v1495_v43 = vadd.f32 %v18284_v9, %v1494_v39  ;;  %v17157_v31 = vld [vmem:[%s22600_s3 + $0x88] sm:$0xff]  }
 0x1f6   :  { %v15096_v44 = vpop.f32.mrf.mxu0  ;;  %15344 = vmatpush3.bf16.msra.mxu1 %v17120_v32 }
 0x1f7   :  { %14224 = vst [vmem:[#allocation2 + $0x218] sm:$0xff] %v13996_v40   ;;  %v13991_v48 = vpack.c.bf16 %v2082_v41, %v2081_v34  ;;  %v1885_v50 = vmul.f32 0.2, %v1495_v43  ;;  %v1506_v51 = vadd.f32 %v18284_v9, %v15096_v44  ;;  %15345 = vmatprep.subr.bf16.mxu1 %v22612_v35  ;;  %v2087_v52 = vmax.f32 %v1503_v38, %v1887_v42 }
 0x1f8   :  { %v1497_v6 = vpop.f32.mrf.mxu0 }
 0x1f9   :  { %14223 = vst [vmem:[#allocation2 + $0x210] sm:$0xff] %v13991_v48   ;;  %v1888_v53 = vmul.f32 0.2, %v1506_v51  ;;  %v1498_v54 = vadd.f32 %v18284_v9, %v1497_v6  ;;  %15270 = vmatmul.mubr.bf16.gmra.mxu1 %v17117_v46  ;;  %v2085_v56 = vmax.f32 %v1495_v43, %v1885_v50  ;;  %v17162_v43 = vld [vmem:[%s22600_s3 + $0x80] sm:$0xff]  }
 0x1fa   :  { %v15099_v55 = vpop.f32.mrf.mxu0  ;;  %15486 = vmatmul.mubr.bf16.gmra.mxu0 %v17116_v45  ;;  %15273 = vmatprep.mubr.msk.bf16.mxu1 %vm17630_vm0, %v22612_v35 }
 0x1fb   :  { %v2088_v57 = vmax.f32 %v1506_v51, %v1888_v53  ;;  %v1886_v58 = vmul.f32 0.2, %v1498_v54  ;;  %v1519_v59 = vadd.f32 %v18284_v9, %v15099_v55  ;;  %15489 = vmatprep.mubr.msk.bf16.mxu0 %vm17630_vm0, %v22612_v35  ;;  %15346 = vmatpush3.bf16.msra.mxu1 %v17125_v47  ;;  %v17124_v53 = vld [vmem:[#allocation2 + $0x20] sm:$0xff]  }
 0x1fc   :  { %v1510_v60 = vpop.f32.mrf.mxu0  ;;  %15347 = vmatprep.subr.bf16.mxu1 %v22612_v35 }
 0x1fd   :  { %v14006_v62 = vpack.c.bf16 %v2088_v57, %v2087_v52  ;;  %v2086_v63 = vmax.f32 %v1498_v54, %v1886_v58  ;;  %v1891_v0 = vmul.f32 0.2, %v1519_v59  ;;  %v1511_v1 = vadd.f32 %v18284_v9, %v1510_v60  ;;  %v17123_v52 = vld [vmem:[#allocation2 + $0x130] sm:$0xff]  }
 0x1fe   :  { %v15100_v2 = vpop.f32.mrf.mxu0 }
 0x1ff   :  { %14226 = vst [vmem:[#allocation2 + $0x228] sm:$0xff] %v14006_v62   ;;  %v14001_v4 = vpack.c.bf16 %v2086_v63, %v2085_v56  ;;  %v1889_v5 = vmul.f32 0.2, %v1511_v1  ;;  %v1522_v7 = vadd.f32 %v18284_v9, %v15100_v2  ;;  %15348 = vmatpush3.bf16.msra.mxu1 %v17133_v61  ;;  %v2091_v11 = vmax.f32 %v1519_v59, %v1891_v0 }
 0x200   :  { %v1513_v49 = vpop.f32.mrf.mxu0  ;;  %15349 = vmatprep.subr.bf16.mxu1 %v22612_v35 }
 0x201   :  { %14225 = vst [vmem:[#allocation2 + $0x220] sm:$0xff] %v14001_v4   ;;  %v1892_v12 = vmul.f32 0.2, %v1522_v7  ;;  %v1514_v13 = vadd.f32 %v18284_v9, %v1513_v49  ;;  %15274 = vmatmul.mubr.bf16.gmra.mxu1 %v17119_v3  ;;  %v2089_v16 = vmax.f32 %v1511_v1, %v1889_v5  ;;  %v17127_v49 = vld [vmem:[#allocation2 + $0x28] sm:$0xff]  }
 0x202   :  { %v15103_v14 = vpop.f32.mrf.mxu0  ;;  %15490 = vmatmul.mubr.bf16.gmra.mxu0 %v17118_v8  ;;  %15277 = vmatprep.mubr.msk.bf16.mxu1 %vm17630_vm0, %v22612_v35 }
 0x203   :  { %v2092_v17 = vmax.f32 %v1522_v7, %v1892_v12  ;;  %v1890_v18 = vmul.f32 0.2, %v1514_v13  ;;  %v1535_v19 = vadd.f32 %v18284_v9, %v15103_v14  ;;  %15493 = vmatprep.mubr.msk.bf16.mxu0 %vm17630_vm0, %v22612_v35  ;;  %15350 = vmatpush3.bf16.msra.mxu1 %v17142_v10  ;;  %v17126_v10 = vld [vmem:[#allocation2 + $0x138] sm:$0xff]  }
 0x204   :  { %v1526_v20 = vpop.f32.mrf.mxu0  ;;  %15351 = vmatprep.subr.bf16.mxu1 %v22612_v35 }
 0x205   :  { %v14016_v21 = vpack.c.bf16 %v2092_v17, %v2091_v11  ;;  %v2090_v22 = vmax.f32 %v1514_v13, %v1890_v18  ;;  %v1895_v23 = vmul.f32 0.2, %v1535_v19  ;;  %v1527_v24 = vadd.f32 %v18284_v9, %v1526_v20 }
 0x206   :  { %v15104_v25 = vpop.f32.mrf.mxu0 }
 0x207   :  { %14228 = vst [vmem:[#allocation2 + $0x238] sm:$0xff] %v14016_v21   ;;  %v14011_v27 = vpack.c.bf16 %v2090_v22, %v2089_v16  ;;  %v1893_v28 = vmul.f32 0.2, %v1527_v24  ;;  %v1538_v29 = vadd.f32 %v18284_v9, %v15104_v25  ;;  %15352 = vmatpush3.bf16.msra.mxu1 %v17150_v15  ;;  %v2095_v33 = vmax.f32 %v1535_v19, %v1895_v23  ;;  %v18442_v21 = vld [vmem:[%s22601_s2] ss:$0 sm:$0xff] }
 0x208   :  { %v1529_v32 = vpop.f32.mrf.mxu0  ;;  %15353 = vmatprep.subr.bf16.mxu1 %v22612_v35 }
 0x209   :  { %14227 = vst [vmem:[#allocation2 + $0x230] sm:$0xff] %v14011_v27   ;;  %v1896_v34 = vmul.f32 0.2, %v1538_v29  ;;  %v1530_v36 = vadd.f32 %v18284_v9, %v1529_v32  ;;  %15278 = vmatmul.mubr.bf16.gmra.mxu1 %v17122_v26  ;;  %v2093_v38 = vmax.f32 %v1527_v24, %v1893_v28 }
 0x20a   :  { %v15107_v37 = vpop.f32.mrf.mxu0  ;;  %15494 = vmatmul.mubr.bf16.gmra.mxu0 %v17121_v30  ;;  %15281 = vmatprep.mubr.msk.bf16.mxu1 %vm17630_vm0, %v22612_v35 }
 0x20b   :  { %v2096_v39 = vmax.f32 %v1538_v29, %v1896_v34  ;;  %v1894_v40 = vmul.f32 0.2, %v1530_v36  ;;  %v1551_v41 = vadd.f32 %v18284_v9, %v15107_v37  ;;  %15497 = vmatprep.mubr.msk.bf16.mxu0 %vm17630_vm0, %v22612_v35  ;;  %15354 = vmatpush3.bf16.msra.mxu1 %v17157_v31  ;;  %v17128_v34 = vld [vmem:[#allocation2 + $0x140] sm:$0xff]  }
 0x20c   :  { %v1542_v42 = vpop.f32.mrf.mxu0  ;;  %15355 = vmatprep.subr.bf16.mxu1 %v22612_v35 }
 0x20d   :  { %v14026_v44 = vpack.c.bf16 %v2096_v39, %v2095_v33  ;;  %v2094_v45 = vmax.f32 %v1530_v36, %v1894_v40  ;;  %v1899_v46 = vmul.f32 0.2, %v1551_v41  ;;  %v1543_v47 = vadd.f32 %v18284_v9, %v1542_v42  ;;  %v17129_v36 = vld [vmem:[#allocation2 + $0x30] sm:$0xff]  }
 0x20e   :  { %v15108_v48 = vpop.f32.mrf.mxu0 }
 0x20f   :  { %14230 = vst [vmem:[#allocation2 + $0x248] sm:$0xff] %v14026_v44   ;;  %v14021_v50 = vpack.c.bf16 %v2094_v45, %v2093_v38  ;;  %v1897_v51 = vmul.f32 0.2, %v1543_v47  ;;  %v1554_v6 = vadd.f32 %v18284_v9, %v15108_v48  ;;  %15356 = vmatpush3.bf16.msra.mxu1 %v17162_v43  ;;  %v2099_v55 = vmax.f32 %v1551_v41, %v1899_v46 }
 0x210   :  { %v1545_v54 = vpop.f32.mrf.mxu0  ;;  %15525 = vmatprep.subr.bf16.mxu1 %v22612_v35 }
 0x211   :  { %14229 = vst [vmem:[#allocation2 + $0x240] sm:$0xff] %v14021_v50   ;;  %v1900_v56 = vmul.f32 0.2, %v1554_v6  ;;  %v1546_v57 = vadd.f32 %v18284_v9, %v1545_v54  ;;  %15282 = vmatmul.mubr.bf16.gmra.mxu1 %v17124_v53  ;;  %v2097_v59 = vmax.f32 %v1543_v47, %v1897_v51  ;;  %v17131_v54 = vld [vmem:[#allocation2 + $0x38] sm:$0xff]  }
 0x212   :  { %v15111_v58 = vpop.f32.mrf.mxu0  ;;  %15498 = vmatmul.mubr.bf16.gmra.mxu0 %v17123_v52  ;;  %15285 = vmatprep.mubr.msk.bf16.mxu1 %vm17630_vm0, %v22612_v35 }
 0x213   :  { %v2100_v60 = vmax.f32 %v1554_v6, %v1900_v56  ;;  %v1898_v61 = vmul.f32 0.2, %v1546_v57  ;;  %v1567_v62 = vadd.f32 %v18284_v9, %v15111_v58  ;;  %15501 = vmatprep.mubr.msk.bf16.mxu0 %vm17630_vm0, %v22612_v35 }
 0x214   :  { %v1558_v63 = vpop.f32.mrf.mxu0 }
 0x215   :  { %v14036_v0 = vpack.c.bf16 %v2100_v60, %v2099_v55  ;;  %v2098_v1 = vmax.f32 %v1546_v57, %v1898_v61  ;;  %v1903_v2 = vmul.f32 0.2, %v1567_v62  ;;  %v1559_v3 = vadd.f32 %v18284_v9, %v1558_v63  ;;  %v17130_v60 = vld [vmem:[#allocation2 + $0x148] sm:$0xff]  }
 0x216   :  { %v15112_v4 = vpop.f32.mrf.mxu0 }
 0x217   :  { %14232 = vst [vmem:[#allocation2 + $0x258] sm:$0xff] %v14036_v0   ;;  %v14031_v5 = vpack.c.bf16 %v2098_v1, %v2097_v59  ;;  %v1901_v7 = vmul.f32 0.2, %v1559_v3  ;;  %v1570_v8 = vadd.f32 %v18284_v9, %v15112_v4  ;;  %v18436_v12 = vpop.f32.mrf.mxu1  ;;  %v2103_v13 = vmax.f32 %v1567_v62, %v1903_v2 }
 0x218   :  { %v1561_v11 = vpop.f32.mrf.mxu0 }
 0x219   :  { %14231 = vst [vmem:[#allocation2 + $0x250] sm:$0xff] %v14031_v5   ;;  %v1904_v14 = vmul.f32 0.2, %v1570_v8  ;;  %v1562_v15 = vadd.f32 %v18284_v9, %v1561_v11  ;;  %v15175_v17 = vpop.f32.mrf.mxu1  ;;  %15286 = vmatmul.mubr.bf16.gmra.mxu1 %v17127_v49  ;;  %v2101_v18 = vmax.f32 %v1559_v3, %v1901_v7 }
 0x21a   :  { %v15115_v16 = vpop.f32.mrf.mxu0  ;;  %15502 = vmatmul.mubr.bf16.gmra.mxu0 %v17126_v10  ;;  %15289 = vmatprep.mubr.msk.bf16.mxu1 %vm17630_vm0, %v22612_v35 }
 0x21b   :  { %v2104_v19 = vmax.f32 %v1570_v8, %v1904_v14  ;;  %v1902_v20 = vmul.f32 0.2, %v1562_v15  ;;  %v1583_v22 = vadd.f32 %v18442_v21, %v15115_v16  ;;  %15505 = vmatprep.mubr.msk.bf16.mxu0 %vm17630_vm0, %v22612_v35  ;;  %v18449_v23 = vpop.f32.mrf.mxu1  ;;  %v17136_v16 = vld [vmem:[#allocation2 + $0x40] sm:$0xff]  }
 0x21c   :  { %v1574_v9 = vpop.f32.mrf.mxu0 }
 0x21d   :  { %v14046_v24 = vpack.c.bf16 %v2104_v19, %v2103_v13  ;;  %v2102_v25 = vmax.f32 %v1562_v15, %v1902_v20  ;;  %v1907_v26 = vmul.f32 0.2, %v1583_v22  ;;  %v1575_v27 = vadd.f32 %v18442_v21, %v1574_v9  ;;  %v15176_v29 = vpop.f32.mrf.mxu1  ;;  %v17135_v9 = vld [vmem:[#allocation2 + $0x150] sm:$0xff]  }
 0x21e   :  { %v15116_v28 = vpop.f32.mrf.mxu0 }
 0x21f   :  { %14234 = vst [vmem:[#allocation2 + $0x268] sm:$0xff] %v14046_v24   ;;  %v14041_v30 = vpack.c.bf16 %v2102_v25, %v2101_v18  ;;  %v1905_v31 = vmul.f32 0.2, %v1575_v27  ;;  %v1586_v32 = vadd.f32 %v18442_v21, %v15116_v28  ;;  %v2107_v37 = vmax.f32 %v1583_v22, %v1907_v26 }
 0x220   :  { %v1577_v33 = vpop.f32.mrf.mxu0 }
 0x221   :  { %14233 = vst [vmem:[#allocation2 + $0x260] sm:$0xff] %v14041_v30   ;;  %v1908_v38 = vmul.f32 0.2, %v1586_v32  ;;  %v1578_v39 = vadd.f32 %v18442_v21, %v1577_v33  ;;  %v18454_v41 = vpop.f32.mrf.mxu1  ;;  %15290 = vmatmul.mubr.bf16.gmra.mxu1 %v17129_v36  ;;  %v2105_v42 = vmax.f32 %v1575_v27, %v1905_v31 }
 0x222   :  { %v15119_v40 = vpop.f32.mrf.mxu0  ;;  %15506 = vmatmul.mubr.bf16.gmra.mxu0 %v17128_v34  ;;  %15293 = vmatprep.mubr.msk.bf16.mxu1 %vm17630_vm0, %v22612_v35 }
 0x223   :  { %v2108_v43 = vmax.f32 %v1586_v32, %v1908_v38  ;;  %v1906_v44 = vmul.f32 0.2, %v1578_v39  ;;  %v1599_v45 = vadd.f32 %v18442_v21, %v15119_v40  ;;  %15509 = vmatprep.mubr.msk.bf16.mxu0 %vm17630_vm0, %v22612_v35  ;;  %v15179_v47 = vpop.f32.mrf.mxu1 }
 0x224   :  { %v1590_v46 = vpop.f32.mrf.mxu0 }
 0x225   :  { %v14056_v48 = vpack.c.bf16 %v2108_v43, %v2107_v37  ;;  %v2106_v50 = vmax.f32 %v1578_v39, %v1906_v44  ;;  %v1911_v51 = vmul.f32 0.2, %v1599_v45  ;;  %v1591_v6 = vadd.f32 %v18442_v21, %v1590_v46  ;;  %v18462_v53 = vpop.f32.mrf.mxu1  ;;  %v17140_v43 = vld [vmem:[#allocation2 + $0x48] sm:$0xff]  }
 0x226   :  { %v15120_v52 = vpop.f32.mrf.mxu0 }
 0x227   :  { %14236 = vst [vmem:[#allocation2 + $0x278] sm:$0xff] %v14056_v48   ;;  %v14051_v55 = vpack.c.bf16 %v2106_v50, %v2105_v42  ;;  %v1909_v56 = vmul.f32 0.2, %v1591_v6  ;;  %v1602_v57 = vadd.f32 %v18442_v21, %v15120_v52  ;;  %v15180_v59 = vpop.f32.mrf.mxu1  ;;  %v2111_v61 = vmax.f32 %v1599_v45, %v1911_v51  ;;  %v17139_v50 = vld [vmem:[#allocation2 + $0x158] sm:$0xff]  }
 0x228   :  { %v1593_v58 = vpop.f32.mrf.mxu0 }
 0x229   :  { %14235 = vst [vmem:[#allocation2 + $0x270] sm:$0xff] %v14051_v55   ;;  %v1912_v62 = vmul.f32 0.2, %v1602_v57  ;;  %v1594_v63 = vadd.f32 %v18442_v21, %v1593_v58  ;;  %v18466_v1 = vpop.f32.mrf.mxu1  ;;  %15294 = vmatmul.mubr.bf16.gmra.mxu1 %v17131_v54  ;;  %v2109_v2 = vmax.f32 %v1591_v6, %v1909_v56 }
 0x22a   :  { %v15123_v0 = vpop.f32.mrf.mxu0  ;;  %15510 = vmatmul.mubr.bf16.gmra.mxu0 %v17130_v60  ;;  %15297 = vmatprep.mubr.msk.bf16.mxu1 %vm17630_vm0, %v22612_v35 }
 0x22b   :  { %v2112_v3 = vmax.f32 %v1602_v57, %v1912_v62  ;;  %v1910_v4 = vmul.f32 0.2, %v1594_v63  ;;  %v1615_v5 = vadd.f32 %v18442_v21, %v15123_v0  ;;  %15513 = vmatprep.mubr.msk.bf16.mxu0 %vm17630_vm0, %v22612_v35  ;;  %v15183_v8 = vpop.f32.mrf.mxu1 }
 0x22c   :  { %v1606_v7 = vpop.f32.mrf.mxu0 }
 0x22d   :  { %v14066_v10 = vpack.c.bf16 %v2112_v3, %v2111_v61  ;;  %v2110_v49 = vmax.f32 %v1594_v63, %v1910_v4  ;;  %v1915_v11 = vmul.f32 0.2, %v1615_v5  ;;  %v1607_v13 = vadd.f32 %v18442_v21, %v1606_v7  ;;  %v18474_v15 = vpop.f32.mrf.mxu1 }
 0x22e   :  { %v15124_v14 = vpop.f32.mrf.mxu0 }
 0x22f   :  { %14238 = vst [vmem:[#allocation2 + $0x288] sm:$0xff] %v14066_v10   ;;  %v14061_v17 = vpack.c.bf16 %v2110_v49, %v2109_v2  ;;  %v1913_v18 = vmul.f32 0.2, %v1607_v13  ;;  %v1618_v19 = vadd.f32 %v18442_v21, %v15124_v14  ;;  %v15184_v22 = vpop.f32.mrf.mxu1  ;;  %v2115_v24 = vmax.f32 %v1615_v5, %v1915_v11  ;;  %v17144_v5 = vld [vmem:[#allocation2 + $0x160] sm:$0xff]  }
 0x230   :  { %v1609_v20 = vpop.f32.mrf.mxu0 }
 0x231   :  { %14237 = vst [vmem:[#allocation2 + $0x280] sm:$0xff] %v14061_v17   ;;  %v1916_v25 = vmul.f32 0.2, %v1618_v19  ;;  %v1610_v26 = vadd.f32 %v18442_v21, %v1609_v20  ;;  %v18478_v28 = vpop.f32.mrf.mxu1  ;;  %15298 = vmatmul.mubr.bf16.gmra.mxu1 %v17136_v16  ;;  %v2113_v29 = vmax.f32 %v1607_v13, %v1913_v18  ;;  %v17145_v13 = vld [vmem:[#allocation2 + $0x50] sm:$0xff]  }
 0x232   :  { %v15127_v27 = vpop.f32.mrf.mxu0  ;;  %15514 = vmatmul.mubr.bf16.gmra.mxu0 %v17135_v9  ;;  %15301 = vmatprep.mubr.msk.bf16.mxu1 %vm17630_vm0, %v22612_v35 }
 0x233   :  { %v2116_v30 = vmax.f32 %v1618_v19, %v1916_v25  ;;  %v1914_v31 = vmul.f32 0.2, %v1610_v26  ;;  %v1631_v32 = vadd.f32 %v18442_v21, %v15127_v27  ;;  %15517 = vmatprep.mubr.msk.bf16.mxu0 %vm17630_vm0, %v22612_v35  ;;  %v15187_v34 = vpop.f32.mrf.mxu1 }
 0x234   :  { %v1622_v33 = vpop.f32.mrf.mxu0  ;;  %v17148_v34 = vld [vmem:[#allocation2 + $0x258] sm:$0xff]  }
 0x235   :  { %v14076_v36 = vpack.c.bf16 %v2116_v30, %v2115_v24  ;;  %v2114_v37 = vmax.f32 %v1610_v26, %v1914_v31  ;;  %v1919_v38 = vmul.f32 0.2, %v1631_v32  ;;  %v1623_v39 = vadd.f32 %v18442_v21, %v1622_v33  ;;  %v18486_v42 = vpop.f32.mrf.mxu1 }
 0x236   :  { %v15128_v40 = vpop.f32.mrf.mxu0 }
 0x237   :  { %14240 = vst [vmem:[#allocation2 + $0x298] sm:$0xff] %v14076_v36   ;;  %v14071_v44 = vpack.c.bf16 %v2114_v37, %v2113_v29  ;;  %v1917_v45 = vmul.f32 0.2, %v1623_v39  ;;  %v1634_v46 = vadd.f32 %v18442_v21, %v15128_v40  ;;  %v15188_v48 = vpop.f32.mrf.mxu1  ;;  %v2119_v51 = vmax.f32 %v1631_v32, %v1919_v38 }
 0x238   :  { %v1625_v47 = vpop.f32.mrf.mxu0 }
 0x239   :  { %14239 = vst [vmem:[#allocation2 + $0x290] sm:$0xff] %v14071_v44   ;;  %v1920_v6 = vmul.f32 0.2, %v1634_v46  ;;  %v1626_v52 = vadd.f32 %v18442_v21, %v1625_v47  ;;  %v18490_v55 = vpop.f32.mrf.mxu1  ;;  %15302 = vmatmul.mubr.bf16.gmra.mxu1 %v17140_v43  ;;  %v2117_v56 = vmax.f32 %v1623_v39, %v1917_v45  ;;  %v17149_v39 = vld [vmem:[#allocation2 + $0x58] sm:$0xff]  }
 0x23a   :  { %v15131_v54 = vpop.f32.mrf.mxu0  ;;  %15518 = vmatmul.mubr.bf16.gmra.mxu0 %v17139_v50  ;;  %15305 = vmatprep.mubr.msk.bf16.mxu1 %vm17630_vm0, %v22612_v35  ;;  %v17186_v44 = vld [vmem:[%s22600_s3 + $0x1f8] sm:$0xff]  }
 0x23b   :  { %v2120_v57 = vmax.f32 %v1634_v46, %v1920_v6  ;;  %v1918_v58 = vmul.f32 0.2, %v1626_v52  ;;  %v1647_v59 = vadd.f32 %v18442_v21, %v15131_v54  ;;  %15521 = vmatprep.mubr.msk.bf16.mxu0 %vm17630_vm0, %v22612_v35  ;;  %v15191_v61 = vpop.f32.mrf.mxu1 }
 0x23c   :  { %v1638_v60 = vpop.f32.mrf.mxu0 }
 0x23d   :  { %v14086_v62 = vpack.c.bf16 %v2120_v57, %v2119_v51  ;;  %v2118_v63 = vmax.f32 %v1626_v52, %v1918_v58  ;;  %v1923_v0 = vmul.f32 0.2, %v1647_v59  ;;  %v1639_v2 = vadd.f32 %v18442_v21, %v1638_v60  ;;  %v18498_v4 = vpop.f32.mrf.mxu1 }
 0x23e   :  { %v15132_v3 = vpop.f32.mrf.mxu0 }
 0x23f   :  { %14242 = vst [vmem:[#allocation2 + $0x2a8] sm:$0xff] %v14086_v62   ;;  %v14081_v7 = vpack.c.bf16 %v2118_v63, %v2117_v56  ;;  %v1921_v8 = vmul.f32 0.2, %v1639_v2  ;;  %v1650_v10 = vadd.f32 %v18442_v21, %v15132_v3  ;;  %v15192_v11 = vpop.f32.mrf.mxu1  ;;  %v2123_v14 = vmax.f32 %v1647_v59, %v1923_v0  ;;  %v17188_v56 = vld [vmem:[%s22600_s3 + $0x1f0] sm:$0xff]  }
 0x240   :  { %v1641_v49 = vpop.f32.mrf.mxu0  ;;  %v17191_v11 = vld [vmem:[%s22600_s3 + $0x1e8] sm:$0xff]  }
 0x241   :  { %14241 = vst [vmem:[#allocation2 + $0x2a0] sm:$0xff] %v14081_v7   ;;  %v1924_v16 = vmul.f32 0.2, %v1650_v10  ;;  %v1642_v17 = vadd.f32 %v18442_v21, %v1641_v49  ;;  %v18502_v19 = vpop.f32.mrf.mxu1  ;;  %15306 = vmatmul.mubr.bf16.gmra.mxu1 %v17145_v13  ;;  %v2121_v20 = vmax.f32 %v1639_v2, %v1921_v8  ;;  %v17151_v2 = vld [vmem:[#allocation2 + $0x260] sm:$0xff]  }
 0x242   :  { %v15135_v18 = vpop.f32.mrf.mxu0  ;;  %15522 = vmatmul.mubr.bf16.gmra.mxu0 %v17144_v5  ;;  %15309 = vmatprep.mubr.msk.bf16.mxu1 %vm17630_vm0, %v22612_v35  ;;  %v17152_v8 = vld [vmem:[#allocation2 + $0x60] sm:$0xff]  }
 0x243   :  { %v2124_v22 = vmax.f32 %v1650_v10, %v1924_v16  ;;  %v1922_v9 = vmul.f32 0.2, %v1642_v17  ;;  %v1663_v24 = vadd.f32 %v18442_v21, %v15135_v18  ;;  %15633 = vmatprep.mubr.msk.bf16.mxu0 %vm17630_vm0, %v22612_v35  ;;  %v15195_v26 = vpop.f32.mrf.mxu1 }
 0x244   :  { %v1654_v25 = vpop.f32.mrf.mxu0 }
 0x245   :  { %v14096_v27 = vpack.c.bf16 %v2124_v22, %v2123_v14  ;;  %v2122_v29 = vmax.f32 %v1642_v17, %v1922_v9  ;;  %v1927_v30 = vmul.f32 0.2, %v1663_v24  ;;  %v1655_v31 = vadd.f32 %v18442_v21, %v1654_v25  ;;  %v18510_v33 = vpop.f32.mrf.mxu1  ;;  %v17192_v25 = vld [vmem:[%s22600_s3 + $0x1e0] sm:$0xff]  }
 0x246   :  { %v15136_v32 = vpop.f32.mrf.mxu0 }
 0x247   :  { %14244 = vst [vmem:[#allocation2 + $0x2b8] sm:$0xff] %v14096_v27   ;;  %v14091_v36 = vpack.c.bf16 %v2122_v29, %v2121_v20  ;;  %v1925_v37 = vmul.f32 0.2, %v1655_v31  ;;  %v1666_v38 = vadd.f32 %v18442_v21, %v15136_v32  ;;  %v15196_v43 = vpop.f32.mrf.mxu1  ;;  %v2127_v45 = vmax.f32 %v1663_v24, %v1927_v30 }
 0x248   :  { %v1657_v40 = vpop.f32.mrf.mxu0  ;;  %v17154_v43 = vld [vmem:[#allocation2 + $0x68] sm:$0xff]  }
 0x249   :  { %14243 = vst [vmem:[#allocation2 + $0x2b0] sm:$0xff] %v14091_v36   ;;  %v1928_v46 = vmul.f32 0.2, %v1666_v38  ;;  %v1658_v47 = vadd.f32 %v18442_v21, %v1657_v40  ;;  %v18517_v50 = vpop.f32.mrf.mxu1  ;;  %15310 = vmatmul.mubr.bf16.gmra.mxu1 %v17149_v39  ;;  %v2125_v51 = vmax.f32 %v1655_v31, %v1925_v37  ;;  %v17153_v37 = vld [vmem:[#allocation2 + $0x268] sm:$0xff]  }
 0x24a   :  { %v15139_v48 = vpop.f32.mrf.mxu0  ;;  %15634 = vmatmul.mubr.bf16.vlgmr.msra.gmra.mxu0 %v17148_v34  ;;  %15313 = vmatprep.mubr.msk.bf16.mxu1 %vm17630_vm0, %v22612_v35 }
 0x24b   :  { %v2128_v6 = vmax.f32 %v1666_v38, %v1928_v46  ;;  %v1926_v52 = vmul.f32 0.2, %v1658_v47  ;;  %v1679_v54 = vadd.f32 %v18442_v21, %v15139_v48  ;;  %15637 = vmatprep.mubr.msk.bf16.mxu0 %vm17630_vm0, %v22612_v35  ;;  %v15199_v58 = vpop.f32.mrf.mxu1  ;;  %15802 = vmatpush3.bf16.msra.mxu0 %v17186_v44  ;;  %v17195_v46 = vld [vmem:[%s22600_s3 + $0x1d8] sm:$0xff]  }
 0x24c   :  { %v1670_v57 = vpop.f32.mrf.mxu0  ;;  %15803 = vmatprep.subr.bf16.mxu0 %v22612_v35 }
 0x24d   :  { %v14106_v59 = vpack.c.bf16 %v2128_v6, %v2127_v45  ;;  %v2126_v60 = vmax.f32 %v1658_v47, %v1926_v52  ;;  %v1931_v61 = vmul.f32 0.2, %v1679_v54  ;;  %v1671_v62 = vadd.f32 %v18442_v21, %v1670_v57  ;;  %v18529_v0 = vpop.f32.mrf.mxu1 }
 0x24e   :  { %v15140_v63 = vpop.f32.mrf.mxu0 }
 0x24f   :  { %14246 = vst [vmem:[#allocation2 + $0x2c8] sm:$0xff] %v14106_v59   ;;  %v14101_v3 = vpack.c.bf16 %v2126_v60, %v2125_v51  ;;  %v1929_v5 = vmul.f32 0.2, %v1671_v62  ;;  %v1682_v7 = vadd.f32 %v18442_v21, %v15140_v63  ;;  %v15200_v49 = vpop.f32.mrf.mxu1  ;;  %15804 = vmatpush3.bf16.msra.mxu0 %v17188_v56  ;;  %v2131_v13 = vmax.f32 %v1679_v54, %v1931_v61  ;;  %v17197_v59 = vld [vmem:[%s22600_s3 + $0x1d0] sm:$0xff]  }
 0x250   :  { %v1673_v10 = vpop.f32.mrf.mxu0  ;;  %15805 = vmatprep.subr.bf16.mxu0 %v22612_v35 }
 0x251   :  { %14245 = vst [vmem:[#allocation2 + $0x2c0] sm:$0xff] %v14101_v3   ;;  %v1932_v14 = vmul.f32 0.2, %v1682_v7  ;;  %v1674_v16 = vadd.f32 %v18442_v21, %v1673_v10  ;;  %v18537_v18 = vpop.f32.mrf.mxu1  ;;  %15314 = vmatmul.mubr.bf16.gmra.mxu1 %v17152_v8  ;;  %v2129_v20 = vmax.f32 %v1671_v62, %v1929_v5  ;;  %v17155_v8 = vld [vmem:[#allocation2 + $0x270] sm:$0xff]  }
 0x252   :  { %v15143_v17 = vpop.f32.mrf.mxu0  ;;  %15638 = vmatmul.mubr.bf16.gmra.mxu0 %v17151_v2  ;;  %15317 = vmatprep.mubr.msk.bf16.mxu1 %vm17630_vm0, %v22612_v35 }
 0x253   :  { %v2132_v22 = vmax.f32 %v1682_v7, %v1932_v14  ;;  %v1930_v9 = vmul.f32 0.2, %v1674_v16  ;;  %v1695_v24 = vadd.f32 %v18442_v21, %v15143_v17  ;;  %15641 = vmatprep.mubr.msk.bf16.mxu0 %vm17630_vm0, %v22612_v35  ;;  %v15203_v27 = vpop.f32.mrf.mxu1  ;;  %15806 = vmatpush3.bf16.msra.mxu0 %v17191_v11  ;;  %v17200_v17 = vld [vmem:[%s22600_s3 + $0x1c8] sm:$0xff]  }
 0x254   :  { %v1686_v26 = vpop.f32.mrf.mxu0  ;;  %15807 = vmatprep.subr.bf16.mxu0 %v22612_v35 }
 0x255   :  { %v14116_v29 = vpack.c.bf16 %v2132_v22, %v2131_v13  ;;  %v2130_v30 = vmax.f32 %v1674_v16, %v1930_v9  ;;  %v1935_v31 = vmul.f32 0.2, %v1695_v24  ;;  %v1687_v32 = vadd.f32 %v18442_v21, %v1686_v26  ;;  %v18549_v36 = vpop.f32.mrf.mxu1  ;;  %v17156_v13 = vld [vmem:[#allocation2 + $0x70] sm:$0xff]  }
 0x256   :  { %v15144_v34 = vpop.f32.mrf.mxu0 }
 0x257   :  { %14248 = vst [vmem:[#allocation2 + $0x2d8] sm:$0xff] %v14116_v29   ;;  %v14111_v38 = vpack.c.bf16 %v2130_v30, %v2129_v20  ;;  %v1933_v39 = vmul.f32 0.2, %v1687_v32  ;;  %v1698_v40 = vadd.f32 %v18442_v21, %v15144_v34  ;;  %v15204_v45 = vpop.f32.mrf.mxu1  ;;  %15808 = vmatpush3.bf16.msra.mxu0 %v17192_v25  ;;  %v2135_v47 = vmax.f32 %v1695_v24, %v1935_v31  ;;  %v17201_v31 = vld [vmem:[%s22600_s3 + $0x1c0] sm:$0xff]  }
 0x258   :  { %v1689_v44 = vpop.f32.mrf.mxu0  ;;  %15809 = vmatprep.subr.bf16.mxu0 %v22612_v35  ;;  %v17158_v45 = vld [vmem:[#allocation2 + $0x278] sm:$0xff]  }
 0x259   :  { %14247 = vst [vmem:[#allocation2 + $0x2d0] sm:$0xff] %v14111_v38   ;;  %v1936_v48 = vmul.f32 0.2, %v1698_v40  ;;  %v1690_v51 = vadd.f32 %v18442_v21, %v1689_v44  ;;  %v18557_v52 = vpop.f32.mrf.mxu1  ;;  %15318 = vmatmul.mubr.bf16.gmra.mxu1 %v17154_v43  ;;  %v2133_v54 = vmax.f32 %v1687_v32, %v1933_v39 }
 0x25a   :  { %v15147_v6 = vpop.f32.mrf.mxu0  ;;  %15642 = vmatmul.mubr.bf16.gmra.mxu0 %v17153_v37  ;;  %15321 = vmatprep.mubr.msk.bf16.mxu1 %vm17630_vm0, %v22612_v35 }
 0x25b   :  { %v2136_v56 = vmax.f32 %v1698_v40, %v1936_v48  ;;  %v1934_v57 = vmul.f32 0.2, %v1690_v51  ;;  %v1711_v58 = vadd.f32 %v18442_v21, %v15147_v6  ;;  %15645 = vmatprep.mubr.msk.bf16.mxu0 %vm17630_vm0, %v22612_v35  ;;  %v15207_v61 = vpop.f32.mrf.mxu1  ;;  %15810 = vmatpush3.bf16.msra.mxu0 %v17195_v46 }
 0x25c   :  { %v1702_v60 = vpop.f32.mrf.mxu0  ;;  %15811 = vmatprep.subr.bf16.mxu0 %v22612_v35 }
 0x25d   :  { %v14126_v62 = vpack.c.bf16 %v2136_v56, %v2135_v47  ;;  %v2134_v63 = vmax.f32 %v1690_v51, %v1934_v57  ;;  %v1939_v2 = vmul.f32 0.2, %v1711_v58  ;;  %v1703_v3 = vadd.f32 %v18442_v21, %v1702_v60  ;;  %v18569_v7 = vpop.f32.mrf.mxu1 }
 0x25e   :  { %v15148_v5 = vpop.f32.mrf.mxu0 }
 0x25f   :  { %14250 = vst [vmem:[#allocation2 + $0x2e8] sm:$0xff] %v14126_v62   ;;  %v14121_v10 = vpack.c.bf16 %v2134_v63, %v2133_v54  ;;  %v1937_v49 = vmul.f32 0.2, %v1703_v3  ;;  %v1714_v11 = vadd.f32 %v18442_v21, %v15148_v5  ;;  %v15208_v16 = vpop.f32.mrf.mxu1  ;;  %15812 = vmatpush3.bf16.msra.mxu0 %v17197_v59  ;;  %v2139_v20 = vmax.f32 %v1711_v58, %v1939_v2  ;;  %v17159_v54 = vld [vmem:[#allocation2 + $0x78] sm:$0xff]  }
 0x260   :  { %v1705_v14 = vpop.f32.mrf.mxu0  ;;  %15813 = vmatprep.subr.bf16.mxu0 %v22612_v35 }
 0x261   :  { %14249 = vst [vmem:[#allocation2 + $0x2e0] sm:$0xff] %v14121_v10   ;;  %v1940_v22 = vmul.f32 0.2, %v1714_v11  ;;  %v1706_v9 = vadd.f32 %v18442_v21, %v1705_v14  ;;  %v18577_v25 = vpop.f32.mrf.mxu1  ;;  %15322 = vmatmul.mubr.bf16.gmra.mxu1 %v17156_v13  ;;  %v2137_v26 = vmax.f32 %v1703_v3, %v1937_v49 }
 0x262   :  { %v15151_v24 = vpop.f32.mrf.mxu0  ;;  %15646 = vmatmul.mubr.bf16.gmra.mxu0 %v17155_v8  ;;  %15325 = vmatprep.mubr.msk.bf16.mxu1 %vm17630_vm0, %v22612_v35  ;;  %v17160_v8 = vld [vmem:[#allocation2 + $0x280] sm:$0xff]  }
 0x263   :  { %v2140_v27 = vmax.f32 %v1714_v11, %v1940_v22  ;;  %v1938_v29 = vmul.f32 0.2, %v1706_v9  ;;  %v1727_v30 = vadd.f32 %v18442_v21, %v15151_v24  ;;  %15649 = vmatprep.mubr.msk.bf16.mxu0 %vm17630_vm0, %v22612_v35  ;;  %v15211_v34 = vpop.f32.mrf.mxu1  ;;  %15814 = vmatpush3.bf16.msra.mxu0 %v17200_v17  ;;  %v17161_v17 = vld [vmem:[#allocation2 + $0x80] sm:$0xff]  }
 0x264   :  { %v1718_v32 = vpop.f32.mrf.mxu0  ;;  %15815 = vmatprep.subr.bf16.mxu0 %v22612_v35 }
 0x265   :  { %v14136_v37 = vpack.c.bf16 %v2140_v27, %v2139_v20  ;;  %v2138_v38 = vmax.f32 %v1706_v9, %v1938_v29  ;;  %v1943_v39 = vmul.f32 0.2, %v1727_v30  ;;  %v1719_v40 = vadd.f32 %v18442_v21, %v1718_v32  ;;  %v18589_v44 = vpop.f32.mrf.mxu1 }
 0x266   :  { %v15152_v43 = vpop.f32.mrf.mxu0 }
 0x267   :  { %14252 = vst [vmem:[#allocation2 + $0x2f8] sm:$0xff] %v14136_v37   ;;  %v14131_v46 = vpack.c.bf16 %v2138_v38, %v2137_v26  ;;  %v1941_v47 = vmul.f32 0.2, %v1719_v40  ;;  %v1730_v48 = vadd.f32 %v18442_v21, %v15152_v43  ;;  %v15212_v6 = vpop.f32.mrf.mxu1  ;;  %15816 = vmatpush3.bf16.msra.mxu0 %v17201_v31  ;;  %v2143_v56 = vmax.f32 %v1727_v30, %v1943_v39 }
 0x268   :  { %v1721_v51 = vpop.f32.mrf.mxu0  ;;  %15985 = vmatprep.subr.bf16.mxu0 %v22612_v35 }
 0x269   :  { %14251 = vst [vmem:[#allocation2 + $0x2f0] sm:$0xff] %v14131_v46   ;;  %v1944_v57 = vmul.f32 0.2, %v1730_v48  ;;  %v1722_v58 = vadd.f32 %v18442_v21, %v1721_v51  ;;  %v18594_v60 = vpop.f32.mrf.mxu1  ;;  %15326 = vmatmul.mubr.bf16.gmra.mxu1 %v17159_v54  ;;  %v2141_v61 = vmax.f32 %v1719_v40, %v1941_v47  ;;  %v17163_v47 = vld [vmem:[#allocation2 + $0x288] sm:$0xff]  }
 0x26a   :  { %v15155_v59 = vpop.f32.mrf.mxu0  ;;  %15650 = vmatmul.mubr.bf16.gmra.mxu0 %v17158_v45  ;;  %15329 = vmatprep.mubr.msk.bf16.mxu1 %vm17630_vm0, %v22612_v35  ;;  %v17164_v51 = vld [vmem:[#allocation2 + $0x88] sm:$0xff]  }
 0x26b   :  { %v2144_v62 = vmax.f32 %v1730_v48, %v1944_v57  ;;  %v1942_v63 = vmul.f32 0.2, %v1722_v58  ;;  %v1743_v2 = vadd.f32 %v18442_v21, %v15155_v59  ;;  %15653 = vmatprep.mubr.msk.bf16.mxu0 %vm17630_vm0, %v22612_v35  ;;  %v15215_v5 = vpop.f32.mrf.mxu1 }
 0x26c   :  { %v1734_v3 = vpop.f32.mrf.mxu0 }
 0x26d   :  { %v14146_v10 = vpack.c.bf16 %v2144_v62, %v2143_v56  ;;  %v2142_v49 = vmax.f32 %v1722_v58, %v1942_v63  ;;  %v1947_v11 = vmul.f32 0.2, %v1743_v2  ;;  %v1735_v13 = vadd.f32 %v18442_v21, %v1734_v3  ;;  %v18602_v16 = vpop.f32.mrf.mxu1  ;;  %v17165_v63 = vld [vmem:[#allocation2 + $0x290] sm:$0xff]  }
 0x26e   :  { %v15156_v14 = vpop.f32.mrf.mxu0 }
 0x26f   :  { %14254 = vst [vmem:[#allocation2 + $0x308] sm:$0xff] %v14146_v10   ;;  %v14141_v20 = vpack.c.bf16 %v2142_v49, %v2141_v61  ;;  %v1945_v22 = vmul.f32 0.2, %v1735_v13  ;;  %v1746_v9 = vadd.f32 %v18442_v21, %v15156_v14  ;;  %v15216_v26 = vpop.f32.mrf.mxu1  ;;  %v2147_v27 = vmax.f32 %v1743_v2, %v1947_v11  ;;  %v17166_v2 = vld [vmem:[#allocation2 + $0x90] sm:$0xff]  }
 0x270   :  { %v1737_v24 = vpop.f32.mrf.mxu0 }
 0x271   :  { %14253 = vst [vmem:[#allocation2 + $0x300] sm:$0xff] %v14141_v20   ;;  %v1948_v29 = vmul.f32 0.2, %v1746_v9  ;;  %v1738_v30 = vadd.f32 %v18442_v21, %v1737_v24  ;;  %v18608_v32 = vpop.f32.mrf.mxu1  ;;  %15330 = vmatmul.mubr.bf16.gmra.mxu1 %v17161_v17  ;;  %v2145_v34 = vmax.f32 %v1735_v13, %v1945_v22  ;;  %v17167_v17 = vld [vmem:[#allocation2 + $0x298] sm:$0xff]   ;;  %v17168_v24 = vld [vmem:[#allocation2 + $0x8] sm:$0xff]  }
 0x272   :  { %v18606_v31 = vpop.f32.mrf.mxu0  ;;  %15654 = vmatmul.mubr.bf16.gmra.mxu0 %v17160_v8  ;;  %15333 = vmatprep.mubr.msk.bf16.mxu1 %vm17630_vm0, %v22612_v35  ;;  %v17169_v20 = vld [vmem:[%s22600_s3 + $0x138] sm:$0xff]  }
 0x273   :  { %22647 = vst [vmem:[#allocation3_spill] sm:$0xff] %v18606_v31  ;;  %v2148_v37 = vmax.f32 %v1746_v9, %v1948_v29  ;;  %v1946_v38 = vmul.f32 0.2, %v1738_v30  ;;  %15657 = vmatprep.mubr.msk.bf16.mxu0 %vm17630_vm0, %v22612_v35  ;;  %v15219_v40 = vpop.f32.mrf.mxu1  ;;  %v17174_v29 = vld [vmem:[%s22600_s3 + $0x130] sm:$0xff]  }
 0x274   :  { %v15451_v39 = vpop.f32.mrf.mxu0  ;;  %v17208_v31 = vld [vmem:[#allocation2 + $0x70] sm:$0xff]  }
 0x275   :  { %v14156_v43 = vpack.c.bf16 %v2148_v37, %v2147_v27  ;;  %v2146_v45 = vmax.f32 %v1738_v30, %v1946_v38  ;;  %v18616_v46 = vpop.f32.mrf.mxu1  ;;  %v17170_v39 = vld [vmem:[#allocation2 + $0x2a0] sm:$0xff]  }
 0x276   :  { %v18614_v21 = vpop.f32.mrf.mxu0 }
 0x277   :  { %22648 = vst [vmem:[#allocation4_spill] sm:$0xff] %v18614_v21  ;;  %14256 = vst [vmem:[#allocation2 + $0x318] sm:$0xff] %v14156_v43   ;;  %v14151_v48 = vpack.c.bf16 %v2146_v45, %v2145_v34  ;;  %v15220_v54 = vpop.f32.mrf.mxu1  ;;  %v17171_v45 = vld [vmem:[#allocation2 + $0x10] sm:$0xff]  }
 0x278   :  { %v15452_v6 = vpop.f32.mrf.mxu0 }
 0x279   :  { %14255 = vst [vmem:[#allocation2 + $0x310] sm:$0xff] %v14151_v48   ;;  %v18620_v57 = vpop.f32.mrf.mxu1  ;;  %15334 = vmatmul.mubr.bf16.gmra.mxu1 %v17164_v51 }
 0x27a   :  { %v18618_v56 = vpop.f32.mrf.mxu0  ;;  %15658 = vmatmul.mubr.bf16.gmra.mxu0 %v17163_v47  ;;  %15337 = vmatprep.mubr.msk.bf16.mxu1 %vm17630_vm0, %v22612_v35  ;;  %v17179_v47 = vld [vmem:[%s22600_s3 + $0x128] sm:$0xff]  }
 0x27b   :  { %22649 = vst [vmem:[#allocation5_spill] sm:$0xff] %v18618_v56  ;;  %15661 = vmatprep.mubr.msk.bf16.mxu0 %vm17630_vm0, %v22612_v35  ;;  %v15223_v59 = vpop.f32.mrf.mxu1  ;;  %v17206_v56 = vld [vmem:[#allocation2 + $0x68] sm:$0xff]  }
 0x27c   :  { %v15455_v58 = vpop.f32.mrf.mxu0 }
 0x27d   :  { %v18628_v62 = vpop.f32.mrf.mxu1  ;;  %v17187_v58 = vld [vmem:[%s22600_s3 + $0x120] sm:$0xff]  }
 0x27e   :  { %v18626_v61 = vpop.f32.mrf.mxu0 }
 0x27f   :  { %22650 = vst [vmem:[#allocation6_spill] sm:$0xff] %v18626_v61  ;;  %v15224_v5 = vpop.f32.mrf.mxu1 }
 0x280   :  { %v15456_v3 = vpop.f32.mrf.mxu0 }
 0x281   :  { %v18632_v10 = vpop.f32.mrf.mxu1  ;;  %15338 = vmatmul.mubr.bf16.gmra.mxu1 %v17166_v2  ;;  %v17172_v2 = vld [vmem:[#allocation2 + $0x2a8] sm:$0xff]  }
 0x282   :  { %v18630_v8 = vpop.f32.mrf.mxu0  ;;  %15662 = vmatmul.mubr.bf16.gmra.mxu0 %v17165_v63  ;;  %22652 = vst [vmem:[#allocation8_spill] sm:$0xff] %v18632_v10  ;;  %15357 = vmatprep.mubr.msk.bf16.mxu1 %vm17630_vm0, %v22612_v35 }
 0x283   :  { %22651 = vst [vmem:[#allocation7_spill] sm:$0xff] %v18630_v8  ;;  %15665 = vmatprep.mubr.msk.bf16.mxu0 %vm17630_vm0, %v22612_v35  ;;  %v15227_v11 = vpop.f32.mrf.mxu1 }
 0x284   :  { %v15459_v49 = vpop.f32.mrf.mxu0  ;;  %v17196_v11 = vld [vmem:[%s22600_s3 + $0x118] sm:$0xff]  }
 0x285   :  { %v18640_v14 = vpop.f32.mrf.mxu1  ;;  %v17173_v49 = vld [vmem:[#allocation2 + $0x18] sm:$0xff]  }
 0x286   :  { %v18638_v13 = vpop.f32.mrf.mxu0  ;;  %22654 = vst [vmem:[#allocation10_spill] sm:$0xff] %v18640_v14  ;;  %v17221_v14 = vld [vmem:[#allocation2 + $0x2a0] sm:$0xff]  }
 0x287   :  { %22653 = vst [vmem:[#allocation9_spill] sm:$0xff] %v18638_v13  ;;  %v15228_v9 = vpop.f32.mrf.mxu1 }
 0x288   :  { %v15460_v22 = vpop.f32.mrf.mxu0 }
 0x289   :  { %v18647_v27 = vpop.f32.mrf.mxu1  ;;  %15358 = vmatmul.mubr.bf16.vlgmr.msra.gmra.mxu1 %v17168_v24  ;;  %v17204_v24 = vld [vmem:[%s22600_s3 + $0x110] sm:$0xff]  }
 0x28a   :  { %v18645_v26 = vpop.f32.mrf.mxu0  ;;  %15666 = vmatmul.mubr.bf16.gmra.mxu0 %v17167_v17  ;;  %22656 = vst [vmem:[#allocation12_spill] sm:$0xff] %v18647_v27  ;;  %15526 = vmatpush3.bf16.msra.mxu1 %v17169_v20  ;;  %v17219_v27 = vld [vmem:[#allocation2 + $0x298] sm:$0xff]  }
 0x28b   :  { %22655 = vst [vmem:[#allocation11_spill] sm:$0xff] %v18645_v26  ;;  %15669 = vmatprep.mubr.msk.bf16.mxu0 %vm17630_vm0, %v22612_v35  ;;  %v15231_v34 = vpop.f32.mrf.mxu1  ;;  %15361 = vmatprep.mubr.msk.bf16.mxu1 %vm17630_vm0, %v22612_v35 }
 0x28c   :  { %v15463_v30 = vpop.f32.mrf.mxu0  ;;  %15527 = vmatprep.subr.bf16.mxu1 %v22612_v35  ;;  %v17175_v34 = vld [vmem:[#allocation2 + $0x2b0] sm:$0xff]  }
 0x28d   :  { %v18659_v38 = vpop.f32.mrf.mxu1 }
 0x28e   :  { %v18657_v37 = vpop.f32.mrf.mxu0  ;;  %22658 = vst [vmem:[#allocation14_spill] sm:$0xff] %v18659_v38  ;;  %15528 = vmatpush3.bf16.msra.mxu1 %v17174_v29 }
 0x28f   :  { %22657 = vst [vmem:[#allocation13_spill] sm:$0xff] %v18657_v37  ;;  %v15232_v43 = vpop.f32.mrf.mxu1  ;;  %15529 = vmatprep.subr.bf16.mxu1 %v22612_v35 }
 0x290   :  { %v15464_v40 = vpop.f32.mrf.mxu0  ;;  %v17176_v43 = vld [vmem:[#allocation2 + $0x20] sm:$0xff]  }
 0x291   :  { %v18667_v51 = vpop.f32.mrf.mxu1  ;;  %15362 = vmatmul.mubr.bf16.gmra.mxu1 %v17171_v45  ;;  %v17211_v45 = vld [vmem:[%s22600_s3 + $0x108] sm:$0xff]  }
 0x292   :  { %v18665_v48 = vpop.f32.mrf.mxu0  ;;  %15670 = vmatmul.mubr.bf16.gmra.mxu0 %v17170_v39  ;;  %22660 = vst [vmem:[#allocation16_spill] sm:$0xff] %v18667_v51  ;;  %15365 = vmatprep.mubr.msk.bf16.mxu1 %vm17630_vm0, %v22612_v35 }
 0x293   :  { %22659 = vst [vmem:[#allocation15_spill] sm:$0xff] %v18665_v48  ;;  %15673 = vmatprep.mubr.msk.bf16.mxu0 %vm17630_vm0, %v22612_v35  ;;  %v15235_v54 = vpop.f32.mrf.mxu1  ;;  %15530 = vmatpush3.bf16.msra.mxu1 %v17179_v47 }
 0x294   :  { %v15467_v6 = vpop.f32.mrf.mxu0  ;;  %15531 = vmatprep.subr.bf16.mxu1 %v22612_v35 }
 0x295   :  { %v18679_v63 = vpop.f32.mrf.mxu1 }
 0x296   :  { %v18677_v59 = vpop.f32.mrf.mxu0  ;;  %22662 = vst [vmem:[#allocation18_spill] sm:$0xff] %v18679_v63 }
 0x297   :  { %22661 = vst [vmem:[#allocation17_spill] sm:$0xff] %v18677_v59  ;;  %v15236_v5 = vpop.f32.mrf.mxu1  ;;  %15532 = vmatpush3.bf16.msra.mxu1 %v17187_v58 }
 0x298   :  { %v15468_v3 = vpop.f32.mrf.mxu0  ;;  %15533 = vmatprep.subr.bf16.mxu1 %v22612_v35 }
 0x299   :  { %v18687_v20 = vpop.f32.mrf.mxu1  ;;  %15366 = vmatmul.mubr.bf16.gmra.mxu1 %v17173_v49  ;;  %v17177_v49 = vld [vmem:[#allocation2 + $0x2b8] sm:$0xff]  }
 0x29a   :  { %v18685_v17 = vpop.f32.mrf.mxu0  ;;  %15674 = vmatmul.mubr.bf16.gmra.mxu0 %v17172_v2  ;;  %22664 = vst [vmem:[#allocation20_spill] sm:$0xff] %v18687_v20  ;;  %15369 = vmatprep.mubr.msk.bf16.mxu1 %vm17630_vm0, %v22612_v35  ;;  %v17216_v2 = vld [vmem:[%s22600_s3 + $0x100] sm:$0xff]  }
 0x29b   :  { %22663 = vst [vmem:[#allocation19_spill] sm:$0xff] %v18685_v17  ;;  %15677 = vmatprep.mubr.msk.bf16.mxu0 %vm17630_vm0, %v22612_v35  ;;  %v15239_v9 = vpop.f32.mrf.mxu1  ;;  %15534 = vmatpush3.bf16.msra.mxu1 %v17196_v11 }
 0x29c   :  { %v15471_v22 = vpop.f32.mrf.mxu0  ;;  %15535 = vmatprep.subr.bf16.mxu1 %v22612_v35  ;;  %v17178_v9 = vld [vmem:[#allocation2 + $0x28] sm:$0xff]  }
 0x29d   :  { %v18699_v30 = vpop.f32.mrf.mxu1 }
 0x29e   :  { %v18697_v29 = vpop.f32.mrf.mxu0  ;;  %22666 = vst [vmem:[#allocation22_spill] sm:$0xff] %v18699_v30 }
 0x29f   :  { %22665 = vst [vmem:[#allocation21_spill] sm:$0xff] %v18697_v29  ;;  %v15240_v40 = vpop.f32.mrf.mxu1  ;;  %15536 = vmatpush3.bf16.msra.mxu1 %v17204_v24 }
 0x2a0   :  { %v15472_v39 = vpop.f32.mrf.mxu0  ;;  %15537 = vmatprep.subr.bf16.mxu1 %v22612_v35 }
 0x2a1   :  { %v18707_v6 = vpop.f32.mrf.mxu1  ;;  %15370 = vmatmul.mubr.bf16.gmra.mxu1 %v17176_v43 }
 0x2a2   :  { %v18705_v47 = vpop.f32.mrf.mxu0  ;;  %15678 = vmatmul.mubr.bf16.gmra.mxu0 %v17175_v34  ;;  %22668 = vst [vmem:[#allocation24_spill] sm:$0xff] %v18707_v6  ;;  %15373 = vmatprep.mubr.msk.bf16.mxu1 %vm17630_vm0, %v22612_v35  ;;  %v17213_v6 = vld [vmem:[#allocation2 + $0x80] sm:$0xff]  }
 0x2a3   :  { %22667 = vst [vmem:[#allocation23_spill] sm:$0xff] %v18705_v47  ;;  %15681 = vmatprep.mubr.msk.bf16.mxu0 %vm17630_vm0, %v22612_v35  ;;  %v15243_v58 = vpop.f32.mrf.mxu1  ;;  %15538 = vmatpush3.bf16.msra.mxu1 %v17211_v45 }
 0x2a4   :  { %v15475_v54 = vpop.f32.mrf.mxu0  ;;  %15539 = vmatprep.subr.bf16.mxu1 %v22612_v35 }
 0x2a5   :  { %v18719_v5 = vpop.f32.mrf.mxu1  ;;  %v17180_v54 = vld [vmem:[#allocation2 + $0x2c0] sm:$0xff]  }
 0x2a6   :  { %v18717_v3 = vpop.f32.mrf.mxu0  ;;  %22670 = vst [vmem:[#allocation26_spill] sm:$0xff] %v18719_v5 }
 0x2a7   :  { %22669 = vst [vmem:[#allocation25_spill] sm:$0xff] %v18717_v3  ;;  %v15244_v22 = vpop.f32.mrf.mxu1  ;;  %15540 = vmatpush3.bf16.msra.mxu1 %v17216_v2 }
 0x2a8   :  { %v15476_v11 = vpop.f32.mrf.mxu0  ;;  %15709 = vmatprep.subr.bf16.mxu1 %v22612_v35 }
 0x2a9   :  { %v18724_v34 = vpop.f32.mrf.mxu1  ;;  %15374 = vmatmul.mubr.bf16.gmra.mxu1 %v17178_v9  ;;  %v17181_v11 = vld [vmem:[#allocation2 + $0x30] sm:$0xff]  }
 0x2aa   :  { %v18722_v24 = vpop.f32.mrf.mxu0  ;;  %15682 = vmatmul.mubr.bf16.gmra.mxu0 %v17177_v49  ;;  %22672 = vst [vmem:[#allocation28_spill] sm:$0xff] %v18724_v34  ;;  %15377 = vmatprep.mubr.msk.bf16.mxu1 %vm17630_vm0, %v22612_v35  ;;  %v17210_v34 = vld [vmem:[#allocation2 + $0x78] sm:$0xff]  }
 0x2ab   :  { %22671 = vst [vmem:[#allocation27_spill] sm:$0xff] %v18722_v24  ;;  %15685 = vmatprep.mubr.msk.bf16.mxu0 %vm17630_vm0, %v22612_v35  ;;  %v15247_v40 = vpop.f32.mrf.mxu1 }
 0x2ac   :  { %v15479_v39 = vpop.f32.mrf.mxu0 }
 0x2ad   :  { %v18732_v45 = vpop.f32.mrf.mxu1 }
 0x2ae   :  { %v18730_v43 = vpop.f32.mrf.mxu0  ;;  %22674 = vst [vmem:[#allocation30_spill] sm:$0xff] %v18732_v45 }
 0x2af   :  { %22673 = vst [vmem:[#allocation29_spill] sm:$0xff] %v18730_v43  ;;  %v15248_v2 = vpop.f32.mrf.mxu1 }
 0x2b0   :  { %v15480_v58 = vpop.f32.mrf.mxu0 }
 0x2b1   :  { %v18736_v22 = vpop.f32.mrf.mxu1  ;;  %15378 = vmatmul.mubr.bf16.gmra.mxu1 %v17181_v11  ;;  %v17182_v58 = vld [vmem:[#allocation2 + $0x2c8] sm:$0xff]  }
 0x2b2   :  { %v18734_v49 = vpop.f32.mrf.mxu0  ;;  %15686 = vmatmul.mubr.bf16.gmra.mxu0 %v17180_v54  ;;  %15381 = vmatprep.mubr.msk.bf16.mxu1 %vm17630_vm0, %v22612_v35 }
 0x2b3   :  { %22675 = vst [vmem:[#allocation31_spill] sm:$0xff] %v18734_v49  ;;  %15689 = vmatprep.mubr.msk.bf16.mxu0 %vm17630_vm0, %v22612_v35  ;;  %v15267_v39 = vpop.f32.mrf.mxu1  ;;  %v17183_v49 = vld [vmem:[#allocation2 + $0x38] sm:$0xff]  }
 0x2b4   :  { %v15483_v9 = vpop.f32.mrf.mxu0 }
 0x2b5   :  { %v18744_v43 = vpop.f32.mrf.mxu1 }
 0x2b6   :  { %v18742_v40 = vpop.f32.mrf.mxu0 }
 0x2b7   :  { %22676 = vst [vmem:[#allocation32_spill] sm:$0xff] %v18742_v40  ;;  %v15268_v24 = vpop.f32.mrf.mxu1 }
 0x2b8   :  { %v15484_v2 = vpop.f32.mrf.mxu0  ;;  %v17184_v24 = vld [vmem:[#allocation2 + $0x2d0] sm:$0xff]  }
 0x2b9   :  { %v18748_v11 = vpop.f32.mrf.mxu1  ;;  %15382 = vmatmul.mubr.bf16.gmra.mxu1 %v17183_v49 }
 0x2ba   :  { %v18746_v54 = vpop.f32.mrf.mxu0  ;;  %15690 = vmatmul.mubr.bf16.gmra.mxu0 %v17182_v58  ;;  %15385 = vmatprep.mubr.msk.bf16.mxu1 %vm17630_vm0, %v22612_v35 }
 0x2bb   :  { %22677 = vst [vmem:[#allocation33_spill] sm:$0xff] %v18746_v54  ;;  %15693 = vmatprep.mubr.msk.bf16.mxu0 %vm17630_vm0, %v22612_v35  ;;  %v15271_v39 = vpop.f32.mrf.mxu1  ;;  %v17185_v54 = vld [vmem:[#allocation2 + $0x40] sm:$0xff]  }
 0x2bc   :  { %v15487_v9 = vpop.f32.mrf.mxu0 }
 0x2bd   :  { %v18756_v3 = vpop.f32.mrf.mxu1 }
 0x2be   :  { %v18754_v40 = vpop.f32.mrf.mxu0 }
 0x2bf   :  { %22678 = vst [vmem:[#allocation34_spill] sm:$0xff] %v18754_v40  ;;  %v15272_v47 = vpop.f32.mrf.mxu1 }
 0x2c0   :  { %v15488_v2 = vpop.f32.mrf.mxu0  ;;  %v17189_v47 = vld [vmem:[#allocation2 + $0x2d8] sm:$0xff]  }
 0x2c1   :  { %v18760_v49 = vpop.f32.mrf.mxu1  ;;  %15386 = vmatmul.mubr.bf16.gmra.mxu1 %v17185_v54 }
 0x2c2   :  { %v18758_v58 = vpop.f32.mrf.mxu0  ;;  %15694 = vmatmul.mubr.bf16.gmra.mxu0 %v17184_v24  ;;  %15389 = vmatprep.mubr.msk.bf16.mxu1 %vm17630_vm0, %v22612_v35 }
 0x2c3   :  { %22679 = vst [vmem:[#allocation35_spill] sm:$0xff] %v18758_v58  ;;  %15697 = vmatprep.mubr.msk.bf16.mxu0 %vm17630_vm0, %v22612_v35  ;;  %v15275_v39 = vpop.f32.mrf.mxu1  ;;  %v17190_v58 = vld [vmem:[#allocation2 + $0x48] sm:$0xff]  }
 0x2c4   :  { %v15491_v9 = vpop.f32.mrf.mxu0 }
 0x2c5   :  { %v18768_v29 = vpop.f32.mrf.mxu1 }
 0x2c6   :  { %v18766_v40 = vpop.f32.mrf.mxu0 }
 0x2c7   :  { %22680 = vst [vmem:[#allocation36_spill] sm:$0xff] %v18766_v40  ;;  %v15276_v17 = vpop.f32.mrf.mxu1 }
 0x2c8   :  { %v15492_v2 = vpop.f32.mrf.mxu0  ;;  %v17193_v17 = vld [vmem:[#allocation2 + $0x2e0] sm:$0xff]  }
 0x2c9   :  { %v18772_v54 = vpop.f32.mrf.mxu1  ;;  %15390 = vmatmul.mubr.bf16.gmra.mxu1 %v17190_v58 }
 0x2ca   :  { %v18770_v24 = vpop.f32.mrf.mxu0  ;;  %15698 = vmatmul.mubr.bf16.gmra.mxu0 %v17189_v47  ;;  %15393 = vmatprep.mubr.msk.bf16.mxu1 %vm17630_vm0, %v22612_v35 }
 0x2cb   :  { %22681 = vst [vmem:[#allocation37_spill] sm:$0xff] %v18770_v24  ;;  %15701 = vmatprep.mubr.msk.bf16.mxu0 %vm17630_vm0, %v22612_v35  ;;  %v15279_v39 = vpop.f32.mrf.mxu1  ;;  %v17194_v24 = vld [vmem:[#allocation2 + $0x50] sm:$0xff]  }
 0x2cc   :  { %v15495_v9 = vpop.f32.mrf.mxu0 }
 0x2cd   :  { %v18780_v59 = vpop.f32.mrf.mxu1 }
 0x2ce   :  { %v18778_v40 = vpop.f32.mrf.mxu0 }
 0x2cf   :  { %22682 = vst [vmem:[#allocation38_spill] sm:$0xff] %v18778_v40  ;;  %v15280_v48 = vpop.f32.mrf.mxu1 }
 0x2d0   :  { %v15496_v2 = vpop.f32.mrf.mxu0  ;;  %v17198_v48 = vld [vmem:[#allocation2 + $0x2e8] sm:$0xff]  }
 0x2d1   :  { %v18784_v58 = vpop.f32.mrf.mxu1  ;;  %15394 = vmatmul.mubr.bf16.gmra.mxu1 %v17194_v24 }
 0x2d2   :  { %v18782_v47 = vpop.f32.mrf.mxu0  ;;  %15702 = vmatmul.mubr.bf16.gmra.mxu0 %v17193_v17  ;;  %15397 = vmatprep.mubr.msk.bf16.mxu1 %vm17630_vm0, %v22612_v35 }
 0x2d3   :  { %22683 = vst [vmem:[#allocation39_spill] sm:$0xff] %v18782_v47  ;;  %15705 = vmatprep.mubr.msk.bf16.mxu0 %vm17630_vm0, %v22612_v35  ;;  %v15283_v39 = vpop.f32.mrf.mxu1  ;;  %v17199_v47 = vld [vmem:[#allocation2 + $0x58] sm:$0xff]  }
 0x2d4   :  { %v15499_v9 = vpop.f32.mrf.mxu0 }
 0x2d5   :  { %v18792_v37 = vpop.f32.mrf.mxu1 }
 0x2d6   :  { %v18790_v40 = vpop.f32.mrf.mxu0 }
 0x2d7   :  { %22684 = vst [vmem:[#allocation40_spill] sm:$0xff] %v18790_v40  ;;  %v15284_v26 = vpop.f32.mrf.mxu1 }
 0x2d8   :  { %v15500_v2 = vpop.f32.mrf.mxu0  ;;  %v17202_v26 = vld [vmem:[#allocation2 + $0x260] sm:$0xff]  }
 0x2d9   :  { %v18796_v24 = vpop.f32.mrf.mxu1  ;;  %15398 = vmatmul.mubr.bf16.gmra.mxu1 %v17199_v47  ;;  %v17240_v47 = vld [vmem:[%s22600_s3 + $0x278] sm:$0xff]  }
 0x2da   :  { %v18794_v17 = vpop.f32.mrf.mxu0  ;;  %15706 = vmatmul.mubr.bf16.gmra.mxu0 %v17198_v48  ;;  %15401 = vmatprep.mubr.msk.bf16.mxu1 %vm17630_vm0, %v22612_v35 }
 0x2db   :  { %22685 = vst [vmem:[#allocation41_spill] sm:$0xff] %v18794_v17  ;;  %15817 = vmatprep.mubr.msk.bf16.mxu0 %vm17630_vm0, %v22612_v35  ;;  %v15287_v39 = vpop.f32.mrf.mxu1  ;;  %v17203_v17 = vld [vmem:[#allocation2 + $0x60] sm:$0xff]  }
 0x2dc   :  { %v15503_v9 = vpop.f32.mrf.mxu0 }
 0x2dd   :  { %v18804_v13 = vpop.f32.mrf.mxu1 }
 0x2de   :  { %v18802_v40 = vpop.f32.mrf.mxu0 }
 0x2df   :  { %22686 = vst [vmem:[#allocation42_spill] sm:$0xff] %v18802_v40  ;;  %v15288_v8 = vpop.f32.mrf.mxu1 }
 0x2e0   :  { %v15504_v2 = vpop.f32.mrf.mxu0  ;;  %v17242_v8 = vld [vmem:[%s22600_s3 + $0x270] sm:$0xff]  }
 0x2e1   :  { %v18811_v61 = vpop.f32.mrf.mxu1  ;;  %15402 = vmatmul.mubr.bf16.gmra.mxu1 %v17203_v17  ;;  %v17205_v17 = vld [vmem:[#allocation2 + $0x268] sm:$0xff]  }
 0x2e2   :  { %v18809_v48 = vpop.f32.mrf.mxu0  ;;  %15818 = vmatmul.mubr.bf16.vlgmr.msra.gmra.mxu0 %v17202_v26  ;;  %15405 = vmatprep.mubr.msk.bf16.mxu1 %vm17630_vm0, %v22612_v35 }
 0x2e3   :  { %22687 = vst [vmem:[#allocation43_spill] sm:$0xff] %v18809_v48  ;;  %15821 = vmatprep.mubr.msk.bf16.mxu0 %vm17630_vm0, %v22612_v35  ;;  %v15291_v39 = vpop.f32.mrf.mxu1  ;;  %15986 = vmatpush3.bf16.msra.mxu0 %v17240_v47 }
 0x2e4   :  { %v15507_v9 = vpop.f32.mrf.mxu0  ;;  %15987 = vmatprep.subr.bf16.mxu0 %v22612_v35 }
 0x2e5   :  { %v18823_v26 = vpop.f32.mrf.mxu1  ;;  %v17245_v9 = vld [vmem:[%s22600_s3 + $0x268] sm:$0xff]  }
 0x2e6   :  { %v18821_v2 = vpop.f32.mrf.mxu0 }
 0x2e7   :  { %22688 = vst [vmem:[#allocation44_spill] sm:$0xff] %v18821_v2  ;;  %v15292_v40 = vpop.f32.mrf.mxu1  ;;  %15988 = vmatpush3.bf16.msra.mxu0 %v17242_v8  ;;  %v17246_v8 = vld [vmem:[%s22600_s3 + $0x260] sm:$0xff]  }
 0x2e8   :  { %v15508_v48 = vpop.f32.mrf.mxu0  ;;  %15989 = vmatprep.subr.bf16.mxu0 %v22612_v35 }
 0x2e9   :  { %v18831_v39 = vpop.f32.mrf.mxu1  ;;  %15406 = vmatmul.mubr.bf16.gmra.mxu1 %v17206_v56  ;;  %v17207_v56 = vld [vmem:[#allocation2 + $0x270] sm:$0xff]  }
 0x2ea   :  { %v18829_v47 = vpop.f32.mrf.mxu0  ;;  %15822 = vmatmul.mubr.bf16.gmra.mxu0 %v17205_v17  ;;  %15409 = vmatprep.mubr.msk.bf16.mxu1 %vm17630_vm0, %v22612_v35 }
 0x2eb   :  { %22689 = vst [vmem:[#allocation45_spill] sm:$0xff] %v18829_v47  ;;  %15825 = vmatprep.mubr.msk.bf16.mxu0 %vm17630_vm0, %v22612_v35  ;;  %v15295_v48 = vpop.f32.mrf.mxu1  ;;  %15990 = vmatpush3.bf16.msra.mxu0 %v17245_v9 }
 0x2ec   :  { %v15511_v40 = vpop.f32.mrf.mxu0  ;;  %15991 = vmatprep.subr.bf16.mxu0 %v22612_v35 }
 0x2ed   :  { %v18843_v17 = vpop.f32.mrf.mxu1  ;;  %v17249_v40 = vld [vmem:[%s22600_s3 + $0x258] sm:$0xff]  }
 0x2ee   :  { %v18841_v47 = vpop.f32.mrf.mxu0 }
 0x2ef   :  { %22690 = vst [vmem:[#allocation46_spill] sm:$0xff] %v18841_v47  ;;  %v15296_v21 = vpop.f32.mrf.mxu1  ;;  %15992 = vmatpush3.bf16.msra.mxu0 %v17246_v8  ;;  %v17251_v8 = vld [vmem:[%s22600_s3 + $0x250] sm:$0xff]  }
 0x2f0   :  { %v15512_v2 = vpop.f32.mrf.mxu0  ;;  %15993 = vmatprep.subr.bf16.mxu0 %v22612_v35 }
 0x2f1   :  { %v18851_v48 = vpop.f32.mrf.mxu1  ;;  %15410 = vmatmul.mubr.bf16.gmra.mxu1 %v17208_v31  ;;  %v17209_v31 = vld [vmem:[#allocation2 + $0x278] sm:$0xff]  }
 0x2f2   :  { %v18849_v9 = vpop.f32.mrf.mxu0  ;;  %15826 = vmatmul.mubr.bf16.gmra.mxu0 %v17207_v56  ;;  %15413 = vmatprep.mubr.msk.bf16.mxu1 %vm17630_vm0, %v22612_v35 }
 0x2f3   :  { %22691 = vst [vmem:[#allocation47_spill] sm:$0xff] %v18849_v9  ;;  %15829 = vmatprep.mubr.msk.bf16.mxu0 %vm17630_vm0, %v22612_v35  ;;  %v15299_v2 = vpop.f32.mrf.mxu1  ;;  %15994 = vmatpush3.bf16.msra.mxu0 %v17249_v40 }
 0x2f4   :  { %v15515_v21 = vpop.f32.mrf.mxu0  ;;  %15995 = vmatprep.subr.bf16.mxu0 %v22612_v35 }
 0x2f5   :  { %v18863_v56 = vpop.f32.mrf.mxu1  ;;  %v17254_v21 = vld [vmem:[%s22600_s3 + $0x248] sm:$0xff]  }
 0x2f6   :  { %v18861_v9 = vpop.f32.mrf.mxu0 }
 0x2f7   :  { %22692 = vst [vmem:[#allocation48_spill] sm:$0xff] %v18861_v9  ;;  %v15300_v45 = vpop.f32.mrf.mxu1  ;;  %15996 = vmatpush3.bf16.msra.mxu0 %v17251_v8  ;;  %v17255_v8 = vld [vmem:[%s22600_s3 + $0x240] sm:$0xff]  }
 0x2f8   :  { %v15516_v47 = vpop.f32.mrf.mxu0  ;;  %15997 = vmatprep.subr.bf16.mxu0 %v22612_v35 }
 0x2f9   :  { %v18871_v2 = vpop.f32.mrf.mxu1  ;;  %15414 = vmatmul.mubr.bf16.gmra.mxu1 %v17210_v34  ;;  %v17212_v34 = vld [vmem:[#allocation2 + $0x280] sm:$0xff]  }
 0x2fa   :  { %v18869_v40 = vpop.f32.mrf.mxu0  ;;  %15830 = vmatmul.mubr.bf16.gmra.mxu0 %v17209_v31  ;;  %15417 = vmatprep.mubr.msk.bf16.mxu1 %vm17630_vm0, %v22612_v35 }
 0x2fb   :  { %22693 = vst [vmem:[#allocation49_spill] sm:$0xff] %v18869_v40  ;;  %15833 = vmatprep.mubr.msk.bf16.mxu0 %vm17630_vm0, %v22612_v35  ;;  %v15303_v47 = vpop.f32.mrf.mxu1  ;;  %15998 = vmatpush3.bf16.msra.mxu0 %v17254_v21 }
 0x2fc   :  { %v15519_v45 = vpop.f32.mrf.mxu0  ;;  %15999 = vmatprep.subr.bf16.mxu0 %v22612_v35 }
 0x2fd   :  { %v18883_v31 = vpop.f32.mrf.mxu1 }
 0x2fe   :  { %v18881_v40 = vpop.f32.mrf.mxu0 }
 0x2ff   :  { %22694 = vst [vmem:[#allocation50_spill] sm:$0xff] %v18881_v40  ;;  %v15304_v5 = vpop.f32.mrf.mxu1  ;;  %16000 = vmatpush3.bf16.msra.mxu0 %v17255_v8  ;;  %v17214_v8 = vld [vmem:[#allocation2 + $0x288] sm:$0xff]  }
 0x300   :  { %v15520_v9 = vpop.f32.mrf.mxu0  ;;  %16169 = vmatprep.subr.bf16.mxu0 %v22612_v35 }
 0x301   :  { %v18888_v21 = vpop.f32.mrf.mxu1  ;;  %15418 = vmatmul.mubr.bf16.gmra.mxu1 %v17213_v6 }
 0x302   :  { %v18886_v45 = vpop.f32.mrf.mxu0  ;;  %15834 = vmatmul.mubr.bf16.gmra.mxu0 %v17212_v34  ;;  %15421 = vmatprep.mubr.msk.bf16.mxu1 %vm17630_vm0, %v22612_v35 }
 0x303   :  { %22695 = vst [vmem:[#allocation51_spill] sm:$0xff] %v18886_v45  ;;  %15837 = vmatprep.mubr.msk.bf16.mxu0 %vm17630_vm0, %v22612_v35  ;;  %v15307_v40 = vpop.f32.mrf.mxu1  ;;  %v17215_v45 = vld [vmem:[#allocation2 + $0x88] sm:$0xff]  }
 0x304   :  { %v15523_v47 = vpop.f32.mrf.mxu0 }
 0x305   :  { %v18896_v5 = vpop.f32.mrf.mxu1 }
 0x306   :  { %v18894_v9 = vpop.f32.mrf.mxu0 }
 0x307   :  { %22696 = vst [vmem:[#allocation52_spill] sm:$0xff] %v18894_v9  ;;  %v15308_v20 = vpop.f32.mrf.mxu1 }
 0x308   :  { %v15524_v30 = vpop.f32.mrf.mxu0  ;;  %v17217_v20 = vld [vmem:[#allocation2 + $0x290] sm:$0xff]  }
 0x309   :  { %v18900_v6 = vpop.f32.mrf.mxu1  ;;  %15422 = vmatmul.mubr.bf16.gmra.mxu1 %v17215_v45 }
 0x30a   :  { %v18898_v34 = vpop.f32.mrf.mxu0  ;;  %15838 = vmatmul.mubr.bf16.gmra.mxu0 %v17214_v8  ;;  %15425 = vmatprep.mubr.msk.bf16.mxu1 %vm17630_vm0, %v22612_v35 }
 0x30b   :  { %22697 = vst [vmem:[#allocation53_spill] sm:$0xff] %v18898_v34  ;;  %15841 = vmatprep.mubr.msk.bf16.mxu0 %vm17630_vm0, %v22612_v35  ;;  %v15311_v47 = vpop.f32.mrf.mxu1  ;;  %v17218_v34 = vld [vmem:[#allocation2 + $0x90] sm:$0xff]  }
 0x30c   :  { %v15635_v40 = vpop.f32.mrf.mxu0 }
 0x30d   :  { %v18908_v63 = vpop.f32.mrf.mxu1 }
 0x30e   :  { %v18906_v9 = vpop.f32.mrf.mxu0 }
 0x30f   :  { %22698 = vst [vmem:[#allocation54_spill] sm:$0xff] %v18906_v9  ;;  %v15312_v51 = vpop.f32.mrf.mxu1 }
 0x310   :  { %v15636_v30 = vpop.f32.mrf.mxu0 }
 0x311   :  { %v18912_v45 = vpop.f32.mrf.mxu1  ;;  %15426 = vmatmul.mubr.bf16.gmra.mxu1 %v17218_v34 }
 0x312   :  { %v18910_v8 = vpop.f32.mrf.mxu0  ;;  %15842 = vmatmul.mubr.bf16.gmra.mxu0 %v17217_v20  ;;  %15429 = vmatprep.mubr.msk.bf16.mxu1 %vm17630_vm0, %v22612_v35 }
 0x313   :  { %22699 = vst [vmem:[#allocation55_spill] sm:$0xff] %v18910_v8  ;;  %15845 = vmatprep.mubr.msk.bf16.mxu0 %vm17630_vm0, %v22612_v35  ;;  %v15315_v47 = vpop.f32.mrf.mxu1  ;;  %v17220_v8 = vld [vmem:[#allocation2 + $0x98] sm:$0xff]  }
 0x314   :  { %v15639_v40 = vpop.f32.mrf.mxu0 }
 0x315   :  { %v18920_v38 = vpop.f32.mrf.mxu1 }
 0x316   :  { %v18918_v9 = vpop.f32.mrf.mxu0  ;;  %22701 = vst [vmem:[#allocation57_spill] sm:$0xff] %v18920_v38 }
 0x317   :  { %22700 = vst [vmem:[#allocation56_spill] sm:$0xff] %v18918_v9  ;;  %v15316_v30 = vpop.f32.mrf.mxu1 }
 0x318   :  { %v15640_v51 = vpop.f32.mrf.mxu0  ;;  %v17223_v30 = vld [vmem:[%s22600_s3 + $0x1b8] sm:$0xff]  }
 0x319   :  { %v18924_v34 = vpop.f32.mrf.mxu1  ;;  %15430 = vmatmul.mubr.bf16.gmra.mxu1 %v17220_v8  ;;  %v17222_v8 = vld [vmem:[#allocation2 + $0x190] sm:$0xff]  }
 0x31a   :  { %v18922_v20 = vpop.f32.mrf.mxu0  ;;  %15846 = vmatmul.mubr.bf16.gmra.mxu0 %v17219_v27  ;;  %22703 = vst [vmem:[#allocation59_spill] sm:$0xff] %v18924_v34  ;;  %15541 = vmatprep.mubr.msk.bf16.mxu1 %vm17630_vm0, %v22612_v35 }
 0x31b   :  { %22702 = vst [vmem:[#allocation58_spill] sm:$0xff] %v18922_v20  ;;  %15849 = vmatprep.mubr.msk.bf16.mxu0 %vm17630_vm0, %v22612_v35  ;;  %v15319_v47 = vpop.f32.mrf.mxu1 }
 0x31c   :  { %v15643_v40 = vpop.f32.mrf.mxu0 }
 0x31d   :  { %v18932_v51 = vpop.f32.mrf.mxu1  ;;  %v17228_v40 = vld [vmem:[%s22600_s3 + $0x1b0] sm:$0xff]  }
 0x31e   :  { %v18930_v9 = vpop.f32.mrf.mxu0  ;;  %22705 = vst [vmem:[#allocation61_spill] sm:$0xff] %v18932_v51  ;;  %v17234_v51 = vld [vmem:[#allocation2 + $0x2c8] sm:$0xff]  }
 0x31f   :  { %22704 = vst [vmem:[#allocation60_spill] sm:$0xff] %v18930_v9  ;;  %v15320_v20 = vpop.f32.mrf.mxu1 }
 0x320   :  { %v15644_v27 = vpop.f32.mrf.mxu0 }
 0x321   :  { %v18939_v10 = vpop.f32.mrf.mxu1  ;;  %15542 = vmatmul.mubr.bf16.vlgmr.msra.gmra.mxu1 %v17222_v8  ;;  %v17224_v8 = vld [vmem:[#allocation2 + $0x2a8] sm:$0xff]  }
 0x322   :  { %v18937_v34 = vpop.f32.mrf.mxu0  ;;  %15850 = vmatmul.mubr.bf16.gmra.mxu0 %v17221_v14  ;;  %22707 = vst [vmem:[#allocation63_spill] sm:$0xff] %v18939_v10  ;;  %15710 = vmatpush3.bf16.msra.mxu1 %v17223_v30 }
 0x323   :  { %22706 = vst [vmem:[#allocation62_spill] sm:$0xff] %v18937_v34  ;;  %15853 = vmatprep.mubr.msk.bf16.mxu0 %vm17630_vm0, %v22612_v35  ;;  %v15323_v9 = vpop.f32.mrf.mxu1  ;;  %15545 = vmatprep.mubr.msk.bf16.mxu1 %vm17630_vm0, %v22612_v35  ;;  %v17225_v34 = vld [vmem:[#allocation2 + $0x198] sm:$0xff]  }
 0x324   :  { %v15647_v47 = vpop.f32.mrf.mxu0  ;;  %15711 = vmatprep.subr.bf16.mxu1 %v22612_v35  ;;  %v17233_v9 = vld [vmem:[%s22600_s3 + $0x1a8] sm:$0xff]  }
 0x325   :  { %v18951_v14 = vpop.f32.mrf.mxu1 }
 0x326   :  { %v18949_v20 = vpop.f32.mrf.mxu0  ;;  %22709 = vst [vmem:[#allocation65_spill] sm:$0xff] %v18951_v14  ;;  %15712 = vmatpush3.bf16.msra.mxu1 %v17228_v40  ;;  %v17227_v14 = vld [vmem:[#allocation2 + $0x1a0] sm:$0xff]  }
 0x327   :  { %22708 = vst [vmem:[#allocation64_spill] sm:$0xff] %v18949_v20  ;;  %v15324_v27 = vpop.f32.mrf.mxu1  ;;  %15713 = vmatprep.subr.bf16.mxu1 %v22612_v35 }
 0x328   :  { %v15648_v30 = vpop.f32.mrf.mxu0  ;;  %v17241_v27 = vld [vmem:[%s22600_s3 + $0x1a0] sm:$0xff]  }
 0x329   :  { %v18959_v10 = vpop.f32.mrf.mxu1  ;;  %15546 = vmatmul.mubr.bf16.gmra.mxu1 %v17225_v34 }
 0x32a   :  { %v18957_v47 = vpop.f32.mrf.mxu0  ;;  %15854 = vmatmul.mubr.bf16.gmra.mxu0 %v17224_v8  ;;  %22711 = vst [vmem:[#allocation67_spill] sm:$0xff] %v18959_v10  ;;  %15549 = vmatprep.mubr.msk.bf16.mxu1 %vm17630_vm0, %v22612_v35  ;;  %v17226_v10 = vld [vmem:[#allocation2 + $0x2b0] sm:$0xff]  }
 0x32b   :  { %22710 = vst [vmem:[#allocation66_spill] sm:$0xff] %v18957_v47  ;;  %15857 = vmatprep.mubr.msk.bf16.mxu0 %vm17630_vm0, %v22612_v35  ;;  %v15327_v30 = vpop.f32.mrf.mxu1  ;;  %15714 = vmatpush3.bf16.msra.mxu1 %v17233_v9 }
 0x32c   :  { %v15651_v40 = vpop.f32.mrf.mxu0  ;;  %15715 = vmatprep.subr.bf16.mxu1 %v22612_v35 }
 0x32d   :  { %v18971_v8 = vpop.f32.mrf.mxu1  ;;  %v17250_v40 = vld [vmem:[%s22600_s3 + $0x198] sm:$0xff]  }
 0x32e   :  { %v18969_v47 = vpop.f32.mrf.mxu0  ;;  %22713 = vst [vmem:[#allocation69_spill] sm:$0xff] %v18971_v8  ;;  %v17230_v8 = vld [vmem:[#allocation2 + $0x1a8] sm:$0xff]  }
 0x32f   :  { %22712 = vst [vmem:[#allocation68_spill] sm:$0xff] %v18969_v47  ;;  %v15328_v20 = vpop.f32.mrf.mxu1  ;;  %15716 = vmatpush3.bf16.msra.mxu1 %v17241_v27 }
 0x330   :  { %v15652_v34 = vpop.f32.mrf.mxu0  ;;  %15717 = vmatprep.subr.bf16.mxu1 %v22612_v35 }
 0x331   :  { %v18979_v30 = vpop.f32.mrf.mxu1  ;;  %15550 = vmatmul.mubr.bf16.gmra.mxu1 %v17227_v14  ;;  %v17258_v34 = vld [vmem:[%s22600_s3 + $0x190] sm:$0xff]  }
 0x332   :  { %v18977_v9 = vpop.f32.mrf.mxu0  ;;  %15858 = vmatmul.mubr.bf16.gmra.mxu0 %v17226_v10  ;;  %22715 = vst [vmem:[#allocation71_spill] sm:$0xff] %v18979_v30  ;;  %15553 = vmatprep.mubr.msk.bf16.mxu1 %vm17630_vm0, %v22612_v35  ;;  %v17229_v30 = vld [vmem:[#allocation2 + $0x2b8] sm:$0xff]  }
 0x333   :  { %22714 = vst [vmem:[#allocation70_spill] sm:$0xff] %v18977_v9  ;;  %15861 = vmatprep.mubr.msk.bf16.mxu0 %vm17630_vm0, %v22612_v35  ;;  %v15331_v27 = vpop.f32.mrf.mxu1  ;;  %15718 = vmatpush3.bf16.msra.mxu1 %v17250_v40 }
 0x334   :  { %v15655_v20 = vpop.f32.mrf.mxu0  ;;  %15719 = vmatprep.subr.bf16.mxu1 %v22612_v35 }
 0x335   :  { %v18991_v10 = vpop.f32.mrf.mxu1  ;;  %v17265_v20 = vld [vmem:[%s22600_s3 + $0x188] sm:$0xff]  }
 0x336   :  { %v18989_v9 = vpop.f32.mrf.mxu0  ;;  %22717 = vst [vmem:[#allocation73_spill] sm:$0xff] %v18991_v10  ;;  %v17232_v10 = vld [vmem:[#allocation2 + $0x1b0] sm:$0xff]  }
 0x337   :  { %22716 = vst [vmem:[#allocation72_spill] sm:$0xff] %v18989_v9  ;;  %v15332_v47 = vpop.f32.mrf.mxu1  ;;  %15720 = vmatpush3.bf16.msra.mxu1 %v17258_v34 }
 0x338   :  { %v15656_v14 = vpop.f32.mrf.mxu0  ;;  %15721 = vmatprep.subr.bf16.mxu1 %v22612_v35 }
 0x339   :  { %v18999_v27 = vpop.f32.mrf.mxu1  ;;  %15554 = vmatmul.mubr.bf16.gmra.mxu1 %v17230_v8  ;;  %v17270_v14 = vld [vmem:[%s22600_s3 + $0x180] sm:$0xff]  }
 0x33a   :  { %v18997_v40 = vpop.f32.mrf.mxu0  ;;  %15862 = vmatmul.mubr.bf16.gmra.mxu0 %v17229_v30  ;;  %22719 = vst [vmem:[#allocation75_spill] sm:$0xff] %v18999_v27  ;;  %15557 = vmatprep.mubr.msk.bf16.mxu1 %vm17630_vm0, %v22612_v35  ;;  %v17231_v27 = vld [vmem:[#allocation2 + $0x2c0] sm:$0xff]  }
 0x33b   :  { %22718 = vst [vmem:[#allocation74_spill] sm:$0xff] %v18997_v40  ;;  %15865 = vmatprep.mubr.msk.bf16.mxu0 %vm17630_vm0, %v22612_v35  ;;  %v15335_v34 = vpop.f32.mrf.mxu1  ;;  %15722 = vmatpush3.bf16.msra.mxu1 %v17265_v20 }
 0x33c   :  { %v15659_v47 = vpop.f32.mrf.mxu0  ;;  %15723 = vmatprep.subr.bf16.mxu1 %v22612_v35 }
 0x33d   :  { %v19011_v30 = vpop.f32.mrf.mxu1 }
 0x33e   :  { %v19009_v40 = vpop.f32.mrf.mxu0  ;;  %22721 = vst [vmem:[#allocation77_spill] sm:$0xff] %v19011_v30 }
 0x33f   :  { %22720 = vst [vmem:[#allocation76_spill] sm:$0xff] %v19009_v40  ;;  %v15336_v9 = vpop.f32.mrf.mxu1  ;;  %15724 = vmatpush3.bf16.msra.mxu1 %v17270_v14 }
 0x340   :  { %v15660_v8 = vpop.f32.mrf.mxu0  ;;  %15893 = vmatprep.subr.bf16.mxu1 %v22612_v35 }
 0x341   :  { %v19016_v20 = vpop.f32.mrf.mxu1  ;;  %15558 = vmatmul.mubr.bf16.gmra.mxu1 %v17232_v10 }
 0x342   :  { %v19014_v47 = vpop.f32.mrf.mxu0  ;;  %15866 = vmatmul.mubr.bf16.gmra.mxu0 %v17231_v27  ;;  %22723 = vst [vmem:[#allocation79_spill] sm:$0xff] %v19016_v20  ;;  %15561 = vmatprep.mubr.msk.bf16.mxu1 %vm17630_vm0, %v22612_v35  ;;  %v3801_v27 = vadd.f32 %v18736_v22, %v18436_v12 }
 0x343   :  { %22722 = vst [vmem:[#allocation78_spill] sm:$0xff] %v19014_v47  ;;  %15869 = vmatprep.mubr.msk.bf16.mxu0 %vm17630_vm0, %v22612_v35  ;;  %v15339_v8 = vpop.f32.mrf.mxu1  ;;  %v17235_v47 = vld [vmem:[#allocation2 + $0x1b8] sm:$0xff]  }
 0x344   :  { %v15663_v34 = vpop.f32.mrf.mxu0  ;;  %v3804_v8 = vadd.f32 %v18744_v43, %v18449_v23 }
 0x345   :  { %v19024_v40 = vpop.f32.mrf.mxu1 }
 0x346   :  { %v19022_v9 = vpop.f32.mrf.mxu0 }
 0x347   :  { %22724 = vst [vmem:[#allocation80_spill] sm:$0xff] %v19022_v9  ;;  %v15340_v30 = vpop.f32.mrf.mxu1 }
 0x348   :  { %v15664_v14 = vpop.f32.mrf.mxu0 }
 0x349   :  { %v4201_v20 = vpop.f32.mrf.mxu1  ;;  %15562 = vmatmul.mubr.bf16.gmra.mxu1 %v17235_v47 }
 0x34a   :  { %v19028_v10 = vpop.f32.mrf.mxu0  ;;  %15870 = vmatmul.mubr.bf16.gmra.mxu0 %v17234_v51  ;;  %v19030_v38 = vadd.f32 %v4201_v20, %v3801_v27  ;;  %15565 = vmatprep.mubr.msk.bf16.mxu1 %vm17630_vm0, %v22612_v35  ;;  %v17236_v20 = vld [vmem:[#allocation2 + $0x2d0] sm:$0xff]   ;;  %v17237_v27 = vld [vmem:[#allocation2 + $0x1c0] sm:$0xff]  }
 0x34b   :  { %22725 = vst [vmem:[#allocation81_spill] sm:$0xff] %v19028_v10  ;;  %15873 = vmatprep.mubr.msk.bf16.mxu0 %vm17630_vm0, %v22612_v35  ;;  %v15359_v30 = vpop.f32.mrf.mxu1  ;;  %v3809_v10 = vadd.f32 %v18748_v11, %v18454_v41 }
 0x34c   :  { %v15667_v34 = vpop.f32.mrf.mxu0 }
 0x34d   :  { %v4204_v12 = vpop.f32.mrf.mxu1 }
 0x34e   :  { %v19038_v14 = vpop.f32.mrf.mxu0  ;;  %v19040_v22 = vadd.f32 %v4204_v12, %v3804_v8  ;;  %v3812_v8 = vadd.f32 %v18756_v3, %v18462_v53 }
 0x34f   :  { %v15360_v47 = vpop.f32.mrf.mxu1 }
 0x350   :  { %v15668_v51 = vpop.f32.mrf.mxu0 }
 0x351   :  { %v4209_v34 = vpop.f32.mrf.mxu1  ;;  %15566 = vmatmul.mubr.bf16.gmra.mxu1 %v17237_v27  ;;  %v3817_v27 = vadd.f32 %v18760_v49, %v18466_v1 }
 0x352   :  { %v19044_v9 = vpop.f32.mrf.mxu0  ;;  %15874 = vmatmul.mubr.bf16.gmra.mxu0 %v17236_v20  ;;  %v19046_v30 = vadd.f32 %v4209_v34, %v3809_v10  ;;  %15569 = vmatprep.mubr.msk.bf16.mxu1 %vm17630_vm0, %v22612_v35  ;;  %v17238_v10 = vld [vmem:[#allocation2 + $0x2d8] sm:$0xff]   ;;  %v17239_v20 = vld [vmem:[#allocation2 + $0x1c8] sm:$0xff]  }
 0x353   :  { %15877 = vmatprep.mubr.msk.bf16.mxu0 %vm17630_vm0, %v22612_v35  ;;  %v15363_v43 = vpop.f32.mrf.mxu1 }
 0x354   :  { %v15671_v23 = vpop.f32.mrf.mxu0 }
 0x355   :  { %v4212_v41 = vpop.f32.mrf.mxu1 }
 0x356   :  { %v19054_v12 = vpop.f32.mrf.mxu0  ;;  %v19056_v11 = vadd.f32 %v4212_v41, %v3812_v8  ;;  %v3820_v8 = vadd.f32 %v18768_v29, %v18474_v15 }
 0x357   :  { %v15364_v47 = vpop.f32.mrf.mxu1 }
 0x358   :  { %v15672_v51 = vpop.f32.mrf.mxu0 }
 0x359   :  { %v4217_v23 = vpop.f32.mrf.mxu1  ;;  %15570 = vmatmul.mubr.bf16.gmra.mxu1 %v17239_v20  ;;  %v17244_v20 = vld [vmem:[#allocation2 + $0x1d0] sm:$0xff]  }
 0x35a   :  { %v19060_v34 = vpop.f32.mrf.mxu0  ;;  %15878 = vmatmul.mubr.bf16.gmra.mxu0 %v17238_v10  ;;  %v19062_v43 = vadd.f32 %v4217_v23, %v3817_v27  ;;  %15573 = vmatprep.mubr.msk.bf16.mxu1 %vm17630_vm0, %v22612_v35  ;;  %v17243_v10 = vld [vmem:[#allocation2 + $0x2e0] sm:$0xff]   ;;  %v3825_v27 = vadd.f32 %v18772_v54, %v18478_v28 }
 0x35b   :  { %15881 = vmatprep.mubr.msk.bf16.mxu0 %vm17630_vm0, %v22612_v35  ;;  %v15367_v3 = vpop.f32.mrf.mxu1 }
 0x35c   :  { %v15675_v53 = vpop.f32.mrf.mxu0 }
 0x35d   :  { %v4220_v1 = vpop.f32.mrf.mxu1 }
 0x35e   :  { %v19070_v41 = vpop.f32.mrf.mxu0  ;;  %v19072_v49 = vadd.f32 %v4220_v1, %v3820_v8  ;;  %v3828_v8 = vadd.f32 %v18780_v59, %v18486_v42 }
 0x35f   :  { %v15368_v47 = vpop.f32.mrf.mxu1 }
 0x360   :  { %v15676_v51 = vpop.f32.mrf.mxu0 }
 0x361   :  { %v4225_v53 = vpop.f32.mrf.mxu1  ;;  %15574 = vmatmul.mubr.bf16.gmra.mxu1 %v17244_v20  ;;  %v17248_v20 = vld [vmem:[#allocation2 + $0x1d8] sm:$0xff]  }
 0x362   :  { %v19076_v23 = vpop.f32.mrf.mxu0  ;;  %15882 = vmatmul.mubr.bf16.gmra.mxu0 %v17243_v10  ;;  %v19078_v3 = vadd.f32 %v4225_v53, %v3825_v27  ;;  %15577 = vmatprep.mubr.msk.bf16.mxu1 %vm17630_vm0, %v22612_v35  ;;  %v17247_v10 = vld [vmem:[#allocation2 + $0x2e8] sm:$0xff]   ;;  %v3833_v27 = vadd.f32 %v18784_v58, %v18490_v55 }
 0x363   :  { %15885 = vmatprep.mubr.msk.bf16.mxu0 %vm17630_vm0, %v22612_v35  ;;  %v15371_v29 = vpop.f32.mrf.mxu1 }
 0x364   :  { %v15679_v15 = vpop.f32.mrf.mxu0 }
 0x365   :  { %v4228_v28 = vpop.f32.mrf.mxu1 }
 0x366   :  { %v19086_v1 = vpop.f32.mrf.mxu0  ;;  %v19088_v54 = vadd.f32 %v4228_v28, %v3828_v8  ;;  %v3836_v8 = vadd.f32 %v18792_v37, %v18498_v4 }
 0x367   :  { %v15372_v47 = vpop.f32.mrf.mxu1 }
 0x368   :  { %v15680_v51 = vpop.f32.mrf.mxu0 }
 0x369   :  { %v4233_v15 = vpop.f32.mrf.mxu1  ;;  %15578 = vmatmul.mubr.bf16.gmra.mxu1 %v17248_v20  ;;  %v17253_v20 = vld [vmem:[#allocation2 + $0x1e0] sm:$0xff]  }
 0x36a   :  { %v19092_v53 = vpop.f32.mrf.mxu0  ;;  %15886 = vmatmul.mubr.bf16.gmra.mxu0 %v17247_v10  ;;  %v19094_v29 = vadd.f32 %v4233_v15, %v3833_v27  ;;  %15581 = vmatprep.mubr.msk.bf16.mxu1 %vm17630_vm0, %v22612_v35  ;;  %v17252_v10 = vld [vmem:[#allocation2 + $0x2f0] sm:$0xff]   ;;  %v3841_v27 = vadd.f32 %v18796_v24, %v18502_v19 }
 0x36b   :  { %15889 = vmatprep.mubr.msk.bf16.mxu0 %vm17630_vm0, %v22612_v35  ;;  %v15375_v59 = vpop.f32.mrf.mxu1 }
 0x36c   :  { %v15683_v42 = vpop.f32.mrf.mxu0 }
 0x36d   :  { %v4236_v55 = vpop.f32.mrf.mxu1 }
 0x36e   :  { %v19102_v28 = vpop.f32.mrf.mxu0  ;;  %v19104_v58 = vadd.f32 %v4236_v55, %v3836_v8  ;;  %v3844_v8 = vadd.f32 %v18804_v13, %v18510_v33 }
 0x36f   :  { %v15376_v47 = vpop.f32.mrf.mxu1 }
 0x370   :  { %v15684_v51 = vpop.f32.mrf.mxu0 }
 0x371   :  { %v4241_v42 = vpop.f32.mrf.mxu1  ;;  %15582 = vmatmul.mubr.bf16.gmra.mxu1 %v17253_v20  ;;  %v17257_v20 = vld [vmem:[#allocation2 + $0x1e8] sm:$0xff]  }
 0x372   :  { %v19108_v15 = vpop.f32.mrf.mxu0  ;;  %15890 = vmatmul.mubr.bf16.gmra.mxu0 %v17252_v10  ;;  %v19110_v59 = vadd.f32 %v4241_v42, %v3841_v27  ;;  %15585 = vmatprep.mubr.msk.bf16.mxu1 %vm17630_vm0, %v22612_v35  ;;  %v17256_v10 = vld [vmem:[#allocation2 + $0xf0] sm:$0xff]   ;;  %v17294_v27 = vld [vmem:[%s22600_s3 + $0x2f8] sm:$0xff]   ;;  %v3849_v42 = vadd.f32 %v18811_v61, %v18517_v50  ;;  %v3852_v61 = vadd.f32 %v18823_v26, %v18529_v0 }
 0x373   :  { %16001 = vmatprep.mubr.msk.bf16.mxu0 %vm17630_vm0, %v22612_v35  ;;  %v15379_v37 = vpop.f32.mrf.mxu1  ;;  %v17296_v50 = vld [vmem:[%s22600_s3 + $0x2f0] sm:$0xff]  }
 0x374   :  { %v15687_v4 = vpop.f32.mrf.mxu0 }
 0x375   :  { %v4244_v19 = vpop.f32.mrf.mxu1 }
 0x376   :  { %v19118_v55 = vpop.f32.mrf.mxu0  ;;  %v19120_v24 = vadd.f32 %v4244_v19, %v3844_v8 }
 0x377   :  { %v15380_v47 = vpop.f32.mrf.mxu1 }
 0x378   :  { %v15688_v51 = vpop.f32.mrf.mxu0 }
 0x379   :  { %v4249_v33 = vpop.f32.mrf.mxu1  ;;  %15586 = vmatmul.mubr.bf16.gmra.mxu1 %v17257_v20 }
 0x37a   :  { %v19127_v4 = vpop.f32.mrf.mxu0  ;;  %16002 = vmatmul.mubr.bf16.vlgmr.msra.gmra.mxu0 %v17256_v10  ;;  %v19129_v13 = vadd.f32 %v4249_v33, %v3849_v42  ;;  %15589 = vmatprep.mubr.msk.bf16.mxu1 %vm17630_vm0, %v22612_v35  ;;  %v17259_v42 = vld [vmem:[#allocation2 + $0xf8] sm:$0xff]   ;;  %v17260_v33 = vld [vmem:[#allocation2 + $0x1f0] sm:$0xff]  }
 0x37b   :  { %22726 = vst [vmem:[#allocation82_spill] sm:$0xff] %v19127_v4  ;;  %16005 = vmatprep.mubr.msk.bf16.mxu0 %vm17630_vm0, %v22612_v35  ;;  %v15383_v8 = vpop.f32.mrf.mxu1  ;;  %16170 = vmatpush3.bf16.msra.mxu0 %v17294_v27  ;;  %v17299_v27 = vld [vmem:[%s22600_s3 + $0x2e8] sm:$0xff]  }
 0x37c   :  { %v15691_v37 = vpop.f32.mrf.mxu0  ;;  %16171 = vmatprep.subr.bf16.mxu0 %v22612_v35 }
 0x37d   :  { %v4252_v51 = vpop.f32.mrf.mxu1  ;;  %v3857_v37 = vadd.f32 %v18831_v39, %v18537_v18  ;;  %v17300_v18 = vld [vmem:[%s22600_s3 + $0x2e0] sm:$0xff]   ;;  %v3860_v39 = vadd.f32 %v18843_v17, %v18549_v36 }
 0x37e   :  { %v19141_v19 = vpop.f32.mrf.mxu0  ;;  %v19143_v47 = vadd.f32 %v4252_v51, %v3852_v61 }
 0x37f   :  { %22727 = vst [vmem:[#allocation83_spill] sm:$0xff] %v19141_v19  ;;  %v15384_v20 = vpop.f32.mrf.mxu1  ;;  %16172 = vmatpush3.bf16.msra.mxu0 %v17296_v50 }
 0x380   :  { %v15692_v10 = vpop.f32.mrf.mxu0  ;;  %16173 = vmatprep.subr.bf16.mxu0 %v22612_v35 }
 0x381   :  { %v4257_v26 = vpop.f32.mrf.mxu1  ;;  %15590 = vmatmul.mubr.bf16.gmra.mxu1 %v17260_v33 }
 0x382   :  { %v19151_v0 = vpop.f32.mrf.mxu0  ;;  %16006 = vmatmul.mubr.bf16.gmra.mxu0 %v17259_v42  ;;  %v19153_v8 = vadd.f32 %v4257_v26, %v3857_v37  ;;  %15593 = vmatprep.mubr.msk.bf16.mxu1 %vm17630_vm0, %v22612_v35  ;;  %v17261_v37 = vld [vmem:[#allocation2 + $0x100] sm:$0xff]   ;;  %v17262_v26 = vld [vmem:[#allocation2 + $0x1f8] sm:$0xff]  }
 0x383   :  { %22728 = vst [vmem:[#allocation84_spill] sm:$0xff] %v19151_v0  ;;  %16009 = vmatprep.mubr.msk.bf16.mxu0 %vm17630_vm0, %v22612_v35  ;;  %v15387_v61 = vpop.f32.mrf.mxu1  ;;  %16174 = vmatpush3.bf16.msra.mxu0 %v17299_v27  ;;  %v17303_v27 = vld [vmem:[%s22600_s3 + $0x2d8] sm:$0xff]  }
 0x384   :  { %v15695_v50 = vpop.f32.mrf.mxu0  ;;  %16175 = vmatprep.subr.bf16.mxu0 %v22612_v35 }
 0x385   :  { %v4260_v10 = vpop.f32.mrf.mxu1  ;;  %v3865_v50 = vadd.f32 %v18851_v48, %v18557_v52  ;;  %v17305_v52 = vld [vmem:[%s22600_s3 + $0x2d0] sm:$0xff]   ;;  %v3868_v48 = vadd.f32 %v18863_v56, %v18569_v7 }
 0x386   :  { %v19165_v51 = vpop.f32.mrf.mxu0  ;;  %v19167_v20 = vadd.f32 %v4260_v10, %v3860_v39 }
 0x387   :  { %22729 = vst [vmem:[#allocation85_spill] sm:$0xff] %v19165_v51  ;;  %v15388_v33 = vpop.f32.mrf.mxu1  ;;  %16176 = vmatpush3.bf16.msra.mxu0 %v17300_v18 }
 0x388   :  { %v15696_v42 = vpop.f32.mrf.mxu0  ;;  %16177 = vmatprep.subr.bf16.mxu0 %v22612_v35 }
 0x389   :  { %v4265_v17 = vpop.f32.mrf.mxu1  ;;  %15594 = vmatmul.mubr.bf16.gmra.mxu1 %v17262_v26 }
 0x38a   :  { %v19175_v36 = vpop.f32.mrf.mxu0  ;;  %16010 = vmatmul.mubr.bf16.gmra.mxu0 %v17261_v37  ;;  %v19177_v61 = vadd.f32 %v4265_v17, %v3865_v50  ;;  %15597 = vmatprep.mubr.msk.bf16.mxu1 %vm17630_vm0, %v22612_v35  ;;  %v17263_v50 = vld [vmem:[#allocation2 + $0x108] sm:$0xff]   ;;  %v17264_v17 = vld [vmem:[#allocation2 + $0x200] sm:$0xff]  }
 0x38b   :  { %22730 = vst [vmem:[#allocation86_spill] sm:$0xff] %v19175_v36  ;;  %16013 = vmatprep.mubr.msk.bf16.mxu0 %vm17630_vm0, %v22612_v35  ;;  %v15391_v39 = vpop.f32.mrf.mxu1  ;;  %16178 = vmatpush3.bf16.msra.mxu0 %v17303_v27  ;;  %v17308_v27 = vld [vmem:[%s22600_s3 + $0x2c8] sm:$0xff]   ;;  %v22767_v36 = vld [vmem:[#allocation75_spill] sm:$0xff] }
 0x38c   :  { %v15699_v18 = vpop.f32.mrf.mxu0  ;;  %16179 = vmatprep.subr.bf16.mxu0 %v22612_v35 }
 0x38d   :  { %v4268_v42 = vpop.f32.mrf.mxu1  ;;  %v3873_v18 = vadd.f32 %v18871_v2, %v18577_v25  ;;  %v17309_v25 = vld [vmem:[%s22600_s3 + $0x2c0] sm:$0xff]   ;;  %v3876_v2 = vadd.f32 %v18883_v31, %v18589_v44 }
 0x38e   :  { %v19189_v10 = vpop.f32.mrf.mxu0  ;;  %v19191_v33 = vadd.f32 %v4268_v42, %v3868_v48 }
 0x38f   :  { %22731 = vst [vmem:[#allocation87_spill] sm:$0xff] %v19189_v10  ;;  %v15392_v26 = vpop.f32.mrf.mxu1  ;;  %16180 = vmatpush3.bf16.msra.mxu0 %v17305_v52 }
 0x390   :  { %v15700_v37 = vpop.f32.mrf.mxu0  ;;  %16181 = vmatprep.subr.bf16.mxu0 %v22612_v35 }
 0x391   :  { %v4273_v56 = vpop.f32.mrf.mxu1  ;;  %15598 = vmatmul.mubr.bf16.gmra.mxu1 %v17264_v17 }
 0x392   :  { %v19199_v7 = vpop.f32.mrf.mxu0  ;;  %16014 = vmatmul.mubr.bf16.gmra.mxu0 %v17263_v50  ;;  %v19201_v39 = vadd.f32 %v4273_v56, %v3873_v18  ;;  %15601 = vmatprep.mubr.msk.bf16.mxu1 %vm17630_vm0, %v22612_v35  ;;  %v17266_v18 = vld [vmem:[#allocation2 + $0x110] sm:$0xff]   ;;  %v17267_v56 = vld [vmem:[#allocation2 + $0x208] sm:$0xff]  }
 0x393   :  { %22732 = vst [vmem:[#allocation88_spill] sm:$0xff] %v19199_v7  ;;  %16017 = vmatprep.mubr.msk.bf16.mxu0 %vm17630_vm0, %v22612_v35  ;;  %v15395_v48 = vpop.f32.mrf.mxu1  ;;  %16182 = vmatpush3.bf16.msra.mxu0 %v17308_v27  ;;  %v3881_v27 = vadd.f32 %v18888_v21, %v18594_v60  ;;  %v3884_v60 = vadd.f32 %v18896_v5, %v18602_v16  ;;  %v22761_v7 = vld [vmem:[#allocation71_spill] sm:$0xff] }
 0x394   :  { %v15703_v52 = vpop.f32.mrf.mxu0  ;;  %16183 = vmatprep.subr.bf16.mxu0 %v22612_v35 }
 0x395   :  { %v4276_v37 = vpop.f32.mrf.mxu1 }
 0x396   :  { %v19213_v42 = vpop.f32.mrf.mxu0  ;;  %v19215_v26 = vadd.f32 %v4276_v37, %v3876_v2 }
 0x397   :  { %22733 = vst [vmem:[#allocation89_spill] sm:$0xff] %v19213_v42  ;;  %v15396_v17 = vpop.f32.mrf.mxu1  ;;  %16184 = vmatpush3.bf16.msra.mxu0 %v17309_v25 }
 0x398   :  { %v15704_v50 = vpop.f32.mrf.mxu0  ;;  %16353 = vmatprep.subr.bf16.mxu0 %v22612_v35 }
 0x399   :  { %v4281_v44 = vpop.f32.mrf.mxu1  ;;  %15602 = vmatmul.mubr.bf16.gmra.mxu1 %v17267_v56  ;;  %v17269_v56 = vld [vmem:[#allocation2 + $0x210] sm:$0xff]  }
 0x39a   :  { %v19220_v52 = vpop.f32.mrf.mxu0  ;;  %16018 = vmatmul.mubr.bf16.gmra.mxu0 %v17266_v18  ;;  %v19222_v31 = vadd.f32 %v4281_v44, %v3881_v27  ;;  %15605 = vmatprep.mubr.msk.bf16.mxu1 %vm17630_vm0, %v22612_v35  ;;  %v17268_v18 = vld [vmem:[#allocation2 + $0x118] sm:$0xff]   ;;  %v3889_v27 = vadd.f32 %v18900_v6, %v18608_v32 }
 0x39b   :  { %22734 = vst [vmem:[#allocation90_spill] sm:$0xff] %v19220_v52  ;;  %16021 = vmatprep.mubr.msk.bf16.mxu0 %vm17630_vm0, %v22612_v35  ;;  %v15399_v25 = vpop.f32.mrf.mxu1  ;;  %v22755_v52 = vld [vmem:[#allocation67_spill] sm:$0xff] }
 0x39c   :  { %v15707_v48 = vpop.f32.mrf.mxu0 }
 0x39d   :  { %v4284_v2 = vpop.f32.mrf.mxu1 }
 0x39e   :  { %v19230_v21 = vpop.f32.mrf.mxu0  ;;  %v19232_v37 = vadd.f32 %v4284_v2, %v3884_v60  ;;  %v3892_v60 = vadd.f32 %v18908_v63, %v18616_v46 }
 0x39f   :  { %22735 = vst [vmem:[#allocation91_spill] sm:$0xff] %v19230_v21  ;;  %v15400_v17 = vpop.f32.mrf.mxu1  ;;  %v17279_v21 = vld [vmem:[#allocation2 + $0x1a0] sm:$0xff]  }
 0x3a0   :  { %v15708_v50 = vpop.f32.mrf.mxu0 }
 0x3a1   :  { %v4289_v48 = vpop.f32.mrf.mxu1  ;;  %15606 = vmatmul.mubr.bf16.gmra.mxu1 %v17269_v56  ;;  %v17272_v56 = vld [vmem:[#allocation2 + $0x218] sm:$0xff]  }
 0x3a2   :  { %v19236_v44 = vpop.f32.mrf.mxu0  ;;  %16022 = vmatmul.mubr.bf16.gmra.mxu0 %v17268_v18  ;;  %v19238_v25 = vadd.f32 %v4289_v48, %v3889_v27  ;;  %15609 = vmatprep.mubr.msk.bf16.mxu1 %vm17630_vm0, %v22612_v35  ;;  %v17271_v18 = vld [vmem:[#allocation2 + $0x120] sm:$0xff]   ;;  %v3897_v27 = vadd.f32 %v18912_v45, %v18620_v57 }
 0x3a3   :  { %22736 = vst [vmem:[#allocation92_spill] sm:$0xff] %v19236_v44  ;;  %16025 = vmatprep.mubr.msk.bf16.mxu0 %vm17630_vm0, %v22612_v35  ;;  %v15403_v5 = vpop.f32.mrf.mxu1 }
 0x3a4   :  { %v15819_v16 = vpop.f32.mrf.mxu0 }
 0x3a5   :  { %v4292_v32 = vpop.f32.mrf.mxu1 }
 0x3a6   :  { %v19246_v2 = vpop.f32.mrf.mxu0  ;;  %v19248_v6 = vadd.f32 %v4292_v32, %v3892_v60  ;;  %v22739_v60 = vld [vmem:[#allocation57_spill] sm:$0xff] }
 0x3a7   :  { %22737 = vst [vmem:[#allocation93_spill] sm:$0xff] %v19246_v2  ;;  %v15404_v17 = vpop.f32.mrf.mxu1  ;;  %v3900_v32 = vadd.f32 %v22739_v60, %v18628_v62 }
 0x3a8   :  { %v15820_v50 = vpop.f32.mrf.mxu0 }
 0x3a9   :  { %v4297_v16 = vpop.f32.mrf.mxu1  ;;  %15610 = vmatmul.mubr.bf16.gmra.mxu1 %v17272_v56  ;;  %v17273_v56 = vld [vmem:[#allocation2 + $0x128] sm:$0xff]  }
 0x3aa   :  { %v19252_v48 = vpop.f32.mrf.mxu0  ;;  %16026 = vmatmul.mubr.bf16.gmra.mxu0 %v17271_v18  ;;  %v19254_v5 = vadd.f32 %v4297_v16, %v3897_v27  ;;  %15613 = vmatprep.mubr.msk.bf16.mxu1 %vm17630_vm0, %v22612_v35  ;;  %v17274_v27 = vld [vmem:[#allocation2 + $0x220] sm:$0xff]   ;;  %v22741_v16 = vld [vmem:[#allocation8_spill] sm:$0xff] }
 0x3ab   :  { %22738 = vst [vmem:[#allocation94_spill] sm:$0xff] %v19252_v48  ;;  %16029 = vmatprep.mubr.msk.bf16.mxu0 %vm17630_vm0, %v22612_v35  ;;  %v15407_v63 = vpop.f32.mrf.mxu1  ;;  %v22742_v48 = vld [vmem:[#allocation59_spill] sm:$0xff] }
 0x3ac   :  { %v15823_v46 = vpop.f32.mrf.mxu0  ;;  %v3905_v2 = vadd.f32 %v22742_v48, %v22741_v16 }
 0x3ad   :  { %v4300_v57 = vpop.f32.mrf.mxu1 }
 0x3ae   :  { %v19262_v50 = vpop.f32.mrf.mxu0  ;;  %v19264_v45 = vadd.f32 %v4300_v57, %v3900_v32  ;;  %v22744_v32 = vld [vmem:[#allocation10_spill] sm:$0xff]  ;;  %v22745_v57 = vld [vmem:[#allocation61_spill] sm:$0xff] }
 0x3af   :  { %22740 = vst [vmem:[#allocation57_spill] sm:$0xff] %v19262_v50  ;;  %v15408_v18 = vpop.f32.mrf.mxu1  ;;  %v22747_v50 = vld [vmem:[#allocation12_spill] sm:$0xff] }
 0x3b0   :  { %v15824_v17 = vpop.f32.mrf.mxu0 }
 0x3b1   :  { %v4305_v46 = vpop.f32.mrf.mxu1  ;;  %15614 = vmatmul.mubr.bf16.gmra.mxu1 %v17274_v27  ;;  %v3908_v17 = vadd.f32 %v22745_v57, %v22744_v32 }
 0x3b2   :  { %v19268_v44 = vpop.f32.mrf.mxu0  ;;  %16030 = vmatmul.mubr.bf16.gmra.mxu0 %v17273_v56  ;;  %v19270_v63 = vadd.f32 %v4305_v46, %v3905_v2  ;;  %15725 = vmatprep.mubr.msk.bf16.mxu1 %vm17630_vm0, %v22612_v35  ;;  %v17277_v2 = vld [vmem:[%s22600_s3 + $0x238] sm:$0xff]   ;;  %v17275_v46 = vld [vmem:[#allocation2 + $0x130] sm:$0xff]  }
 0x3b3   :  { %22743 = vst [vmem:[#allocation8_spill] sm:$0xff] %v19268_v44  ;;  %16033 = vmatprep.mubr.msk.bf16.mxu0 %vm17630_vm0, %v22612_v35  ;;  %v15411_v60 = vpop.f32.mrf.mxu1  ;;  %v17276_v44 = vld [vmem:[#allocation2 + $0x198] sm:$0xff]   ;;  %v22748_v35 = vld [vmem:[#allocation63_spill] sm:$0xff] }
 0x3b4   :  { %v15827_v62 = vpop.f32.mrf.mxu0 }
 0x3b5   :  { %v4308_v48 = vpop.f32.mrf.mxu1  ;;  %v3913_v62 = vadd.f32 %v22748_v35, %v22747_v50  ;;  %v22751_v35 = vld [vmem:[#allocation14_spill] sm:$0xff]  ;;  %v22752_v50 = vld [vmem:[#allocation65_spill] sm:$0xff] }
 0x3b6   :  { %v19278_v18 = vpop.f32.mrf.mxu0  ;;  %v19280_v16 = vadd.f32 %v4308_v48, %v3908_v17  ;;  %v22750_v17 = vmov 0.0   ;;  %v17282_v48 = vld [vmem:[%s22600_s3 + $0x230] sm:$0xff]  }
 0x3b7   :  { %22746 = vst [vmem:[#allocation59_spill] sm:$0xff] %v19278_v18  ;;  %v15412_v27 = vpop.f32.mrf.mxu1  ;;  %v17278_v18 = vld [vmem:[#allocation2 + $0x138] sm:$0xff]  }
 0x3b8   :  { %v15828_v56 = vpop.f32.mrf.mxu0 }
 0x3b9   :  { %v4313_v32 = vpop.f32.mrf.mxu1  ;;  %15726 = vmatmul.mubr.bf16.vlgmr.msra.gmra.mxu1 %v17276_v44  ;;  %v3916_v44 = vadd.f32 %v22752_v50, %v22751_v35 }
 0x3ba   :  { %v19287_v60 = vpop.f32.mrf.mxu0  ;;  %16034 = vmatmul.mubr.bf16.gmra.mxu0 %v17275_v46  ;;  %v19289_v57 = vadd.f32 %v4313_v32, %v3913_v62  ;;  %15894 = vmatpush3.bf16.msra.mxu1 %v17277_v2 }
 0x3bb   :  { %22749 = vst [vmem:[#allocation10_spill] sm:$0xff] %v19287_v60  ;;  %16037 = vmatprep.mubr.msk.bf16.mxu0 %vm17630_vm0, %v22750_v17  ;;  %v15415_v27 = vpop.f32.mrf.mxu1  ;;  %15729 = vmatprep.mubr.msk.bf16.mxu1 %vm17630_vm0, %v22750_v17 }
 0x3bc   :  { %v15831_v56 = vpop.f32.mrf.mxu0  ;;  %15895 = vmatprep.subr.bf16.mxu1 %v22750_v17  ;;  %v22754_v27 = vld [vmem:[#allocation16_spill] sm:$0xff] }
 0x3bd   :  { %v4316_v2 = vpop.f32.mrf.mxu1  ;;  %v17287_v56 = vld [vmem:[%s22600_s3 + $0x228] sm:$0xff]   ;;  %v3921_v42 = vadd.f32 %v22755_v52, %v22754_v27  ;;  %v17295_v52 = vld [vmem:[%s22600_s3 + $0x220] sm:$0xff]  }
 0x3be   :  { %v19301_v46 = vpop.f32.mrf.mxu0  ;;  %v19303_v62 = vadd.f32 %v4316_v2, %v3916_v44  ;;  %15896 = vmatpush3.bf16.msra.mxu1 %v17282_v48  ;;  %v22757_v2 = vld [vmem:[#allocation18_spill] sm:$0xff] }
 0x3bf   :  { %22753 = vst [vmem:[#allocation61_spill] sm:$0xff] %v19301_v46  ;;  %v15416_v60 = vpop.f32.mrf.mxu1  ;;  %15897 = vmatprep.subr.bf16.mxu1 %v22750_v17  ;;  %v17280_v46 = vld [vmem:[#allocation2 + $0x140] sm:$0xff]  }
 0x3c0   :  { %v15832_v32 = vpop.f32.mrf.mxu0 }
 0x3c1   :  { %v4321_v50 = vpop.f32.mrf.mxu1  ;;  %15730 = vmatmul.mubr.bf16.gmra.mxu1 %v17279_v21  ;;  %v22758_v32 = vld [vmem:[#allocation69_spill] sm:$0xff] }
 0x3c2   :  { %v19311_v35 = vpop.f32.mrf.mxu0  ;;  %16038 = vmatmul.mubr.bf16.gmra.mxu0 %v17278_v18  ;;  %v19313_v44 = vadd.f32 %v4321_v50, %v3921_v42  ;;  %15733 = vmatprep.mubr.msk.bf16.mxu1 %vm17630_vm0, %v22750_v17  ;;  %v3924_v18 = vadd.f32 %v22758_v32, %v22757_v2 }
 0x3c3   :  { %22756 = vst [vmem:[#allocation12_spill] sm:$0xff] %v19311_v35  ;;  %16041 = vmatprep.mubr.msk.bf16.mxu0 %vm17630_vm0, %v22750_v17  ;;  %v15419_v48 = vpop.f32.mrf.mxu1  ;;  %15898 = vmatpush3.bf16.msra.mxu1 %v17287_v56  ;;  %v17304_v56 = vld [vmem:[%s22600_s3 + $0x218] sm:$0xff]  }
 0x3c4   :  { %v15835_v60 = vpop.f32.mrf.mxu0  ;;  %15899 = vmatprep.subr.bf16.mxu1 %v22750_v17  ;;  %v22760_v48 = vld [vmem:[#allocation20_spill] sm:$0xff] }
 0x3c5   :  { %v4324_v21 = vpop.f32.mrf.mxu1  ;;  %v17281_v60 = vld [vmem:[#allocation2 + $0x1a8] sm:$0xff]   ;;  %v3929_v10 = vadd.f32 %v22761_v7, %v22760_v48  ;;  %v17312_v7 = vld [vmem:[%s22600_s3 + $0x210] sm:$0xff]  }
 0x3c6   :  { %v19325_v42 = vpop.f32.mrf.mxu0  ;;  %v19327_v27 = vadd.f32 %v4324_v21, %v3924_v18  ;;  %v22763_v21 = vld [vmem:[#allocation22_spill] sm:$0xff] }
 0x3c7   :  { %22759 = vst [vmem:[#allocation63_spill] sm:$0xff] %v19325_v42  ;;  %v15420_v35 = vpop.f32.mrf.mxu1  ;;  %15900 = vmatpush3.bf16.msra.mxu1 %v17295_v52  ;;  %v17283_v42 = vld [vmem:[#allocation2 + $0x148] sm:$0xff]  }
 0x3c8   :  { %v15836_v50 = vpop.f32.mrf.mxu0  ;;  %15901 = vmatprep.subr.bf16.mxu1 %v22750_v17 }
 0x3c9   :  { %v4329_v32 = vpop.f32.mrf.mxu1  ;;  %15734 = vmatmul.mubr.bf16.gmra.mxu1 %v17281_v60  ;;  %v22764_v50 = vld [vmem:[#allocation73_spill] sm:$0xff] }
 0x3ca   :  { %v19335_v2 = vpop.f32.mrf.mxu0  ;;  %16042 = vmatmul.mubr.bf16.gmra.mxu0 %v17280_v46  ;;  %v19337_v18 = vadd.f32 %v4329_v32, %v3929_v10  ;;  %15737 = vmatprep.mubr.msk.bf16.mxu1 %vm17630_vm0, %v22750_v17  ;;  %v3932_v46 = vadd.f32 %v22764_v50, %v22763_v21 }
 0x3cb   :  { %22762 = vst [vmem:[#allocation14_spill] sm:$0xff] %v19335_v2  ;;  %16045 = vmatprep.mubr.msk.bf16.mxu0 %vm17630_vm0, %v22750_v17  ;;  %v15423_v52 = vpop.f32.mrf.mxu1  ;;  %15902 = vmatpush3.bf16.msra.mxu1 %v17304_v56  ;;  %v17319_v56 = vld [vmem:[%s22600_s3 + $0x208] sm:$0xff]  }
 0x3cc   :  { %v15839_v35 = vpop.f32.mrf.mxu0  ;;  %15903 = vmatprep.subr.bf16.mxu1 %v22750_v17  ;;  %v22766_v52 = vld [vmem:[#allocation24_spill] sm:$0xff] }
 0x3cd   :  { %v4332_v60 = vpop.f32.mrf.mxu1  ;;  %v17284_v35 = vld [vmem:[#allocation2 + $0x1b0] sm:$0xff]   ;;  %v3937_v51 = vadd.f32 %v22767_v36, %v22766_v52  ;;  %v17324_v36 = vld [vmem:[%s22600_s3 + $0x200] sm:$0xff]  }
 0x3ce   :  { %v19349_v10 = vpop.f32.mrf.mxu0  ;;  %v19351_v48 = vadd.f32 %v4332_v60, %v3932_v46  ;;  %v22769_v60 = vld [vmem:[#allocation26_spill] sm:$0xff] }
 0x3cf   :  { %22765 = vst [vmem:[#allocation65_spill] sm:$0xff] %v19349_v10  ;;  %v15424_v2 = vpop.f32.mrf.mxu1  ;;  %15904 = vmatpush3.bf16.msra.mxu1 %v17312_v7  ;;  %v17285_v10 = vld [vmem:[#allocation2 + $0x150] sm:$0xff]  }
 0x3d0   :  { %v15840_v32 = vpop.f32.mrf.mxu0  ;;  %15905 = vmatprep.subr.bf16.mxu1 %v22750_v17 }
 0x3d1   :  { %v4337_v50 = vpop.f32.mrf.mxu1  ;;  %15738 = vmatmul.mubr.bf16.gmra.mxu1 %v17284_v35  ;;  %v22770_v32 = vld [vmem:[#allocation77_spill] sm:$0xff] }
 0x3d2   :  { %v19359_v21 = vpop.f32.mrf.mxu0  ;;  %16046 = vmatmul.mubr.bf16.gmra.mxu0 %v17283_v42  ;;  %v19361_v46 = vadd.f32 %v4337_v50, %v3937_v51  ;;  %15741 = vmatprep.mubr.msk.bf16.mxu1 %vm17630_vm0, %v22750_v17  ;;  %v3940_v42 = vadd.f32 %v22770_v32, %v22769_v60 }
 0x3d3   :  { %22768 = vst [vmem:[#allocation16_spill] sm:$0xff] %v19359_v21  ;;  %16049 = vmatprep.mubr.msk.bf16.mxu0 %vm17630_vm0, %v22750_v17  ;;  %v15427_v7 = vpop.f32.mrf.mxu1  ;;  %15906 = vmatpush3.bf16.msra.mxu1 %v17319_v56  ;;  %v22772_v56 = vld [vmem:[#allocation28_spill] sm:$0xff] }
 0x3d4   :  { %v15843_v2 = vpop.f32.mrf.mxu0  ;;  %15907 = vmatprep.subr.bf16.mxu1 %v22750_v17  ;;  %v22773_v7 = vld [vmem:[#allocation79_spill] sm:$0xff] }
 0x3d5   :  { %v4340_v35 = vpop.f32.mrf.mxu1  ;;  %v17286_v2 = vld [vmem:[#allocation2 + $0x1b8] sm:$0xff]   ;;  %v3945_v0 = vadd.f32 %v22773_v7, %v22772_v56 }
 0x3d6   :  { %v19373_v51 = vpop.f32.mrf.mxu0  ;;  %v19375_v52 = vadd.f32 %v4340_v35, %v3940_v42  ;;  %v22775_v42 = vld [vmem:[#allocation30_spill] sm:$0xff] }
 0x3d7   :  { %22771 = vst [vmem:[#allocation67_spill] sm:$0xff] %v19373_v51  ;;  %v15428_v21 = vpop.f32.mrf.mxu1  ;;  %15908 = vmatpush3.bf16.msra.mxu1 %v17324_v36  ;;  %v3948_v35 = vadd.f32 %v19024_v40, %v22775_v42 }
 0x3d8   :  { %v15844_v50 = vpop.f32.mrf.mxu0  ;;  %16077 = vmatprep.subr.bf16.mxu1 %v22750_v17 }
 0x3d9   :  { %v4345_v60 = vpop.f32.mrf.mxu1  ;;  %15742 = vmatmul.mubr.bf16.gmra.mxu1 %v17286_v2 }
 0x3da   :  { %v19380_v19 = vpop.f32.mrf.mxu0  ;;  %16050 = vmatmul.mubr.bf16.gmra.mxu0 %v17285_v10  ;;  %v19382_v32 = vadd.f32 %v4345_v60, %v3945_v0  ;;  %15745 = vmatprep.mubr.msk.bf16.mxu1 %vm17630_vm0, %v22750_v17  ;;  %v17288_v0 = vld [vmem:[#allocation2 + $0x158] sm:$0xff]   ;;  %v17289_v60 = vld [vmem:[#allocation2 + $0x1c0] sm:$0xff]  }
 0x3db   :  { %22774 = vst [vmem:[#allocation18_spill] sm:$0xff] %v19380_v19  ;;  %16053 = vmatprep.mubr.msk.bf16.mxu0 %vm17630_vm0, %v22750_v17  ;;  %v15431_v36 = vpop.f32.mrf.mxu1  ;;  %v22777_v19 = vld [vmem:[#allocation3_spill] sm:$0xff] }
 0x3dc   :  { %v15847_v21 = vpop.f32.mrf.mxu0  ;;  %v4791_v51 = vadd.f32 %v22777_v19, %v19030_v38 }
 0x3dd   :  { %v4348_v56 = vpop.f32.mrf.mxu1 }
 0x3de   :  { %v19390_v50 = vpop.f32.mrf.mxu0  ;;  %v19392_v7 = vadd.f32 %v4348_v56, %v3948_v35  ;;  %v22779_v35 = vld [vmem:[#allocation4_spill] sm:$0xff] }
 0x3df   :  { %22776 = vst [vmem:[#allocation69_spill] sm:$0xff] %v19390_v50  ;;  %v15432_v2 = vpop.f32.mrf.mxu1  ;;  %v4792_v56 = vadd.f32 %v22779_v35, %v19040_v22 }
 0x3e0   :  { %v15848_v10 = vpop.f32.mrf.mxu0 }
 0x3e1   :  { %v5079_v21 = vpop.f32.mrf.mxu1  ;;  %15746 = vmatmul.mubr.bf16.gmra.mxu1 %v17289_v60  ;;  %v17291_v60 = vld [vmem:[#allocation2 + $0x1c8] sm:$0xff]  }
 0x3e2   :  { %v19396_v4 = vpop.f32.mrf.mxu0  ;;  %16054 = vmatmul.mubr.bf16.gmra.mxu0 %v17288_v0  ;;  %v19398_v36 = vadd.f32 %v5079_v21, %v4791_v51  ;;  %15749 = vmatprep.mubr.msk.bf16.mxu1 %vm17630_vm0, %v22750_v17  ;;  %v17290_v51 = vld [vmem:[#allocation2 + $0x160] sm:$0xff]   ;;  %v22781_v21 = vld [vmem:[#allocation5_spill] sm:$0xff] }
 0x3e3   :  { %22778 = vst [vmem:[#allocation20_spill] sm:$0xff] %v19396_v4  ;;  %16057 = vmatprep.mubr.msk.bf16.mxu0 %vm17630_vm0, %v22750_v17  ;;  %v15543_v42 = vpop.f32.mrf.mxu1  ;;  %v4793_v4 = vadd.f32 %v22781_v21, %v19046_v30  ;;  %v17293_v21 = vld [vmem:[#allocation2 + $0x1d0] sm:$0xff]  }
 0x3e4   :  { %v15851_v40 = vpop.f32.mrf.mxu0 }
 0x3e5   :  { %v5082_v38 = vpop.f32.mrf.mxu1 }
 0x3e6   :  { %v19406_v10 = vpop.f32.mrf.mxu0  ;;  %v19408_v19 = vadd.f32 %v5082_v38, %v4792_v56  ;;  %v22783_v56 = vld [vmem:[#allocation6_spill] sm:$0xff] }
 0x3e7   :  { %22780 = vst [vmem:[#allocation71_spill] sm:$0xff] %v19406_v10  ;;  %v15544_v0 = vpop.f32.mrf.mxu1  ;;  %v4794_v38 = vadd.f32 %v22783_v56, %v19056_v11 }
 0x3e8   :  { %v15852_v2 = vpop.f32.mrf.mxu0 }
 0x3e9   :  { %v5087_v40 = vpop.f32.mrf.mxu1  ;;  %15750 = vmatmul.mubr.bf16.gmra.mxu1 %v17291_v60 }
 0x3ea   :  { %v19412_v50 = vpop.f32.mrf.mxu0  ;;  %16058 = vmatmul.mubr.bf16.gmra.mxu0 %v17290_v51  ;;  %v19414_v42 = vadd.f32 %v5087_v40, %v4793_v4  ;;  %15753 = vmatprep.mubr.msk.bf16.mxu1 %vm17630_vm0, %v22750_v17  ;;  %v17292_v4 = vld [vmem:[#allocation2 + $0x168] sm:$0xff]   ;;  %v22785_v40 = vld [vmem:[#allocation7_spill] sm:$0xff] }
 0x3eb   :  { %22782 = vst [vmem:[#allocation22_spill] sm:$0xff] %v19412_v50  ;;  %16061 = vmatprep.mubr.msk.bf16.mxu0 %vm17630_vm0, %v22750_v17  ;;  %v15547_v35 = vpop.f32.mrf.mxu1  ;;  %v4795_v50 = vadd.f32 %v22785_v40, %v19062_v43  ;;  %v17298_v40 = vld [vmem:[#allocation2 + $0x1d8] sm:$0xff]  }
 0x3ec   :  { %v15855_v22 = vpop.f32.mrf.mxu0 }
 0x3ed   :  { %v5090_v30 = vpop.f32.mrf.mxu1 }
 0x3ee   :  { %v19422_v2 = vpop.f32.mrf.mxu0  ;;  %v19424_v0 = vadd.f32 %v5090_v30, %v4794_v38  ;;  %v22787_v38 = vld [vmem:[#allocation9_spill] sm:$0xff] }
 0x3ef   :  { %22784 = vst [vmem:[#allocation73_spill] sm:$0xff] %v19422_v2  ;;  %v15548_v60 = vpop.f32.mrf.mxu1  ;;  %v4796_v30 = vadd.f32 %v22787_v38, %v19072_v49 }
 0x3f0   :  { %v15856_v51 = vpop.f32.mrf.mxu0 }
 0x3f1   :  { %v5095_v22 = vpop.f32.mrf.mxu1  ;;  %15754 = vmatmul.mubr.bf16.gmra.mxu1 %v17293_v21 }
 0x3f2   :  { %v19428_v10 = vpop.f32.mrf.mxu0  ;;  %16062 = vmatmul.mubr.bf16.gmra.mxu0 %v17292_v4  ;;  %v19430_v35 = vadd.f32 %v5095_v22, %v4795_v50  ;;  %15757 = vmatprep.mubr.msk.bf16.mxu1 %vm17630_vm0, %v22750_v17  ;;  %v17297_v50 = vld [vmem:[#allocation2 + $0x170] sm:$0xff]   ;;  %v22789_v22 = vld [vmem:[#allocation11_spill] sm:$0xff] }
 0x3f3   :  { %22786 = vst [vmem:[#allocation24_spill] sm:$0xff] %v19428_v10  ;;  %16065 = vmatprep.mubr.msk.bf16.mxu0 %vm17630_vm0, %v22750_v17  ;;  %v15551_v56 = vpop.f32.mrf.mxu1  ;;  %v4797_v10 = vadd.f32 %v22789_v22, %v19078_v3  ;;  %v17302_v22 = vld [vmem:[#allocation2 + $0x1e0] sm:$0xff]  }
 0x3f4   :  { %v15859_v11 = vpop.f32.mrf.mxu0 }
 0x3f5   :  { %v5098_v43 = vpop.f32.mrf.mxu1 }
 0x3f6   :  { %v19438_v51 = vpop.f32.mrf.mxu0  ;;  %v19440_v60 = vadd.f32 %v5098_v43, %v4796_v30  ;;  %v22791_v30 = vld [vmem:[#allocation13_spill] sm:$0xff] }
 0x3f7   :  { %22788 = vst [vmem:[#allocation75_spill] sm:$0xff] %v19438_v51  ;;  %v15552_v21 = vpop.f32.mrf.mxu1  ;;  %v4798_v43 = vadd.f32 %v22791_v30, %v19088_v54 }
 0x3f8   :  { %v15860_v4 = vpop.f32.mrf.mxu0 }
 0x3f9   :  { %v5103_v11 = vpop.f32.mrf.mxu1  ;;  %15758 = vmatmul.mubr.bf16.gmra.mxu1 %v17298_v40 }
 0x3fa   :  { %v19444_v2 = vpop.f32.mrf.mxu0  ;;  %16066 = vmatmul.mubr.bf16.gmra.mxu0 %v17297_v50  ;;  %v19446_v56 = vadd.f32 %v5103_v11, %v4797_v10  ;;  %15761 = vmatprep.mubr.msk.bf16.mxu1 %vm17630_vm0, %v22750_v17  ;;  %v17301_v10 = vld [vmem:[#allocation2 + $0x178] sm:$0xff]   ;;  %v22793_v11 = vld [vmem:[#allocation15_spill] sm:$0xff] }
 0x3fb   :  { %22790 = vst [vmem:[#allocation26_spill] sm:$0xff] %v19444_v2  ;;  %16069 = vmatprep.mubr.msk.bf16.mxu0 %vm17630_vm0, %v22750_v17  ;;  %v15555_v38 = vpop.f32.mrf.mxu1  ;;  %v4799_v2 = vadd.f32 %v22793_v11, %v19094_v29  ;;  %v17307_v11 = vld [vmem:[#allocation2 + $0x1e8] sm:$0xff]  }
 0x3fc   :  { %v15863_v49 = vpop.f32.mrf.mxu0 }
 0x3fd   :  { %v5106_v3 = vpop.f32.mrf.mxu1 }
 0x3fe   :  { %v19454_v4 = vpop.f32.mrf.mxu0  ;;  %v19456_v21 = vadd.f32 %v5106_v3, %v4798_v43  ;;  %v22795_v43 = vld [vmem:[#allocation17_spill] sm:$0xff] }
 0x3ff   :  { %22792 = vst [vmem:[#allocation77_spill] sm:$0xff] %v19454_v4  ;;  %v15556_v40 = vpop.f32.mrf.mxu1  ;;  %v4800_v3 = vadd.f32 %v22795_v43, %v19104_v58 }
 0x400   :  { %v15864_v50 = vpop.f32.mrf.mxu0 }
 0x401   :  { %v5111_v49 = vpop.f32.mrf.mxu1  ;;  %15762 = vmatmul.mubr.bf16.gmra.mxu1 %v17302_v22 }
 0x402   :  { %v19460_v51 = vpop.f32.mrf.mxu0  ;;  %16070 = vmatmul.mubr.bf16.gmra.mxu0 %v17301_v10  ;;  %v19462_v38 = vadd.f32 %v5111_v49, %v4799_v2  ;;  %15765 = vmatprep.mubr.msk.bf16.mxu1 %vm17630_vm0, %v22750_v17  ;;  %v17306_v2 = vld [vmem:[#allocation2 + $0x180] sm:$0xff]  }
 0x403   :  { %22794 = vst [vmem:[#allocation28_spill] sm:$0xff] %v19460_v51  ;;  %16073 = vmatprep.mubr.msk.bf16.mxu0 %vm17630_vm0, %v22750_v17  ;;  %v15559_v30 = vpop.f32.mrf.mxu1  ;;  %v22797_v49 = vld [vmem:[#allocation19_spill] sm:$0xff] }
 0x404   :  { %v15867_v54 = vpop.f32.mrf.mxu0  ;;  %v4801_v51 = vadd.f32 %v22797_v49, %v19110_v59  ;;  %v17311_v49 = vld [vmem:[#allocation2 + $0x1f0] sm:$0xff]  }
 0x405   :  { %v5114_v29 = vpop.f32.mrf.mxu1 }
 0x406   :  { %v19470_v50 = vpop.f32.mrf.mxu0  ;;  %v19472_v40 = vadd.f32 %v5114_v29, %v4800_v3  ;;  %v22799_v3 = vld [vmem:[#allocation21_spill] sm:$0xff] }
 0x407   :  { %22796 = vst [vmem:[#allocation79_spill] sm:$0xff] %v19470_v50  ;;  %v15560_v22 = vpop.f32.mrf.mxu1  ;;  %v4802_v29 = vadd.f32 %v22799_v3, %v19120_v24 }
 0x408   :  { %v15868_v10 = vpop.f32.mrf.mxu0 }
 0x409   :  { %v5119_v54 = vpop.f32.mrf.mxu1  ;;  %15766 = vmatmul.mubr.bf16.gmra.mxu1 %v17307_v11 }
 0x40a   :  { %v19476_v4 = vpop.f32.mrf.mxu0  ;;  %16074 = vmatmul.mubr.bf16.gmra.mxu0 %v17306_v2  ;;  %v19478_v30 = vadd.f32 %v5119_v54, %v4801_v51  ;;  %15769 = vmatprep.mubr.msk.bf16.mxu1 %vm17630_vm0, %v22750_v17  ;;  %v17310_v51 = vld [vmem:[#allocation2 + $0xf8] sm:$0xff]  }
 0x40b   :  { %22798 = vst [vmem:[#allocation30_spill] sm:$0xff] %v19476_v4  ;;  %16185 = vmatprep.mubr.msk.bf16.mxu0 %vm17630_vm0, %v22750_v17  ;;  %v15563_v43 = vpop.f32.mrf.mxu1  ;;  %v17348_v54 = vld [vmem:[%s22600_s3 + $0x378] sm:$0xff]   ;;  %v22801_v4 = vld [vmem:[#allocation23_spill] sm:$0xff] }
 0x40c   :  { %v15871_v58 = vpop.f32.mrf.mxu0 }
 0x40d   :  { %v5122_v59 = vpop.f32.mrf.mxu1  ;;  %v4803_v58 = vadd.f32 %v22801_v4, %v19129_v13  ;;  %v17350_v13 = vld [vmem:[%s22600_s3 + $0x370] sm:$0xff]  }
 0x40e   :  { %v19486_v10 = vpop.f32.mrf.mxu0  ;;  %v19488_v22 = vadd.f32 %v5122_v59, %v4802_v29  ;;  %v22803_v4 = vld [vmem:[#allocation25_spill] sm:$0xff] }
 0x40f   :  { %22800 = vst [vmem:[#allocation3_spill] sm:$0xff] %v19486_v10  ;;  %v15564_v11 = vpop.f32.mrf.mxu1 }
 0x410   :  { %v15872_v2 = vpop.f32.mrf.mxu0 }
 0x411   :  { %v5127_v24 = vpop.f32.mrf.mxu1  ;;  %15770 = vmatmul.mubr.bf16.gmra.mxu1 %v17311_v49  ;;  %v4804_v2 = vadd.f32 %v22803_v4, %v19143_v47 }
 0x412   :  { %v19495_v43 = vpop.f32.mrf.mxu0  ;;  %16186 = vmatmul.mubr.bf16.vlgmr.msra.gmra.mxu0 %v17310_v51  ;;  %v19497_v3 = vadd.f32 %v5127_v24, %v4803_v58  ;;  %15773 = vmatprep.mubr.msk.bf16.mxu1 %vm17630_vm0, %v22750_v17 }
 0x413   :  { %22802 = vst [vmem:[#allocation4_spill] sm:$0xff] %v19495_v43  ;;  %16189 = vmatprep.mubr.msk.bf16.mxu0 %vm17630_vm0, %v22750_v17  ;;  %v15567_v59 = vpop.f32.mrf.mxu1  ;;  %16354 = vmatpush3.bf16.msra.mxu0 %v17348_v54  ;;  %v17313_v43 = vld [vmem:[#allocation2 + $0x100] sm:$0xff]   ;;  %v17353_v54 = vld [vmem:[%s22600_s3 + $0x368] sm:$0xff]  }
 0x414   :  { %v15875_v29 = vpop.f32.mrf.mxu0  ;;  %16355 = vmatprep.subr.bf16.mxu0 %v22750_v17  ;;  %v22805_v59 = vld [vmem:[#allocation27_spill] sm:$0xff] }
 0x415   :  { %v5130_v51 = vpop.f32.mrf.mxu1  ;;  %v17314_v29 = vld [vmem:[#allocation2 + $0x1f8] sm:$0xff]   ;;  %v4805_v10 = vadd.f32 %v22805_v59, %v19153_v8  ;;  %v17354_v8 = vld [vmem:[%s22600_s3 + $0x360] sm:$0xff]  }
 0x416   :  { %v19509_v11 = vpop.f32.mrf.mxu0  ;;  %v19511_v49 = vadd.f32 %v5130_v51, %v4804_v2 }
 0x417   :  { %22804 = vst [vmem:[#allocation5_spill] sm:$0xff] %v19509_v11  ;;  %v15568_v24 = vpop.f32.mrf.mxu1  ;;  %16356 = vmatpush3.bf16.msra.mxu0 %v17350_v13 }
 0x418   :  { %v15876_v58 = vpop.f32.mrf.mxu0  ;;  %16357 = vmatprep.subr.bf16.mxu0 %v22750_v17 }
 0x419   :  { %v5135_v4 = vpop.f32.mrf.mxu1  ;;  %15774 = vmatmul.mubr.bf16.gmra.mxu1 %v17314_v29  ;;  %v22807_v58 = vld [vmem:[#allocation29_spill] sm:$0xff] }
 0x41a   :  { %v19519_v47 = vpop.f32.mrf.mxu0  ;;  %16190 = vmatmul.mubr.bf16.gmra.mxu0 %v17313_v43  ;;  %v19521_v2 = vadd.f32 %v5135_v4, %v4805_v10  ;;  %15777 = vmatprep.mubr.msk.bf16.mxu1 %vm17630_vm0, %v22750_v17  ;;  %v4806_v43 = vadd.f32 %v22807_v58, %v19167_v20 }
 0x41b   :  { %22806 = vst [vmem:[#allocation6_spill] sm:$0xff] %v19519_v47  ;;  %16193 = vmatprep.mubr.msk.bf16.mxu0 %vm17630_vm0, %v22750_v17  ;;  %v15571_v51 = vpop.f32.mrf.mxu1  ;;  %16358 = vmatpush3.bf16.msra.mxu0 %v17353_v54  ;;  %v17315_v47 = vld [vmem:[#allocation2 + $0x108] sm:$0xff]   ;;  %v17357_v54 = vld [vmem:[%s22600_s3 + $0x358] sm:$0xff]  }
 0x41c   :  { %v15879_v13 = vpop.f32.mrf.mxu0  ;;  %16359 = vmatprep.subr.bf16.mxu0 %v22750_v17  ;;  %v22809_v51 = vld [vmem:[#allocation31_spill] sm:$0xff] }
 0x41d   :  { %v5138_v24 = vpop.f32.mrf.mxu1  ;;  %v17316_v13 = vld [vmem:[#allocation2 + $0x200] sm:$0xff]   ;;  %v4807_v11 = vadd.f32 %v22809_v51, %v19177_v61  ;;  %v17359_v61 = vld [vmem:[%s22600_s3 + $0x350] sm:$0xff]  }
 0x41e   :  { %v19533_v10 = vpop.f32.mrf.mxu0  ;;  %v19535_v29 = vadd.f32 %v5138_v24, %v4806_v43 }
 0x41f   :  { %22808 = vst [vmem:[#allocation7_spill] sm:$0xff] %v19533_v10  ;;  %v15572_v4 = vpop.f32.mrf.mxu1  ;;  %16360 = vmatpush3.bf16.msra.mxu0 %v17354_v8 }
 0x420   :  { %v15880_v59 = vpop.f32.mrf.mxu0  ;;  %16361 = vmatprep.subr.bf16.mxu0 %v22750_v17 }
 0x421   :  { %v5143_v58 = vpop.f32.mrf.mxu1  ;;  %15778 = vmatmul.mubr.bf16.gmra.mxu1 %v17316_v13  ;;  %v22811_v59 = vld [vmem:[#allocation32_spill] sm:$0xff] }
 0x422   :  { %v19543_v20 = vpop.f32.mrf.mxu0  ;;  %16194 = vmatmul.mubr.bf16.gmra.mxu0 %v17315_v47  ;;  %v19545_v43 = vadd.f32 %v5143_v58, %v4807_v11  ;;  %15781 = vmatprep.mubr.msk.bf16.mxu1 %vm17630_vm0, %v22750_v17  ;;  %v4808_v47 = vadd.f32 %v22811_v59, %v19191_v33 }
 0x423   :  { %22810 = vst [vmem:[#allocation9_spill] sm:$0xff] %v19543_v20  ;;  %16197 = vmatprep.mubr.msk.bf16.mxu0 %vm17630_vm0, %v22750_v17  ;;  %v15575_v24 = vpop.f32.mrf.mxu1  ;;  %16362 = vmatpush3.bf16.msra.mxu0 %v17357_v54  ;;  %v17317_v20 = vld [vmem:[#allocation2 + $0x110] sm:$0xff]   ;;  %v17362_v54 = vld [vmem:[%s22600_s3 + $0x348] sm:$0xff]  }
 0x424   :  { %v15883_v8 = vpop.f32.mrf.mxu0  ;;  %16363 = vmatprep.subr.bf16.mxu0 %v22750_v17  ;;  %v22813_v24 = vld [vmem:[#allocation33_spill] sm:$0xff] }
 0x425   :  { %v5146_v4 = vpop.f32.mrf.mxu1  ;;  %v17318_v8 = vld [vmem:[#allocation2 + $0x208] sm:$0xff]   ;;  %v4809_v10 = vadd.f32 %v22813_v24, %v19201_v39  ;;  %v17363_v39 = vld [vmem:[%s22600_s3 + $0x340] sm:$0xff]  }
 0x426   :  { %v19557_v11 = vpop.f32.mrf.mxu0  ;;  %v19559_v13 = vadd.f32 %v5146_v4, %v4808_v47 }
 0x427   :  { %22812 = vst [vmem:[#allocation11_spill] sm:$0xff] %v19557_v11  ;;  %v15576_v58 = vpop.f32.mrf.mxu1  ;;  %16364 = vmatpush3.bf16.msra.mxu0 %v17359_v61 }
 0x428   :  { %v15884_v51 = vpop.f32.mrf.mxu0  ;;  %16365 = vmatprep.subr.bf16.mxu0 %v22750_v17 }
 0x429   :  { %v5151_v59 = vpop.f32.mrf.mxu1  ;;  %15782 = vmatmul.mubr.bf16.gmra.mxu1 %v17318_v8  ;;  %v22815_v51 = vld [vmem:[#allocation34_spill] sm:$0xff] }
 0x42a   :  { %v19567_v33 = vpop.f32.mrf.mxu0  ;;  %16198 = vmatmul.mubr.bf16.gmra.mxu0 %v17317_v20  ;;  %v19569_v47 = vadd.f32 %v5151_v59, %v4809_v10  ;;  %15785 = vmatprep.mubr.msk.bf16.mxu1 %vm17630_vm0, %v22750_v17  ;;  %v4810_v20 = vadd.f32 %v22815_v51, %v19215_v26 }
 0x42b   :  { %22814 = vst [vmem:[#allocation13_spill] sm:$0xff] %v19567_v33  ;;  %16201 = vmatprep.mubr.msk.bf16.mxu0 %vm17630_vm0, %v22750_v17  ;;  %v15579_v4 = vpop.f32.mrf.mxu1  ;;  %16366 = vmatpush3.bf16.msra.mxu0 %v17362_v54  ;;  %v17320_v33 = vld [vmem:[#allocation2 + $0x118] sm:$0xff]   ;;  %v22817_v54 = vld [vmem:[#allocation35_spill] sm:$0xff] }
 0x42c   :  { %v15887_v61 = vpop.f32.mrf.mxu0  ;;  %16367 = vmatprep.subr.bf16.mxu0 %v22750_v17  ;;  %v4811_v4 = vadd.f32 %v22817_v54, %v19222_v31 }
 0x42d   :  { %v5154_v58 = vpop.f32.mrf.mxu1  ;;  %v17321_v61 = vld [vmem:[#allocation2 + $0x210] sm:$0xff]  }
 0x42e   :  { %v19581_v10 = vpop.f32.mrf.mxu0  ;;  %v19583_v8 = vadd.f32 %v5154_v58, %v4810_v20  ;;  %v22819_v58 = vld [vmem:[#allocation36_spill] sm:$0xff] }
 0x42f   :  { %22816 = vst [vmem:[#allocation15_spill] sm:$0xff] %v19581_v10  ;;  %v15580_v59 = vpop.f32.mrf.mxu1  ;;  %16368 = vmatpush3.bf16.msra.mxu0 %v17363_v39  ;;  %v4812_v31 = vadd.f32 %v22819_v58, %v19232_v37 }
 0x430   :  { %v15888_v24 = vpop.f32.mrf.mxu0  ;;  %16537 = vmatprep.subr.bf16.mxu0 %v22750_v17 }
 0x431   :  { %v5159_v26 = vpop.f32.mrf.mxu1  ;;  %15786 = vmatmul.mubr.bf16.gmra.mxu1 %v17321_v61 }
 0x432   :  { %v19588_v11 = vpop.f32.mrf.mxu0  ;;  %16202 = vmatmul.mubr.bf16.gmra.mxu0 %v17320_v33  ;;  %v19590_v51 = vadd.f32 %v5159_v26, %v4811_v4  ;;  %15789 = vmatprep.mubr.msk.bf16.mxu1 %vm17630_vm0, %v22750_v17  ;;  %v17322_v4 = vld [vmem:[#allocation2 + $0x120] sm:$0xff]   ;;  %v17323_v26 = vld [vmem:[#allocation2 + $0x218] sm:$0xff]  }
 0x433   :  { %22818 = vst [vmem:[#allocation17_spill] sm:$0xff] %v19588_v11  ;;  %16205 = vmatprep.mubr.msk.bf16.mxu0 %vm17630_vm0, %v22750_v17  ;;  %v15583_v39 = vpop.f32.mrf.mxu1  ;;  %v22821_v11 = vld [vmem:[#allocation37_spill] sm:$0xff] }
 0x434   :  { %v15891_v20 = vpop.f32.mrf.mxu0  ;;  %v4813_v10 = vadd.f32 %v22821_v11, %v19238_v25 }
 0x435   :  { %v5162_v59 = vpop.f32.mrf.mxu1 }
 0x436   :  { %v19598_v24 = vpop.f32.mrf.mxu0  ;;  %v19600_v54 = vadd.f32 %v5162_v59, %v4812_v31  ;;  %v22823_v31 = vld [vmem:[#allocation38_spill] sm:$0xff] }
 0x437   :  { %22820 = vst [vmem:[#allocation19_spill] sm:$0xff] %v19598_v24  ;;  %v15584_v61 = vpop.f32.mrf.mxu1  ;;  %v4814_v59 = vadd.f32 %v22823_v31, %v19248_v6 }
 0x438   :  { %v15892_v33 = vpop.f32.mrf.mxu0 }
 0x439   :  { %v5167_v20 = vpop.f32.mrf.mxu1  ;;  %15790 = vmatmul.mubr.bf16.gmra.mxu1 %v17323_v26  ;;  %v17326_v26 = vld [vmem:[#allocation2 + $0x220] sm:$0xff]  }
 0x43a   :  { %v19604_v50 = vpop.f32.mrf.mxu0  ;;  %16206 = vmatmul.mubr.bf16.gmra.mxu0 %v17322_v4  ;;  %v19606_v39 = vadd.f32 %v5167_v20, %v4813_v10  ;;  %15793 = vmatprep.mubr.msk.bf16.mxu1 %vm17630_vm0, %v22750_v17  ;;  %v17325_v10 = vld [vmem:[#allocation2 + $0x128] sm:$0xff]   ;;  %v22825_v20 = vld [vmem:[#allocation39_spill] sm:$0xff] }
 0x43b   :  { %22822 = vst [vmem:[#allocation21_spill] sm:$0xff] %v19604_v50  ;;  %16209 = vmatprep.mubr.msk.bf16.mxu0 %vm17630_vm0, %v22750_v17  ;;  %v15587_v58 = vpop.f32.mrf.mxu1  ;;  %v4815_v50 = vadd.f32 %v22825_v20, %v19254_v5  ;;  %v17328_v20 = vld [vmem:[#allocation2 + $0x228] sm:$0xff]  }
 0x43c   :  { %v16003_v37 = vpop.f32.mrf.mxu0 }
 0x43d   :  { %v5170_v25 = vpop.f32.mrf.mxu1 }
 0x43e   :  { %v19614_v33 = vpop.f32.mrf.mxu0  ;;  %v19616_v11 = vadd.f32 %v5170_v25, %v4814_v59  ;;  %v22827_v59 = vld [vmem:[#allocation40_spill] sm:$0xff] }
 0x43f   :  { %22824 = vst [vmem:[#allocation23_spill] sm:$0xff] %v19614_v33  ;;  %v15588_v4 = vpop.f32.mrf.mxu1  ;;  %v4816_v25 = vadd.f32 %v22827_v59, %v19264_v45 }
 0x440   :  { %v16004_v61 = vpop.f32.mrf.mxu0 }
 0x441   :  { %v5175_v37 = vpop.f32.mrf.mxu1  ;;  %15794 = vmatmul.mubr.bf16.gmra.mxu1 %v17326_v26 }
 0x442   :  { %v19620_v24 = vpop.f32.mrf.mxu0  ;;  %16210 = vmatmul.mubr.bf16.gmra.mxu0 %v17325_v10  ;;  %v19622_v58 = vadd.f32 %v5175_v37, %v4815_v50  ;;  %15797 = vmatprep.mubr.msk.bf16.mxu1 %vm17630_vm0, %v22750_v17  ;;  %v17327_v50 = vld [vmem:[#allocation2 + $0x130] sm:$0xff]  }
 0x443   :  { %22826 = vst [vmem:[#allocation25_spill] sm:$0xff] %v19620_v24  ;;  %16213 = vmatprep.mubr.msk.bf16.mxu0 %vm17630_vm0, %v22750_v17  ;;  %v15591_v31 = vpop.f32.mrf.mxu1  ;;  %v22829_v37 = vld [vmem:[#allocation41_spill] sm:$0xff] }
 0x444   :  { %v16007_v6 = vpop.f32.mrf.mxu0  ;;  %v4817_v24 = vadd.f32 %v22829_v37, %v19270_v63  ;;  %v17329_v37 = vld [vmem:[#allocation2 + $0x138] sm:$0xff]  }
 0x445   :  { %v5178_v5 = vpop.f32.mrf.mxu1 }
 0x446   :  { %v19630_v61 = vpop.f32.mrf.mxu0  ;;  %v19632_v4 = vadd.f32 %v5178_v5, %v4816_v25  ;;  %v22831_v25 = vld [vmem:[#allocation42_spill] sm:$0xff] }
 0x447   :  { %22828 = vst [vmem:[#allocation27_spill] sm:$0xff] %v19630_v61  ;;  %v15592_v26 = vpop.f32.mrf.mxu1  ;;  %v4818_v5 = vadd.f32 %v22831_v25, %v19280_v16 }
 0x448   :  { %v16008_v10 = vpop.f32.mrf.mxu0 }
 0x449   :  { %v5183_v6 = vpop.f32.mrf.mxu1  ;;  %15798 = vmatmul.mubr.bf16.gmra.mxu1 %v17328_v20 }
 0x44a   :  { %v19636_v33 = vpop.f32.mrf.mxu0  ;;  %16214 = vmatmul.mubr.bf16.gmra.mxu0 %v17327_v50  ;;  %v19638_v31 = vadd.f32 %v5183_v6, %v4817_v24  ;;  %15909 = vmatprep.mubr.msk.bf16.mxu1 %vm17630_vm0, %v22750_v17  ;;  %v17331_v24 = vld [vmem:[%s22600_s3 + $0x2b8] sm:$0xff]   ;;  %v17330_v6 = vld [vmem:[#allocation2 + $0x28] sm:$0xff]  }
 0x44b   :  { %22830 = vst [vmem:[#allocation29_spill] sm:$0xff] %v19636_v33  ;;  %16217 = vmatprep.mubr.msk.bf16.mxu0 %vm17630_vm0, %v22750_v17  ;;  %v15595_v59 = vpop.f32.mrf.mxu1  ;;  %v22833_v33 = vld [vmem:[#allocation43_spill] sm:$0xff] }
 0x44c   :  { %v16011_v45 = vpop.f32.mrf.mxu0 }
 0x44d   :  { %v5186_v63 = vpop.f32.mrf.mxu1  ;;  %v4819_v45 = vadd.f32 %v22833_v33, %v19289_v57  ;;  %v22835_v57 = vld [vmem:[#allocation44_spill] sm:$0xff] }
 0x44e   :  { %v19646_v10 = vpop.f32.mrf.mxu0  ;;  %v19648_v26 = vadd.f32 %v5186_v63, %v4818_v5  ;;  %v17336_v5 = vld [vmem:[%s22600_s3 + $0x2b0] sm:$0xff]   ;;  %v4820_v33 = vadd.f32 %v22835_v57, %v19303_v62 }
 0x44f   :  { %22832 = vst [vmem:[#allocation31_spill] sm:$0xff] %v19646_v10  ;;  %v15596_v20 = vpop.f32.mrf.mxu1 }
 0x450   :  { %v16012_v50 = vpop.f32.mrf.mxu0 }
 0x451   :  { %v5191_v16 = vpop.f32.mrf.mxu1  ;;  %15910 = vmatmul.mubr.bf16.vlgmr.msra.gmra.mxu1 %v17330_v6 }
 0x452   :  { %v19655_v59 = vpop.f32.mrf.mxu0  ;;  %16218 = vmatmul.mubr.bf16.gmra.mxu0 %v17329_v37  ;;  %v19657_v25 = vadd.f32 %v5191_v16, %v4819_v45  ;;  %16078 = vmatpush3.bf16.msra.mxu1 %v17331_v24  ;;  %v17332_v16 = vld [vmem:[#allocation2 + $0x140] sm:$0xff]  }
 0x453   :  { %22834 = vst [vmem:[#allocation32_spill] sm:$0xff] %v19655_v59  ;;  %16221 = vmatprep.mubr.msk.bf16.mxu0 %vm17630_vm0, %v22750_v17  ;;  %v15599_v50 = vpop.f32.mrf.mxu1  ;;  %15913 = vmatprep.mubr.msk.bf16.mxu1 %vm17630_vm0, %v22750_v17  ;;  %v17333_v59 = vld [vmem:[#allocation2 + $0x30] sm:$0xff]  }
 0x454   :  { %v16015_v63 = vpop.f32.mrf.mxu0  ;;  %16079 = vmatprep.subr.bf16.mxu1 %v22750_v17  ;;  %v22837_v50 = vld [vmem:[#allocation45_spill] sm:$0xff] }
 0x455   :  { %v5194_v24 = vpop.f32.mrf.mxu1  ;;  %v17341_v63 = vld [vmem:[%s22600_s3 + $0x2a8] sm:$0xff]   ;;  %v4821_v10 = vadd.f32 %v22837_v50, %v19313_v44  ;;  %v17349_v44 = vld [vmem:[%s22600_s3 + $0x2a0] sm:$0xff]  }
 0x456   :  { %v19669_v20 = vpop.f32.mrf.mxu0  ;;  %v19671_v37 = vadd.f32 %v5194_v24, %v4820_v33  ;;  %16080 = vmatpush3.bf16.msra.mxu1 %v17336_v5 }
 0x457   :  { %22836 = vst [vmem:[#allocation33_spill] sm:$0xff] %v19669_v20  ;;  %v15600_v45 = vpop.f32.mrf.mxu1  ;;  %16081 = vmatprep.subr.bf16.mxu1 %v22750_v17 }
 0x458   :  { %v16016_v6 = vpop.f32.mrf.mxu0 }
 0x459   :  { %v5199_v57 = vpop.f32.mrf.mxu1  ;;  %15914 = vmatmul.mubr.bf16.gmra.mxu1 %v17333_v59  ;;  %v22839_v6 = vld [vmem:[#allocation46_spill] sm:$0xff] }
 0x45a   :  { %v19679_v62 = vpop.f32.mrf.mxu0  ;;  %16222 = vmatmul.mubr.bf16.gmra.mxu0 %v17332_v16  ;;  %v19681_v33 = vadd.f32 %v5199_v57, %v4821_v10  ;;  %15917 = vmatprep.mubr.msk.bf16.mxu1 %vm17630_vm0, %v22750_v17  ;;  %v4822_v45 = vadd.f32 %v22839_v6, %v19327_v27 }
 0x45b   :  { %22838 = vst [vmem:[#allocation34_spill] sm:$0xff] %v19679_v62  ;;  %16225 = vmatprep.mubr.msk.bf16.mxu0 %vm17630_vm0, %v22750_v17  ;;  %v15603_v24 = vpop.f32.mrf.mxu1  ;;  %16082 = vmatpush3.bf16.msra.mxu1 %v17341_v63  ;;  %v17334_v62 = vld [vmem:[#allocation2 + $0x148] sm:$0xff]   ;;  %v17358_v63 = vld [vmem:[%s22600_s3 + $0x298] sm:$0xff]  }
 0x45c   :  { %v16019_v5 = vpop.f32.mrf.mxu0  ;;  %16083 = vmatprep.subr.bf16.mxu1 %v22750_v17  ;;  %v22841_v24 = vld [vmem:[#allocation47_spill] sm:$0xff] }
 0x45d   :  { %v5202_v59 = vpop.f32.mrf.mxu1  ;;  %v17335_v5 = vld [vmem:[#allocation2 + $0x38] sm:$0xff]   ;;  %v4823_v20 = vadd.f32 %v22841_v24, %v19337_v18  ;;  %v17366_v18 = vld [vmem:[%s22600_s3 + $0x290] sm:$0xff]  }
 0x45e   :  { %v19693_v10 = vpop.f32.mrf.mxu0  ;;  %v19695_v16 = vadd.f32 %v5202_v59, %v4822_v45 }
 0x45f   :  { %22840 = vst [vmem:[#allocation35_spill] sm:$0xff] %v19693_v10  ;;  %v15604_v57 = vpop.f32.mrf.mxu1  ;;  %16084 = vmatpush3.bf16.msra.mxu1 %v17349_v44 }
 0x460   :  { %v16020_v50 = vpop.f32.mrf.mxu0  ;;  %16085 = vmatprep.subr.bf16.mxu1 %v22750_v17 }
 0x461   :  { %v5207_v6 = vpop.f32.mrf.mxu1  ;;  %15918 = vmatmul.mubr.bf16.gmra.mxu1 %v17335_v5  ;;  %v22843_v50 = vld [vmem:[#allocation48_spill] sm:$0xff] }
 0x462   :  { %v19703_v27 = vpop.f32.mrf.mxu0  ;;  %16226 = vmatmul.mubr.bf16.gmra.mxu0 %v17334_v62  ;;  %v19705_v45 = vadd.f32 %v5207_v6, %v4823_v20  ;;  %15921 = vmatprep.mubr.msk.bf16.mxu1 %vm17630_vm0, %v22750_v17  ;;  %v4824_v62 = vadd.f32 %v22843_v50, %v19351_v48 }
 0x463   :  { %22842 = vst [vmem:[#allocation36_spill] sm:$0xff] %v19703_v27  ;;  %16229 = vmatprep.mubr.msk.bf16.mxu0 %vm17630_vm0, %v22750_v17  ;;  %v15607_v59 = vpop.f32.mrf.mxu1  ;;  %16086 = vmatpush3.bf16.msra.mxu1 %v17358_v63  ;;  %v17337_v27 = vld [vmem:[#allocation2 + $0x150] sm:$0xff]   ;;  %v17373_v63 = vld [vmem:[%s22600_s3 + $0x288] sm:$0xff]  }
 0x464   :  { %v16023_v44 = vpop.f32.mrf.mxu0  ;;  %16087 = vmatprep.subr.bf16.mxu1 %v22750_v17  ;;  %v22845_v59 = vld [vmem:[#allocation49_spill] sm:$0xff] }
 0x465   :  { %v5210_v57 = vpop.f32.mrf.mxu1  ;;  %v17338_v44 = vld [vmem:[#allocation2 + $0x40] sm:$0xff]   ;;  %v4825_v10 = vadd.f32 %v22845_v59, %v19361_v46 }
 0x466   :  { %v19717_v20 = vpop.f32.mrf.mxu0  ;;  %v19719_v5 = vadd.f32 %v5210_v57, %v4824_v62  ;;  %v17378_v46 = vld [vmem:[%s22600_s3 + $0x280] sm:$0xff]  }
 0x467   :  { %22844 = vst [vmem:[#allocation37_spill] sm:$0xff] %v19717_v20  ;;  %v15608_v6 = vpop.f32.mrf.mxu1  ;;  %16088 = vmatpush3.bf16.msra.mxu1 %v17366_v18 }
 0x468   :  { %v16024_v24 = vpop.f32.mrf.mxu0  ;;  %16089 = vmatprep.subr.bf16.mxu1 %v22750_v17 }
 0x469   :  { %v5215_v50 = vpop.f32.mrf.mxu1  ;;  %15922 = vmatmul.mubr.bf16.gmra.mxu1 %v17338_v44  ;;  %v22847_v24 = vld [vmem:[#allocation50_spill] sm:$0xff] }
 0x46a   :  { %v19727_v48 = vpop.f32.mrf.mxu0  ;;  %16230 = vmatmul.mubr.bf16.gmra.mxu0 %v17337_v27  ;;  %v19729_v62 = vadd.f32 %v5215_v50, %v4825_v10  ;;  %15925 = vmatprep.mubr.msk.bf16.mxu1 %vm17630_vm0, %v22750_v17  ;;  %v4826_v27 = vadd.f32 %v22847_v24, %v19375_v52 }
 0x46b   :  { %22846 = vst [vmem:[#allocation38_spill] sm:$0xff] %v19727_v48  ;;  %16233 = vmatprep.mubr.msk.bf16.mxu0 %vm17630_vm0, %v22750_v17  ;;  %v15611_v57 = vpop.f32.mrf.mxu1  ;;  %16090 = vmatpush3.bf16.msra.mxu1 %v17373_v63  ;;  %v17339_v48 = vld [vmem:[#allocation2 + $0x158] sm:$0xff]   ;;  %v22849_v63 = vld [vmem:[#allocation51_spill] sm:$0xff] }
 0x46c   :  { %v16027_v18 = vpop.f32.mrf.mxu0  ;;  %16091 = vmatprep.subr.bf16.mxu1 %v22750_v17  ;;  %v4827_v57 = vadd.f32 %v22849_v63, %v19382_v32 }
 0x46d   :  { %v5218_v6 = vpop.f32.mrf.mxu1  ;;  %v17340_v18 = vld [vmem:[#allocation2 + $0x48] sm:$0xff]  }
 0x46e   :  { %v19741_v10 = vpop.f32.mrf.mxu0  ;;  %v19743_v44 = vadd.f32 %v5218_v6, %v4826_v27  ;;  %v22851_v6 = vld [vmem:[#allocation52_spill] sm:$0xff] }
 0x46f   :  { %22848 = vst [vmem:[#allocation39_spill] sm:$0xff] %v19741_v10  ;;  %v15612_v50 = vpop.f32.mrf.mxu1  ;;  %16092 = vmatpush3.bf16.msra.mxu1 %v17378_v46  ;;  %v4828_v32 = vadd.f32 %v22851_v6, %v19392_v7 }
 0x470   :  { %v16028_v59 = vpop.f32.mrf.mxu0  ;;  %16261 = vmatprep.subr.bf16.mxu1 %v22750_v17 }
 0x471   :  { %v5223_v52 = vpop.f32.mrf.mxu1  ;;  %15926 = vmatmul.mubr.bf16.gmra.mxu1 %v17340_v18 }
 0x472   :  { %v19748_v20 = vpop.f32.mrf.mxu0  ;;  %16234 = vmatmul.mubr.bf16.gmra.mxu0 %v17339_v48  ;;  %v19750_v24 = vadd.f32 %v5223_v52, %v4827_v57  ;;  %15929 = vmatprep.mubr.msk.bf16.mxu1 %vm17630_vm0, %v22750_v17  ;;  %v17342_v57 = vld [vmem:[#allocation2 + $0x160] sm:$0xff]   ;;  %v17343_v52 = vld [vmem:[#allocation2 + $0x50] sm:$0xff]  }
 0x473   :  { %22850 = vst [vmem:[#allocation40_spill] sm:$0xff] %v19748_v20  ;;  %16237 = vmatprep.mubr.msk.bf16.mxu0 %vm17630_vm0, %v22750_v17  ;;  %v15615_v46 = vpop.f32.mrf.mxu1  ;;  %v22853_v20 = vld [vmem:[#allocation53_spill] sm:$0xff] }
 0x474   :  { %v16031_v27 = vpop.f32.mrf.mxu0  ;;  %v5669_v10 = vadd.f32 %v22853_v20, %v19398_v36 }
 0x475   :  { %v5226_v50 = vpop.f32.mrf.mxu1 }
 0x476   :  { %v19758_v59 = vpop.f32.mrf.mxu0  ;;  %v19760_v63 = vadd.f32 %v5226_v50, %v4828_v32  ;;  %v22855_v32 = vld [vmem:[#allocation54_spill] sm:$0xff] }
 0x477   :  { %22852 = vst [vmem:[#allocation41_spill] sm:$0xff] %v19758_v59  ;;  %v15616_v18 = vpop.f32.mrf.mxu1  ;;  %v5670_v50 = vadd.f32 %v22855_v32, %v19408_v19 }
 0x478   :  { %v16032_v48 = vpop.f32.mrf.mxu0 }
 0x479   :  { %v5957_v27 = vpop.f32.mrf.mxu1  ;;  %15930 = vmatmul.mubr.bf16.gmra.mxu1 %v17343_v52  ;;  %v17345_v52 = vld [vmem:[#allocation2 + $0x58] sm:$0xff]  }
 0x47a   :  { %v19764_v61 = vpop.f32.mrf.mxu0  ;;  %16238 = vmatmul.mubr.bf16.gmra.mxu0 %v17342_v57  ;;  %v19766_v46 = vadd.f32 %v5957_v27, %v5669_v10  ;;  %15933 = vmatprep.mubr.msk.bf16.mxu1 %vm17630_vm0, %v22750_v17  ;;  %v17344_v10 = vld [vmem:[#allocation2 + $0x168] sm:$0xff]   ;;  %v22857_v27 = vld [vmem:[#allocation55_spill] sm:$0xff] }
 0x47b   :  { %22854 = vst [vmem:[#allocation42_spill] sm:$0xff] %v19764_v61  ;;  %16241 = vmatprep.mubr.msk.bf16.mxu0 %vm17630_vm0, %v22750_v17  ;;  %v15727_v6 = vpop.f32.mrf.mxu1  ;;  %v5671_v61 = vadd.f32 %v22857_v27, %v19414_v42  ;;  %v17347_v27 = vld [vmem:[#allocation2 + $0x60] sm:$0xff]  }
 0x47c   :  { %v16035_v7 = vpop.f32.mrf.mxu0 }
 0x47d   :  { %v5960_v36 = vpop.f32.mrf.mxu1 }
 0x47e   :  { %v19774_v48 = vpop.f32.mrf.mxu0  ;;  %v19776_v20 = vadd.f32 %v5960_v36, %v5670_v50  ;;  %v22859_v50 = vld [vmem:[#allocation56_spill] sm:$0xff] }
 0x47f   :  { %22856 = vst [vmem:[#allocation43_spill] sm:$0xff] %v19774_v48  ;;  %v15728_v57 = vpop.f32.mrf.mxu1  ;;  %v5672_v36 = vadd.f32 %v22859_v50, %v19424_v0 }
 0x480   :  { %v16036_v18 = vpop.f32.mrf.mxu0 }
 0x481   :  { %v5965_v7 = vpop.f32.mrf.mxu1  ;;  %15934 = vmatmul.mubr.bf16.gmra.mxu1 %v17345_v52 }
 0x482   :  { %v19780_v59 = vpop.f32.mrf.mxu0  ;;  %16242 = vmatmul.mubr.bf16.gmra.mxu0 %v17344_v10  ;;  %v19782_v6 = vadd.f32 %v5965_v7, %v5671_v61  ;;  %15937 = vmatprep.mubr.msk.bf16.mxu1 %vm17630_vm0, %v22750_v17  ;;  %v17346_v61 = vld [vmem:[#allocation2 + $0x170] sm:$0xff]   ;;  %v22861_v7 = vld [vmem:[#allocation58_spill] sm:$0xff] }
 0x483   :  { %22858 = vst [vmem:[#allocation44_spill] sm:$0xff] %v19780_v59  ;;  %16245 = vmatprep.mubr.msk.bf16.mxu0 %vm17630_vm0, %v22750_v17  ;;  %v15731_v32 = vpop.f32.mrf.mxu1  ;;  %v5673_v59 = vadd.f32 %v22861_v7, %v19430_v35  ;;  %v17352_v7 = vld [vmem:[#allocation2 + $0x68] sm:$0xff]  }
 0x484   :  { %v16039_v19 = vpop.f32.mrf.mxu0 }
 0x485   :  { %v5968_v42 = vpop.f32.mrf.mxu1 }
 0x486   :  { %v19790_v18 = vpop.f32.mrf.mxu0  ;;  %v19792_v57 = vadd.f32 %v5968_v42, %v5672_v36  ;;  %v22863_v36 = vld [vmem:[#allocation60_spill] sm:$0xff] }
 0x487   :  { %22860 = vst [vmem:[#allocation45_spill] sm:$0xff] %v19790_v18  ;;  %v15732_v52 = vpop.f32.mrf.mxu1  ;;  %v5674_v42 = vadd.f32 %v22863_v36, %v19440_v60 }
 0x488   :  { %v16040_v10 = vpop.f32.mrf.mxu0 }
 0x489   :  { %v5973_v19 = vpop.f32.mrf.mxu1  ;;  %15938 = vmatmul.mubr.bf16.gmra.mxu1 %v17347_v27 }
 0x48a   :  { %v19796_v48 = vpop.f32.mrf.mxu0  ;;  %16246 = vmatmul.mubr.bf16.gmra.mxu0 %v17346_v61  ;;  %v19798_v32 = vadd.f32 %v5973_v19, %v5673_v59  ;;  %15941 = vmatprep.mubr.msk.bf16.mxu1 %vm17630_vm0, %v22750_v17  ;;  %v17351_v59 = vld [vmem:[#allocation2 + $0x178] sm:$0xff]  }
 0x48b   :  { %22862 = vst [vmem:[#allocation46_spill] sm:$0xff] %v19796_v48  ;;  %16249 = vmatprep.mubr.msk.bf16.mxu0 %vm17630_vm0, %v22750_v17  ;;  %v15735_v50 = vpop.f32.mrf.mxu1  ;;  %v22865_v19 = vld [vmem:[#allocation62_spill] sm:$0xff] }
 0x48c   :  { %v16043_v0 = vpop.f32.mrf.mxu0  ;;  %v5675_v48 = vadd.f32 %v22865_v19, %v19446_v56  ;;  %v17356_v19 = vld [vmem:[#allocation2 + $0x70] sm:$0xff]  }
 0x48d   :  { %v5976_v35 = vpop.f32.mrf.mxu1 }
 0x48e   :  { %v19806_v10 = vpop.f32.mrf.mxu0  ;;  %v19808_v52 = vadd.f32 %v5976_v35, %v5674_v42  ;;  %v22867_v42 = vld [vmem:[#allocation64_spill] sm:$0xff] }
 0x48f   :  { %22864 = vst [vmem:[#allocation47_spill] sm:$0xff] %v19806_v10  ;;  %v15736_v27 = vpop.f32.mrf.mxu1  ;;  %v5676_v35 = vadd.f32 %v22867_v42, %v19456_v21 }
 0x490   :  { %v16044_v61 = vpop.f32.mrf.mxu0 }
 0x491   :  { %v5981_v0 = vpop.f32.mrf.mxu1  ;;  %15942 = vmatmul.mubr.bf16.gmra.mxu1 %v17352_v7 }
 0x492   :  { %v19812_v18 = vpop.f32.mrf.mxu0  ;;  %16250 = vmatmul.mubr.bf16.gmra.mxu0 %v17351_v59  ;;  %v19814_v50 = vadd.f32 %v5981_v0, %v5675_v48  ;;  %15945 = vmatprep.mubr.msk.bf16.mxu1 %vm17630_vm0, %v22750_v17  ;;  %v17355_v48 = vld [vmem:[#allocation2 + $0x180] sm:$0xff]   ;;  %v22869_v0 = vld [vmem:[#allocation66_spill] sm:$0xff] }
 0x493   :  { %22866 = vst [vmem:[#allocation48_spill] sm:$0xff] %v19812_v18  ;;  %16253 = vmatprep.mubr.msk.bf16.mxu0 %vm17630_vm0, %v22750_v17  ;;  %v15739_v36 = vpop.f32.mrf.mxu1  ;;  %v5677_v18 = vadd.f32 %v22869_v0, %v19462_v38  ;;  %v17361_v0 = vld [vmem:[#allocation2 + $0x78] sm:$0xff]  }
 0x494   :  { %v16047_v60 = vpop.f32.mrf.mxu0 }
 0x495   :  { %v5984_v56 = vpop.f32.mrf.mxu1 }
 0x496   :  { %v19822_v61 = vpop.f32.mrf.mxu0  ;;  %v19824_v27 = vadd.f32 %v5984_v56, %v5676_v35  ;;  %v22871_v35 = vld [vmem:[#allocation68_spill] sm:$0xff] }
 0x497   :  { %22868 = vst [vmem:[#allocation49_spill] sm:$0xff] %v19822_v61  ;;  %v15740_v7 = vpop.f32.mrf.mxu1  ;;  %v5678_v56 = vadd.f32 %v22871_v35, %v19472_v40 }
 0x498   :  { %v16048_v59 = vpop.f32.mrf.mxu0 }
 0x499   :  { %v5989_v60 = vpop.f32.mrf.mxu1  ;;  %15946 = vmatmul.mubr.bf16.gmra.mxu1 %v17356_v19 }
 0x49a   :  { %v19828_v10 = vpop.f32.mrf.mxu0  ;;  %16254 = vmatmul.mubr.bf16.gmra.mxu0 %v17355_v48  ;;  %v19830_v36 = vadd.f32 %v5989_v60, %v5677_v18  ;;  %15949 = vmatprep.mubr.msk.bf16.mxu1 %vm17630_vm0, %v22750_v17  ;;  %v17360_v18 = vld [vmem:[#allocation2 + $0x188] sm:$0xff]   ;;  %v22872_v60 = vld [vmem:[#allocation70_spill] sm:$0xff] }
 0x49b   :  { %22870 = vst [vmem:[#allocation50_spill] sm:$0xff] %v19828_v10  ;;  %16257 = vmatprep.mubr.msk.bf16.mxu0 %vm17630_vm0, %v22750_v17  ;;  %v15743_v42 = vpop.f32.mrf.mxu1  ;;  %v5679_v10 = vadd.f32 %v22872_v60, %v19478_v30  ;;  %v17365_v60 = vld [vmem:[#allocation2 + $0x80] sm:$0xff]  }
 0x49c   :  { %v16051_v21 = vpop.f32.mrf.mxu0 }
 0x49d   :  { %v5992_v38 = vpop.f32.mrf.mxu1 }
 0x49e   :  { %v19838_v59 = vpop.f32.mrf.mxu0  ;;  %v19840_v7 = vadd.f32 %v5992_v38, %v5678_v56  ;;  %v22874_v56 = vld [vmem:[#allocation72_spill] sm:$0xff] }
 0x49f   :  { %v15744_v19 = vpop.f32.mrf.mxu1  ;;  %v5680_v38 = vadd.f32 %v22874_v56, %v19488_v22 }
 0x4a0   :  { %v16052_v48 = vpop.f32.mrf.mxu0 }
 0x4a1   :  { %v5997_v21 = vpop.f32.mrf.mxu1  ;;  %15950 = vmatmul.mubr.bf16.gmra.mxu1 %v17361_v0 }
 0x4a2   :  { %v19844_v61 = vpop.f32.mrf.mxu0  ;;  %16258 = vmatmul.mubr.bf16.gmra.mxu0 %v17360_v18  ;;  %v19846_v42 = vadd.f32 %v5997_v21, %v5679_v10  ;;  %15953 = vmatprep.mubr.msk.bf16.mxu1 %vm17630_vm0, %v22750_v17  ;;  %v17364_v10 = vld [vmem:[#allocation2 + $0x280] sm:$0xff]   ;;  %v17402_v21 = vld [vmem:[%s22600_s3 + $0x3f8] sm:$0xff]  }
 0x4a3   :  { %22873 = vst [vmem:[#allocation51_spill] sm:$0xff] %v19844_v61  ;;  %16369 = vmatprep.mubr.msk.bf16.mxu0 %vm17630_vm0, %v22750_v17  ;;  %v15747_v35 = vpop.f32.mrf.mxu1  ;;  %v22876_v61 = vld [vmem:[#allocation74_spill] sm:$0xff] }
 0x4a4   :  { %v16055_v40 = vpop.f32.mrf.mxu0 }
 0x4a5   :  { %v6000_v30 = vpop.f32.mrf.mxu1  ;;  %v5681_v40 = vadd.f32 %v22876_v61, %v19497_v3  ;;  %v17404_v3 = vld [vmem:[%s22600_s3 + $0x3f0] sm:$0xff]   ;;  %v22878_v61 = vld [vmem:[#allocation76_spill] sm:$0xff] }
 0x4a6   :  { %v19854_v48 = vpop.f32.mrf.mxu0  ;;  %v19856_v19 = vadd.f32 %v6000_v30, %v5680_v38 }
 0x4a7   :  { %22875 = vst [vmem:[#allocation52_spill] sm:$0xff] %v19854_v48  ;;  %v15748_v0 = vpop.f32.mrf.mxu1 }
 0x4a8   :  { %v16056_v18 = vpop.f32.mrf.mxu0 }
 0x4a9   :  { %v6005_v22 = vpop.f32.mrf.mxu1  ;;  %15954 = vmatmul.mubr.bf16.gmra.mxu1 %v17365_v60  ;;  %v5682_v18 = vadd.f32 %v22878_v61, %v19511_v49 }
 0x4aa   :  { %v19863_v35 = vpop.f32.mrf.mxu0  ;;  %16370 = vmatmul.mubr.bf16.vlgmr.msra.gmra.mxu0 %v17364_v10  ;;  %v19865_v56 = vadd.f32 %v6005_v22, %v5681_v40  ;;  %15957 = vmatprep.mubr.msk.bf16.mxu1 %vm17630_vm0, %v22750_v17 }
 0x4ab   :  { %22877 = vst [vmem:[#allocation53_spill] sm:$0xff] %v19863_v35  ;;  %16373 = vmatprep.mubr.msk.bf16.mxu0 %vm17630_vm0, %v22750_v17  ;;  %v15751_v30 = vpop.f32.mrf.mxu1  ;;  %16538 = vmatpush3.bf16.msra.mxu0 %v17402_v21  ;;  %v17367_v35 = vld [vmem:[#allocation2 + $0x288] sm:$0xff]  }
 0x4ac   :  { %v16059_v38 = vpop.f32.mrf.mxu0  ;;  %16539 = vmatprep.subr.bf16.mxu0 %v22750_v17  ;;  %v17407_v21 = vld [vmem:[%s22600_s3 + $0x3e8] sm:$0xff]   ;;  %v22880_v30 = vld [vmem:[#allocation78_spill] sm:$0xff] }
 0x4ad   :  { %v6008_v10 = vpop.f32.mrf.mxu1  ;;  %v17368_v38 = vld [vmem:[#allocation2 + $0x88] sm:$0xff]   ;;  %v5683_v48 = vadd.f32 %v22880_v30, %v19521_v2  ;;  %v17408_v2 = vld [vmem:[%s22600_s3 + $0x3e0] sm:$0xff]  }
 0x4ae   :  { %v19877_v0 = vpop.f32.mrf.mxu0  ;;  %v19879_v60 = vadd.f32 %v6008_v10, %v5682_v18 }
 0x4af   :  { %22879 = vst [vmem:[#allocation54_spill] sm:$0xff] %v19877_v0  ;;  %v15752_v22 = vpop.f32.mrf.mxu1  ;;  %16540 = vmatpush3.bf16.msra.mxu0 %v17404_v3 }
 0x4b0   :  { %v16060_v40 = vpop.f32.mrf.mxu0  ;;  %16541 = vmatprep.subr.bf16.mxu0 %v22750_v17 }
 0x4b1   :  { %v6013_v61 = vpop.f32.mrf.mxu1  ;;  %15958 = vmatmul.mubr.bf16.gmra.mxu1 %v17368_v38  ;;  %v22882_v40 = vld [vmem:[#allocation80_spill] sm:$0xff] }
 0x4b2   :  { %v19887_v49 = vpop.f32.mrf.mxu0  ;;  %16374 = vmatmul.mubr.bf16.gmra.mxu0 %v17367_v35  ;;  %v19889_v18 = vadd.f32 %v6013_v61, %v5683_v48  ;;  %15961 = vmatprep.mubr.msk.bf16.mxu1 %vm17630_vm0, %v22750_v17  ;;  %v5684_v35 = vadd.f32 %v22882_v40, %v19535_v29 }
 0x4b3   :  { %22881 = vst [vmem:[#allocation55_spill] sm:$0xff] %v19887_v49  ;;  %16377 = vmatprep.mubr.msk.bf16.mxu0 %vm17630_vm0, %v22750_v17  ;;  %v15755_v10 = vpop.f32.mrf.mxu1  ;;  %16542 = vmatpush3.bf16.msra.mxu0 %v17407_v21  ;;  %v17369_v49 = vld [vmem:[#allocation2 + $0x290] sm:$0xff]   ;;  %v17411_v21 = vld [vmem:[%s22600_s3 + $0x3d8] sm:$0xff]  }
 0x4b4   :  { %v16063_v3 = vpop.f32.mrf.mxu0  ;;  %16543 = vmatprep.subr.bf16.mxu0 %v22750_v17  ;;  %v22883_v10 = vld [vmem:[#allocation81_spill] sm:$0xff] }
 0x4b5   :  { %v6016_v22 = vpop.f32.mrf.mxu1  ;;  %v17370_v3 = vld [vmem:[#allocation2 + $0x90] sm:$0xff]   ;;  %v5685_v0 = vadd.f32 %v22883_v10, %v19545_v43 }
 0x4b6   :  { %v19901_v48 = vpop.f32.mrf.mxu0  ;;  %v19903_v38 = vadd.f32 %v6016_v22, %v5684_v35  ;;  %v17413_v43 = vld [vmem:[%s22600_s3 + $0x3d0] sm:$0xff]  }
 0x4b7   :  { %v15756_v61 = vpop.f32.mrf.mxu1  ;;  %16544 = vmatpush3.bf16.msra.mxu0 %v17408_v2 }
 0x4b8   :  { %v16064_v30 = vpop.f32.mrf.mxu0  ;;  %16545 = vmatprep.subr.bf16.mxu0 %v22750_v17 }
 0x4b9   :  { %v6021_v40 = vpop.f32.mrf.mxu1  ;;  %15962 = vmatmul.mubr.bf16.gmra.mxu1 %v17370_v3 }
 0x4ba   :  { %v19911_v29 = vpop.f32.mrf.mxu0  ;;  %16378 = vmatmul.mubr.bf16.gmra.mxu0 %v17369_v49  ;;  %v19913_v35 = vadd.f32 %v6021_v40, %v5685_v0  ;;  %15965 = vmatprep.mubr.msk.bf16.mxu1 %vm17630_vm0, %v22750_v17  ;;  %v5686_v49 = vadd.f32 %v19038_v14, %v19559_v13  ;;  %v17371_v40 = vld [vmem:[#allocation2 + $0x298] sm:$0xff]  }
 0x4bb   :  { %16381 = vmatprep.mubr.msk.bf16.mxu0 %vm17630_vm0, %v22750_v17  ;;  %v15759_v22 = vpop.f32.mrf.mxu1  ;;  %16546 = vmatpush3.bf16.msra.mxu0 %v17411_v21  ;;  %v17416_v21 = vld [vmem:[%s22600_s3 + $0x3c8] sm:$0xff]  }
 0x4bc   :  { %v16067_v2 = vpop.f32.mrf.mxu0  ;;  %16547 = vmatprep.subr.bf16.mxu0 %v22750_v17  ;;  %v5687_v22 = vadd.f32 %v19044_v9, %v19569_v47  ;;  %v17417_v9 = vld [vmem:[%s22600_s3 + $0x3c0] sm:$0xff]   ;;  %v5688_v47 = vadd.f32 %v19054_v12, %v19583_v8 }
 0x4bd   :  { %v6024_v30 = vpop.f32.mrf.mxu1  ;;  %v17372_v2 = vld [vmem:[#allocation2 + $0x98] sm:$0xff]  }
 0x4be   :  { %v19925_v0 = vpop.f32.mrf.mxu0  ;;  %v19927_v61 = vadd.f32 %v6024_v30, %v5686_v49 }
 0x4bf   :  { %v15760_v10 = vpop.f32.mrf.mxu1  ;;  %16548 = vmatpush3.bf16.msra.mxu0 %v17413_v43 }
 0x4c0   :  { %v16068_v3 = vpop.f32.mrf.mxu0  ;;  %16549 = vmatprep.subr.bf16.mxu0 %v22750_v17 }
 0x4c1   :  { %v6029_v13 = vpop.f32.mrf.mxu1  ;;  %15966 = vmatmul.mubr.bf16.gmra.mxu1 %v17372_v2 }
 0x4c2   :  { %v19935_v14 = vpop.f32.mrf.mxu0  ;;  %16382 = vmatmul.mubr.bf16.gmra.mxu0 %v17371_v40  ;;  %v19937_v49 = vadd.f32 %v6029_v13, %v5687_v22  ;;  %15969 = vmatprep.mubr.msk.bf16.mxu1 %vm17630_vm0, %v22750_v17  ;;  %v17374_v13 = vld [vmem:[#allocation2 + $0x2a0] sm:$0xff]  }
 0x4c3   :  { %16385 = vmatprep.mubr.msk.bf16.mxu0 %vm17630_vm0, %v22750_v17  ;;  %v15763_v30 = vpop.f32.mrf.mxu1  ;;  %16550 = vmatpush3.bf16.msra.mxu0 %v17416_v21  ;;  %v5689_v21 = vadd.f32 %v19060_v34, %v19590_v51  ;;  %v5690_v34 = vadd.f32 %v19070_v41, %v19600_v54 }
 0x4c4   :  { %v16071_v43 = vpop.f32.mrf.mxu0  ;;  %16551 = vmatprep.subr.bf16.mxu0 %v22750_v17 }
 0x4c5   :  { %v6032_v10 = vpop.f32.mrf.mxu1  ;;  %v17375_v43 = vld [vmem:[#allocation2 + $0xa0] sm:$0xff]  }
 0x4c6   :  { %v19949_v3 = vpop.f32.mrf.mxu0  ;;  %v19951_v40 = vadd.f32 %v6032_v10, %v5688_v47 }
 0x4c7   :  { %v15764_v22 = vpop.f32.mrf.mxu1  ;;  %16552 = vmatpush3.bf16.msra.mxu0 %v17417_v9 }
 0x4c8   :  { %v16072_v2 = vpop.f32.mrf.mxu0  ;;  %16689 = vmatprep.subr.bf16.mxu0 %v22750_v17 }
 0x4c9   :  { %v6037_v12 = vpop.f32.mrf.mxu1  ;;  %15970 = vmatmul.mubr.bf16.gmra.mxu1 %v17375_v43  ;;  %v17376_v43 = vld [vmem:[#allocation2 + $0x2a8] sm:$0xff]  }
 0x4ca   :  { %v19956_v30 = vpop.f32.mrf.mxu0  ;;  %16386 = vmatmul.mubr.bf16.gmra.mxu0 %v17374_v13  ;;  %v19958_v8 = vadd.f32 %v6037_v12, %v5689_v21  ;;  %15973 = vmatprep.mubr.msk.bf16.mxu1 %vm17630_vm0, %v22750_v17  ;;  %v17377_v21 = vld [vmem:[#allocation2 + $0xa8] sm:$0xff]   ;;  %v5691_v12 = vadd.f32 %v19076_v23, %v19606_v39 }
 0x4cb   :  { %22884 = vst [vmem:[#allocation56_spill] sm:$0xff] %v19956_v30  ;;  %16389 = vmatprep.mubr.msk.bf16.mxu0 %vm17630_vm0, %v22750_v17  ;;  %v15767_v9 = vpop.f32.mrf.mxu1 }
 0x4cc   :  { %v16075_v47 = vpop.f32.mrf.mxu0 }
 0x4cd   :  { %v6040_v10 = vpop.f32.mrf.mxu1 }
 0x4ce   :  { %v19966_v51 = vpop.f32.mrf.mxu0  ;;  %v19968_v2 = vadd.f32 %v6040_v10, %v5690_v34  ;;  %v5692_v34 = vadd.f32 %v19086_v1, %v19616_v11 }
 0x4cf   :  { %v15768_v13 = vpop.f32.mrf.mxu1 }
 0x4d0   :  { %v16076_v22 = vpop.f32.mrf.mxu0 }
 0x4d1   :  { %v6045_v47 = vpop.f32.mrf.mxu1  ;;  %15974 = vmatmul.mubr.bf16.gmra.mxu1 %v17377_v21  ;;  %v17380_v21 = vld [vmem:[#allocation2 + $0xb0] sm:$0xff]  }
 0x4d2   :  { %v19972_v30 = vpop.f32.mrf.mxu0  ;;  %16390 = vmatmul.mubr.bf16.gmra.mxu0 %v17376_v43  ;;  %v19974_v9 = vadd.f32 %v6045_v47, %v5691_v12  ;;  %15977 = vmatprep.mubr.msk.bf16.mxu1 %vm17630_vm0, %v22750_v17  ;;  %v17379_v43 = vld [vmem:[#allocation2 + $0x2b0] sm:$0xff]   ;;  %v5693_v12 = vadd.f32 %v19092_v53, %v19622_v58 }
 0x4d3   :  { %16393 = vmatprep.mubr.msk.bf16.mxu0 %vm17630_vm0, %v22750_v17  ;;  %v15771_v54 = vpop.f32.mrf.mxu1 }
 0x4d4   :  { %v16187_v41 = vpop.f32.mrf.mxu0 }
 0x4d5   :  { %v6048_v23 = vpop.f32.mrf.mxu1 }
 0x4d6   :  { %v19982_v10 = vpop.f32.mrf.mxu0  ;;  %v19984_v39 = vadd.f32 %v6048_v23, %v5692_v34  ;;  %v5694_v34 = vadd.f32 %v19102_v28, %v19632_v4 }
 0x4d7   :  { %v15772_v13 = vpop.f32.mrf.mxu1 }
 0x4d8   :  { %v16188_v22 = vpop.f32.mrf.mxu0 }
 0x4d9   :  { %v6053_v41 = vpop.f32.mrf.mxu1  ;;  %15978 = vmatmul.mubr.bf16.gmra.mxu1 %v17380_v21  ;;  %v17382_v21 = vld [vmem:[#allocation2 + $0xb8] sm:$0xff]  }
 0x4da   :  { %v19988_v47 = vpop.f32.mrf.mxu0  ;;  %16394 = vmatmul.mubr.bf16.gmra.mxu0 %v17379_v43  ;;  %v19990_v54 = vadd.f32 %v6053_v41, %v5693_v12  ;;  %15981 = vmatprep.mubr.msk.bf16.mxu1 %vm17630_vm0, %v22750_v17  ;;  %v17381_v43 = vld [vmem:[#allocation2 + $0x2b8] sm:$0xff]   ;;  %v5695_v12 = vadd.f32 %v19108_v15, %v19638_v31 }
 0x4db   :  { %16397 = vmatprep.mubr.msk.bf16.mxu0 %vm17630_vm0, %v22750_v17  ;;  %v15775_v11 = vpop.f32.mrf.mxu1 }
 0x4dc   :  { %v16191_v1 = vpop.f32.mrf.mxu0 }
 0x4dd   :  { %v6056_v53 = vpop.f32.mrf.mxu1 }
 0x4de   :  { %v19998_v23 = vpop.f32.mrf.mxu0  ;;  %v20000_v58 = vadd.f32 %v6056_v53, %v5694_v34  ;;  %v5696_v34 = vadd.f32 %v19118_v55, %v19648_v26 }
 0x4df   :  { %v15776_v13 = vpop.f32.mrf.mxu1 }
 0x4e0   :  { %v16192_v22 = vpop.f32.mrf.mxu0 }
 0x4e1   :  { %v6061_v1 = vpop.f32.mrf.mxu1  ;;  %15982 = vmatmul.mubr.bf16.gmra.mxu1 %v17382_v21  ;;  %v17385_v22 = vld [vmem:[%s22600_s3 + $0x338] sm:$0xff]   ;;  %v17383_v21 = vld [vmem:[#allocation2 + $0x2c0] sm:$0xff]  }
 0x4e2   :  { %v20004_v41 = vpop.f32.mrf.mxu0  ;;  %16398 = vmatmul.mubr.bf16.gmra.mxu0 %v17381_v43  ;;  %v20006_v11 = vadd.f32 %v6061_v1, %v5695_v12  ;;  %16093 = vmatprep.mubr.msk.bf16.mxu1 %vm17630_vm0, %v22750_v17  ;;  %v17384_v12 = vld [vmem:[#allocation2 + $0x30] sm:$0xff]   ;;  %v22887_v1 = vld [vmem:[#allocation82_spill] sm:$0xff] }
 0x4e3   :  { %22885 = vst [vmem:[#allocation58_spill] sm:$0xff] %v20004_v41  ;;  %16401 = vmatprep.mubr.msk.bf16.mxu0 %vm17630_vm0, %v22750_v17  ;;  %v15779_v4 = vpop.f32.mrf.mxu1 }
 0x4e4   :  { %v16195_v28 = vpop.f32.mrf.mxu0 }
 0x4e5   :  { %v6064_v15 = vpop.f32.mrf.mxu1  ;;  %v5697_v28 = vadd.f32 %v22887_v1, %v19657_v25  ;;  %v22889_v25 = vld [vmem:[#allocation83_spill] sm:$0xff] }
 0x4e6   :  { %v20014_v53 = vpop.f32.mrf.mxu0  ;;  %v20016_v31 = vadd.f32 %v6064_v15, %v5696_v34  ;;  %v17390_v34 = vld [vmem:[%s22600_s3 + $0x330] sm:$0xff]  }
 0x4e7   :  { %22886 = vst [vmem:[#allocation60_spill] sm:$0xff] %v20014_v53  ;;  %v15780_v43 = vpop.f32.mrf.mxu1 }
 0x4e8   :  { %v16196_v13 = vpop.f32.mrf.mxu0  ;;  %v5698_v43 = vadd.f32 %v22889_v25, %v19671_v37 }
 0x4e9   :  { %v6069_v55 = vpop.f32.mrf.mxu1  ;;  %16094 = vmatmul.mubr.bf16.vlgmr.msra.gmra.mxu1 %v17384_v12 }
 0x4ea   :  { %v20023_v4 = vpop.f32.mrf.mxu0  ;;  %16402 = vmatmul.mubr.bf16.gmra.mxu0 %v17383_v21  ;;  %v20025_v26 = vadd.f32 %v6069_v55, %v5697_v28  ;;  %16262 = vmatpush3.bf16.msra.mxu1 %v17385_v22  ;;  %v17386_v55 = vld [vmem:[#allocation2 + $0x2c8] sm:$0xff]  }
 0x4eb   :  { %22888 = vst [vmem:[#allocation62_spill] sm:$0xff] %v20023_v4  ;;  %16405 = vmatprep.mubr.msk.bf16.mxu0 %vm17630_vm0, %v22750_v17  ;;  %v15783_v13 = vpop.f32.mrf.mxu1  ;;  %16097 = vmatprep.mubr.msk.bf16.mxu1 %vm17630_vm0, %v22750_v17  ;;  %v17387_v4 = vld [vmem:[#allocation2 + $0x38] sm:$0xff]  }
 0x4ec   :  { %v16199_v15 = vpop.f32.mrf.mxu0  ;;  %16263 = vmatprep.subr.bf16.mxu1 %v22750_v17  ;;  %v22891_v13 = vld [vmem:[#allocation84_spill] sm:$0xff] }
 0x4ed   :  { %v6072_v22 = vpop.f32.mrf.mxu1  ;;  %v17395_v15 = vld [vmem:[%s22600_s3 + $0x328] sm:$0xff]   ;;  %v5699_v53 = vadd.f32 %v22891_v13, %v19681_v33  ;;  %v17403_v33 = vld [vmem:[%s22600_s3 + $0x320] sm:$0xff]  }
 0x4ee   :  { %v20037_v21 = vpop.f32.mrf.mxu0  ;;  %v20039_v12 = vadd.f32 %v6072_v22, %v5698_v43  ;;  %16264 = vmatpush3.bf16.msra.mxu1 %v17390_v34 }
 0x4ef   :  { %22890 = vst [vmem:[#allocation64_spill] sm:$0xff] %v20037_v21  ;;  %v15784_v28 = vpop.f32.mrf.mxu1  ;;  %16265 = vmatprep.subr.bf16.mxu1 %v22750_v17 }
 0x4f0   :  { %v16200_v1 = vpop.f32.mrf.mxu0 }
 0x4f1   :  { %v6077_v25 = vpop.f32.mrf.mxu1  ;;  %16098 = vmatmul.mubr.bf16.gmra.mxu1 %v17387_v4  ;;  %v22893_v1 = vld [vmem:[#allocation85_spill] sm:$0xff] }
 0x4f2   :  { %v20047_v37 = vpop.f32.mrf.mxu0  ;;  %16406 = vmatmul.mubr.bf16.gmra.mxu0 %v17386_v55  ;;  %v20049_v43 = vadd.f32 %v6077_v25, %v5699_v53  ;;  %16101 = vmatprep.mubr.msk.bf16.mxu1 %vm17630_vm0, %v22750_v17  ;;  %v5700_v28 = vadd.f32 %v22893_v1, %v19695_v16 }
 0x4f3   :  { %22892 = vst [vmem:[#allocation66_spill] sm:$0xff] %v20047_v37  ;;  %16409 = vmatprep.mubr.msk.bf16.mxu0 %vm17630_vm0, %v22750_v17  ;;  %v15787_v22 = vpop.f32.mrf.mxu1  ;;  %16266 = vmatpush3.bf16.msra.mxu1 %v17395_v15  ;;  %v17388_v37 = vld [vmem:[#allocation2 + $0x2d0] sm:$0xff]   ;;  %v17412_v15 = vld [vmem:[%s22600_s3 + $0x318] sm:$0xff]  }
 0x4f4   :  { %v16203_v34 = vpop.f32.mrf.mxu0  ;;  %16267 = vmatprep.subr.bf16.mxu1 %v22750_v17  ;;  %v22895_v22 = vld [vmem:[#allocation86_spill] sm:$0xff] }
 0x4f5   :  { %v6080_v4 = vpop.f32.mrf.mxu1  ;;  %v17389_v34 = vld [vmem:[#allocation2 + $0x40] sm:$0xff]   ;;  %v5701_v21 = vadd.f32 %v22895_v22, %v19705_v45  ;;  %v17420_v45 = vld [vmem:[%s22600_s3 + $0x310] sm:$0xff]  }
 0x4f6   :  { %v20061_v53 = vpop.f32.mrf.mxu0  ;;  %v20063_v55 = vadd.f32 %v6080_v4, %v5700_v28 }
 0x4f7   :  { %22894 = vst [vmem:[#allocation68_spill] sm:$0xff] %v20061_v53  ;;  %v15788_v25 = vpop.f32.mrf.mxu1  ;;  %16268 = vmatpush3.bf16.msra.mxu1 %v17403_v33 }
 0x4f8   :  { %v16204_v13 = vpop.f32.mrf.mxu0  ;;  %16269 = vmatprep.subr.bf16.mxu1 %v22750_v17 }
 0x4f9   :  { %v6085_v1 = vpop.f32.mrf.mxu1  ;;  %16102 = vmatmul.mubr.bf16.gmra.mxu1 %v17389_v34  ;;  %v22897_v13 = vld [vmem:[#allocation87_spill] sm:$0xff] }
 0x4fa   :  { %v20071_v16 = vpop.f32.mrf.mxu0  ;;  %16410 = vmatmul.mubr.bf16.gmra.mxu0 %v17388_v37  ;;  %v20073_v28 = vadd.f32 %v6085_v1, %v5701_v21  ;;  %16105 = vmatprep.mubr.msk.bf16.mxu1 %vm17630_vm0, %v22750_v17  ;;  %v5702_v37 = vadd.f32 %v22897_v13, %v19719_v5 }
 0x4fb   :  { %22896 = vst [vmem:[#allocation70_spill] sm:$0xff] %v20071_v16  ;;  %16413 = vmatprep.mubr.msk.bf16.mxu0 %vm17630_vm0, %v22750_v17  ;;  %v15791_v4 = vpop.f32.mrf.mxu1  ;;  %16270 = vmatpush3.bf16.msra.mxu1 %v17412_v15  ;;  %v17391_v16 = vld [vmem:[#allocation2 + $0x2d8] sm:$0xff]   ;;  %v17427_v15 = vld [vmem:[%s22600_s3 + $0x308] sm:$0xff]  }
 0x4fc   :  { %v16207_v33 = vpop.f32.mrf.mxu0  ;;  %16271 = vmatprep.subr.bf16.mxu1 %v22750_v17  ;;  %v22899_v4 = vld [vmem:[#allocation88_spill] sm:$0xff] }
 0x4fd   :  { %v6088_v25 = vpop.f32.mrf.mxu1  ;;  %v17392_v33 = vld [vmem:[#allocation2 + $0x48] sm:$0xff]   ;;  %v5703_v53 = vadd.f32 %v22899_v4, %v19729_v62  ;;  %v17432_v62 = vld [vmem:[%s22600_s3 + $0x300] sm:$0xff]  }
 0x4fe   :  { %v20085_v21 = vpop.f32.mrf.mxu0  ;;  %v20087_v34 = vadd.f32 %v6088_v25, %v5702_v37 }
 0x4ff   :  { %22898 = vst [vmem:[#allocation72_spill] sm:$0xff] %v20085_v21  ;;  %v15792_v1 = vpop.f32.mrf.mxu1  ;;  %16272 = vmatpush3.bf16.msra.mxu1 %v17420_v45 }
 0x500   :  { %v16208_v22 = vpop.f32.mrf.mxu0  ;;  %16273 = vmatprep.subr.bf16.mxu1 %v22750_v17 }
 0x501   :  { %v6093_v13 = vpop.f32.mrf.mxu1  ;;  %16106 = vmatmul.mubr.bf16.gmra.mxu1 %v17392_v33  ;;  %v22901_v22 = vld [vmem:[#allocation89_spill] sm:$0xff] }
 0x502   :  { %v20095_v5 = vpop.f32.mrf.mxu0  ;;  %16414 = vmatmul.mubr.bf16.gmra.mxu0 %v17391_v16  ;;  %v20097_v37 = vadd.f32 %v6093_v13, %v5703_v53  ;;  %16109 = vmatprep.mubr.msk.bf16.mxu1 %vm17630_vm0, %v22750_v17  ;;  %v5704_v16 = vadd.f32 %v22901_v22, %v19743_v44 }
 0x503   :  { %22900 = vst [vmem:[#allocation74_spill] sm:$0xff] %v20095_v5  ;;  %16417 = vmatprep.mubr.msk.bf16.mxu0 %vm17630_vm0, %v22750_v17  ;;  %v15795_v25 = vpop.f32.mrf.mxu1  ;;  %16274 = vmatpush3.bf16.msra.mxu1 %v17427_v15  ;;  %v17393_v5 = vld [vmem:[#allocation2 + $0x2e0] sm:$0xff]   ;;  %v22903_v15 = vld [vmem:[#allocation90_spill] sm:$0xff] }
 0x504   :  { %v16211_v45 = vpop.f32.mrf.mxu0  ;;  %16275 = vmatprep.subr.bf16.mxu1 %v22750_v17  ;;  %v5705_v25 = vadd.f32 %v22903_v15, %v19750_v24 }
 0x505   :  { %v6096_v1 = vpop.f32.mrf.mxu1  ;;  %v17394_v45 = vld [vmem:[#allocation2 + $0x50] sm:$0xff]  }
 0x506   :  { %v20109_v53 = vpop.f32.mrf.mxu0  ;;  %v20111_v33 = vadd.f32 %v6096_v1, %v5704_v16  ;;  %v22905_v1 = vld [vmem:[#allocation91_spill] sm:$0xff] }
 0x507   :  { %22902 = vst [vmem:[#allocation76_spill] sm:$0xff] %v20109_v53  ;;  %v15796_v13 = vpop.f32.mrf.mxu1  ;;  %16276 = vmatpush3.bf16.msra.mxu1 %v17432_v62  ;;  %v5706_v24 = vadd.f32 %v22905_v1, %v19760_v63 }
 0x508   :  { %v16212_v4 = vpop.f32.mrf.mxu0  ;;  %16445 = vmatprep.subr.bf16.mxu1 %v22750_v17 }
 0x509   :  { %v6101_v44 = vpop.f32.mrf.mxu1  ;;  %16110 = vmatmul.mubr.bf16.gmra.mxu1 %v17394_v45 }
 0x50a   :  { %v20116_v21 = vpop.f32.mrf.mxu0  ;;  %16418 = vmatmul.mubr.bf16.gmra.mxu0 %v17393_v5  ;;  %v20118_v22 = vadd.f32 %v6101_v44, %v5705_v25  ;;  %16113 = vmatprep.mubr.msk.bf16.mxu1 %vm17630_vm0, %v22750_v17  ;;  %v17396_v25 = vld [vmem:[#allocation2 + $0x2e8] sm:$0xff]   ;;  %v17397_v44 = vld [vmem:[#allocation2 + $0x58] sm:$0xff]  }
 0x50b   :  { %22904 = vst [vmem:[#allocation78_spill] sm:$0xff] %v20116_v21  ;;  %16421 = vmatprep.mubr.msk.bf16.mxu0 %vm17630_vm0, %v22750_v17  ;;  %v15799_v62 = vpop.f32.mrf.mxu1  ;;  %v22907_v21 = vld [vmem:[#allocation92_spill] sm:$0xff] }
 0x50c   :  { %v16215_v16 = vpop.f32.mrf.mxu0  ;;  %v6547_v53 = vadd.f32 %v22907_v21, %v19766_v46 }
 0x50d   :  { %v6104_v13 = vpop.f32.mrf.mxu1 }
 0x50e   :  { %v20126_v4 = vpop.f32.mrf.mxu0  ;;  %v20128_v15 = vadd.f32 %v6104_v13, %v5706_v24  ;;  %v22909_v24 = vld [vmem:[#allocation93_spill] sm:$0xff] }
 0x50f   :  { %22906 = vst [vmem:[#allocation80_spill] sm:$0xff] %v20126_v4  ;;  %v15800_v45 = vpop.f32.mrf.mxu1  ;;  %v6548_v13 = vadd.f32 %v22909_v24, %v19776_v20 }
 0x510   :  { %v16216_v5 = vpop.f32.mrf.mxu0 }
 0x511   :  { %v6835_v16 = vpop.f32.mrf.mxu1  ;;  %16114 = vmatmul.mubr.bf16.gmra.mxu1 %v17397_v44  ;;  %v17399_v44 = vld [vmem:[#allocation2 + $0x60] sm:$0xff]  }
 0x512   :  { %v20132_v41 = vpop.f32.mrf.mxu0  ;;  %16422 = vmatmul.mubr.bf16.gmra.mxu0 %v17396_v25  ;;  %v20134_v62 = vadd.f32 %v6835_v16, %v6547_v53  ;;  %16117 = vmatprep.mubr.msk.bf16.mxu1 %vm17630_vm0, %v22750_v17  ;;  %v17398_v53 = vld [vmem:[#allocation2 + $0x2f0] sm:$0xff]   ;;  %v22911_v16 = vld [vmem:[#allocation94_spill] sm:$0xff] }
 0x513   :  { %22908 = vst [vmem:[#allocation81_spill] sm:$0xff] %v20132_v41  ;;  %16425 = vmatprep.mubr.msk.bf16.mxu0 %vm17630_vm0, %v22750_v17  ;;  %v15911_v1 = vpop.f32.mrf.mxu1  ;;  %v6549_v41 = vadd.f32 %v22911_v16, %v19782_v6  ;;  %v17401_v16 = vld [vmem:[#allocation2 + $0x68] sm:$0xff]  }
 0x514   :  { %v16219_v63 = vpop.f32.mrf.mxu0 }
 0x515   :  { %v6838_v46 = vpop.f32.mrf.mxu1 }
 0x516   :  { %v20142_v5 = vpop.f32.mrf.mxu0  ;;  %v20144_v21 = vadd.f32 %v6838_v46, %v6548_v13  ;;  %v22913_v13 = vld [vmem:[#allocation57_spill] sm:$0xff] }
 0x517   :  { %22910 = vst [vmem:[#allocation82_spill] sm:$0xff] %v20142_v5  ;;  %v15912_v25 = vpop.f32.mrf.mxu1  ;;  %v6550_v46 = vadd.f32 %v22913_v13, %v19792_v57 }
 0x518   :  { %v16220_v45 = vpop.f32.mrf.mxu0 }
 0x519   :  { %v6843_v63 = vpop.f32.mrf.mxu1  ;;  %16118 = vmatmul.mubr.bf16.gmra.mxu1 %v17399_v44 }
 0x51a   :  { %v20148_v4 = vpop.f32.mrf.mxu0  ;;  %16426 = vmatmul.mubr.bf16.gmra.mxu0 %v17398_v53  ;;  %v20150_v1 = vadd.f32 %v6843_v63, %v6549_v41  ;;  %16121 = vmatprep.mubr.msk.bf16.mxu1 %vm17630_vm0, %v22750_v17  ;;  %v17400_v41 = vld [vmem:[#allocation2 + $0x2f8] sm:$0xff]   ;;  %v22915_v63 = vld [vmem:[#allocation8_spill] sm:$0xff] }
 0x51b   :  { %22912 = vst [vmem:[#allocation83_spill] sm:$0xff] %v20148_v4  ;;  %16429 = vmatprep.mubr.msk.bf16.mxu0 %vm17630_vm0, %v22750_v17  ;;  %v15915_v24 = vpop.f32.mrf.mxu1  ;;  %v6551_v4 = vadd.f32 %v22915_v63, %v19798_v32  ;;  %v17406_v63 = vld [vmem:[#allocation2 + $0x70] sm:$0xff]  }
 0x51c   :  { %v16223_v20 = vpop.f32.mrf.mxu0 }
 0x51d   :  { %v6846_v6 = vpop.f32.mrf.mxu1 }
 0x51e   :  { %v20158_v45 = vpop.f32.mrf.mxu0  ;;  %v20160_v25 = vadd.f32 %v6846_v6, %v6550_v46  ;;  %v22917_v46 = vld [vmem:[#allocation59_spill] sm:$0xff] }
 0x51f   :  { %22914 = vst [vmem:[#allocation84_spill] sm:$0xff] %v20158_v45  ;;  %v15916_v44 = vpop.f32.mrf.mxu1  ;;  %v6552_v6 = vadd.f32 %v22917_v46, %v19808_v52 }
 0x520   :  { %v16224_v53 = vpop.f32.mrf.mxu0 }
 0x521   :  { %v6851_v20 = vpop.f32.mrf.mxu1  ;;  %16122 = vmatmul.mubr.bf16.gmra.mxu1 %v17401_v16 }
 0x522   :  { %v20164_v5 = vpop.f32.mrf.mxu0  ;;  %16430 = vmatmul.mubr.bf16.gmra.mxu0 %v17400_v41  ;;  %v20166_v24 = vadd.f32 %v6851_v20, %v6551_v4  ;;  %16125 = vmatprep.mubr.msk.bf16.mxu1 %vm17630_vm0, %v22750_v17  ;;  %v17405_v4 = vld [vmem:[#allocation2 + $0x300] sm:$0xff]   ;;  %v22919_v20 = vld [vmem:[#allocation10_spill] sm:$0xff] }
 0x523   :  { %22916 = vst [vmem:[#allocation85_spill] sm:$0xff] %v20164_v5  ;;  %16433 = vmatprep.mubr.msk.bf16.mxu0 %vm17630_vm0, %v22750_v17  ;;  %v15919_v13 = vpop.f32.mrf.mxu1  ;;  %v6553_v5 = vadd.f32 %v22919_v20, %v19814_v50  ;;  %v17410_v20 = vld [vmem:[#allocation2 + $0x78] sm:$0xff]  }
 0x524   :  { %v16227_v57 = vpop.f32.mrf.mxu0 }
 0x525   :  { %v6854_v32 = vpop.f32.mrf.mxu1 }
 0x526   :  { %v20174_v53 = vpop.f32.mrf.mxu0  ;;  %v20176_v44 = vadd.f32 %v6854_v32, %v6552_v6  ;;  %v22921_v6 = vld [vmem:[#allocation61_spill] sm:$0xff] }
 0x527   :  { %22918 = vst [vmem:[#allocation86_spill] sm:$0xff] %v20174_v53  ;;  %v15920_v16 = vpop.f32.mrf.mxu1  ;;  %v6554_v32 = vadd.f32 %v22921_v6, %v19824_v27 }
 0x528   :  { %v16228_v41 = vpop.f32.mrf.mxu0 }
 0x529   :  { %v6859_v57 = vpop.f32.mrf.mxu1  ;;  %16126 = vmatmul.mubr.bf16.gmra.mxu1 %v17406_v63 }
 0x52a   :  { %v20180_v45 = vpop.f32.mrf.mxu0  ;;  %16434 = vmatmul.mubr.bf16.gmra.mxu0 %v17405_v4  ;;  %v20182_v13 = vadd.f32 %v6859_v57, %v6553_v5  ;;  %16129 = vmatprep.mubr.msk.bf16.mxu1 %vm17630_vm0, %v22750_v17  ;;  %v17409_v5 = vld [vmem:[#allocation2 + $0x308] sm:$0xff]  }
 0x52b   :  { %22920 = vst [vmem:[#allocation87_spill] sm:$0xff] %v20180_v45  ;;  %16437 = vmatprep.mubr.msk.bf16.mxu0 %vm17630_vm0, %v22750_v17  ;;  %v15923_v46 = vpop.f32.mrf.mxu1  ;;  %v22923_v57 = vld [vmem:[#allocation12_spill] sm:$0xff] }
 0x52c   :  { %v16231_v52 = vpop.f32.mrf.mxu0  ;;  %v6555_v45 = vadd.f32 %v22923_v57, %v19830_v36  ;;  %v17415_v57 = vld [vmem:[#allocation2 + $0x80] sm:$0xff]  }
 0x52d   :  { %v6862_v50 = vpop.f32.mrf.mxu1 }
 0x52e   :  { %v20190_v41 = vpop.f32.mrf.mxu0  ;;  %v20192_v16 = vadd.f32 %v6862_v50, %v6554_v32  ;;  %v22925_v32 = vld [vmem:[#allocation63_spill] sm:$0xff] }
 0x52f   :  { %22922 = vst [vmem:[#allocation88_spill] sm:$0xff] %v20190_v41  ;;  %v15924_v63 = vpop.f32.mrf.mxu1  ;;  %v6556_v50 = vadd.f32 %v22925_v32, %v19840_v7 }
 0x530   :  { %v16232_v4 = vpop.f32.mrf.mxu0 }
 0x531   :  { %v6867_v52 = vpop.f32.mrf.mxu1  ;;  %16130 = vmatmul.mubr.bf16.gmra.mxu1 %v17410_v20 }
 0x532   :  { %v20196_v53 = vpop.f32.mrf.mxu0  ;;  %16438 = vmatmul.mubr.bf16.gmra.mxu0 %v17409_v5  ;;  %v20198_v46 = vadd.f32 %v6867_v52, %v6555_v45  ;;  %16133 = vmatprep.mubr.msk.bf16.mxu1 %vm17630_vm0, %v22750_v17  ;;  %v17414_v45 = vld [vmem:[#allocation2 + $0x310] sm:$0xff]   ;;  %v22927_v52 = vld [vmem:[#allocation14_spill] sm:$0xff] }
 0x533   :  { %22924 = vst [vmem:[#allocation89_spill] sm:$0xff] %v20196_v53  ;;  %16441 = vmatprep.mubr.msk.bf16.mxu0 %vm17630_vm0, %v22750_v17  ;;  %v15927_v6 = vpop.f32.mrf.mxu1  ;;  %v6557_v53 = vadd.f32 %v22927_v52, %v19846_v42  ;;  %v17419_v52 = vld [vmem:[#allocation2 + $0x88] sm:$0xff]  }
 0x534   :  { %v16235_v27 = vpop.f32.mrf.mxu0 }
 0x535   :  { %v6870_v36 = vpop.f32.mrf.mxu1 }
 0x536   :  { %v20206_v4 = vpop.f32.mrf.mxu0  ;;  %v20208_v63 = vadd.f32 %v6870_v36, %v6556_v50  ;;  %v22929_v50 = vld [vmem:[#allocation65_spill] sm:$0xff] }
 0x537   :  { %22926 = vst [vmem:[#allocation90_spill] sm:$0xff] %v20206_v4  ;;  %v15928_v20 = vpop.f32.mrf.mxu1  ;;  %v6558_v36 = vadd.f32 %v22929_v50, %v19856_v19 }
 0x538   :  { %v16236_v5 = vpop.f32.mrf.mxu0 }
 0x539   :  { %v6875_v27 = vpop.f32.mrf.mxu1  ;;  %16134 = vmatmul.mubr.bf16.gmra.mxu1 %v17415_v57 }
 0x53a   :  { %v20212_v41 = vpop.f32.mrf.mxu0  ;;  %16442 = vmatmul.mubr.bf16.gmra.mxu0 %v17414_v45  ;;  %v20214_v6 = vadd.f32 %v6875_v27, %v6557_v53  ;;  %16137 = vmatprep.mubr.msk.bf16.mxu1 %vm17630_vm0, %v22750_v17  ;;  %v17418_v53 = vld [vmem:[#allocation2 + $0x288] sm:$0xff]  }
 0x53b   :  { %22928 = vst [vmem:[#allocation91_spill] sm:$0xff] %v20212_v41  ;;  %16553 = vmatprep.mubr.msk.bf16.mxu0 %vm17630_vm0, %v22750_v17  ;;  %v15931_v32 = vpop.f32.mrf.mxu1  ;;  %v22931_v27 = vld [vmem:[#allocation16_spill] sm:$0xff] }
 0x53c   :  { %v16239_v7 = vpop.f32.mrf.mxu0  ;;  %v6559_v41 = vadd.f32 %v22931_v27, %v19865_v56  ;;  %v17422_v27 = vld [vmem:[#allocation2 + $0x90] sm:$0xff]  }
 0x53d   :  { %v6878_v42 = vpop.f32.mrf.mxu1 }
 0x53e   :  { %v20222_v5 = vpop.f32.mrf.mxu0  ;;  %v20224_v20 = vadd.f32 %v6878_v42, %v6558_v36  ;;  %v22933_v36 = vld [vmem:[#allocation67_spill] sm:$0xff] }
 0x53f   :  { %22930 = vst [vmem:[#allocation92_spill] sm:$0xff] %v20222_v5  ;;  %v15932_v57 = vpop.f32.mrf.mxu1  ;;  %v6560_v42 = vadd.f32 %v22933_v36, %v19879_v60 }
 0x540   :  { %v16240_v45 = vpop.f32.mrf.mxu0 }
 0x541   :  { %v6883_v7 = vpop.f32.mrf.mxu1  ;;  %16138 = vmatmul.mubr.bf16.gmra.mxu1 %v17419_v52 }
 0x542   :  { %v20228_v4 = vpop.f32.mrf.mxu0  ;;  %16554 = vmatmul.mubr.bf16.vlgmr.msra.gmra.mxu0 %v17418_v53  ;;  %v20230_v32 = vadd.f32 %v6883_v7, %v6559_v41  ;;  %16141 = vmatprep.mubr.msk.bf16.mxu1 %vm17630_vm0, %v22750_v17  ;;  %v17421_v41 = vld [vmem:[#allocation2 + $0x290] sm:$0xff]   ;;  %v22935_v7 = vld [vmem:[#allocation18_spill] sm:$0xff] }
 0x543   :  { %22932 = vst [vmem:[#allocation93_spill] sm:$0xff] %v20228_v4  ;;  %16557 = vmatprep.mubr.msk.bf16.mxu0 %vm17630_vm0, %v22750_v17  ;;  %v15935_v50 = vpop.f32.mrf.mxu1  ;;  %v6561_v4 = vadd.f32 %v22935_v7, %v19889_v18  ;;  %v17424_v7 = vld [vmem:[#allocation2 + $0x98] sm:$0xff]  }
 0x544   :  { %v16243_v19 = vpop.f32.mrf.mxu0 }
 0x545   :  { %v6886_v56 = vpop.f32.mrf.mxu1 }
 0x546   :  { %v20238_v45 = vpop.f32.mrf.mxu0  ;;  %v20240_v57 = vadd.f32 %v6886_v56, %v6560_v42  ;;  %v22937_v42 = vld [vmem:[#allocation69_spill] sm:$0xff] }
 0x547   :  { %22934 = vst [vmem:[#allocation94_spill] sm:$0xff] %v20238_v45  ;;  %v15936_v52 = vpop.f32.mrf.mxu1  ;;  %v6562_v56 = vadd.f32 %v22937_v42, %v19903_v38 }
 0x548   :  { %v16244_v53 = vpop.f32.mrf.mxu0 }
 0x549   :  { %v6891_v19 = vpop.f32.mrf.mxu1  ;;  %16142 = vmatmul.mubr.bf16.gmra.mxu1 %v17422_v27 }
 0x54a   :  { %v20244_v5 = vpop.f32.mrf.mxu0  ;;  %16558 = vmatmul.mubr.bf16.gmra.mxu0 %v17421_v41  ;;  %v20246_v50 = vadd.f32 %v6891_v19, %v6561_v4  ;;  %16145 = vmatprep.mubr.msk.bf16.mxu1 %vm17630_vm0, %v22750_v17  ;;  %v17423_v4 = vld [vmem:[#allocation2 + $0x298] sm:$0xff]   ;;  %v22939_v19 = vld [vmem:[#allocation20_spill] sm:$0xff] }
 0x54b   :  { %22936 = vst [vmem:[#allocation57_spill] sm:$0xff] %v20244_v5  ;;  %16561 = vmatprep.mubr.msk.bf16.mxu0 %vm17630_vm0, %v22750_v17  ;;  %v15939_v36 = vpop.f32.mrf.mxu1  ;;  %v6563_v5 = vadd.f32 %v22939_v19, %v19913_v35  ;;  %v17426_v19 = vld [vmem:[#allocation2 + $0xa0] sm:$0xff]  }
 0x54c   :  { %v16247_v60 = vpop.f32.mrf.mxu0 }
 0x54d   :  { %v6894_v18 = vpop.f32.mrf.mxu1 }
 0x54e   :  { %v20254_v53 = vpop.f32.mrf.mxu0  ;;  %v20256_v52 = vadd.f32 %v6894_v18, %v6562_v56  ;;  %v22941_v56 = vld [vmem:[#allocation71_spill] sm:$0xff] }
 0x54f   :  { %22938 = vst [vmem:[#allocation8_spill] sm:$0xff] %v20254_v53  ;;  %v15940_v27 = vpop.f32.mrf.mxu1  ;;  %v6564_v18 = vadd.f32 %v22941_v56, %v19927_v61 }
 0x550   :  { %v16248_v41 = vpop.f32.mrf.mxu0 }
 0x551   :  { %v6899_v60 = vpop.f32.mrf.mxu1  ;;  %16146 = vmatmul.mubr.bf16.gmra.mxu1 %v17424_v7 }
 0x552   :  { %v20260_v45 = vpop.f32.mrf.mxu0  ;;  %16562 = vmatmul.mubr.bf16.gmra.mxu0 %v17423_v4  ;;  %v20262_v36 = vadd.f32 %v6899_v60, %v6563_v5  ;;  %16149 = vmatprep.mubr.msk.bf16.mxu1 %vm17630_vm0, %v22750_v17  ;;  %v17425_v5 = vld [vmem:[#allocation2 + $0x2a0] sm:$0xff]   ;;  %v22943_v60 = vld [vmem:[#allocation22_spill] sm:$0xff] }
 0x553   :  { %22940 = vst [vmem:[#allocation59_spill] sm:$0xff] %v20260_v45  ;;  %16565 = vmatprep.mubr.msk.bf16.mxu0 %vm17630_vm0, %v22750_v17  ;;  %v15943_v42 = vpop.f32.mrf.mxu1  ;;  %v6565_v45 = vadd.f32 %v22943_v60, %v19937_v49  ;;  %v17429_v60 = vld [vmem:[#allocation2 + $0xa8] sm:$0xff]  }
 0x554   :  { %v16251_v38 = vpop.f32.mrf.mxu0 }
 0x555   :  { %v6902_v35 = vpop.f32.mrf.mxu1 }
 0x556   :  { %v20270_v41 = vpop.f32.mrf.mxu0  ;;  %v20272_v27 = vadd.f32 %v6902_v35, %v6564_v18  ;;  %v22945_v18 = vld [vmem:[#allocation73_spill] sm:$0xff] }
 0x557   :  { %22942 = vst [vmem:[#allocation10_spill] sm:$0xff] %v20270_v41  ;;  %v15944_v7 = vpop.f32.mrf.mxu1  ;;  %v6566_v35 = vadd.f32 %v22945_v18, %v19951_v40 }
 0x558   :  { %v16252_v4 = vpop.f32.mrf.mxu0 }
 0x559   :  { %v6907_v38 = vpop.f32.mrf.mxu1  ;;  %16150 = vmatmul.mubr.bf16.gmra.mxu1 %v17426_v19 }
 0x55a   :  { %v20276_v53 = vpop.f32.mrf.mxu0  ;;  %16566 = vmatmul.mubr.bf16.gmra.mxu0 %v17425_v5  ;;  %v20278_v42 = vadd.f32 %v6907_v38, %v6565_v45  ;;  %16153 = vmatprep.mubr.msk.bf16.mxu1 %vm17630_vm0, %v22750_v17  ;;  %v17428_v45 = vld [vmem:[#allocation2 + $0x2a8] sm:$0xff]  }
 0x55b   :  { %22944 = vst [vmem:[#allocation61_spill] sm:$0xff] %v20276_v53  ;;  %16569 = vmatprep.mubr.msk.bf16.mxu0 %vm17630_vm0, %v22750_v17  ;;  %v15947_v56 = vpop.f32.mrf.mxu1  ;;  %v22947_v38 = vld [vmem:[#allocation24_spill] sm:$0xff] }
 0x55c   :  { %v16255_v61 = vpop.f32.mrf.mxu0  ;;  %v6567_v53 = vadd.f32 %v22947_v38, %v19958_v8  ;;  %v17431_v38 = vld [vmem:[#allocation2 + $0xb0] sm:$0xff]  }
 0x55d   :  { %v6910_v49 = vpop.f32.mrf.mxu1 }
 0x55e   :  { %v20286_v4 = vpop.f32.mrf.mxu0  ;;  %v20288_v7 = vadd.f32 %v6910_v49, %v6566_v35  ;;  %v22949_v35 = vld [vmem:[#allocation75_spill] sm:$0xff] }
 0x55f   :  { %22946 = vst [vmem:[#allocation12_spill] sm:$0xff] %v20286_v4  ;;  %v15948_v19 = vpop.f32.mrf.mxu1  ;;  %v6568_v49 = vadd.f32 %v22949_v35, %v19968_v2 }
 0x560   :  { %v16256_v5 = vpop.f32.mrf.mxu0 }
 0x561   :  { %v6915_v61 = vpop.f32.mrf.mxu1  ;;  %16154 = vmatmul.mubr.bf16.gmra.mxu1 %v17429_v60 }
 0x562   :  { %v20292_v41 = vpop.f32.mrf.mxu0  ;;  %16570 = vmatmul.mubr.bf16.gmra.mxu0 %v17428_v45  ;;  %v20294_v56 = vadd.f32 %v6915_v61, %v6567_v53  ;;  %16157 = vmatprep.mubr.msk.bf16.mxu1 %vm17630_vm0, %v22750_v17  ;;  %v17430_v53 = vld [vmem:[#allocation2 + $0x2b0] sm:$0xff]   ;;  %v22951_v61 = vld [vmem:[#allocation26_spill] sm:$0xff] }
 0x563   :  { %22948 = vst [vmem:[#allocation63_spill] sm:$0xff] %v20292_v41  ;;  %16573 = vmatprep.mubr.msk.bf16.mxu0 %vm17630_vm0, %v22750_v17  ;;  %v15951_v18 = vpop.f32.mrf.mxu1  ;;  %v6569_v41 = vadd.f32 %v22951_v61, %v19974_v9  ;;  %v17434_v61 = vld [vmem:[#allocation2 + $0xb8] sm:$0xff]  }
 0x564   :  { %v16259_v40 = vpop.f32.mrf.mxu0 }
 0x565   :  { %v6918_v8 = vpop.f32.mrf.mxu1 }
 0x566   :  { %v20302_v5 = vpop.f32.mrf.mxu0  ;;  %v20304_v19 = vadd.f32 %v6918_v8, %v6568_v49  ;;  %v22953_v49 = vld [vmem:[#allocation77_spill] sm:$0xff] }
 0x567   :  { %22950 = vst [vmem:[#allocation14_spill] sm:$0xff] %v20302_v5  ;;  %v15952_v60 = vpop.f32.mrf.mxu1  ;;  %v6570_v8 = vadd.f32 %v22953_v49, %v19984_v39 }
 0x568   :  { %v16260_v45 = vpop.f32.mrf.mxu0 }
 0x569   :  { %v6923_v40 = vpop.f32.mrf.mxu1  ;;  %16158 = vmatmul.mubr.bf16.gmra.mxu1 %v17431_v38 }
 0x56a   :  { %v20308_v4 = vpop.f32.mrf.mxu0  ;;  %16574 = vmatmul.mubr.bf16.gmra.mxu0 %v17430_v53  ;;  %v20310_v18 = vadd.f32 %v6923_v40, %v6569_v41  ;;  %16161 = vmatprep.mubr.msk.bf16.mxu1 %vm17630_vm0, %v22750_v17  ;;  %v17433_v41 = vld [vmem:[#allocation2 + $0x2b8] sm:$0xff]   ;;  %v22955_v40 = vld [vmem:[#allocation28_spill] sm:$0xff] }
 0x56b   :  { %22952 = vst [vmem:[#allocation65_spill] sm:$0xff] %v20308_v4  ;;  %16577 = vmatprep.mubr.msk.bf16.mxu0 %vm17630_vm0, %v22750_v17  ;;  %v15955_v35 = vpop.f32.mrf.mxu1  ;;  %v6571_v4 = vadd.f32 %v22955_v40, %v19990_v54  ;;  %v17436_v40 = vld [vmem:[#allocation2 + $0xc0] sm:$0xff]  }
 0x56c   :  { %v16371_v2 = vpop.f32.mrf.mxu0 }
 0x56d   :  { %v6926_v9 = vpop.f32.mrf.mxu1 }
 0x56e   :  { %v20318_v45 = vpop.f32.mrf.mxu0  ;;  %v20320_v60 = vadd.f32 %v6926_v9, %v6570_v8  ;;  %v22957_v8 = vld [vmem:[#allocation79_spill] sm:$0xff] }
 0x56f   :  { %22954 = vst [vmem:[#allocation16_spill] sm:$0xff] %v20318_v45  ;;  %v15956_v38 = vpop.f32.mrf.mxu1  ;;  %v6572_v9 = vadd.f32 %v22957_v8, %v20000_v58 }
 0x570   :  { %v16372_v53 = vpop.f32.mrf.mxu0 }
 0x571   :  { %v6931_v2 = vpop.f32.mrf.mxu1  ;;  %16162 = vmatmul.mubr.bf16.gmra.mxu1 %v17434_v61 }
 0x572   :  { %v20324_v5 = vpop.f32.mrf.mxu0  ;;  %16578 = vmatmul.mubr.bf16.gmra.mxu0 %v17433_v41  ;;  %v20326_v35 = vadd.f32 %v6931_v2, %v6571_v4  ;;  %16165 = vmatprep.mubr.msk.bf16.mxu1 %vm17630_vm0, %v22750_v17  ;;  %v17435_v4 = vld [vmem:[#allocation2 + $0x2c0] sm:$0xff]   ;;  %v22959_v2 = vld [vmem:[#allocation30_spill] sm:$0xff] }
 0x573   :  { %22956 = vst [vmem:[#allocation67_spill] sm:$0xff] %v20324_v5  ;;  %16581 = vmatprep.mubr.msk.bf16.mxu0 %vm17630_vm0, %v22750_v17  ;;  %v15959_v49 = vpop.f32.mrf.mxu1  ;;  %v6573_v5 = vadd.f32 %v22959_v2, %v20006_v11  ;;  %v17437_v2 = vld [vmem:[#allocation2 + $0x2c8] sm:$0xff]  }
 0x574   :  { %v16375_v39 = vpop.f32.mrf.mxu0 }
 0x575   :  { %v6934_v54 = vpop.f32.mrf.mxu1 }
 0x576   :  { %v20334_v53 = vpop.f32.mrf.mxu0  ;;  %v20336_v38 = vadd.f32 %v6934_v54, %v6572_v9  ;;  %v22961_v9 = vld [vmem:[#allocation3_spill] sm:$0xff] }
 0x577   :  { %22958 = vst [vmem:[#allocation18_spill] sm:$0xff] %v20334_v53  ;;  %v15960_v61 = vpop.f32.mrf.mxu1  ;;  %v6574_v54 = vadd.f32 %v22961_v9, %v20016_v31 }
 0x578   :  { %v16376_v41 = vpop.f32.mrf.mxu0 }
 0x579   :  { %v6939_v39 = vpop.f32.mrf.mxu1  ;;  %16166 = vmatmul.mubr.bf16.gmra.mxu1 %v17436_v40 }
 0x57a   :  { %v20340_v45 = vpop.f32.mrf.mxu0  ;;  %16582 = vmatmul.mubr.bf16.gmra.mxu0 %v17435_v4  ;;  %v20342_v49 = vadd.f32 %v6939_v39, %v6573_v5  ;;  %16277 = vmatprep.mubr.msk.bf16.mxu1 %vm17630_vm0, %v22750_v17  ;;  %v17439_v5 = vld [vmem:[%s22600_s3 + $0x3b8] sm:$0xff]  }
 0x57b   :  { %22960 = vst [vmem:[#allocation69_spill] sm:$0xff] %v20340_v45  ;;  %16585 = vmatprep.mubr.msk.bf16.mxu0 %vm17630_vm0, %v22750_v17  ;;  %v15963_v8 = vpop.f32.mrf.mxu1  ;;  %v17438_v39 = vld [vmem:[#allocation2 + $0x1b8] sm:$0xff]   ;;  %v22963_v45 = vld [vmem:[#allocation4_spill] sm:$0xff] }
 0x57c   :  { %v16379_v58 = vpop.f32.mrf.mxu0 }
 0x57d   :  { %v6942_v11 = vpop.f32.mrf.mxu1  ;;  %v6575_v58 = vadd.f32 %v22963_v45, %v20025_v26  ;;  %v22965_v26 = vld [vmem:[#allocation5_spill] sm:$0xff] }
 0x57e   :  { %v20350_v41 = vpop.f32.mrf.mxu0  ;;  %v20352_v61 = vadd.f32 %v6942_v11, %v6574_v54  ;;  %v17444_v54 = vld [vmem:[%s22600_s3 + $0x3b0] sm:$0xff]   ;;  %v6576_v45 = vadd.f32 %v22965_v26, %v20039_v12 }
 0x57f   :  { %22962 = vst [vmem:[#allocation20_spill] sm:$0xff] %v20350_v41  ;;  %v15964_v40 = vpop.f32.mrf.mxu1 }
 0x580   :  { %v16380_v4 = vpop.f32.mrf.mxu0 }
 0x581   :  { %v6947_v31 = vpop.f32.mrf.mxu1  ;;  %16278 = vmatmul.mubr.bf16.vlgmr.msra.gmra.mxu1 %v17438_v39 }
 0x582   :  { %v20359_v8 = vpop.f32.mrf.mxu0  ;;  %16586 = vmatmul.mubr.bf16.gmra.mxu0 %v17437_v2  ;;  %v20361_v9 = vadd.f32 %v6947_v31, %v6575_v58  ;;  %16446 = vmatpush3.bf16.msra.mxu1 %v17439_v5  ;;  %v17440_v31 = vld [vmem:[#allocation2 + $0x2d0] sm:$0xff]  }
 0x583   :  { %22964 = vst [vmem:[#allocation71_spill] sm:$0xff] %v20359_v8  ;;  %16589 = vmatprep.mubr.msk.bf16.mxu0 %vm17630_vm0, %v22750_v17  ;;  %v15967_v4 = vpop.f32.mrf.mxu1  ;;  %16281 = vmatprep.mubr.msk.bf16.mxu1 %vm17630_vm0, %v22750_v17  ;;  %v17441_v8 = vld [vmem:[#allocation2 + $0x1c0] sm:$0xff]  }
 0x584   :  { %v16383_v11 = vpop.f32.mrf.mxu0  ;;  %16447 = vmatprep.subr.bf16.mxu1 %v22750_v17  ;;  %v22967_v4 = vld [vmem:[#allocation6_spill] sm:$0xff] }
 0x585   :  { %v6950_v5 = vpop.f32.mrf.mxu1  ;;  %v17449_v11 = vld [vmem:[%s22600_s3 + $0x3a8] sm:$0xff]   ;;  %v6577_v41 = vadd.f32 %v22967_v4, %v20049_v43  ;;  %v17456_v43 = vld [vmem:[%s22600_s3 + $0x3a0] sm:$0xff]  }
 0x586   :  { %v20373_v40 = vpop.f32.mrf.mxu0  ;;  %v20375_v2 = vadd.f32 %v6950_v5, %v6576_v45  ;;  %16448 = vmatpush3.bf16.msra.mxu1 %v17444_v54 }
 0x587   :  { %22966 = vst [vmem:[#allocation22_spill] sm:$0xff] %v20373_v40  ;;  %v15968_v58 = vpop.f32.mrf.mxu1  ;;  %16449 = vmatprep.subr.bf16.mxu1 %v22750_v17 }
 0x588   :  { %v16384_v39 = vpop.f32.mrf.mxu0 }
 0x589   :  { %v6955_v26 = vpop.f32.mrf.mxu1  ;;  %16282 = vmatmul.mubr.bf16.gmra.mxu1 %v17441_v8  ;;  %v22969_v39 = vld [vmem:[#allocation7_spill] sm:$0xff] }
 0x58a   :  { %v20383_v12 = vpop.f32.mrf.mxu0  ;;  %16590 = vmatmul.mubr.bf16.gmra.mxu0 %v17440_v31  ;;  %v20385_v45 = vadd.f32 %v6955_v26, %v6577_v41  ;;  %16285 = vmatprep.mubr.msk.bf16.mxu1 %vm17630_vm0, %v22750_v17  ;;  %v6578_v58 = vadd.f32 %v22969_v39, %v20063_v55 }
 0x58b   :  { %22968 = vst [vmem:[#allocation73_spill] sm:$0xff] %v20383_v12  ;;  %16593 = vmatprep.mubr.msk.bf16.mxu0 %vm17630_vm0, %v22750_v17  ;;  %v15971_v5 = vpop.f32.mrf.mxu1  ;;  %16450 = vmatpush3.bf16.msra.mxu1 %v17449_v11  ;;  %v17442_v12 = vld [vmem:[#allocation2 + $0x2d8] sm:$0xff]  }
 0x58c   :  { %v16387_v54 = vpop.f32.mrf.mxu0  ;;  %16451 = vmatprep.subr.bf16.mxu1 %v22750_v17  ;;  %v17461_v11 = vld [vmem:[%s22600_s3 + $0x398] sm:$0xff]   ;;  %v22971_v5 = vld [vmem:[#allocation9_spill] sm:$0xff] }
 0x58d   :  { %v6958_v8 = vpop.f32.mrf.mxu1  ;;  %v17443_v54 = vld [vmem:[#allocation2 + $0x1c8] sm:$0xff]   ;;  %v6579_v40 = vadd.f32 %v22971_v5, %v20073_v28  ;;  %v17465_v28 = vld [vmem:[%s22600_s3 + $0x390] sm:$0xff]  }
 0x58e   :  { %v20397_v41 = vpop.f32.mrf.mxu0  ;;  %v20399_v31 = vadd.f32 %v6958_v8, %v6578_v58 }
 0x58f   :  { %22970 = vst [vmem:[#allocation24_spill] sm:$0xff] %v20397_v41  ;;  %v15972_v26 = vpop.f32.mrf.mxu1  ;;  %16452 = vmatpush3.bf16.msra.mxu1 %v17456_v43 }
 0x590   :  { %v16388_v4 = vpop.f32.mrf.mxu0  ;;  %16453 = vmatprep.subr.bf16.mxu1 %v22750_v17 }
 0x591   :  { %v6963_v39 = vpop.f32.mrf.mxu1  ;;  %16286 = vmatmul.mubr.bf16.gmra.mxu1 %v17443_v54  ;;  %v22973_v4 = vld [vmem:[#allocation11_spill] sm:$0xff] }
 0x592   :  { %v20407_v55 = vpop.f32.mrf.mxu0  ;;  %16594 = vmatmul.mubr.bf16.gmra.mxu0 %v17442_v12  ;;  %v20409_v58 = vadd.f32 %v6963_v39, %v6579_v40  ;;  %16289 = vmatprep.mubr.msk.bf16.mxu1 %vm17630_vm0, %v22750_v17  ;;  %v6580_v12 = vadd.f32 %v22973_v4, %v20087_v34 }
 0x593   :  { %22972 = vst [vmem:[#allocation75_spill] sm:$0xff] %v20407_v55  ;;  %16597 = vmatprep.mubr.msk.bf16.mxu0 %vm17630_vm0, %v22750_v17  ;;  %v15975_v8 = vpop.f32.mrf.mxu1  ;;  %16454 = vmatpush3.bf16.msra.mxu1 %v17461_v11  ;;  %v17445_v55 = vld [vmem:[#allocation2 + $0x2e0] sm:$0xff]   ;;  %v17469_v11 = vld [vmem:[%s22600_s3 + $0x388] sm:$0xff]  }
 0x594   :  { %v16391_v43 = vpop.f32.mrf.mxu0  ;;  %16455 = vmatprep.subr.bf16.mxu1 %v22750_v17  ;;  %v22975_v8 = vld [vmem:[#allocation13_spill] sm:$0xff] }
 0x595   :  { %v6966_v26 = vpop.f32.mrf.mxu1  ;;  %v17446_v43 = vld [vmem:[#allocation2 + $0x1d0] sm:$0xff]   ;;  %v6581_v41 = vadd.f32 %v22975_v8, %v20097_v37  ;;  %v17472_v37 = vld [vmem:[%s22600_s3 + $0x380] sm:$0xff]  }
 0x596   :  { %v20421_v40 = vpop.f32.mrf.mxu0  ;;  %v20423_v54 = vadd.f32 %v6966_v26, %v6580_v12 }
 0x597   :  { %22974 = vst [vmem:[#allocation26_spill] sm:$0xff] %v20421_v40  ;;  %v15976_v39 = vpop.f32.mrf.mxu1  ;;  %16456 = vmatpush3.bf16.msra.mxu1 %v17465_v28 }
 0x598   :  { %v16392_v5 = vpop.f32.mrf.mxu0  ;;  %16457 = vmatprep.subr.bf16.mxu1 %v22750_v17 }
 0x599   :  { %v6971_v4 = vpop.f32.mrf.mxu1  ;;  %16290 = vmatmul.mubr.bf16.gmra.mxu1 %v17446_v43  ;;  %v22977_v5 = vld [vmem:[#allocation15_spill] sm:$0xff] }
 0x59a   :  { %v20431_v34 = vpop.f32.mrf.mxu0  ;;  %16598 = vmatmul.mubr.bf16.gmra.mxu0 %v17445_v55  ;;  %v20433_v12 = vadd.f32 %v6971_v4, %v6581_v41  ;;  %16293 = vmatprep.mubr.msk.bf16.mxu1 %vm17630_vm0, %v22750_v17  ;;  %v6582_v55 = vadd.f32 %v22977_v5, %v20111_v33 }
 0x59b   :  { %22976 = vst [vmem:[#allocation77_spill] sm:$0xff] %v20431_v34  ;;  %16601 = vmatprep.mubr.msk.bf16.mxu0 %vm17630_vm0, %v22750_v17  ;;  %v15979_v26 = vpop.f32.mrf.mxu1  ;;  %16458 = vmatpush3.bf16.msra.mxu1 %v17469_v11  ;;  %v17447_v34 = vld [vmem:[#allocation2 + $0x2e8] sm:$0xff]   ;;  %v22979_v11 = vld [vmem:[#allocation17_spill] sm:$0xff] }
 0x59c   :  { %v16395_v28 = vpop.f32.mrf.mxu0  ;;  %16459 = vmatprep.subr.bf16.mxu1 %v22750_v17  ;;  %v6583_v26 = vadd.f32 %v22979_v11, %v20118_v22 }
 0x59d   :  { %v6974_v39 = vpop.f32.mrf.mxu1  ;;  %v17448_v28 = vld [vmem:[#allocation2 + $0x1d8] sm:$0xff]  }
 0x59e   :  { %v20445_v41 = vpop.f32.mrf.mxu0  ;;  %v20447_v43 = vadd.f32 %v6974_v39, %v6582_v55  ;;  %v22981_v39 = vld [vmem:[#allocation19_spill] sm:$0xff] }
 0x59f   :  { %22978 = vst [vmem:[#allocation28_spill] sm:$0xff] %v20445_v41  ;;  %v15980_v4 = vpop.f32.mrf.mxu1  ;;  %16460 = vmatpush3.bf16.msra.mxu1 %v17472_v37  ;;  %v6584_v22 = vadd.f32 %v22981_v39, %v20128_v15 }
 0x5a0   :  { %v16396_v8 = vpop.f32.mrf.mxu0  ;;  %16629 = vmatprep.subr.bf16.mxu1 %v22750_v17 }
 0x5a1   :  { %v6979_v33 = vpop.f32.mrf.mxu1  ;;  %16294 = vmatmul.mubr.bf16.gmra.mxu1 %v17448_v28 }
 0x5a2   :  { %v20452_v40 = vpop.f32.mrf.mxu0  ;;  %16602 = vmatmul.mubr.bf16.gmra.mxu0 %v17447_v34  ;;  %v20454_v5 = vadd.f32 %v6979_v33, %v6583_v26  ;;  %16297 = vmatprep.mubr.msk.bf16.mxu1 %vm17630_vm0, %v22750_v17  ;;  %v17450_v26 = vld [vmem:[#allocation2 + $0x2f0] sm:$0xff]   ;;  %v17451_v33 = vld [vmem:[#allocation2 + $0x1e0] sm:$0xff]  }
 0x5a3   :  { %22980 = vst [vmem:[#allocation79_spill] sm:$0xff] %v20452_v40  ;;  %16605 = vmatprep.mubr.msk.bf16.mxu0 %vm17630_vm0, %v22750_v17  ;;  %v15983_v37 = vpop.f32.mrf.mxu1  ;;  %v22983_v40 = vld [vmem:[#allocation21_spill] sm:$0xff] }
 0x5a4   :  { %v16399_v55 = vpop.f32.mrf.mxu0  ;;  %v7425_v41 = vadd.f32 %v22983_v40, %v20134_v62 }
 0x5a5   :  { %v6982_v4 = vpop.f32.mrf.mxu1 }
 0x5a6   :  { %v20462_v8 = vpop.f32.mrf.mxu0  ;;  %v20464_v11 = vadd.f32 %v6982_v4, %v6584_v22  ;;  %v22985_v22 = vld [vmem:[#allocation23_spill] sm:$0xff] }
 0x5a7   :  { %22982 = vst [vmem:[#allocation30_spill] sm:$0xff] %v20462_v8  ;;  %v15984_v28 = vpop.f32.mrf.mxu1  ;;  %v7426_v4 = vadd.f32 %v22985_v22, %v20144_v21 }
 0x5a8   :  { %v16400_v34 = vpop.f32.mrf.mxu0 }
 0x5a9   :  { %v7713_v55 = vpop.f32.mrf.mxu1  ;;  %16298 = vmatmul.mubr.bf16.gmra.mxu1 %v17451_v33  ;;  %v17453_v33 = vld [vmem:[#allocation2 + $0x1e8] sm:$0xff]  }
 0x5aa   :  { %v20468_v53 = vpop.f32.mrf.mxu0  ;;  %16606 = vmatmul.mubr.bf16.gmra.mxu0 %v17450_v26  ;;  %v20470_v37 = vadd.f32 %v7713_v55, %v7425_v41  ;;  %16301 = vmatprep.mubr.msk.bf16.mxu1 %vm17630_vm0, %v22750_v17  ;;  %v17452_v41 = vld [vmem:[#allocation2 + $0x2f8] sm:$0xff]   ;;  %v22987_v55 = vld [vmem:[#allocation25_spill] sm:$0xff] }
 0x5ab   :  { %22984 = vst [vmem:[#allocation3_spill] sm:$0xff] %v20468_v53  ;;  %16609 = vmatprep.mubr.msk.bf16.mxu0 %vm17630_vm0, %v22750_v17  ;;  %v16095_v39 = vpop.f32.mrf.mxu1  ;;  %v7427_v53 = vadd.f32 %v22987_v55, %v20150_v1  ;;  %v17455_v55 = vld [vmem:[#allocation2 + $0x1f0] sm:$0xff]  }
 0x5ac   :  { %v16403_v15 = vpop.f32.mrf.mxu0 }
 0x5ad   :  { %v7716_v62 = vpop.f32.mrf.mxu1 }
 0x5ae   :  { %v20478_v34 = vpop.f32.mrf.mxu0  ;;  %v20480_v40 = vadd.f32 %v7716_v62, %v7426_v4  ;;  %v22989_v4 = vld [vmem:[#allocation27_spill] sm:$0xff] }
 0x5af   :  { %22986 = vst [vmem:[#allocation4_spill] sm:$0xff] %v20478_v34  ;;  %v16096_v26 = vpop.f32.mrf.mxu1  ;;  %v7428_v62 = vadd.f32 %v22989_v4, %v20160_v25 }
 0x5b0   :  { %v16404_v28 = vpop.f32.mrf.mxu0 }
 0x5b1   :  { %v7721_v15 = vpop.f32.mrf.mxu1  ;;  %16302 = vmatmul.mubr.bf16.gmra.mxu1 %v17453_v33 }
 0x5b2   :  { %v20484_v8 = vpop.f32.mrf.mxu0  ;;  %16610 = vmatmul.mubr.bf16.gmra.mxu0 %v17452_v41  ;;  %v20486_v39 = vadd.f32 %v7721_v15, %v7427_v53  ;;  %16305 = vmatprep.mubr.msk.bf16.mxu1 %vm17630_vm0, %v22750_v17  ;;  %v17454_v53 = vld [vmem:[#allocation2 + $0x300] sm:$0xff]   ;;  %v22991_v15 = vld [vmem:[#allocation29_spill] sm:$0xff] }
 0x5b3   :  { %22988 = vst [vmem:[#allocation5_spill] sm:$0xff] %v20484_v8  ;;  %16613 = vmatprep.mubr.msk.bf16.mxu0 %vm17630_vm0, %v22750_v17  ;;  %v16099_v22 = vpop.f32.mrf.mxu1  ;;  %v7429_v8 = vadd.f32 %v22991_v15, %v20166_v24  ;;  %v17458_v15 = vld [vmem:[#allocation2 + $0x1f8] sm:$0xff]  }
 0x5b4   :  { %v16407_v21 = vpop.f32.mrf.mxu0 }
 0x5b5   :  { %v7724_v1 = vpop.f32.mrf.mxu1 }
 0x5b6   :  { %v20494_v28 = vpop.f32.mrf.mxu0  ;;  %v20496_v26 = vadd.f32 %v7724_v1, %v7428_v62  ;;  %v22993_v62 = vld [vmem:[#allocation31_spill] sm:$0xff] }
 0x5b7   :  { %22990 = vst [vmem:[#allocation6_spill] sm:$0xff] %v20494_v28  ;;  %v16100_v33 = vpop.f32.mrf.mxu1  ;;  %v7430_v1 = vadd.f32 %v22993_v62, %v20176_v44 }
 0x5b8   :  { %v16408_v41 = vpop.f32.mrf.mxu0 }
 0x5b9   :  { %v7729_v21 = vpop.f32.mrf.mxu1  ;;  %16306 = vmatmul.mubr.bf16.gmra.mxu1 %v17455_v55 }
 0x5ba   :  { %v20500_v34 = vpop.f32.mrf.mxu0  ;;  %16614 = vmatmul.mubr.bf16.gmra.mxu0 %v17454_v53  ;;  %v20502_v22 = vadd.f32 %v7729_v21, %v7429_v8  ;;  %16309 = vmatprep.mubr.msk.bf16.mxu1 %vm17630_vm0, %v22750_v17  ;;  %v17457_v8 = vld [vmem:[#allocation2 + $0x308] sm:$0xff]  }
 0x5bb   :  { %22992 = vst [vmem:[#allocation7_spill] sm:$0xff] %v20500_v34  ;;  %16617 = vmatprep.mubr.msk.bf16.mxu0 %vm17630_vm0, %v22750_v17  ;;  %v16103_v4 = vpop.f32.mrf.mxu1  ;;  %v22995_v21 = vld [vmem:[#allocation32_spill] sm:$0xff] }
 0x5bc   :  { %v16411_v25 = vpop.f32.mrf.mxu0  ;;  %v7431_v34 = vadd.f32 %v22995_v21, %v20182_v13  ;;  %v17460_v21 = vld [vmem:[#allocation2 + $0x200] sm:$0xff]  }
 0x5bd   :  { %v7732_v24 = vpop.f32.mrf.mxu1 }
 0x5be   :  { %v20510_v41 = vpop.f32.mrf.mxu0  ;;  %v20512_v33 = vadd.f32 %v7732_v24, %v7430_v1  ;;  %v22997_v1 = vld [vmem:[#allocation33_spill] sm:$0xff] }
 0x5bf   :  { %22994 = vst [vmem:[#allocation9_spill] sm:$0xff] %v20510_v41  ;;  %v16104_v55 = vpop.f32.mrf.mxu1  ;;  %v7432_v24 = vadd.f32 %v22997_v1, %v20192_v16 }
 0x5c0   :  { %v16412_v53 = vpop.f32.mrf.mxu0 }
 0x5c1   :  { %v7737_v25 = vpop.f32.mrf.mxu1  ;;  %16310 = vmatmul.mubr.bf16.gmra.mxu1 %v17458_v15 }
 0x5c2   :  { %v20516_v28 = vpop.f32.mrf.mxu0  ;;  %16618 = vmatmul.mubr.bf16.gmra.mxu0 %v17457_v8  ;;  %v20518_v4 = vadd.f32 %v7737_v25, %v7431_v34  ;;  %16313 = vmatprep.mubr.msk.bf16.mxu1 %vm17630_vm0, %v22750_v17  ;;  %v17459_v34 = vld [vmem:[#allocation2 + $0x310] sm:$0xff]   ;;  %v22999_v25 = vld [vmem:[#allocation34_spill] sm:$0xff] }
 0x5c3   :  { %22996 = vst [vmem:[#allocation11_spill] sm:$0xff] %v20516_v28  ;;  %16621 = vmatprep.mubr.msk.bf16.mxu0 %vm17630_vm0, %v22750_v17  ;;  %v16107_v62 = vpop.f32.mrf.mxu1  ;;  %v7433_v28 = vadd.f32 %v22999_v25, %v20198_v46  ;;  %v17463_v25 = vld [vmem:[#allocation2 + $0x208] sm:$0xff]  }
 0x5c4   :  { %v16415_v44 = vpop.f32.mrf.mxu0 }
 0x5c5   :  { %v7740_v13 = vpop.f32.mrf.mxu1 }
 0x5c6   :  { %v20526_v53 = vpop.f32.mrf.mxu0  ;;  %v20528_v55 = vadd.f32 %v7740_v13, %v7432_v24  ;;  %v23001_v24 = vld [vmem:[#allocation35_spill] sm:$0xff] }
 0x5c7   :  { %22998 = vst [vmem:[#allocation13_spill] sm:$0xff] %v20526_v53  ;;  %v16108_v15 = vpop.f32.mrf.mxu1  ;;  %v7434_v13 = vadd.f32 %v23001_v24, %v20208_v63 }
 0x5c8   :  { %v16416_v8 = vpop.f32.mrf.mxu0 }
 0x5c9   :  { %v7745_v44 = vpop.f32.mrf.mxu1  ;;  %16314 = vmatmul.mubr.bf16.gmra.mxu1 %v17460_v21 }
 0x5ca   :  { %v20532_v41 = vpop.f32.mrf.mxu0  ;;  %16622 = vmatmul.mubr.bf16.gmra.mxu0 %v17459_v34  ;;  %v20534_v62 = vadd.f32 %v7745_v44, %v7433_v28  ;;  %16317 = vmatprep.mubr.msk.bf16.mxu1 %vm17630_vm0, %v22750_v17  ;;  %v17462_v28 = vld [vmem:[#allocation2 + $0x318] sm:$0xff]   ;;  %v23003_v44 = vld [vmem:[#allocation36_spill] sm:$0xff] }
 0x5cb   :  { %23000 = vst [vmem:[#allocation15_spill] sm:$0xff] %v20532_v41  ;;  %16625 = vmatprep.mubr.msk.bf16.mxu0 %vm17630_vm0, %v22750_v17  ;;  %v16111_v1 = vpop.f32.mrf.mxu1  ;;  %v7435_v41 = vadd.f32 %v23003_v44, %v20214_v6  ;;  %v23007_v44 = vld [vmem:[#allocation38_spill] sm:$0xff] }
 0x5cc   :  { %v16419_v16 = vpop.f32.mrf.mxu0 }
 0x5cd   :  { %v7748_v46 = vpop.f32.mrf.mxu1 }
 0x5ce   :  { %v20542_v8 = vpop.f32.mrf.mxu0  ;;  %v20544_v15 = vadd.f32 %v7748_v46, %v7434_v13  ;;  %v23005_v13 = vld [vmem:[#allocation37_spill] sm:$0xff] }
 0x5cf   :  { %23002 = vst [vmem:[#allocation17_spill] sm:$0xff] %v20542_v8  ;;  %v16112_v21 = vpop.f32.mrf.mxu1  ;;  %v7436_v46 = vadd.f32 %v23005_v13, %v20224_v20  ;;  %v23009_v13 = vld [vmem:[#allocation39_spill] sm:$0xff] }
 0x5d0   :  { %v16420_v34 = vpop.f32.mrf.mxu0 }
 0x5d1   :  { %v7753_v16 = vpop.f32.mrf.mxu1  ;;  %16318 = vmatmul.mubr.bf16.gmra.mxu1 %v17463_v25 }
 0x5d2   :  { %v20548_v53 = vpop.f32.mrf.mxu0  ;;  %16626 = vmatmul.mubr.bf16.gmra.mxu0 %v17462_v28  ;;  %v20550_v1 = vadd.f32 %v7753_v16, %v7435_v41  ;;  %16321 = vmatprep.mubr.msk.bf16.mxu1 %vm17630_vm0, %v22750_v17  ;;  %v17464_v41 = vld [vmem:[#allocation2 + $0x210] sm:$0xff]   ;;  %v7437_v16 = vadd.f32 %v23007_v44, %v20230_v32 }
 0x5d3   :  { %23004 = vst [vmem:[#allocation19_spill] sm:$0xff] %v20548_v53  ;;  %16705 = vmatprep.mubr.msk.bf16.mxu0 %vm17630_vm0, %v22750_v17  ;;  %v16115_v24 = vpop.f32.mrf.mxu1 }
 0x5d4   :  { %v16423_v63 = vpop.f32.mrf.mxu0 }
 0x5d5   :  { %v7756_v6 = vpop.f32.mrf.mxu1 }
 0x5d6   :  { %v20558_v34 = vpop.f32.mrf.mxu0  ;;  %v20560_v21 = vadd.f32 %v7756_v6, %v7436_v46  ;;  %v7438_v46 = vadd.f32 %v23009_v13, %v20240_v57 }
 0x5d7   :  { %23006 = vst [vmem:[#allocation21_spill] sm:$0xff] %v20558_v34  ;;  %v16116_v25 = vpop.f32.mrf.mxu1  ;;  %v10166_v34 = vld [vmem:[%s22602_s11 + $0xc0] sm:$0xff] }
 0x5d8   :  { %v16424_v28 = vpop.f32.mrf.mxu0 }
 0x5d9   :  { %v7761_v8 = vpop.f32.mrf.mxu1  ;;  %16322 = vmatmul.mubr.bf16.gmra.mxu1 %v17464_v41  ;;  %v23011_v41 = vld [vmem:[#allocation40_spill] sm:$0xff] }
 0x5da   :  { %v20564_v53 = vpop.f32.mrf.mxu0  ;;  %v20566_v63 = vadd.f32 %v7761_v8, %v7437_v16  ;;  %16325 = vmatprep.mubr.msk.bf16.mxu1 %vm17630_vm0, %v22750_v17  ;;  %v7439_v8 = vadd.f32 %v23011_v41, %v20246_v50  ;;  %v17631_v16 = vmov 0   ;;  %v10144_v50 = vld [vmem:[%s22602_s11 + $0x10] sm:$0xff] }
 0x5db   :  { %23008 = vst [vmem:[#allocation23_spill] sm:$0xff] %v20564_v53  ;;  %v16119_v24 = vpop.f32.mrf.mxu1  ;;  %v17466_v53 = vld [vmem:[#allocation2 + $0x218] sm:$0xff]   ;;  %16952 = vset.pattern.permute.xlu0 %v17631_v16  ;;  %16953 = vset.pattern.permute.xlu1 %v17631_v16 }
 0x5dc   :  { %v16427_v20 = vpop.f32.mrf.mxu0  ;;  %10194 = vperm.xlu1 %16953, %v10144_v50  }
 0x5dd   :  { %v7764_v28 = vpop.f32.mrf.mxu1  ;;  %v10142_v20 = vld [vmem:[%s22602_s11] sm:$0xff] }
 0x5de   :  { %v20572_v6 = vpop.f32.mrf.mxu0  ;;  %v20574_v25 = vadd.f32 %v7764_v28, %v7438_v46  ;;  %10184 = vperm.xlu0 %16952, %v10142_v20  }
 0x5df   :  { %23010 = vst [vmem:[#allocation25_spill] sm:$0xff] %v20572_v6  ;;  %v16120_v44 = vpop.f32.mrf.mxu1  ;;  %v10162_v6 = vld [vmem:[%s22602_s11 + $0xa0] sm:$0xff] }
 0x5e0   :  { %v16428_v32 = vpop.f32.mrf.mxu0  ;;  %v23013_v44 = vld [vmem:[#allocation41_spill] sm:$0xff] }
 0x5e1   :  { %v7769_v57 = vpop.f32.mrf.mxu1  ;;  %16326 = vmatmul.mubr.bf16.gmra.mxu1 %v17466_v53  ;;  %v10143_v32 = vld [vmem:[%s22602_s11 + $0x8] sm:$0xff]  ;;  %v7440_v41 = vadd.f32 %v23013_v44, %v20256_v52  ;;  %v23015_v52 = vld [vmem:[#allocation42_spill] sm:$0xff] }
 0x5e2   :  { %v20581_v24 = vpop.f32.mrf.mxu0  ;;  %v20583_v13 = vadd.f32 %v7769_v57, %v7439_v8  ;;  %16329 = vmatprep.mubr.msk.bf16.mxu1 %vm17630_vm0, %v22750_v17  ;;  %10189 = vperm.xlu0 %16952, %v10143_v32   ;;  %v7441_v50 = vadd.f32 %v23015_v52, %v20262_v36  ;;  %v10148_v36 = vld [vmem:[%s22602_s11 + $0x30] sm:$0xff] }
 0x5e3   :  { %23012 = vst [vmem:[#allocation27_spill] sm:$0xff] %v20581_v24  ;;  %v16123_v28 = vpop.f32.mrf.mxu1  ;;  %v10146_v24 = vld [vmem:[%s22602_s11 + $0x20] sm:$0xff] }
 0x5e4   :  { %v16431_v46 = vpop.f32.mrf.mxu0  ;;  %v10145_v28 = vld [vmem:[%s22602_s11 + $0x18] sm:$0xff] }
 0x5e5   :  { %v7772_v8 = vpop.f32.mrf.mxu1  ;;  %v17467_v46 = vld [vmem:[#allocation2 + $0x220] sm:$0xff]   ;;  %10199 = vperm.xlu1 %16953, %v10145_v28  }
 0x5e6   :  { %v20595_v53 = vpop.f32.mrf.mxu0  ;;  %v20597_v16 = vadd.f32 %v7772_v8, %v7440_v41  ;;  %10204 = vperm.xlu0 %16952, %v10146_v24   ;;  %v23017_v28 = vld [vmem:[#allocation43_spill] sm:$0xff] }
 0x5e7   :  { %23014 = vst [vmem:[#allocation29_spill] sm:$0xff] %v20595_v53  ;;  %v16124_v57 = vpop.f32.mrf.mxu1  ;;  %v7442_v52 = vadd.f32 %v23017_v28, %v20272_v27  ;;  %v10150_v53 = vld [vmem:[%s22602_s11 + $0x40] sm:$0xff]  ;;  %v23019_v27 = vld [vmem:[#allocation44_spill] sm:$0xff] }
 0x5e8   :  { %v16432_v20 = vpop.f32.mrf.mxu0  ;;  %v10147_v57 = vld [vmem:[%s22602_s11 + $0x28] sm:$0xff] }
 0x5e9   :  { %v7777_v32 = vpop.f32.mrf.mxu1  ;;  %16330 = vmatmul.mubr.bf16.gmra.mxu1 %v17467_v46  ;;  %10209 = vperm.xlu1 %16953, %v10147_v57   ;;  %v7443_v57 = vadd.f32 %v23019_v27, %v20278_v42  ;;  %v10152_v42 = vld [vmem:[%s22602_s11 + $0x50] sm:$0xff] }
 0x5ea   :  { %v20607_v44 = vpop.f32.mrf.mxu0  ;;  %v20609_v41 = vadd.f32 %v7777_v32, %v7441_v50  ;;  %16333 = vmatprep.mubr.msk.bf16.mxu1 %vm17630_vm0, %v22750_v17  ;;  %10214 = vperm.xlu0 %16952, %v10148_v36  }
 0x5eb   :  { %23016 = vst [vmem:[#allocation31_spill] sm:$0xff] %v20607_v44  ;;  %v16127_v20 = vpop.f32.mrf.mxu1  ;;  %v10149_v44 = vld [vmem:[%s22602_s11 + $0x38] sm:$0xff] }
 0x5ec   :  { %v16435_v8 = vpop.f32.mrf.mxu0  ;;  %v17468_v20 = vld [vmem:[#allocation2 + $0x228] sm:$0xff]  }
 0x5ed   :  { %v7780_v46 = vpop.f32.mrf.mxu1  ;;  %10219 = vperm.xlu1 %16953, %v10149_v44   ;;  %v23021_v44 = vld [vmem:[#allocation45_spill] sm:$0xff] }
 0x5ee   :  { %v20621_v24 = vpop.f32.mrf.mxu0  ;;  %v20623_v50 = vadd.f32 %v7780_v46, %v7442_v52  ;;  %10224 = vperm.xlu0 %16952, %v10150_v53   ;;  %v7444_v27 = vadd.f32 %v23021_v44, %v20288_v7  ;;  %v23023_v7 = vld [vmem:[#allocation46_spill] sm:$0xff] }
 0x5ef   :  { %23018 = vst [vmem:[#allocation32_spill] sm:$0xff] %v20621_v24  ;;  %v16128_v8 = vpop.f32.mrf.mxu1  ;;  %v10154_v24 = vld [vmem:[%s22602_s11 + $0x60] sm:$0xff] }
 0x5f0   :  { %v16436_v32 = vpop.f32.mrf.mxu0  ;;  %v10151_v8 = vld [vmem:[%s22602_s11 + $0x48] sm:$0xff] }
 0x5f1   :  { %v7785_v36 = vpop.f32.mrf.mxu1  ;;  %16334 = vmatmul.mubr.bf16.gmra.mxu1 %v17468_v20  ;;  %10229 = vperm.xlu1 %16953, %v10151_v8   ;;  %v7445_v8 = vadd.f32 %v23023_v7, %v20294_v56  ;;  %v10156_v56 = vld [vmem:[%s22602_s11 + $0x70] sm:$0xff] }
 0x5f2   :  { %v20633_v28 = vpop.f32.mrf.mxu0  ;;  %v20635_v52 = vadd.f32 %v7785_v36, %v7443_v57  ;;  %16337 = vmatprep.mubr.msk.bf16.mxu1 %vm17630_vm0, %v22750_v17  ;;  %10234 = vperm.xlu0 %16952, %v10152_v42  }
 0x5f3   :  { %23020 = vst [vmem:[#allocation33_spill] sm:$0xff] %v20633_v28  ;;  %v16131_v32 = vpop.f32.mrf.mxu1  ;;  %v10153_v28 = vld [vmem:[%s22602_s11 + $0x58] sm:$0xff] }
 0x5f4   :  { %v16439_v46 = vpop.f32.mrf.mxu0  ;;  %v17470_v32 = vld [vmem:[#allocation2 + $0x230] sm:$0xff]  }
 0x5f5   :  { %v7788_v20 = vpop.f32.mrf.mxu1  ;;  %10239 = vperm.xlu1 %16953, %v10153_v28   ;;  %v23025_v28 = vld [vmem:[#allocation47_spill] sm:$0xff] }
 0x5f6   :  { %v20647_v53 = vpop.f32.mrf.mxu0  ;;  %v20649_v57 = vadd.f32 %v7788_v20, %v7444_v27  ;;  %10244 = vperm.xlu0 %16952, %v10154_v24   ;;  %v7446_v7 = vadd.f32 %v23025_v28, %v20304_v19  ;;  %v23027_v19 = vld [vmem:[#allocation48_spill] sm:$0xff] }
 0x5f7   :  { %23022 = vst [vmem:[#allocation34_spill] sm:$0xff] %v20647_v53  ;;  %v16132_v46 = vpop.f32.mrf.mxu1  ;;  %v10158_v53 = vld [vmem:[%s22602_s11 + $0x80] sm:$0xff] }
 0x5f8   :  { %v16440_v36 = vpop.f32.mrf.mxu0  ;;  %v10155_v46 = vld [vmem:[%s22602_s11 + $0x68] sm:$0xff] }
 0x5f9   :  { %v7793_v42 = vpop.f32.mrf.mxu1  ;;  %16338 = vmatmul.mubr.bf16.gmra.mxu1 %v17470_v32  ;;  %10249 = vperm.xlu1 %16953, %v10155_v46   ;;  %v7447_v46 = vadd.f32 %v23027_v19, %v20310_v18  ;;  %v10160_v18 = vld [vmem:[%s22602_s11 + $0x90] sm:$0xff] }
 0x5fa   :  { %v20659_v44 = vpop.f32.mrf.mxu0  ;;  %v20661_v27 = vadd.f32 %v7793_v42, %v7445_v8  ;;  %16341 = vmatprep.mubr.msk.bf16.mxu1 %vm17630_vm0, %v22750_v17  ;;  %10254 = vperm.xlu0 %16952, %v10156_v56  }
 0x5fb   :  { %23024 = vst [vmem:[#allocation35_spill] sm:$0xff] %v20659_v44  ;;  %v16135_v36 = vpop.f32.mrf.mxu1  ;;  %v10157_v44 = vld [vmem:[%s22602_s11 + $0x78] sm:$0xff] }
 0x5fc   :  { %v16443_v20 = vpop.f32.mrf.mxu0  ;;  %v17471_v36 = vld [vmem:[#allocation2 + $0x238] sm:$0xff]  }
 0x5fd   :  { %v7796_v32 = vpop.f32.mrf.mxu1  ;;  %10259 = vperm.xlu1 %16953, %v10157_v44   ;;  %v23028_v44 = vld [vmem:[#allocation49_spill] sm:$0xff] }
 0x5fe   :  { %v20673_v24 = vpop.f32.mrf.mxu0  ;;  %v20675_v8 = vadd.f32 %v7796_v32, %v7446_v7  ;;  %10264 = vperm.xlu0 %16952, %v10158_v53   ;;  %v7448_v19 = vadd.f32 %v23028_v44, %v20320_v60  ;;  %v23029_v60 = vld [vmem:[#allocation50_spill] sm:$0xff] }
 0x5ff   :  { %23026 = vst [vmem:[#allocation36_spill] sm:$0xff] %v20673_v24  ;;  %v16136_v20 = vpop.f32.mrf.mxu1  ;;  %v10161_v24 = vld [vmem:[%s22602_s11 + $0x98] sm:$0xff] }
 0x600   :  { %v16444_v42 = vpop.f32.mrf.mxu0  ;;  %v10159_v20 = vld [vmem:[%s22602_s11 + $0x88] sm:$0xff] }
 0x601   :  { %v7801_v56 = vpop.f32.mrf.mxu1  ;;  %16342 = vmatmul.mubr.bf16.gmra.mxu1 %v17471_v36  ;;  %10269 = vperm.xlu1 %16953, %v10159_v20   ;;  %v7449_v20 = vadd.f32 %v23029_v60, %v20326_v35  ;;  %v10164_v35 = vld [vmem:[%s22602_s11 + $0xb0] sm:$0xff] }
 0x602   :  { %v20685_v28 = vpop.f32.mrf.mxu0  ;;  %v20687_v7 = vadd.f32 %v7801_v56, %v7447_v46  ;;  %16345 = vmatprep.mubr.msk.bf16.mxu1 %vm17630_vm0, %v22750_v17  ;;  %10274 = vperm.xlu0 %16952, %v10160_v18  }
 0x603   :  { %v16139_v42 = vpop.f32.mrf.mxu1 }
 0x604   :  { %v16555_v32 = vpop.f32.mrf.mxu0  ;;  %v17473_v42 = vld [vmem:[#allocation2 + $0x240] sm:$0xff]  }
 0x605   :  { %v7804_v36 = vpop.f32.mrf.mxu1  ;;  %10279 = vperm.xlu1 %16953, %v10161_v24   ;;  %v7450_v24 = vadd.f32 %v19838_v59, %v20336_v38  ;;  %v23031_v59 = vld [vmem:[#allocation51_spill] sm:$0xff] }
 0x606   :  { %v20699_v53 = vpop.f32.mrf.mxu0  ;;  %v20701_v46 = vadd.f32 %v7804_v36, %v7448_v19  ;;  %10284 = vperm.xlu0 %16952, %v10162_v6   ;;  %v7451_v38 = vadd.f32 %v23031_v59, %v20342_v49  ;;  %v10168_v49 = vld [vmem:[%s22602_s11 + $0xd0] sm:$0xff] }
 0x607   :  { %v16140_v32 = vpop.f32.mrf.mxu1 }
 0x608   :  { %v16556_v56 = vpop.f32.mrf.mxu0  ;;  %v10163_v32 = vld [vmem:[%s22602_s11 + $0xa8] sm:$0xff] }
 0x609   :  { %v7809_v18 = vpop.f32.mrf.mxu1  ;;  %16346 = vmatmul.mubr.bf16.gmra.mxu1 %v17473_v42  ;;  %10289 = vperm.xlu1 %16953, %v10163_v32  }
 0x60a   :  { %v20711_v44 = vpop.f32.mrf.mxu0  ;;  %v20713_v19 = vadd.f32 %v7809_v18, %v7449_v20  ;;  %16349 = vmatprep.mubr.msk.bf16.mxu1 %vm17630_vm0, %v22750_v17  ;;  %10294 = vperm.xlu0 %16952, %v10164_v35  }
 0x60b   :  { %v16143_v56 = vpop.f32.mrf.mxu1 }
 0x60c   :  { %v16559_v36 = vpop.f32.mrf.mxu0  ;;  %v10165_v56 = vld [vmem:[%s22602_s11 + $0xb8] sm:$0xff] }
 0x60d   :  { %v7812_v42 = vpop.f32.mrf.mxu1  ;;  %v17474_v36 = vld [vmem:[#allocation2 + $0x248] sm:$0xff]   ;;  %10299 = vperm.xlu1 %16953, %v10165_v56  }
 0x60e   :  { %v20725_v6 = vpop.f32.mrf.mxu0  ;;  %v20727_v60 = vadd.f32 %v7812_v42, %v7450_v24  ;;  %10304 = vperm.xlu0 %16952, %v10166_v34   ;;  %v23033_v56 = vld [vmem:[#allocation52_spill] sm:$0xff] }
 0x60f   :  { %23030 = vst [vmem:[#allocation37_spill] sm:$0xff] %v20725_v6  ;;  %v16144_v18 = vpop.f32.mrf.mxu1  ;;  %v7452_v59 = vadd.f32 %v23033_v56, %v20352_v61  ;;  %v10170_v6 = vld [vmem:[%s22602_s11 + $0xe0] sm:$0xff]  ;;  %v23035_v61 = vld [vmem:[#allocation53_spill] sm:$0xff] }
 0x610   :  { %v16560_v20 = vpop.f32.mrf.mxu0  ;;  %v10167_v18 = vld [vmem:[%s22602_s11 + $0xc8] sm:$0xff] }
 0x611   :  { %v7817_v35 = vpop.f32.mrf.mxu1  ;;  %16350 = vmatmul.mubr.bf16.gmra.mxu1 %v17474_v36  ;;  %10309 = vperm.xlu1 %16953, %v10167_v18   ;;  %v7453_v18 = vadd.f32 %v23035_v61, %v20361_v9  ;;  %v10172_v9 = vld [vmem:[%s22602_s11 + $0xf0] sm:$0xff] }
 0x612   :  { %v20737_v32 = vpop.f32.mrf.mxu0  ;;  %v20739_v24 = vadd.f32 %v7817_v35, %v7451_v38  ;;  %16461 = vmatprep.mubr.msk.bf16.mxu1 %vm17630_vm0, %v22750_v17  ;;  %10314 = vperm.xlu0 %16952, %v10168_v49  }
 0x613   :  { %23032 = vst [vmem:[#allocation38_spill] sm:$0xff] %v20737_v32  ;;  %v16147_v20 = vpop.f32.mrf.mxu1  ;;  %v10169_v32 = vld [vmem:[%s22602_s11 + $0xd8] sm:$0xff] }
 0x614   :  { %v16563_v42 = vpop.f32.mrf.mxu0  ;;  %v17475_v20 = vld [vmem:[#allocation2 + $0x1c0] sm:$0xff]  }
 0x615   :  { %v7820_v36 = vpop.f32.mrf.mxu1  ;;  %10319 = vperm.xlu1 %16953, %v10169_v32   ;;  %v23037_v32 = vld [vmem:[#allocation54_spill] sm:$0xff] }
 0x616   :  { %v20751_v34 = vpop.f32.mrf.mxu0  ;;  %v20753_v38 = vadd.f32 %v7820_v36, %v7452_v59  ;;  %10324 = vperm.xlu0 %16952, %v10170_v6   ;;  %v7454_v61 = vadd.f32 %v23037_v32, %v20375_v2  ;;  %v23038_v2 = vld [vmem:[#allocation55_spill] sm:$0xff] }
 0x617   :  { %23034 = vst [vmem:[#allocation39_spill] sm:$0xff] %v20751_v34  ;;  %v16148_v42 = vpop.f32.mrf.mxu1  ;;  %v10174_v34 = vld [vmem:[%s22602_s11 + $0x100] sm:$0xff] }
 0x618   :  { %v16564_v35 = vpop.f32.mrf.mxu0  ;;  %v10171_v42 = vld [vmem:[%s22602_s11 + $0xe8] sm:$0xff] }
 0x619   :  { %v7825_v49 = vpop.f32.mrf.mxu1  ;;  %16462 = vmatmul.mubr.bf16.vlgmr.msra.gmra.mxu1 %v17475_v20  ;;  %10329 = vperm.xlu1 %16953, %v10171_v42   ;;  %v7455_v42 = vadd.f32 %v23038_v2, %v20385_v45  ;;  %v10176_v45 = vld [vmem:[%s22602_s11 + $0x110] sm:$0xff] }
 0x61a   :  { %v20763_v56 = vpop.f32.mrf.mxu0  ;;  %v20765_v59 = vadd.f32 %v7825_v49, %v7453_v18  ;;  %16465 = vmatprep.mubr.msk.bf16.mxu1 %vm17630_vm0, %v22750_v17  ;;  %10334 = vperm.xlu0 %16952, %v10172_v9  }
 0x61b   :  { %23036 = vst [vmem:[#allocation40_spill] sm:$0xff] %v20763_v56  ;;  %v16151_v35 = vpop.f32.mrf.mxu1  ;;  %v10173_v56 = vld [vmem:[%s22602_s11 + $0xf8] sm:$0xff] }
 0x61c   :  { %v16567_v36 = vpop.f32.mrf.mxu0  ;;  %v17476_v35 = vld [vmem:[#allocation2 + $0x1c8] sm:$0xff]  }
 0x61d   :  { %v7828_v20 = vpop.f32.mrf.mxu1  ;;  %10339 = vperm.xlu1 %16953, %v10173_v56   ;;  %v7456_v56 = vadd.f32 %v19901_v48, %v20399_v31  ;;  %v7457_v48 = vadd.f32 %v19911_v29, %v20409_v58  ;;  %v7458_v29 = vadd.f32 %v19925_v0, %v20423_v54  ;;  %v12519_v58 = vld [vmem:[%s22603_s12] sm:$0xff]  ;;  %v7459_v0 = vadd.f32 %v19935_v14, %v20433_v12 }
 0x61e   :  { %v20777_v6 = vpop.f32.mrf.mxu0  ;;  %v20779_v18 = vadd.f32 %v7828_v20, %v7454_v61  ;;  %10344 = vperm.xlu0 %16952, %v10174_v34  }
 0x61f   :  { %v16152_v36 = vpop.f32.mrf.mxu1 }
 0x620   :  { %v16568_v49 = vpop.f32.mrf.mxu0  ;;  %v10175_v36 = vld [vmem:[%s22602_s11 + $0x108] sm:$0xff] }
 0x621   :  { %v7833_v9 = vpop.f32.mrf.mxu1  ;;  %16466 = vmatmul.mubr.bf16.gmra.mxu1 %v17476_v35  ;;  %10349 = vperm.xlu1 %16953, %v10175_v36  }
 0x622   :  { %v20789_v32 = vpop.f32.mrf.mxu0  ;;  %v20791_v61 = vadd.f32 %v7833_v9, %v7455_v42  ;;  %16469 = vmatprep.mubr.msk.bf16.mxu1 %vm17630_vm0, %v22750_v17  ;;  %10354 = vperm.xlu0 %16952, %v10176_v45  }
 0x623   :  { %23039 = vst [vmem:[#allocation41_spill] sm:$0xff] %v20789_v32  ;;  %v16155_v49 = vpop.f32.mrf.mxu1  ;;  %v10178_v32 = vld [vmem:[%s22602_s11 + $0x120] sm:$0xff] }
 0x624   :  { %v16571_v20 = vpop.f32.mrf.mxu0  ;;  %v10177_v49 = vld [vmem:[%s22602_s11 + $0x118] sm:$0xff] }
 0x625   :  { %v7836_v35 = vpop.f32.mrf.mxu1  ;;  %v17477_v20 = vld [vmem:[#allocation2 + $0x1d0] sm:$0xff]   ;;  %10359 = vperm.xlu1 %16953, %v10177_v49  }
 0x626   :  { %v20803_v34 = vpop.f32.mrf.mxu0  ;;  %v20805_v2 = vadd.f32 %v7836_v35, %v7456_v56  ;;  %10364 = vperm.xlu0 %16952, %v10178_v32  }
 0x627   :  { %v16156_v9 = vpop.f32.mrf.mxu1 }
 0x628   :  { %v16572_v42 = vpop.f32.mrf.mxu0 }
 0x629   :  { %v7841_v36 = vpop.f32.mrf.mxu1  ;;  %16470 = vmatmul.mubr.bf16.gmra.mxu1 %v17477_v20  ;;  %v10179_v42 = vld [vmem:[%s22602_s11 + $0x128] sm:$0xff] }
 0x62a   :  { %v20815_v31 = vpop.f32.mrf.mxu0  ;;  %v20817_v45 = vadd.f32 %v7841_v36, %v7457_v48  ;;  %16473 = vmatprep.mubr.msk.bf16.mxu1 %vm17630_vm0, %v22750_v17  ;;  %10369 = vperm.xlu1 %16953, %v10179_v42   ;;  %v17478_v36 = vld [vmem:[#allocation2 + $0x1d8] sm:$0xff]  }
 0x62b   :  { %v16159_v35 = vpop.f32.mrf.mxu1  ;;  %12525 = vperm.xlu0 %16952, %v12519_v58  }
 0x62c   :  { %v16575_v56 = vpop.f32.mrf.mxu0 }
 0x62d   :  { %v7844_v9 = vpop.f32.mrf.mxu1  ;;  %v12520_v56 = vld [vmem:[%s22603_s12 + $0x8] sm:$0xff] }
 0x62e   :  { %v20829_v32 = vpop.f32.mrf.mxu0  ;;  %v20831_v20 = vadd.f32 %v7844_v9, %v7458_v29  ;;  %12530 = vperm.xlu1 %16953, %v12520_v56   ;;  %v7460_v9 = vadd.f32 %v19949_v3, %v20447_v43  ;;  %v17479_v56 = vld [vmem:[#allocation2 + $0x1e0] sm:$0xff]  }
 0x62f   :  { %23040 = vst [vmem:[#allocation42_spill] sm:$0xff] %v20829_v32  ;;  %v16160_v48 = vpop.f32.mrf.mxu1 }
 0x630   :  { %v16576_v49 = vpop.f32.mrf.mxu0 }
 0x631   :  { %v7849_v35 = vpop.f32.mrf.mxu1  ;;  %16474 = vmatmul.mubr.bf16.gmra.mxu1 %v17478_v36  ;;  %v23042_v36 = vld [vmem:[#allocation56_spill] sm:$0xff] }
 0x632   :  { %v20838_v54 = vpop.f32.mrf.mxu0  ;;  %v20840_v42 = vadd.f32 %v7849_v35, %v7459_v0  ;;  %16477 = vmatprep.mubr.msk.bf16.mxu1 %vm17630_vm0, %v22750_v17  ;;  %v7461_v0 = vadd.f32 %v23042_v36, %v20454_v5  ;;  %v17480_v36 = vld [vmem:[#allocation2 + $0x1e8] sm:$0xff]  }
 0x633   :  { %23041 = vst [vmem:[#allocation43_spill] sm:$0xff] %v20838_v54  ;;  %v16163_v58 = vpop.f32.mrf.mxu1 }
 0x634   :  { %v16579_v29 = vpop.f32.mrf.mxu0  ;;  %v7462_v58 = vadd.f32 %v19966_v51, %v20464_v11 }
 0x635   :  { %v7852_v48 = vpop.f32.mrf.mxu1 }
 0x636   :  { %v20846_v49 = vpop.f32.mrf.mxu0  ;;  %v20848_v32 = vadd.f32 %v7852_v48, %v7460_v9 }
 0x637   :  { %v16164_v12 = vpop.f32.mrf.mxu1 }
 0x638   :  { %v16580_v14 = vpop.f32.mrf.mxu0 }
 0x639   :  { %v7857_v54 = vpop.f32.mrf.mxu1  ;;  %16478 = vmatmul.mubr.bf16.gmra.mxu1 %v17479_v56 }
 0x63a   :  { %v20852_v35 = vpop.f32.mrf.mxu0  ;;  %v20854_v29 = vadd.f32 %v7857_v54, %v7461_v0  ;;  %16481 = vmatprep.mubr.msk.bf16.mxu1 %vm17630_vm0, %v22750_v17  ;;  %v8303_v54 = vadd.f32 %v19972_v30, %v20470_v37 }
 0x63b   :  { %v16167_v43 = vpop.f32.mrf.mxu1 }
 0x63c   :  { %v16583_v3 = vpop.f32.mrf.mxu0  ;;  %v8304_v43 = vadd.f32 %v19982_v10, %v20480_v40 }
 0x63d   :  { %v7860_v48 = vpop.f32.mrf.mxu1 }
 0x63e   :  { %v20860_v9 = vpop.f32.mrf.mxu0  ;;  %v20862_v14 = vadd.f32 %v7860_v48, %v7462_v58 }
 0x63f   :  { %v16168_v12 = vpop.f32.mrf.mxu1 }
 0x640   :  { %v16584_v5 = vpop.f32.mrf.mxu0  ;;  %v17481_v12 = vld [vmem:[#allocation2 + $0x1f0] sm:$0xff]  }
 0x641   :  { %v8591_v0 = vpop.f32.mrf.mxu1  ;;  %16482 = vmatmul.mubr.bf16.gmra.mxu1 %v17480_v36  ;;  %v8305_v36 = vadd.f32 %v19988_v47, %v20486_v39 }
 0x642   :  { %v20866_v56 = vpop.f32.mrf.mxu0  ;;  %v20868_v3 = vadd.f32 %v8591_v0, %v8303_v54  ;;  %16485 = vmatprep.mubr.msk.bf16.mxu1 %vm17630_vm0, %v22750_v17 }
 0x643   :  { %v16279_v11 = vpop.f32.mrf.mxu1 }
 0x644   :  { %v16587_v51 = vpop.f32.mrf.mxu0  ;;  %v8306_v11 = vadd.f32 %v19998_v23, %v20496_v26 }
 0x645   :  { %v8594_v48 = vpop.f32.mrf.mxu1 }
 0x646   :  { %v20874_v58 = vpop.f32.mrf.mxu0  ;;  %v20876_v5 = vadd.f32 %v8594_v48, %v8304_v43 }
 0x647   :  { %v16280_v37 = vpop.f32.mrf.mxu1 }
 0x648   :  { %v16588_v30 = vpop.f32.mrf.mxu0  ;;  %v17482_v37 = vld [vmem:[#allocation2 + $0x1f8] sm:$0xff]  }
 0x649   :  { %v8599_v0 = vpop.f32.mrf.mxu1  ;;  %16486 = vmatmul.mubr.bf16.gmra.mxu1 %v17481_v12  ;;  %v23045_v12 = vld [vmem:[#allocation58_spill] sm:$0xff] }
 0x64a   :  { %v20880_v54 = vpop.f32.mrf.mxu0  ;;  %v20882_v51 = vadd.f32 %v8599_v0, %v8305_v36  ;;  %16489 = vmatprep.mubr.msk.bf16.mxu1 %vm17630_vm0, %v22750_v17  ;;  %v8307_v36 = vadd.f32 %v23045_v12, %v20502_v22 }
 0x64b   :  { %23043 = vst [vmem:[#allocation44_spill] sm:$0xff] %v20880_v54  ;;  %v16283_v40 = vpop.f32.mrf.mxu1 }
 0x64c   :  { %v16591_v10 = vpop.f32.mrf.mxu0  ;;  %v23047_v40 = vld [vmem:[#allocation60_spill] sm:$0xff] }
 0x64d   :  { %v8602_v48 = vpop.f32.mrf.mxu1 }
 0x64e   :  { %v20888_v43 = vpop.f32.mrf.mxu0  ;;  %v20890_v30 = vadd.f32 %v8602_v48, %v8306_v11  ;;  %v8308_v11 = vadd.f32 %v23047_v40, %v20512_v33  ;;  %v23051_v40 = vld [vmem:[#allocation64_spill] sm:$0xff] }
 0x64f   :  { %23044 = vst [vmem:[#allocation45_spill] sm:$0xff] %v20888_v43  ;;  %v16284_v39 = vpop.f32.mrf.mxu1 }
 0x650   :  { %v16592_v47 = vpop.f32.mrf.mxu0 }
 0x651   :  { %v8607_v54 = vpop.f32.mrf.mxu1  ;;  %16490 = vmatmul.mubr.bf16.gmra.mxu1 %v17482_v37  ;;  %v23049_v37 = vld [vmem:[#allocation62_spill] sm:$0xff] }
 0x652   :  { %v20894_v0 = vpop.f32.mrf.mxu0  ;;  %v20896_v10 = vadd.f32 %v8607_v54, %v8307_v36  ;;  %16493 = vmatprep.mubr.msk.bf16.mxu1 %vm17630_vm0, %v22750_v17  ;;  %v8309_v54 = vadd.f32 %v23049_v37, %v20518_v4 }
 0x653   :  { %23046 = vst [vmem:[#allocation46_spill] sm:$0xff] %v20894_v0  ;;  %v16287_v26 = vpop.f32.mrf.mxu1  ;;  %v17483_v0 = vld [vmem:[#allocation2 + $0x200] sm:$0xff]  }
 0x654   :  { %v16595_v23 = vpop.f32.mrf.mxu0 }
 0x655   :  { %v8610_v47 = vpop.f32.mrf.mxu1 }
 0x656   :  { %v20902_v48 = vpop.f32.mrf.mxu0  ;;  %v20904_v39 = vadd.f32 %v8610_v47, %v8308_v11  ;;  %v8310_v11 = vadd.f32 %v23051_v40, %v20528_v55  ;;  %v23055_v40 = vld [vmem:[#allocation68_spill] sm:$0xff] }
 0x657   :  { %23048 = vst [vmem:[#allocation47_spill] sm:$0xff] %v20902_v48  ;;  %v16288_v12 = vpop.f32.mrf.mxu1 }
 0x658   :  { %v16596_v22 = vpop.f32.mrf.mxu0 }
 0x659   :  { %v8615_v43 = vpop.f32.mrf.mxu1  ;;  %16494 = vmatmul.mubr.bf16.gmra.mxu1 %v17483_v0  ;;  %v23053_v0 = vld [vmem:[#allocation66_spill] sm:$0xff] }
 0x65a   :  { %v20908_v36 = vpop.f32.mrf.mxu0  ;;  %v20910_v23 = vadd.f32 %v8615_v43, %v8309_v54  ;;  %16497 = vmatprep.mubr.msk.bf16.mxu1 %vm17630_vm0, %v22750_v17  ;;  %v8311_v43 = vadd.f32 %v23053_v0, %v20534_v62 }
 0x65b   :  { %23050 = vst [vmem:[#allocation48_spill] sm:$0xff] %v20908_v36  ;;  %v16291_v26 = vpop.f32.mrf.mxu1  ;;  %v17484_v36 = vld [vmem:[#allocation2 + $0x208] sm:$0xff]  }
 0x65c   :  { %v16599_v33 = vpop.f32.mrf.mxu0 }
 0x65d   :  { %v8618_v22 = vpop.f32.mrf.mxu1 }
 0x65e   :  { %v20916_v47 = vpop.f32.mrf.mxu0  ;;  %v20918_v12 = vadd.f32 %v8618_v22, %v8310_v11  ;;  %v8312_v11 = vadd.f32 %v23055_v40, %v20544_v15  ;;  %v23059_v40 = vld [vmem:[#allocation72_spill] sm:$0xff] }
 0x65f   :  { %23052 = vst [vmem:[#allocation49_spill] sm:$0xff] %v20916_v47  ;;  %v16292_v37 = vpop.f32.mrf.mxu1 }
 0x660   :  { %v16600_v4 = vpop.f32.mrf.mxu0 }
 0x661   :  { %v8623_v48 = vpop.f32.mrf.mxu1  ;;  %16498 = vmatmul.mubr.bf16.gmra.mxu1 %v17484_v36  ;;  %v23057_v36 = vld [vmem:[#allocation70_spill] sm:$0xff] }
 0x662   :  { %v20922_v54 = vpop.f32.mrf.mxu0  ;;  %v20924_v33 = vadd.f32 %v8623_v48, %v8311_v43  ;;  %16501 = vmatprep.mubr.msk.bf16.mxu1 %vm17630_vm0, %v22750_v17  ;;  %v8313_v48 = vadd.f32 %v23057_v36, %v20550_v1 }
 0x663   :  { %23054 = vst [vmem:[#allocation50_spill] sm:$0xff] %v20922_v54  ;;  %v16295_v26 = vpop.f32.mrf.mxu1  ;;  %v17485_v54 = vld [vmem:[#allocation2 + $0x210] sm:$0xff]  }
 0x664   :  { %v16603_v55 = vpop.f32.mrf.mxu0 }
 0x665   :  { %v8626_v4 = vpop.f32.mrf.mxu1 }
 0x666   :  { %v20930_v22 = vpop.f32.mrf.mxu0  ;;  %v20932_v37 = vadd.f32 %v8626_v4, %v8312_v11  ;;  %v8314_v11 = vadd.f32 %v23059_v40, %v20560_v21  ;;  %v23063_v40 = vld [vmem:[#allocation76_spill] sm:$0xff] }
 0x667   :  { %23056 = vst [vmem:[#allocation51_spill] sm:$0xff] %v20930_v22  ;;  %v16296_v0 = vpop.f32.mrf.mxu1 }
 0x668   :  { %v16604_v62 = vpop.f32.mrf.mxu0 }
 0x669   :  { %v8631_v47 = vpop.f32.mrf.mxu1  ;;  %16502 = vmatmul.mubr.bf16.gmra.mxu1 %v17485_v54  ;;  %v23061_v54 = vld [vmem:[#allocation74_spill] sm:$0xff] }
 0x66a   :  { %v20936_v43 = vpop.f32.mrf.mxu0  ;;  %v20938_v55 = vadd.f32 %v8631_v47, %v8313_v48  ;;  %16505 = vmatprep.mubr.msk.bf16.mxu1 %vm17630_vm0, %v22750_v17  ;;  %v8315_v47 = vadd.f32 %v23061_v54, %v20566_v63 }
 0x66b   :  { %23058 = vst [vmem:[#allocation52_spill] sm:$0xff] %v20936_v43  ;;  %v16299_v26 = vpop.f32.mrf.mxu1  ;;  %v17486_v43 = vld [vmem:[#allocation2 + $0x218] sm:$0xff]  }
 0x66c   :  { %v16607_v15 = vpop.f32.mrf.mxu0 }
 0x66d   :  { %v8634_v62 = vpop.f32.mrf.mxu1 }
 0x66e   :  { %v20944_v4 = vpop.f32.mrf.mxu0  ;;  %v20946_v0 = vadd.f32 %v8634_v62, %v8314_v11  ;;  %v8316_v11 = vadd.f32 %v23063_v40, %v20574_v25  ;;  %v23067_v40 = vld [vmem:[#allocation80_spill] sm:$0xff] }
 0x66f   :  { %23060 = vst [vmem:[#allocation53_spill] sm:$0xff] %v20944_v4  ;;  %v16300_v36 = vpop.f32.mrf.mxu1 }
 0x670   :  { %v16608_v1 = vpop.f32.mrf.mxu0 }
 0x671   :  { %v8639_v22 = vpop.f32.mrf.mxu1  ;;  %16506 = vmatmul.mubr.bf16.gmra.mxu1 %v17486_v43  ;;  %v23065_v43 = vld [vmem:[#allocation78_spill] sm:$0xff] }
 0x672   :  { %v20950_v48 = vpop.f32.mrf.mxu0  ;;  %v20952_v15 = vadd.f32 %v8639_v22, %v8315_v47  ;;  %16509 = vmatprep.mubr.msk.bf16.mxu1 %vm17630_vm0, %v22750_v17  ;;  %v8317_v22 = vadd.f32 %v23065_v43, %v20583_v13 }
 0x673   :  { %23062 = vst [vmem:[#allocation54_spill] sm:$0xff] %v20950_v48  ;;  %v16303_v26 = vpop.f32.mrf.mxu1  ;;  %v17487_v48 = vld [vmem:[#allocation2 + $0x220] sm:$0xff]  }
 0x674   :  { %v16611_v21 = vpop.f32.mrf.mxu0 }
 0x675   :  { %v8642_v1 = vpop.f32.mrf.mxu1 }
 0x676   :  { %v20958_v62 = vpop.f32.mrf.mxu0  ;;  %v20960_v36 = vadd.f32 %v8642_v1, %v8316_v11  ;;  %v8318_v11 = vadd.f32 %v23067_v40, %v20597_v16  ;;  %v23071_v40 = vld [vmem:[#allocation82_spill] sm:$0xff] }
 0x677   :  { %23064 = vst [vmem:[#allocation55_spill] sm:$0xff] %v20958_v62  ;;  %v16304_v54 = vpop.f32.mrf.mxu1 }
 0x678   :  { %v16612_v63 = vpop.f32.mrf.mxu0 }
 0x679   :  { %v8647_v4 = vpop.f32.mrf.mxu1  ;;  %16510 = vmatmul.mubr.bf16.gmra.mxu1 %v17487_v48  ;;  %v23069_v48 = vld [vmem:[#allocation81_spill] sm:$0xff] }
 0x67a   :  { %v20964_v47 = vpop.f32.mrf.mxu0  ;;  %v20966_v21 = vadd.f32 %v8647_v4, %v8317_v22  ;;  %16513 = vmatprep.mubr.msk.bf16.mxu1 %vm17630_vm0, %v22750_v17  ;;  %v8319_v4 = vadd.f32 %v23069_v48, %v20609_v41 }
 0x67b   :  { %23066 = vst [vmem:[#allocation56_spill] sm:$0xff] %v20964_v47  ;;  %v16307_v26 = vpop.f32.mrf.mxu1  ;;  %v17488_v47 = vld [vmem:[#allocation2 + $0x228] sm:$0xff]  }
 0x67c   :  { %v16615_v25 = vpop.f32.mrf.mxu0 }
 0x67d   :  { %v8650_v63 = vpop.f32.mrf.mxu1 }
 0x67e   :  { %v20972_v1 = vpop.f32.mrf.mxu0  ;;  %v20974_v54 = vadd.f32 %v8650_v63, %v8318_v11  ;;  %v8320_v11 = vadd.f32 %v23071_v40, %v20623_v50  ;;  %v23075_v40 = vld [vmem:[#allocation84_spill] sm:$0xff] }
 0x67f   :  { %23068 = vst [vmem:[#allocation58_spill] sm:$0xff] %v20972_v1  ;;  %v16308_v43 = vpop.f32.mrf.mxu1 }
 0x680   :  { %v16616_v13 = vpop.f32.mrf.mxu0 }
 0x681   :  { %v8655_v62 = vpop.f32.mrf.mxu1  ;;  %16514 = vmatmul.mubr.bf16.gmra.mxu1 %v17488_v47  ;;  %v23073_v47 = vld [vmem:[#allocation83_spill] sm:$0xff] }
 0x682   :  { %v20978_v22 = vpop.f32.mrf.mxu0  ;;  %v20980_v25 = vadd.f32 %v8655_v62, %v8319_v4  ;;  %16517 = vmatprep.mubr.msk.bf16.mxu1 %vm17630_vm0, %v22750_v17  ;;  %v8321_v62 = vadd.f32 %v23073_v47, %v20635_v52 }
 0x683   :  { %23070 = vst [vmem:[#allocation60_spill] sm:$0xff] %v20978_v22  ;;  %v16311_v26 = vpop.f32.mrf.mxu1  ;;  %v17489_v22 = vld [vmem:[#allocation2 + $0x230] sm:$0xff]  }
 0x684   :  { %v16619_v16 = vpop.f32.mrf.mxu0 }
 0x685   :  { %v8658_v13 = vpop.f32.mrf.mxu1 }
 0x686   :  { %v20986_v63 = vpop.f32.mrf.mxu0  ;;  %v20988_v43 = vadd.f32 %v8658_v13, %v8320_v11  ;;  %v8322_v11 = vadd.f32 %v23075_v40, %v20649_v57  ;;  %v23079_v40 = vld [vmem:[#allocation86_spill] sm:$0xff] }
 0x687   :  { %23072 = vst [vmem:[#allocation62_spill] sm:$0xff] %v20986_v63  ;;  %v16312_v48 = vpop.f32.mrf.mxu1 }
 0x688   :  { %v16620_v41 = vpop.f32.mrf.mxu0 }
 0x689   :  { %v8663_v1 = vpop.f32.mrf.mxu1  ;;  %16518 = vmatmul.mubr.bf16.gmra.mxu1 %v17489_v22  ;;  %v23077_v22 = vld [vmem:[#allocation85_spill] sm:$0xff] }
 0x68a   :  { %v20992_v4 = vpop.f32.mrf.mxu0  ;;  %v20994_v16 = vadd.f32 %v8663_v1, %v8321_v62  ;;  %16521 = vmatprep.mubr.msk.bf16.mxu1 %vm17630_vm0, %v22750_v17  ;;  %v8323_v1 = vadd.f32 %v23077_v22, %v20661_v27 }
 0x68b   :  { %23074 = vst [vmem:[#allocation64_spill] sm:$0xff] %v20992_v4  ;;  %v16315_v26 = vpop.f32.mrf.mxu1  ;;  %v17490_v4 = vld [vmem:[#allocation2 + $0x238] sm:$0xff]  }
 0x68c   :  { %v16623_v50 = vpop.f32.mrf.mxu0 }
 0x68d   :  { %v8666_v41 = vpop.f32.mrf.mxu1 }
 0x68e   :  { %v21000_v13 = vpop.f32.mrf.mxu0  ;;  %v21002_v48 = vadd.f32 %v8666_v41, %v8322_v11  ;;  %v8324_v11 = vadd.f32 %v23079_v40, %v20675_v8  ;;  %v23082_v8 = vld [vmem:[#allocation88_spill] sm:$0xff] }
 0x68f   :  { %23076 = vst [vmem:[#allocation66_spill] sm:$0xff] %v21000_v13  ;;  %v16316_v47 = vpop.f32.mrf.mxu1 }
 0x690   :  { %v16624_v52 = vpop.f32.mrf.mxu0 }
 0x691   :  { %v8671_v63 = vpop.f32.mrf.mxu1  ;;  %16522 = vmatmul.mubr.bf16.gmra.mxu1 %v17490_v4  ;;  %v23081_v4 = vld [vmem:[#allocation87_spill] sm:$0xff] }
 0x692   :  { %v21006_v62 = vpop.f32.mrf.mxu0  ;;  %v21008_v50 = vadd.f32 %v8671_v63, %v8323_v1  ;;  %16525 = vmatprep.mubr.msk.bf16.mxu1 %vm17630_vm0, %v22750_v17  ;;  %v8325_v63 = vadd.f32 %v23081_v4, %v20687_v7 }
 0x693   :  { %23078 = vst [vmem:[#allocation68_spill] sm:$0xff] %v21006_v62  ;;  %v16319_v26 = vpop.f32.mrf.mxu1  ;;  %v17491_v62 = vld [vmem:[#allocation2 + $0x240] sm:$0xff]  }
 0x694   :  { %v16627_v57 = vpop.f32.mrf.mxu0  ;;  %v8326_v26 = vadd.f32 %v23082_v8, %v20701_v46 }
 0x695   :  { %v8674_v52 = vpop.f32.mrf.mxu1 }
 0x696   :  { %v21014_v41 = vpop.f32.mrf.mxu0  ;;  %v21016_v47 = vadd.f32 %v8674_v52, %v8324_v11 }
 0x697   :  { %23080 = vst [vmem:[#allocation70_spill] sm:$0xff] %v21014_v41  ;;  %v16320_v22 = vpop.f32.mrf.mxu1 }
 0x698   :  { %v16628_v27 = vpop.f32.mrf.mxu0  ;;  %v23083_v22 = vld [vmem:[#allocation89_spill] sm:$0xff] }
 0x699   :  { %v8679_v1 = vpop.f32.mrf.mxu1  ;;  %16526 = vmatmul.mubr.bf16.gmra.mxu1 %v17491_v62  ;;  %v17492_v27 = vld [vmem:[#allocation2 + $0x248] sm:$0xff]   ;;  %v8327_v41 = vadd.f32 %v23083_v22, %v20713_v19 }
 0x69a   :  { %v21020_v13 = vadd.f32 %v8679_v1, %v8325_v63  ;;  %16529 = vmatprep.mubr.msk.bf16.mxu1 %vm17630_vm0, %v22750_v17  ;;  %v23084_v63 = vld [vmem:[#allocation90_spill] sm:$0xff]  ;;  %v23087_v22 = vld [vmem:[#allocation92_spill] sm:$0xff] }
 0x69b   :  { %v16323_v57 = vpop.f32.mrf.mxu1  ;;  %v8328_v1 = vadd.f32 %v23084_v63, %v20727_v60 }
 0x69d   :  { %v8682_v40 = vpop.f32.mrf.mxu1 }
 0x69e   :  { %v21026_v11 = vadd.f32 %v8682_v40, %v8326_v26  ;;  %v17493_v26 = vld [vmem:[#allocation2 + $0x250] sm:$0xff]   ;;  %v23085_v40 = vld [vmem:[#allocation91_spill] sm:$0xff] }
 0x69f   :  { %v16324_v52 = vpop.f32.mrf.mxu1 }
 0x6a0   :  { %v8329_v52 = vadd.f32 %v23085_v40, %v20739_v24  ;;  %v23089_v40 = vld [vmem:[#allocation94_spill] sm:$0xff] }
 0x6a1   :  { %v8687_v7 = vpop.f32.mrf.mxu1  ;;  %16530 = vmatmul.mubr.bf16.gmra.mxu1 %v17492_v27 }
 0x6a2   :  { %v21030_v62 = vadd.f32 %v8687_v7, %v8327_v41  ;;  %16533 = vmatprep.mubr.msk.bf16.mxu1 %vm17630_vm0, %v22750_v17  ;;  %v8330_v7 = vadd.f32 %v23087_v22, %v20753_v38  ;;  %v23090_v38 = vld [vmem:[#allocation57_spill] sm:$0xff] }
 0x6a3   :  { %v16327_v4 = vpop.f32.mrf.mxu1  ;;  %v8333_v22 = vadd.f32 %v23090_v38, %v20791_v61  ;;  %v23093_v61 = vld [vmem:[#allocation10_spill] sm:$0xff] }
 0x6a4   :  { %v8336_v38 = vadd.f32 %v23093_v61, %v20831_v20  ;;  %v23097_v20 = vld [vmem:[#allocation63_spill] sm:$0xff] }
 0x6a5   :  { %v8690_v46 = vpop.f32.mrf.mxu1  ;;  %v8339_v61 = vadd.f32 %v23097_v20, %v20854_v29  ;;  %v23102_v29 = vld [vmem:[#allocation16_spill] sm:$0xff] }
 0x6a6   :  { %v21036_v57 = vadd.f32 %v8690_v46, %v8328_v1  ;;  %v23088_v1 = vld [vmem:[#allocation93_spill] sm:$0xff]  ;;  %v9182_v20 = vadd.f32 %v23102_v29, %v20876_v5 }
 0x6a7   :  { %v16328_v8 = vpop.f32.mrf.mxu1  ;;  %v8331_v46 = vadd.f32 %v23088_v1, %v20765_v59  ;;  %v23091_v59 = vld [vmem:[#allocation8_spill] sm:$0xff] }
 0x6a8   :  { %v8334_v1 = vadd.f32 %v23091_v59, %v20805_v2  ;;  %v23094_v2 = vld [vmem:[#allocation61_spill] sm:$0xff] }
 0x6a9   :  { %v8695_v19 = vpop.f32.mrf.mxu1  ;;  %16534 = vmatmul.mubr.bf16.gmra.mxu1 %v17493_v26  ;;  %v8337_v59 = vadd.f32 %v23094_v2, %v20840_v42  ;;  %v23099_v42 = vld [vmem:[#allocation14_spill] sm:$0xff] }
 0x6aa   :  { %v21040_v27 = vadd.f32 %v8695_v19, %v8329_v52  ;;  %16645 = vmatprep.mubr.msk.bf16.mxu1 %vm17630_vm0, %v22750_v17  ;;  %v8332_v52 = vadd.f32 %v23089_v40, %v20779_v18  ;;  %v23092_v18 = vld [vmem:[#allocation59_spill] sm:$0xff]  ;;  %v8340_v2 = vadd.f32 %v23099_v42, %v20862_v14 }
 0x6ab   :  { %v16331_v41 = vpop.f32.mrf.mxu1  ;;  %v8335_v40 = vadd.f32 %v23092_v18, %v20817_v45  ;;  %v23095_v45 = vld [vmem:[#allocation12_spill] sm:$0xff] }
 0x6ac   :  { %23086 = vst [vmem:[#allocation72_spill] sm:$0xff] %v21040_v27  ;;  %v8338_v18 = vadd.f32 %v23095_v45, %v20848_v32  ;;  %v23101_v32 = vld [vmem:[#allocation65_spill] sm:$0xff] }
 0x6ad   :  { %v8698_v60 = vpop.f32.mrf.mxu1  ;;  %v9181_v45 = vadd.f32 %v23101_v32, %v20868_v3 }
 0x6ae   :  { %v21046_v4 = vadd.f32 %v8698_v60, %v8330_v7 }
 0x6af   :  { %v16332_v63 = vpop.f32.mrf.mxu1 }
 0x6b1   :  { %v8703_v8 = vpop.f32.mrf.mxu1 }
 0x6b2   :  { %v21050_v24 = vadd.f32 %v8703_v8, %v8331_v46 }
 0x6b3   :  { %v16335_v26 = vpop.f32.mrf.mxu1 }
 0x6b5   :  { %v8706_v19 = vpop.f32.mrf.mxu1 }
 0x6b6   :  { %v21054_v27 = vadd.f32 %v8706_v19, %v8332_v52 }
 0x6b7   :  { %v16336_v41 = vpop.f32.mrf.mxu1 }
 0x6b9   :  { %v8711_v7 = vpop.f32.mrf.mxu1 }
 0x6ba   :  { %v21058_v60 = vadd.f32 %v8711_v7, %v8333_v22 }
 0x6bb   :  { %v16339_v63 = vpop.f32.mrf.mxu1 }
 0x6bd   :  { %v8714_v46 = vpop.f32.mrf.mxu1 }
 0x6be   :  { %v21062_v8 = vadd.f32 %v8714_v46, %v8334_v1 }
 0x6bf   :  { %v16340_v26 = vpop.f32.mrf.mxu1 }
 0x6c1   :  { %v8719_v52 = vpop.f32.mrf.mxu1 }
 0x6c2   :  { %v21066_v19 = vadd.f32 %v8719_v52, %v8335_v40 }
 0x6c3   :  { %v16343_v41 = vpop.f32.mrf.mxu1 }
 0x6c5   :  { %v8722_v22 = vpop.f32.mrf.mxu1 }
 0x6c6   :  { %v21070_v7 = vadd.f32 %v8722_v22, %v8336_v38 }
 0x6c7   :  { %v16344_v63 = vpop.f32.mrf.mxu1 }
 0x6c9   :  { %v8727_v1 = vpop.f32.mrf.mxu1 }
 0x6ca   :  { %v21074_v46 = vadd.f32 %v8727_v1, %v8337_v59 }
 0x6cb   :  { %v16347_v26 = vpop.f32.mrf.mxu1 }
 0x6cd   :  { %v8730_v40 = vpop.f32.mrf.mxu1 }
 0x6ce   :  { %v21078_v52 = vadd.f32 %v8730_v40, %v8338_v18 }
 0x6cf   :  { %v16348_v41 = vpop.f32.mrf.mxu1 }
 0x6d0   :  { %23096 = vst [vmem:[#allocation74_spill] sm:$0xff] %v21078_v52 }
 0x6d1   :  { %v8735_v38 = vpop.f32.mrf.mxu1 }
 0x6d2   :  { %v21082_v22 = vadd.f32 %v8735_v38, %v8339_v61 }
 0x6d3   :  { %v16351_v63 = vpop.f32.mrf.mxu1 }
 0x6d4   :  { %23098 = vst [vmem:[#allocation76_spill] sm:$0xff] %v21082_v22  ;;  %v23103_v22 = vld [vmem:[#allocation67_spill] sm:$0xff] }
 0x6d5   :  { %v8738_v59 = vpop.f32.mrf.mxu1  ;;  %v9183_v14 = vadd.f32 %v23103_v22, %v20882_v51  ;;  %v23106_v51 = vld [vmem:[#allocation20_spill] sm:$0xff] }
 0x6d6   :  { %v21086_v1 = vadd.f32 %v8738_v59, %v8340_v2  ;;  %v9186_v22 = vadd.f32 %v23106_v51, %v20904_v39  ;;  %v23108_v39 = vld [vmem:[#allocation22_spill] sm:$0xff] }
 0x6d7   :  { %v16352_v26 = vpop.f32.mrf.mxu1 }
 0x6d8   :  { %23100 = vst [vmem:[#allocation78_spill] sm:$0xff] %v21086_v1  ;;  %v23104_v26 = vld [vmem:[#allocation18_spill] sm:$0xff] }
 0x6d9   :  { %v9469_v18 = vpop.f32.mrf.mxu1  ;;  %v9184_v3 = vadd.f32 %v23104_v26, %v20890_v30  ;;  %v17494_v30 = vld [vmem:[%s22604_s7 + $0x78] sm:$0xff]  }
 0x6da   :  { %v21090_v40 = vadd.f32 %v9469_v18, %v9181_v45  ;;  %16630 = vmatpush3.bf16.msra.mxu1 %v17494_v30  ;;  %v23111_v30 = vld [vmem:[#allocation24_spill] sm:$0xff] }
 0x6db   :  { %v16463_v41 = vpop.f32.mrf.mxu1  ;;  %16631 = vmatprep.subr.bf16.mxu1 %v22750_v17 }
 0x6dc   :  { %v23105_v41 = vld [vmem:[#allocation69_spill] sm:$0xff] }
 0x6dd   :  { %v9472_v61 = vpop.f32.mrf.mxu1  ;;  %v9185_v5 = vadd.f32 %v23105_v41, %v20896_v10 }
 0x6de   :  { %v9621_v38 = vadd.f32 %v9472_v61, %v9182_v20 }
 0x6df   :  { %v16464_v63 = vpop.f32.mrf.mxu1 }
 0x6e1   :  { %v9477_v42 = vpop.f32.mrf.mxu1 }
 0x6e2   :  { %v21096_v2 = vadd.f32 %v9477_v42, %v9183_v14 }
 0x6e3   :  { %v16467_v59 = vpop.f32.mrf.mxu1 }
 0x6e4   :  { %v23107_v59 = vld [vmem:[#allocation71_spill] sm:$0xff] }
 0x6e5   :  { %v9480_v32 = vpop.f32.mrf.mxu1  ;;  %v9187_v26 = vadd.f32 %v23107_v59, %v20910_v23  ;;  %v21126_v23 = vpop.permute.xlu0 %10184  ;;  %v9190_v59 = vadd.f32 %v23111_v30, %v20932_v37 }
 0x6e6   :  { %v21100_v45 = vadd.f32 %v9480_v32, %v9184_v3  ;;  %23110 = vst [vmem:[#allocation80_spill] sm:$0xff] %v21126_v23 }
 0x6e7   :  { %v16468_v18 = vpop.f32.mrf.mxu1 }
 0x6e8   :  { %v9188_v18 = vadd.f32 %v23108_v39, %v20918_v12  ;;  %v23113_v39 = vld [vmem:[#allocation75_spill] sm:$0xff] }
 0x6e9   :  { %v9485_v29 = vpop.f32.mrf.mxu1 }
 0x6ea   :  { %v21104_v20 = vadd.f32 %v9485_v29, %v9185_v5 }
 0x6eb   :  { %v16471_v61 = vpop.f32.mrf.mxu1 }
 0x6ec   :  { %v23109_v61 = vld [vmem:[#allocation73_spill] sm:$0xff] }
 0x6ed   :  { %v9488_v63 = vpop.f32.mrf.mxu1  ;;  %v9189_v51 = vadd.f32 %v23109_v61, %v20924_v33 }
 0x6ee   :  { %v21108_v14 = vadd.f32 %v9488_v63, %v9186_v22 }
 0x6ef   :  { %v16472_v42 = vpop.f32.mrf.mxu1 }
 0x6f1   :  { %v9493_v3 = vpop.f32.mrf.mxu1 }
 0x6f2   :  { %v21115_v10 = vadd.f32 %v9493_v3, %v9187_v26  ;;  %v21130_v26 = vpop.permute.xlu1 %10194 }
 0x6f3   :  { %v16475_v32 = vpop.f32.mrf.mxu1  ;;  %23112 = vst [vmem:[#allocation81_spill] sm:$0xff] %v21130_v26 }
 0x6f5   :  { %v9496_v41 = vpop.f32.mrf.mxu1 }
 0x6f6   :  { %v21120_v5 = vadd.f32 %v9496_v41, %v9188_v18  ;;  %v9191_v18 = vadd.f32 %v23113_v39, %v20938_v55  ;;  %v21136_v41 = vpop.permute.xlu0 %10189  ;;  %v21140_v61 = vpop.permute.xlu1 %10199 }
 0x6f7   :  { %v16476_v29 = vpop.f32.mrf.mxu1  ;;  %23114 = vst [vmem:[#allocation82_spill] sm:$0xff] %v21136_v41  ;;  %23115 = vst [vmem:[#allocation83_spill] sm:$0xff] %v21140_v61 }
 0x6f9   :  { %v9501_v22 = vpop.f32.mrf.mxu1 }
 0x6fa   :  { %v21124_v63 = vadd.f32 %v9501_v22, %v9189_v51  ;;  %v23116_v22 = vld [vmem:[#allocation26_spill] sm:$0xff]  ;;  %v21150_v39 = vpop.permute.xlu1 %10209 }
 0x6fb   :  { %v16479_v42 = vpop.f32.mrf.mxu1  ;;  %v9192_v37 = vadd.f32 %v23116_v22, %v20946_v0 }
 0x6fd   :  { %v9504_v3 = vpop.f32.mrf.mxu1 }
 0x6fe   :  { %v21132_v12 = vadd.f32 %v9504_v3, %v9190_v59  ;;  %v21146_v59 = vpop.permute.xlu0 %10204 }
 0x6ff   :  { %v16480_v32 = vpop.f32.mrf.mxu1 }
 0x700   :  { %v23117_v32 = vld [vmem:[#allocation77_spill] sm:$0xff] }
 0x701   :  { %v9509_v33 = vpop.f32.mrf.mxu1  ;;  %v9193_v55 = vadd.f32 %v23117_v32, %v20952_v15  ;;  %v21166_v15 = vld [vmem:[%s22605_s4] ss:$0 sm:$0xff] }
 0x702   :  { %v21138_v29 = vadd.f32 %v9509_v33, %v9191_v18  ;;  %v21156_v52 = vpop.permute.xlu0 %10214 }
 0x703   :  { %v16483_v51 = vpop.f32.mrf.mxu1  ;;  %23119 = vst [vmem:[#allocation84_spill] sm:$0xff] %v21156_v52 }
 0x704   :  { %v23118_v51 = vld [vmem:[#allocation28_spill] sm:$0xff] }
 0x705   :  { %v9512_v42 = vpop.f32.mrf.mxu1  ;;  %v9194_v1 = vadd.f32 %v23118_v51, %v20960_v36  ;;  %v10059_v36 = vadd.f32 %v20685_v28, %v21090_v40  ;;  %v23125_v40 = vld [vmem:[#allocation38_spill] sm:$0xff] }
 0x706   :  { %v21144_v30 = vadd.f32 %v9512_v42, %v9192_v37  ;;  %v10060_v37 = vadd.f32 %v20699_v53, %v9621_v38  ;;  %v21161_v42 = vpop.permute.xlu1 %10219  ;;  %v23122_v38 = vld [vmem:[#allocation37_spill] sm:$0xff] }
 0x707   :  { %v16484_v3 = vpop.f32.mrf.mxu1  ;;  %v10062_v51 = vadd.f32 %v23122_v38, %v21100_v45  ;;  %v21186_v28 = vadd.f32 %v21166_v15, %v10059_v36 }
 0x708   :  { %v21177_v53 = vadd.f32 %v21166_v15, %v10060_v37 }
 0x709   :  { %v9517_v17 = vpop.f32.mrf.mxu1  ;;  %v21200_v38 = vadd.f32 %v21166_v15, %v10062_v51  ;;  %v23128_v51 = vld [vmem:[#allocation40_spill] sm:$0xff] }
 0x70a   :  { %v21152_v18 = vadd.f32 %v9517_v17, %v9193_v55  ;;  %v23120_v17 = vld [vmem:[#allocation79_spill] sm:$0xff]  ;;  %23121 = vst [vmem:[#allocation85_spill] sm:$0xff] %v21177_v53  ;;  %v21193_v37 = vpop.permute.xlu1 %10229  ;;  %v10373_v45 = vmul.f32 %v21136_v41, %v21177_v53  ;;  %v10065_v41 = vadd.f32 %v23128_v51, %v21115_v10 }
 0x70b   :  { %v16487_v33 = vpop.f32.mrf.mxu1  ;;  %v9195_v32 = vadd.f32 %v23120_v17, %v20966_v21  ;;  %v23123_v21 = vld [vmem:[#allocation30_spill] sm:$0xff] }
 0x70c   :  { %v9196_v17 = vadd.f32 %v23123_v21, %v20974_v54  ;;  %v23126_v54 = vld [vmem:[#allocation39_spill] sm:$0xff] }
 0x70d   :  { %v9520_v0 = vpop.f32.mrf.mxu1  ;;  %v10064_v36 = vadd.f32 %v23126_v54, %v21108_v14 }
 0x70e   :  { %v21158_v22 = vadd.f32 %v9520_v0, %v9194_v1  ;;  %v10061_v1 = vadd.f32 %v20711_v44, %v21096_v2  ;;  %v21181_v0 = vpop.permute.xlu0 %10224  ;;  %v10063_v2 = vadd.f32 %v23125_v40, %v21104_v20  ;;  %v10372_v20 = vmul.f32 %v21126_v23, %v21186_v28  ;;  %v23129_v23 = vld [vmem:[#allocation4_spill] sm:$0xff] }
 0x70f   :  { %v16488_v3 = vpop.f32.mrf.mxu1 }
 0x710   :  { %v21189_v44 = vadd.f32 %v21166_v15, %v10061_v1  ;;  %v23127_v1 = vld [vmem:[#allocation3_spill] sm:$0xff]  ;;  %v21211_v40 = vadd.f32 %v21166_v15, %v10063_v2  ;;  %v10410_v54 = vadd.f32 %v10373_v45, %v10372_v20  ;;  %v10066_v2 = vadd.f32 %v20777_v6, %v21120_v5 }
 0x711   :  { %v9525_v55 = vpop.f32.mrf.mxu1  ;;  %v9197_v21 = vadd.f32 %v23127_v1, %v20980_v25  ;;  %v10375_v25 = vmul.f32 %v21140_v61, %v21200_v38  ;;  %v21224_v1 = vpop.permute.xlu1 %10239  ;;  %v21233_v45 = vadd.f32 %v21166_v15, %v10065_v41  ;;  %v23131_v41 = vld [vmem:[#allocation5_spill] sm:$0xff] }
 0x712   :  { %v21174_v33 = vadd.f32 %v9525_v55, %v9195_v32  ;;  %23124 = vst [vmem:[#allocation86_spill] sm:$0xff] %v21189_v44 }
 0x713   :  { %v16491_v3 = vpop.f32.mrf.mxu1 }
 0x715   :  { %v9528_v32 = vpop.f32.mrf.mxu1 }
 0x716   :  { %v21195_v55 = vadd.f32 %v9528_v32, %v9196_v17  ;;  %v10374_v17 = vmul.f32 %v21130_v26, %v21189_v44  ;;  %v21213_v32 = vpop.permute.xlu0 %10234  ;;  %v9198_v44 = vadd.f32 %v23129_v23, %v20988_v43  ;;  %v21242_v43 = vadd.f32 %v21166_v15, %v10066_v2 }
 0x717   :  { %v16492_v3 = vpop.f32.mrf.mxu1  ;;  %v10068_v23 = vadd.f32 %v20803_v34, %v21132_v12  ;;  %v10069_v2 = vadd.f32 %v20815_v31, %v21138_v29  ;;  %v23132_v12 = vld [vmem:[#allocation42_spill] sm:$0xff] }
 0x718   :  { %v21222_v3 = vadd.f32 %v21166_v15, %v10064_v36  ;;  %v10411_v10 = vadd.f32 %v10410_v54, %v10374_v17  ;;  %v9199_v17 = vadd.f32 %v23131_v41, %v20994_v16  ;;  %v10379_v34 = vmul.f32 %v21161_v42, %v21242_v43 }
 0x719   :  { %v9533_v53 = vpop.f32.mrf.mxu1  ;;  %v21260_v16 = vadd.f32 %v21166_v15, %v10068_v23  ;;  %v21271_v29 = vadd.f32 %v21166_v15, %v10069_v2  ;;  %v23136_v2 = vld [vmem:[#allocation7_spill] sm:$0xff] }
 0x71a   :  { %v21217_v14 = vadd.f32 %v9533_v53, %v9197_v21  ;;  %v10376_v53 = vmul.f32 %v21146_v59, %v21211_v40  ;;  %v23130_v21 = vld [vmem:[#allocation41_spill] sm:$0xff]  ;;  %v10412_v61 = vadd.f32 %v10411_v10, %v10375_v25  ;;  %v10377_v6 = vmul.f32 %v21150_v39, %v21222_v3  ;;  %v21239_v5 = vpop.permute.xlu0 %10244 }
 0x71b   :  { %v16495_v26 = vpop.f32.mrf.mxu1  ;;  %v10067_v36 = vadd.f32 %v23130_v21, %v21124_v63  ;;  %v10378_v63 = vmul.f32 %v21156_v52, %v21233_v45 }
 0x71c   :  { %v10413_v54 = vadd.f32 %v10412_v61, %v10376_v53  ;;  %v10070_v61 = vadd.f32 %v23132_v12, %v21144_v30 }
 0x71d   :  { %v9536_v20 = vpop.f32.mrf.mxu1  ;;  %v21253_v25 = vadd.f32 %v21166_v15, %v10067_v36 }
 0x71e   :  { %v9637_v51 = vadd.f32 %v9536_v20, %v9198_v44  ;;  %v21250_v44 = vpop.permute.xlu1 %10249  ;;  %v10414_v20 = vadd.f32 %v10413_v54, %v10377_v6  ;;  %v21266_v52 = vpop.permute.xlu0 %10254  ;;  %v23134_v6 = vld [vmem:[#allocation43_spill] sm:$0xff] }
 0x71f   :  { %v16496_v26 = vpop.f32.mrf.mxu1  ;;  %v10380_v31 = vmul.f32 %v21181_v0, %v21253_v25  ;;  %v10071_v23 = vadd.f32 %v23134_v6, %v21152_v18  ;;  %v10382_v18 = vmul.f32 %v21213_v32, %v21271_v29 }
 0x720   :  { %v23133_v26 = vld [vmem:[#allocation6_spill] sm:$0xff]  ;;  %v10415_v41 = vadd.f32 %v10414_v20, %v10378_v63  ;;  %v21280_v63 = vadd.f32 %v21166_v15, %v10070_v61  ;;  %v10072_v20 = vadd.f32 %v20846_v49, %v21158_v22  ;;  %v10074_v22 = vadd.f32 %v20860_v9, %v21195_v55 }
 0x721   :  { %v9541_v10 = vpop.f32.mrf.mxu1  ;;  %v9200_v36 = vadd.f32 %v23133_v26, %v21002_v48  ;;  %v10381_v48 = vmul.f32 %v21193_v37, %v21260_v16  ;;  %v10076_v55 = vadd.f32 %v20874_v58, %v9637_v51 }
 0x722   :  { %v9638_v21 = vadd.f32 %v9541_v10, %v9199_v17  ;;  %v10416_v10 = vadd.f32 %v10415_v41, %v10379_v34  ;;  %v21275_v30 = vpop.permute.xlu1 %10259  ;;  %v21289_v34 = vadd.f32 %v21166_v15, %v10071_v23  ;;  %v21293_v6 = vpop.permute.xlu0 %10264  ;;  %v10383_v49 = vmul.f32 %v21224_v1, %v21280_v63  ;;  %v23138_v23 = vld [vmem:[#allocation9_spill] sm:$0xff] }
 0x723   :  { %v16499_v53 = vpop.f32.mrf.mxu1  ;;  %23135 = vst [vmem:[#allocation87_spill] sm:$0xff] %v21275_v30  ;;  %23137 = vst [vmem:[#allocation88_spill] sm:$0xff] %v21293_v6 }
 0x724   :  { %v9201_v53 = vadd.f32 %v23136_v2, %v21008_v50  ;;  %v10417_v26 = vadd.f32 %v10416_v10, %v10380_v31  ;;  %v21298_v50 = vadd.f32 %v21166_v15, %v10072_v20  ;;  %v9202_v10 = vadd.f32 %v23138_v23, %v21016_v47 }
 0x725   :  { %v9544_v17 = vpop.f32.mrf.mxu1  ;;  %v10075_v20 = vadd.f32 %v20866_v56, %v21217_v14  ;;  %v21316_v47 = vadd.f32 %v21166_v15, %v10074_v22 }
 0x726   :  { %v9639_v54 = vadd.f32 %v9544_v17, %v9200_v36  ;;  %v10073_v36 = vadd.f32 %v20852_v35, %v21174_v33  ;;  %v10418_v17 = vadd.f32 %v10417_v26, %v10381_v48  ;;  %v10384_v33 = vmul.f32 %v21239_v5, %v21289_v34 }
 0x727   :  { %v16500_v12 = vpop.f32.mrf.mxu1  ;;  %v10385_v9 = vmul.f32 %v21250_v44, %v21298_v50  ;;  %v21326_v14 = vadd.f32 %v21166_v15, %v10075_v20  ;;  %v10387_v51 = vmul.f32 %v21275_v30, %v21316_v47 }
 0x728   :  { %v21304_v12 = vpop.permute.xlu1 %10269  ;;  %v10419_v35 = vadd.f32 %v10418_v17, %v10382_v18  ;;  %v21309_v48 = vadd.f32 %v21166_v15, %v10073_v36  ;;  %v21321_v36 = vpop.permute.xlu0 %10274 }
 0x729   :  { %v9549_v41 = vpop.f32.mrf.mxu1  ;;  %23139 = vst [vmem:[#allocation89_spill] sm:$0xff] %v21304_v12  ;;  %23141 = vst [vmem:[#allocation90_spill] sm:$0xff] %v21321_v36 }
 0x72a   :  { %v9640_v61 = vadd.f32 %v9549_v41, %v9201_v53  ;;  %v10420_v26 = vadd.f32 %v10419_v35, %v10383_v49  ;;  %v23140_v41 = vld [vmem:[#allocation11_spill] sm:$0xff]  ;;  %v10386_v56 = vmul.f32 %v21266_v52, %v21309_v48  ;;  %v23142_v49 = vld [vmem:[#allocation44_spill] sm:$0xff] }
 0x72b   :  { %v16503_v31 = vpop.f32.mrf.mxu1  ;;  %v9203_v17 = vadd.f32 %v23140_v41, %v21020_v13  ;;  %v10077_v23 = vadd.f32 %v23142_v49, %v9638_v21  ;;  %v21334_v13 = vadd.f32 %v21166_v15, %v10076_v55  ;;  %v10388_v21 = vmul.f32 %v21293_v6, %v21326_v14 }
 0x72c   :  { %v10421_v31 = vadd.f32 %v10420_v26, %v10384_v33  ;;  %v21329_v35 = vpop.permute.xlu1 %10279  ;;  %v21345_v30 = vpop.permute.xlu0 %10284 }
 0x72d   :  { %v9552_v2 = vpop.f32.mrf.mxu1  ;;  %23143 = vst [vmem:[#allocation91_spill] sm:$0xff] %v21329_v35  ;;  %23147 = vst [vmem:[#allocation92_spill] sm:$0xff] %v21345_v30 }
 0x72e   :  { %v9641_v53 = vadd.f32 %v9552_v2, %v9202_v10  ;;  %v10422_v58 = vadd.f32 %v10421_v31, %v10385_v9  ;;  %v23144_v2 = vld [vmem:[#allocation45_spill] sm:$0xff]  ;;  %v23146_v31 = vld [vmem:[#allocation46_spill] sm:$0xff] }
 0x72f   :  { %v16504_v18 = vpop.f32.mrf.mxu1  ;;  %v10078_v26 = vadd.f32 %v23144_v2, %v9639_v54  ;;  %v10079_v49 = vadd.f32 %v23146_v31, %v9640_v61  ;;  %v10389_v54 = vmul.f32 %v21304_v12, %v21334_v13  ;;  %v23149_v2 = vld [vmem:[#allocation15_spill] sm:$0xff] }
 0x730   :  { %v23145_v18 = vld [vmem:[#allocation13_spill] sm:$0xff]  ;;  %v10423_v41 = vadd.f32 %v10422_v58, %v10386_v56  ;;  %v23148_v56 = vld [vmem:[#allocation47_spill] sm:$0xff] }
 0x731   :  { %v9557_v10 = vpop.f32.mrf.mxu1  ;;  %v9204_v20 = vadd.f32 %v23145_v18, %v21026_v11  ;;  %v21350_v11 = vadd.f32 %v21166_v15, %v10078_v26  ;;  %v10080_v58 = vadd.f32 %v23148_v56, %v9641_v53  ;;  %v21355_v18 = vpop.permute.xlu1 %10289  ;;  %v23152_v56 = vld [vmem:[#allocation49_spill] sm:$0xff] }
 0x732   :  { %v9642_v22 = vadd.f32 %v9557_v10, %v9203_v17  ;;  %v21342_v17 = vadd.f32 %v21166_v15, %v10077_v23  ;;  %v10424_v55 = vadd.f32 %v10423_v41, %v10387_v51  ;;  %v9205_v23 = vadd.f32 %v23149_v2, %v21030_v62  ;;  %23150 = vst [vmem:[#allocation93_spill] sm:$0xff] %v21355_v18  ;;  %v23151_v41 = vld [vmem:[#allocation48_spill] sm:$0xff] }
 0x733   :  { %v16507_v33 = vpop.f32.mrf.mxu1  ;;  %v21360_v51 = vadd.f32 %v21166_v15, %v10079_v49  ;;  %v10391_v53 = vmul.f32 %v21329_v35, %v21350_v11  ;;  %v21366_v62 = vadd.f32 %v21166_v15, %v10080_v58 }
 0x734   :  { %v10425_v6 = vadd.f32 %v10424_v55, %v10388_v21  ;;  %v10390_v61 = vmul.f32 %v21321_v36, %v21342_v17  ;;  %v23153_v55 = vld [vmem:[#allocation17_spill] sm:$0xff]  ;;  %v21371_v36 = vpop.permute.xlu0 %10294 }
 0x735   :  { %v9560_v9 = vpop.f32.mrf.mxu1  ;;  %v9206_v2 = vadd.f32 %v23153_v55, %v21036_v57  ;;  %23154 = vst [vmem:[#allocation94_spill] sm:$0xff] %v21371_v36  ;;  %v21379_v58 = vpop.permute.xlu1 %10299  ;;  %v23159_v55 = vld [vmem:[#allocation51_spill] sm:$0xff] }
 0x736   :  { %v9643_v10 = vadd.f32 %v9560_v9, %v9204_v20  ;;  %v10081_v9 = vadd.f32 %v23151_v41, %v9642_v22  ;;  %v10426_v26 = vadd.f32 %v10425_v6, %v10389_v54  ;;  %v10392_v22 = vmul.f32 %v21345_v30, %v21360_v51  ;;  %v23155_v54 = vld [vmem:[#allocation50_spill] sm:$0xff]  ;;  %23156 = vst [vmem:[#allocation57_spill] sm:$0xff] %v21379_v58 }
 0x737   :  { %v16508_v33 = vpop.f32.mrf.mxu1 }
 0x738   :  { %v10082_v21 = vadd.f32 %v23152_v56, %v9643_v10  ;;  %v10427_v49 = vadd.f32 %v10426_v26, %v10390_v61  ;;  %v21376_v6 = vadd.f32 %v21166_v15, %v10081_v9  ;;  %v23157_v10 = vld [vmem:[#allocation72_spill] sm:$0xff]  ;;  %v10393_v61 = vmul.f32 %v21355_v18, %v21366_v62 }
 0x739   :  { %v9565_v20 = vpop.f32.mrf.mxu1 }
 0x73a   :  { %v9644_v31 = vadd.f32 %v9565_v20, %v9205_v23  ;;  %v10428_v57 = vadd.f32 %v10427_v49, %v10391_v53  ;;  %v21386_v26 = vadd.f32 %v21166_v15, %v10082_v21  ;;  %v23161_v49 = vld [vmem:[#allocation21_spill] sm:$0xff] }
 0x73b   :  { %v16511_v33 = vpop.f32.mrf.mxu1 }
 0x73c   :  { %v10083_v23 = vadd.f32 %v23155_v54, %v9644_v31  ;;  %v23158_v33 = vld [vmem:[#allocation19_spill] sm:$0xff]  ;;  %v10429_v35 = vadd.f32 %v10428_v57, %v10392_v22  ;;  %v21394_v54 = vpop.permute.xlu0 %10304  ;;  %v10395_v21 = vmul.f32 %v21379_v58, %v21386_v26  ;;  %v23162_v22 = vld [vmem:[#allocation52_spill] sm:$0xff]  ;;  %v21404_v57 = vpop.permute.xlu1 %10309 }
 0x73d   :  { %v9568_v12 = vpop.f32.mrf.mxu1  ;;  %v9207_v56 = vadd.f32 %v23158_v33, %v23157_v10  ;;  %23160 = vst [vmem:[#allocation8_spill] sm:$0xff] %v21394_v54  ;;  %23163 = vst [vmem:[#allocation59_spill] sm:$0xff] %v21404_v57 }
 0x73e   :  { %v9645_v20 = vadd.f32 %v9568_v12, %v9206_v2  ;;  %v10394_v12 = vmul.f32 %v21371_v36, %v21376_v6  ;;  %v21392_v31 = vadd.f32 %v21166_v15, %v10083_v23  ;;  %v10430_v10 = vadd.f32 %v10429_v35, %v10393_v61 }
 0x73f   :  { %v16512_v41 = vpop.f32.mrf.mxu1 }
 0x740   :  { %v10084_v30 = vadd.f32 %v23159_v55, %v9645_v20  ;;  %v9208_v41 = vadd.f32 %v23161_v49, %v21046_v4  ;;  %v10431_v55 = vadd.f32 %v10430_v10, %v10394_v12  ;;  %v21416_v58 = vpop.permute.xlu0 %10314 }
 0x741   :  { %v9573_v9 = vpop.f32.mrf.mxu1  ;;  %23167 = vst [vmem:[#allocation61_spill] sm:$0xff] %v21416_v58 }
 0x742   :  { %v9646_v2 = vadd.f32 %v9573_v9, %v9207_v56  ;;  %v21401_v20 = vadd.f32 %v21166_v15, %v10084_v30  ;;  %v10396_v56 = vmul.f32 %v21394_v54, %v21392_v31  ;;  %v10432_v61 = vadd.f32 %v10431_v55, %v10395_v21  ;;  %v23165_v30 = vld [vmem:[#allocation53_spill] sm:$0xff]  ;;  %v21423_v21 = vpop.permute.xlu1 %10319 }
 0x743   :  { %v16515_v53 = vpop.f32.mrf.mxu1  ;;  %23168 = vst [vmem:[#allocation12_spill] sm:$0xff] %v21423_v21 }
 0x744   :  { %v10085_v33 = vadd.f32 %v23162_v22, %v9646_v2  ;;  %v10397_v53 = vmul.f32 %v21404_v57, %v21401_v20  ;;  %v23166_v2 = vld [vmem:[#allocation23_spill] sm:$0xff]  ;;  %v10433_v10 = vadd.f32 %v10432_v61, %v10396_v56  ;;  %v21433_v57 = vpop.permute.xlu0 %10324 }
 0x745   :  { %v9576_v23 = vpop.f32.mrf.mxu1  ;;  %v9209_v22 = vadd.f32 %v23166_v2, %v21050_v24  ;;  %23171 = vst [vmem:[#allocation63_spill] sm:$0xff] %v21433_v57 }
 0x746   :  { %v21409_v9 = vadd.f32 %v21166_v15, %v10085_v33  ;;  %v9647_v4 = vadd.f32 %v9576_v23, %v9208_v41  ;;  %v10434_v55 = vadd.f32 %v10433_v10, %v10397_v53  ;;  %v23172_v10 = vld [vmem:[#allocation55_spill] sm:$0xff] }
 0x747   :  { %v16516_v35 = vpop.f32.mrf.mxu1 }
 0x748   :  { %23164 = vst [vmem:[#allocation10_spill] sm:$0xff] %v21409_v9  ;;  %v10086_v49 = vadd.f32 %v23165_v30, %v9647_v4  ;;  %v10398_v54 = vmul.f32 %v21416_v58, %v21409_v9  ;;  %v23169_v35 = vld [vmem:[#allocation54_spill] sm:$0xff]  ;;  %v23170_v30 = vld [vmem:[#allocation25_spill] sm:$0xff] }
 0x749   :  { %v9581_v12 = vpop.f32.mrf.mxu1  ;;  %v9210_v2 = vadd.f32 %v23170_v30, %v21054_v27 }
 0x74a   :  { %v21421_v33 = vadd.f32 %v21166_v15, %v10086_v49  ;;  %v9648_v41 = vadd.f32 %v9581_v12, %v9209_v22  ;;  %v10435_v61 = vadd.f32 %v10434_v55, %v10398_v54 }
 0x74b   :  { %v16519_v23 = vpop.f32.mrf.mxu1 }
 0x74c   :  { %v10399_v4 = vmul.f32 %v21423_v21, %v21421_v33  ;;  %v10087_v24 = vadd.f32 %v23169_v35, %v9648_v41  ;;  %v23173_v41 = vld [vmem:[#allocation27_spill] sm:$0xff] }
 0x74d   :  { %v9584_v56 = vpop.f32.mrf.mxu1  ;;  %v9211_v35 = vadd.f32 %v23173_v41, %v21058_v60  ;;  %v23178_v41 = vld [vmem:[#allocation58_spill] sm:$0xff] }
 0x74e   :  { %v21431_v58 = vadd.f32 %v21166_v15, %v10087_v24  ;;  %v9649_v49 = vadd.f32 %v9584_v56, %v9210_v2  ;;  %v10436_v12 = vadd.f32 %v10435_v61, %v10399_v4  ;;  %v21443_v24 = vpop.permute.xlu1 %10329  ;;  %v23175_v2 = vld [vmem:[#allocation56_spill] sm:$0xff]  ;;  %v23176_v61 = vld [vmem:[#allocation29_spill] sm:$0xff] }
 0x74f   :  { %v16520_v22 = vpop.f32.mrf.mxu1  ;;  %23174 = vst [vmem:[#allocation14_spill] sm:$0xff] %v21443_v24 }
 0x750   :  { %v10400_v53 = vmul.f32 %v21433_v57, %v21431_v58  ;;  %v10088_v23 = vadd.f32 %v23172_v10, %v9649_v49  ;;  %v9212_v49 = vadd.f32 %v23176_v61, %v21062_v8 }
 0x751   :  { %v9589_v21 = vpop.f32.mrf.mxu1 }
 0x752   :  { %v10437_v27 = vadd.f32 %v10436_v12, %v10400_v53  ;;  %v21441_v54 = vadd.f32 %v21166_v15, %v10088_v23  ;;  %v9650_v55 = vadd.f32 %v9589_v21, %v9211_v35  ;;  %v21453_v53 = vpop.permute.xlu0 %10334 }
 0x753   :  { %v16523_v30 = vpop.f32.mrf.mxu1  ;;  %23177 = vst [vmem:[#allocation65_spill] sm:$0xff] %v21453_v53 }
 0x754   :  { %v10401_v4 = vmul.f32 %v21443_v24, %v21441_v54  ;;  %v10089_v56 = vadd.f32 %v23175_v2, %v9650_v55  ;;  %v23179_v30 = vld [vmem:[#allocation31_spill] sm:$0xff] }
 0x755   :  { %v9592_v22 = vpop.f32.mrf.mxu1  ;;  %v9213_v55 = vadd.f32 %v23179_v30, %v21066_v19 }
 0x756   :  { %v10438_v10 = vadd.f32 %v10437_v27, %v10401_v4  ;;  %v21451_v60 = vadd.f32 %v21166_v15, %v10089_v56  ;;  %v9651_v12 = vadd.f32 %v9592_v22, %v9212_v49  ;;  %v21463_v4 = vpop.permute.xlu1 %10339  ;;  %v23181_v49 = vld [vmem:[#allocation60_spill] sm:$0xff] }
 0x757   :  { %v16524_v21 = vpop.f32.mrf.mxu1  ;;  %23180 = vst [vmem:[#allocation16_spill] sm:$0xff] %v21463_v4 }
 0x758   :  { %v10402_v23 = vmul.f32 %v21453_v53, %v21451_v60  ;;  %v10090_v35 = vadd.f32 %v23178_v41, %v9651_v12  ;;  %v23182_v21 = vld [vmem:[#allocation32_spill] sm:$0xff] }
 0x759   :  { %v9597_v2 = vpop.f32.mrf.mxu1  ;;  %v9214_v12 = vadd.f32 %v23182_v21, %v21070_v7 }
 0x75a   :  { %v10439_v24 = vadd.f32 %v10438_v10, %v10402_v23  ;;  %v21461_v8 = vadd.f32 %v21166_v15, %v10090_v35  ;;  %v9652_v27 = vadd.f32 %v9597_v2, %v9213_v55  ;;  %v21471_v23 = vpop.permute.xlu0 %10344  ;;  %v23184_v55 = vld [vmem:[#allocation62_spill] sm:$0xff]  ;;  %v21478_v21 = vpop.permute.xlu1 %10349 }
 0x75b   :  { %v16527_v56 = vpop.f32.mrf.mxu1  ;;  %23183 = vst [vmem:[#allocation67_spill] sm:$0xff] %v21471_v23  ;;  %23186 = vst [vmem:[#allocation18_spill] sm:$0xff] %v21478_v21 }
 0x75c   :  { %v10403_v61 = vmul.f32 %v21463_v4, %v21461_v8  ;;  %v10091_v22 = vadd.f32 %v23181_v49, %v9652_v27  ;;  %v23185_v56 = vld [vmem:[#allocation33_spill] sm:$0xff] }
 0x75d   :  { %v9600_v41 = vpop.f32.mrf.mxu1  ;;  %v9215_v4 = vadd.f32 %v23185_v56, %v21074_v46 }
 0x75e   :  { %v10440_v53 = vadd.f32 %v10439_v24, %v10403_v61  ;;  %v10136_v19 = vadd.f32 %v21166_v15, %v10091_v22  ;;  %v9653_v10 = vadd.f32 %v9600_v41, %v9214_v12  ;;  %v23187_v22 = vld [vmem:[#allocation64_spill] sm:$0xff]  ;;  %v23188_v41 = vld [vmem:[#allocation74_spill] sm:$0xff]  ;;  %v21485_v56 = vpop.permute.xlu0 %10354 }
 0x75f   :  { %v16528_v35 = vpop.f32.mrf.mxu1  ;;  %23190 = vst [vmem:[#allocation69_spill] sm:$0xff] %v21485_v56 }
 0x760   :  { %v10404_v30 = vmul.f32 %v21471_v23, %v10136_v19  ;;  %v10092_v2 = vadd.f32 %v23184_v55, %v9653_v10  ;;  %v23189_v35 = vld [vmem:[#allocation34_spill] sm:$0xff] }
 0x761   :  { %v9605_v57 = vpop.f32.mrf.mxu1  ;;  %v9216_v23 = vadd.f32 %v23189_v35, %v23188_v41  ;;  %v21492_v35 = vpop.permute.xlu1 %10359 }
 0x762   :  { %v10441_v27 = vadd.f32 %v10440_v53, %v10404_v30  ;;  %v10137_v49 = vadd.f32 %v21166_v15, %v10092_v2  ;;  %v9654_v7 = vadd.f32 %v9605_v57, %v9215_v4  ;;  %v23191_v4 = vld [vmem:[#allocation66_spill] sm:$0xff]  ;;  %v23192_v2 = vld [vmem:[#allocation76_spill] sm:$0xff]  ;;  %23194 = vst [vmem:[#allocation20_spill] sm:$0xff] %v21492_v35 }
 0x763   :  { %v16531_v24 = vpop.f32.mrf.mxu1 }
 0x764   :  { %v10405_v61 = vmul.f32 %v21478_v21, %v10137_v49  ;;  %v10093_v12 = vadd.f32 %v23187_v22, %v9654_v7  ;;  %v23193_v24 = vld [vmem:[#allocation35_spill] sm:$0xff] }
 0x765   :  { %v9608_v36 = vpop.f32.mrf.mxu1  ;;  %v9217_v21 = vadd.f32 %v23193_v24, %v23192_v2  ;;  %v21499_v24 = vpop.permute.xlu0 %10364 }
 0x766   :  { %v10442_v10 = vadd.f32 %v10441_v27, %v10405_v61  ;;  %v10138_v55 = vadd.f32 %v21166_v15, %v10093_v12  ;;  %v9655_v46 = vadd.f32 %v9608_v36, %v9216_v23  ;;  %v23195_v23 = vld [vmem:[#allocation68_spill] sm:$0xff]  ;;  %v23196_v12 = vld [vmem:[#allocation78_spill] sm:$0xff] }
 0x767   :  { %v16532_v53 = vpop.f32.mrf.mxu1 }
 0x768   :  { %v10406_v57 = vmul.f32 %v21485_v56, %v10138_v55  ;;  %v10094_v30 = vadd.f32 %v23191_v4, %v9655_v46  ;;  %v23197_v53 = vld [vmem:[#allocation36_spill] sm:$0xff] }
 0x769   :  { %v9613_v9 = vpop.f32.mrf.mxu1  ;;  %v9218_v56 = vadd.f32 %v23197_v53, %v23196_v12 }
 0x76a   :  { %v10443_v7 = vadd.f32 %v10442_v10, %v10406_v57  ;;  %v10139_v22 = vadd.f32 %v21166_v15, %v10094_v30  ;;  %v9656_v41 = vadd.f32 %v9613_v9, %v9217_v21  ;;  %v23198_v21 = vld [vmem:[#allocation70_spill] sm:$0xff] }
 0x76b   :  { %v16535_v27 = vpop.f32.mrf.mxu1 }
 0x76c   :  { %v10407_v36 = vmul.f32 %v21492_v35, %v10139_v22  ;;  %v10095_v61 = vadd.f32 %v23195_v23, %v9656_v41  ;;  %v21504_v35 = vpop.permute.xlu1 %10369 }
 0x76d   :  { %v9616_v18 = vpop.f32.mrf.mxu1 }
 0x76e   :  { %v10444_v46 = vadd.f32 %v10443_v7, %v10407_v36  ;;  %v10140_v4 = vadd.f32 %v21166_v15, %v10095_v61  ;;  %v9657_v2 = vadd.f32 %v9616_v18, %v9218_v56 }
 0x76f   :  { %v16536_v10 = vpop.f32.mrf.mxu1 }
 0x770   :  { %v10408_v9 = vmul.f32 %v21499_v24, %v10140_v4  ;;  %v10096_v57 = vadd.f32 %v23198_v21, %v9657_v2 }
 0x772   :  { %v10445_v30 = vadd.f32 %v10444_v46, %v10408_v9  ;;  %v10141_v27 = vadd.f32 %v21166_v15, %v10096_v57 }
 0x774   :  { %v10409_v41 = vmul.f32 %v21504_v35, %v10141_v27 }
 0x776   :  { %v10446_v23 = vadd.f32 %v10445_v30, %v10409_v41  ;;  %v17502_v41 = vld [vmem:[%s22604_s7 + $0xe8] sm:$0xff]  }
 0x778   :  { %v10447_v12 = vrot.slane %v10446_v23, 4 }
 0x77a   :  { %v10448_v7 = vadd.f32 %v10447_v12, %v10446_v23 }
 0x77c   :  { %v10449_v36 = vrot.slane %v10448_v7, 2 }
 0x77e   :  { %v10450_v61 = vadd.f32 %v10449_v36, %v10448_v7 }
 0x780   :  { %v10451_v18 = vrot.slane %v10450_v61, 1 }
 0x782   :  { %v10452_v56 = vadd.f32 %v10451_v18, %v10450_v61  ;;  %v17497_v61 = vld [vmem:[%s22604_s7 + $0x60] sm:$0xff]  }
 0x783   :  { %v17504_v18 = vld [vmem:[%s22604_s7 + $0xe0] sm:$0xff]  }
 0x784   :  { %v21507_v53 = vmul.f32 0.03125, %v10452_v56 }
 0x786   :  { %v21511_v10 = vsub.f32 %v21421_v33, %v21507_v53  ;;  %v21515_v15 = vsub.f32 %v21431_v58, %v21507_v53  ;;  %v21519_v46 = vsub.f32 %v21441_v54, %v21507_v53  ;;  %v21523_v2 = vsub.f32 %v21451_v60, %v21507_v53 }
 0x787   :  { %v21527_v9 = vsub.f32 %v21461_v8, %v21507_v53  ;;  %v21530_v21 = vsub.f32 %v10136_v19, %v21507_v53  ;;  %v21533_v33 = vsub.f32 %v10137_v49, %v21507_v53  ;;  %v21536_v58 = vsub.f32 %v10138_v55, %v21507_v53  ;;  %v17498_v8 = vld [vmem:[%s22604_s7 + $0xf8] sm:$0xff]   ;;  %v17495_v49 = vld [vmem:[%s22604_s7 + $0x70] sm:$0xff]  }
 0x788   :  { %v21539_v54 = vsub.f32 %v10139_v22, %v21507_v53  ;;  %v21542_v57 = vsub.f32 %v10140_v4, %v21507_v53  ;;  %v21545_v60 = vsub.f32 %v10141_v27, %v21507_v53  ;;  %16690 = vmatpush3.bf16.msra.mxu0 %v17498_v8  ;;  %v23199_v19 = vmov 0.0   ;;  %v17500_v55 = vld [vmem:[%s22604_s7 + $0xf0] sm:$0xff]   ;;  %16632 = vmatpush3.bf16.msra.mxu1 %v17495_v49  ;;  %v17496_v27 = vld [vmem:[%s22604_s7 + $0x68] sm:$0xff]  }
 0x789   :  { %16691 = vmatprep.subr.bf16.mxu0 %v23199_v19  ;;  %v21559_v22 = vsub.f32 %v21186_v28, %v21507_v53  ;;  %v23201_v4 = vld [vmem:[#allocation85_spill] sm:$0xff]  ;;  %16633 = vmatprep.subr.bf16.mxu1 %v23199_v19  ;;  %v23203_v28 = vld [vmem:[#allocation86_spill] sm:$0xff]  ;;  %v21584_v36 = vsub.f32 %v21200_v38, %v21507_v53  ;;  %v21595_v56 = vsub.f32 %v21211_v40, %v21507_v53  ;;  %v23205_v38 = vld [vmem:[#allocation80_spill] sm:$0xff] }
 0x78a   :  { %v21563_v30 = vsub.f32 %v23201_v4, %v21507_v53  ;;  %v21575_v23 = vsub.f32 %v23203_v28, %v21507_v53  ;;  %v17499_v40 = vld [vmem:[%s22604_s7 + $0x58] sm:$0xff]  }
 0x78b   :  { %23200 = vst [vmem:[#allocation71_spill] sm:$0xff] %v21559_v22  ;;  %v10492_v12 = vmul.f32 %v21559_v22, %v21559_v22  ;;  %23204 = vst [vmem:[#allocation73_spill] sm:$0xff] %v21595_v56  ;;  %v17506_v28 = vld [vmem:[%s22604_s7 + $0xd8] sm:$0xff]  }
 0x78c   :  { %23202 = vst [vmem:[#allocation22_spill] sm:$0xff] %v21563_v30  ;;  %16692 = vmatpush3.bf16.msra.mxu0 %v17500_v55  ;;  %v10493_v7 = vmul.f32 %v21563_v30, %v21563_v30  ;;  %16634 = vmatpush3.bf16.msra.mxu1 %v17496_v27  ;;  %v10494_v8 = vmul.f32 %v21575_v23, %v21575_v23  ;;  %v23206_v55 = vld [vmem:[#allocation82_spill] sm:$0xff]  ;;  %v23208_v30 = vld [vmem:[#allocation83_spill] sm:$0xff] }
 0x78d   :  { %16693 = vmatprep.subr.bf16.mxu0 %v23199_v19  ;;  %16635 = vmatprep.subr.bf16.mxu1 %v23199_v19  ;;  %v10530_v49 = vmul.f32 %v10492_v12, %v23205_v38  ;;  %v21604_v27 = vsub.f32 %v21222_v3, %v21507_v53  ;;  %v21617_v12 = vsub.f32 %v21233_v45, %v21507_v53 }
 0x78e   :  { %v10531_v4 = vmul.f32 %v10493_v7, %v23206_v55  ;;  %v10496_v3 = vmul.f32 %v21595_v56, %v21595_v56  ;;  %v23207_v7 = vld [vmem:[#allocation81_spill] sm:$0xff] }
 0x78f   :  { %v10497_v55 = vmul.f32 %v21604_v27, %v21604_v27  ;;  %v17501_v56 = vld [vmem:[%s22604_s7 + $0x50] sm:$0xff]  }
 0x790   :  { %16694 = vmatpush3.bf16.msra.mxu0 %v17502_v41  ;;  %16636 = vmatpush3.bf16.msra.mxu1 %v17497_v61  ;;  %v10495_v41 = vmul.f32 %v21584_v36, %v21584_v36  ;;  %v10532_v61 = vmul.f32 %v10494_v8, %v23207_v7  ;;  %v10568_v38 = vadd.f32 %v10531_v4, %v10530_v49  ;;  %v17507_v8 = vld [vmem:[%s22604_s7 + $0xd0] sm:$0xff]  }
 0x791   :  { %16695 = vmatprep.subr.bf16.mxu0 %v23199_v19  ;;  %16637 = vmatprep.subr.bf16.mxu1 %v23199_v19  ;;  %v10498_v49 = vmul.f32 %v21617_v12, %v21617_v12 }
 0x792   :  { %v10533_v22 = vmul.f32 %v10495_v41, %v23208_v30  ;;  %v10569_v45 = vadd.f32 %v10568_v38, %v10532_v61  ;;  %v10534_v30 = vmul.f32 %v10496_v3, %v21146_v59  ;;  %v10463_v41 = vsub.f32 %v21260_v16, %v21507_v53  ;;  %v17508_v59 = vld [vmem:[%s22604_s7 + $0xc8] sm:$0xff]  }
 0x793   :  { %v21657_v16 = vsub.f32 %v21271_v29, %v21507_v53  ;;  %v21663_v61 = vsub.f32 %v21280_v63, %v21507_v53  ;;  %v17505_v29 = vld [vmem:[%s22604_s7 + $0x40] sm:$0xff]  }
 0x794   :  { %16696 = vmatpush3.bf16.msra.mxu0 %v17504_v18  ;;  %16638 = vmatpush3.bf16.msra.mxu1 %v17499_v40  ;;  %v21625_v18 = vsub.f32 %v21242_v43, %v21507_v53  ;;  %v10462_v43 = vsub.f32 %v21253_v25, %v21507_v53  ;;  %v10570_v4 = vadd.f32 %v10569_v45, %v10533_v22  ;;  %v17503_v25 = vld [vmem:[%s22604_s7 + $0x48] sm:$0xff]  }
 0x795   :  { %16697 = vmatprep.subr.bf16.mxu0 %v23199_v19  ;;  %16639 = vmatprep.subr.bf16.mxu1 %v23199_v19  ;;  %v10501_v38 = vmul.f32 %v10463_v41, %v10463_v41  ;;  %v10502_v63 = vmul.f32 %v21657_v16, %v21657_v16 }
 0x796   :  { %v10499_v40 = vmul.f32 %v21625_v18, %v21625_v18  ;;  %v10571_v7 = vadd.f32 %v10570_v4, %v10534_v30  ;;  %v10500_v22 = vmul.f32 %v10462_v43, %v10462_v43  ;;  %v21675_v43 = vsub.f32 %v21289_v34, %v21507_v53 }
 0x797   :  { %v21683_v30 = vsub.f32 %v21298_v50, %v21507_v53  ;;  %v10503_v4 = vmul.f32 %v21663_v61, %v21663_v61  ;;  %v10539_v41 = vmul.f32 %v10501_v38, %v21193_v37 }
 0x798   :  { %16698 = vmatpush3.bf16.msra.mxu0 %v17506_v28  ;;  %16640 = vmatpush3.bf16.msra.mxu1 %v17501_v56  ;;  %v10535_v28 = vmul.f32 %v10497_v55, %v21150_v39  ;;  %v23209_v56 = vld [vmem:[#allocation84_spill] sm:$0xff]  ;;  %v10537_v55 = vmul.f32 %v10499_v40, %v21161_v42  ;;  %v10538_v42 = vmul.f32 %v10500_v22, %v21181_v0 }
 0x799   :  { %16699 = vmatprep.subr.bf16.mxu0 %v23199_v19  ;;  %16641 = vmatprep.subr.bf16.mxu1 %v23199_v19  ;;  %v10536_v3 = vmul.f32 %v10498_v49, %v23209_v56  ;;  %v21691_v0 = vsub.f32 %v21309_v48, %v21507_v53  ;;  %v10504_v40 = vmul.f32 %v21675_v43, %v21675_v43 }
 0x79a   :  { %v10572_v39 = vadd.f32 %v10571_v7, %v10535_v28  ;;  %v10540_v28 = vmul.f32 %v10502_v63, %v21213_v32  ;;  %v21698_v7 = vsub.f32 %v21316_v47, %v21507_v53  ;;  %v10505_v37 = vmul.f32 %v21683_v30, %v21683_v30 }
 0x79b   :  { %v21705_v48 = vsub.f32 %v21326_v14, %v21507_v53  ;;  %v10506_v22 = vmul.f32 %v21691_v0, %v21691_v0  ;;  %v10542_v32 = vmul.f32 %v10504_v40, %v21239_v5  ;;  %v21712_v47 = vsub.f32 %v21334_v13, %v21507_v53 }
 0x79c   :  { %16700 = vmatpush3.bf16.msra.mxu0 %v17507_v8  ;;  %16642 = vmatpush3.bf16.msra.mxu1 %v17503_v25  ;;  %v10573_v45 = vadd.f32 %v10572_v39, %v10536_v3  ;;  %v17509_v8 = vld [vmem:[%s22604_s7 + $0xc0] sm:$0xff]   ;;  %v10541_v25 = vmul.f32 %v10503_v4, %v21224_v1  ;;  %v10507_v3 = vmul.f32 %v21698_v7, %v21698_v7 }
 0x79d   :  { %16701 = vmatprep.subr.bf16.mxu0 %v23199_v19  ;;  %16643 = vmatprep.subr.bf16.mxu1 %v23199_v19  ;;  %v10543_v1 = vmul.f32 %v10505_v37, %v21250_v44  ;;  %v10472_v14 = vsub.f32 %v21342_v17, %v21507_v53  ;;  %v10508_v38 = vmul.f32 %v21705_v48, %v21705_v48 }
 0x79e   :  { %v10574_v49 = vadd.f32 %v10573_v45, %v10537_v55  ;;  %v10544_v55 = vmul.f32 %v10506_v22, %v21266_v52  ;;  %v10473_v45 = vsub.f32 %v21350_v11, %v21507_v53  ;;  %v10509_v13 = vmul.f32 %v21712_v47, %v21712_v47  ;;  %v23212_v11 = vld [vmem:[#allocation89_spill] sm:$0xff]  ;;  %v23214_v22 = vld [vmem:[#allocation91_spill] sm:$0xff] }
 0x79f   :  { %v21729_v44 = vsub.f32 %v21360_v51, %v21507_v53  ;;  %v10510_v17 = vmul.f32 %v10472_v14, %v10472_v14  ;;  %v21734_v52 = vsub.f32 %v21366_v62, %v21507_v53 }
 0x7a0   :  { %16702 = vmatpush3.bf16.msra.mxu0 %v17508_v59  ;;  %16644 = vmatpush3.bf16.msra.mxu1 %v17505_v29  ;;  %v10575_v34 = vadd.f32 %v10574_v49, %v10538_v42  ;;  %v23210_v29 = vld [vmem:[#allocation87_spill] sm:$0xff]  ;;  %v23211_v42 = vld [vmem:[#allocation88_spill] sm:$0xff] }
 0x7a1   :  { %16703 = vmatprep.subr.bf16.mxu0 %v23199_v19  ;;  %16649 = vmatprep.subr.bf16.mxu1 %v23199_v19  ;;  %v10546_v49 = vmul.f32 %v10508_v38, %v23211_v42  ;;  %v10512_v51 = vmul.f32 %v21729_v44, %v21729_v44  ;;  %v10513_v62 = vmul.f32 %v21734_v52, %v21734_v52  ;;  %v23219_v42 = vld [vmem:[#allocation57_spill] sm:$0xff] }
 0x7a2   :  { %v10576_v50 = vadd.f32 %v10575_v34, %v10539_v41  ;;  %v10511_v41 = vmul.f32 %v10473_v45, %v10473_v45  ;;  %v10547_v34 = vmul.f32 %v10509_v13, %v23212_v11  ;;  %v23217_v13 = vld [vmem:[#allocation10_spill] sm:$0xff]  ;;  %v23220_v11 = vld [vmem:[#allocation8_spill] sm:$0xff] }
 0x7a4   :  { %16704 = vmatpush3.bf16.msra.mxu0 %v17509_v8  ;;  %v10577_v59 = vadd.f32 %v10576_v50, %v10540_v28  ;;  %v10545_v8 = vmul.f32 %v10507_v3, %v23210_v29  ;;  %v21739_v28 = vsub.f32 %v21376_v6, %v21507_v53  ;;  %v23213_v50 = vld [vmem:[#allocation90_spill] sm:$0xff]  ;;  %v21753_v6 = vsub.f32 %v21392_v31, %v21507_v53 }
 0x7a5   :  { %16729 = vmatprep.subr.bf16.mxu0 %v23199_v19  ;;  %v10548_v37 = vmul.f32 %v10510_v17, %v23213_v50  ;;  %v21767_v31 = vsub.f32 %v23217_v13, %v21507_v53  ;;  %v23225_v13 = vld [vmem:[#allocation14_spill] sm:$0xff] }
 0x7a6   :  { %v10578_v56 = vadd.f32 %v10577_v59, %v10541_v25  ;;  %v21746_v59 = vsub.f32 %v21386_v26, %v21507_v53  ;;  %v10514_v3 = vmul.f32 %v21739_v28, %v21739_v28  ;;  %v21760_v26 = vsub.f32 %v21401_v20, %v21507_v53 }
 0x7a7   :  { %v10516_v29 = vmul.f32 %v21753_v6, %v21753_v6  ;;  %v10519_v53 = vmul.f32 %v21511_v10, %v21511_v10 }
 0x7a8   :  { %v10579_v39 = vadd.f32 %v10578_v56, %v10542_v32  ;;  %v10549_v32 = vmul.f32 %v10511_v41, %v23214_v22  ;;  %v10515_v38 = vmul.f32 %v21746_v59, %v21746_v59  ;;  %v10517_v20 = vmul.f32 %v21760_v26, %v21760_v26 }
 0x7a9   :  { %v10518_v41 = vmul.f32 %v21767_v31, %v21767_v31 }
 0x7aa   :  { %v10580_v5 = vadd.f32 %v10579_v39, %v10543_v1  ;;  %v23215_v1 = vld [vmem:[#allocation92_spill] sm:$0xff] }
 0x7ab   :  { %v10550_v39 = vmul.f32 %v10512_v51, %v23215_v1  ;;  %v23221_v51 = vld [vmem:[#allocation59_spill] sm:$0xff] }
 0x7ac   :  { %v10581_v63 = vadd.f32 %v10580_v5, %v10544_v55  ;;  %v23216_v55 = vld [vmem:[#allocation93_spill] sm:$0xff]  ;;  %v10555_v50 = vmul.f32 %v10517_v20, %v23221_v51  ;;  %v10525_v20 = vmul.f32 %v21533_v33, %v21533_v33  ;;  %v23229_v51 = vld [vmem:[#allocation18_spill] sm:$0xff] }
 0x7ad   :  { %v10551_v5 = vmul.f32 %v10513_v62, %v23216_v55  ;;  %v23222_v62 = vld [vmem:[#allocation61_spill] sm:$0xff] }
 0x7ae   :  { %v10582_v4 = vadd.f32 %v10581_v63, %v10545_v8  ;;  %v23218_v8 = vld [vmem:[#allocation94_spill] sm:$0xff]  ;;  %v10556_v22 = vmul.f32 %v10518_v41, %v23222_v62  ;;  %v10526_v41 = vmul.f32 %v21536_v58, %v21536_v58  ;;  %v23230_v62 = vld [vmem:[#allocation69_spill] sm:$0xff] }
 0x7af   :  { %v10552_v63 = vmul.f32 %v10514_v3, %v23218_v8  ;;  %v23223_v3 = vld [vmem:[#allocation12_spill] sm:$0xff]  ;;  %v10524_v8 = vmul.f32 %v21530_v21, %v21530_v21 }
 0x7b0   :  { %v10583_v40 = vadd.f32 %v10582_v4, %v10546_v49  ;;  %v10553_v49 = vmul.f32 %v10515_v38, %v23219_v42  ;;  %v10557_v1 = vmul.f32 %v10519_v53, %v23223_v3  ;;  %v23224_v38 = vld [vmem:[#allocation63_spill] sm:$0xff]  ;;  %v23227_v42 = vld [vmem:[#allocation16_spill] sm:$0xff]  ;;  %v10527_v53 = vmul.f32 %v21539_v54, %v21539_v54 }
 0x7b1   :  { %v23231_v3 = vld [vmem:[#allocation20_spill] sm:$0xff] }
 0x7b2   :  { %v10584_v25 = vadd.f32 %v10583_v40, %v10547_v34  ;;  %v10554_v34 = vmul.f32 %v10516_v29, %v23220_v11  ;;  %v23228_v11 = vld [vmem:[#allocation67_spill] sm:$0xff] }
 0x7b4   :  { %v10585_v56 = vadd.f32 %v10584_v25, %v10548_v37  ;;  %v10520_v25 = vmul.f32 %v21515_v15, %v21515_v15 }
 0x7b6   :  { %v10586_v14 = vadd.f32 %v10585_v56, %v10549_v32  ;;  %v10521_v56 = vmul.f32 %v21519_v46, %v21519_v46  ;;  %v10558_v55 = vmul.f32 %v10520_v25, %v23224_v38  ;;  %v10528_v25 = vmul.f32 %v21542_v57, %v21542_v57 }
 0x7b8   :  { %v10587_v45 = vadd.f32 %v10586_v14, %v10550_v39  ;;  %v10522_v14 = vmul.f32 %v21523_v2, %v21523_v2  ;;  %v10559_v15 = vmul.f32 %v10521_v56, %v23225_v13  ;;  %v10529_v56 = vmul.f32 %v21545_v60, %v21545_v60 }
 0x7ba   :  { %v10588_v17 = vadd.f32 %v10587_v45, %v10551_v5  ;;  %v10523_v45 = vmul.f32 %v21527_v9, %v21527_v9 }
 0x7bc   :  { %v10589_v4 = vadd.f32 %v10588_v17, %v10552_v63  ;;  %v23226_v63 = vld [vmem:[#allocation65_spill] sm:$0xff] }
 0x7bd   :  { %v10560_v46 = vmul.f32 %v10522_v14, %v23226_v63  ;;  %v10566_v14 = vmul.f32 %v10528_v25, %v21499_v24  ;;  %v21818_v24 = vld [vmem:[%s22606_s5] ss:$0 sm:$0xff] }
 0x7be   :  { %v10590_v40 = vadd.f32 %v10589_v4, %v10553_v49  ;;  %v10561_v49 = vmul.f32 %v10523_v45, %v23227_v42 }
 0x7c0   :  { %v10591_v37 = vadd.f32 %v10590_v40, %v10554_v34  ;;  %v10562_v34 = vmul.f32 %v10524_v8, %v23228_v11 }
 0x7c2   :  { %v10592_v32 = vadd.f32 %v10591_v37, %v10555_v50  ;;  %v10563_v50 = vmul.f32 %v10525_v20, %v23229_v51 }
 0x7c4   :  { %v10593_v39 = vadd.f32 %v10592_v32, %v10556_v22  ;;  %v10564_v22 = vmul.f32 %v10526_v41, %v23230_v62 }
 0x7c6   :  { %v10594_v5 = vadd.f32 %v10593_v39, %v10557_v1  ;;  %v10565_v1 = vmul.f32 %v10527_v53, %v23231_v3 }
 0x7c8   :  { %v10595_v29 = vadd.f32 %v10594_v5, %v10558_v55  ;;  %v10567_v55 = vmul.f32 %v10529_v56, %v21504_v35 }
 0x7ca   :  { %v10596_v17 = vadd.f32 %v10595_v29, %v10559_v15 }
 0x7cc   :  { %v10597_v4 = vadd.f32 %v10596_v17, %v10560_v46 }
 0x7ce   :  { %v10598_v40 = vadd.f32 %v10597_v4, %v10561_v49  ;;  %v21825_v49 = vld [vmem:[%s22607_s6] ss:$0 sm:$0xff] }
 0x7d0   :  { %v10599_v37 = vadd.f32 %v10598_v40, %v10562_v34  ;;  %v23232_v34 = vld [vmem:[#allocation73_spill] sm:$0xff] }
 0x7d2   :  { %v10600_v32 = vadd.f32 %v10599_v37, %v10563_v50 }
 0x7d4   :  { %v10601_v39 = vadd.f32 %v10600_v32, %v10564_v22 }
 0x7d6   :  { %v10602_v38 = vadd.f32 %v10601_v39, %v10565_v1 }
 0x7d8   :  { %v10603_v5 = vadd.f32 %v10602_v38, %v10566_v14 }
 0x7da   :  { %v10604_v45 = vadd.f32 %v10603_v5, %v10567_v55 }
 0x7dc   :  { %v10605_v13 = vrot.slane %v10604_v45, 4 }
 0x7de   :  { %v10606_v15 = vadd.f32 %v10605_v13, %v10604_v45 }
 0x7e0   :  { %v10607_v29 = vrot.slane %v10606_v15, 2 }
 0x7e2   :  { %v10608_v8 = vadd.f32 %v10607_v29, %v10606_v15 }
 0x7e4   :  { %v10609_v63 = vrot.slane %v10608_v8, 1 }
 0x7e6   :  { %v10610_v46 = vadd.f32 %v10609_v63, %v10608_v8 }
 0x7e8   :  { %v10611_v17 = vmul.f32 0.03125, %v10610_v46 }
 0x7ea   :  { %v10612_v20 = vadd.f32 1e-05, %v10611_v17 }
 0x7ec   :  { %17622 = vrsqrt.f32 %v10612_v20 }
 0x7f9   :  { %v21813_v42 = vpop.eup %17622 }
 0x7fa   :  { %v10645_v35 = vmul.f32 %v21813_v42, %v21545_v60  ;;  %v10616_v41 = vmul.f32 %v21813_v42, %v21575_v23  ;;  %v10617_v11 = vmul.f32 %v21813_v42, %v21584_v36  ;;  %v10618_v40 = vmul.f32 %v21813_v42, %v23232_v34 }
 0x7fb   :  { %v10619_v53 = vmul.f32 %v21813_v42, %v21604_v27  ;;  %v10620_v60 = vmul.f32 %v21813_v42, %v21617_v12  ;;  %v10621_v50 = vmul.f32 %v21813_v42, %v21625_v18  ;;  %v10622_v23 = vmul.f32 %v21813_v42, %v21657_v16 }
 0x7fc   :  { %v10683_v4 = vmul.f32 %v21818_v24, %v10645_v35  ;;  %v10623_v36 = vmul.f32 %v21813_v42, %v21663_v61  ;;  %v10626_v37 = vmul.f32 %v21813_v42, %v21691_v0  ;;  %v10627_v27 = vmul.f32 %v21813_v42, %v21698_v7 }
 0x7fd   :  { %v10628_v12 = vmul.f32 %v21813_v42, %v21705_v48  ;;  %v10629_v25 = vmul.f32 %v21813_v42, %v21712_v47  ;;  %v10630_v18 = vmul.f32 %v21813_v42, %v21729_v44  ;;  %v10631_v16 = vmul.f32 %v21813_v42, %v21734_v52 }
 0x7fe   :  { %v21839_v51 = vadd.f32 %v21825_v49, %v10683_v4  ;;  %v10632_v61 = vmul.f32 %v21813_v42, %v21739_v28  ;;  %v10633_v0 = vmul.f32 %v21813_v42, %v21746_v59  ;;  %v10634_v7 = vmul.f32 %v21813_v42, %v21753_v6 }
 0x7ff   :  { %v10635_v48 = vmul.f32 %v21813_v42, %v21760_v26  ;;  %v10636_v47 = vmul.f32 %v21813_v42, %v21767_v31  ;;  %v10637_v44 = vmul.f32 %v21813_v42, %v21511_v10  ;;  %v10638_v52 = vmul.f32 %v21813_v42, %v21523_v2 }
 0x800   :  { %v10639_v28 = vmul.f32 %v21813_v42, %v21527_v9  ;;  %v10640_v59 = vmul.f32 %v21813_v42, %v21530_v21  ;;  %v10641_v6 = vmul.f32 %v21813_v42, %v21533_v33  ;;  %v10642_v26 = vmul.f32 %v21813_v42, %v21536_v58 }
 0x801   :  { %v10643_v31 = vmul.f32 %v21813_v42, %v21539_v54  ;;  %v10644_v10 = vmul.f32 %v21813_v42, %v21542_v57  ;;  %v10656_v2 = vmul.f32 %v21818_v24, %v10618_v40  ;;  %v10654_v62 = vmul.f32 %v21818_v24, %v10616_v41 }
 0x802   :  { %v10655_v9 = vmul.f32 %v21818_v24, %v10617_v11  ;;  %v10657_v21 = vmul.f32 %v21818_v24, %v10619_v53  ;;  %v10660_v22 = vmul.f32 %v21818_v24, %v10622_v23  ;;  %v10658_v33 = vmul.f32 %v21818_v24, %v10620_v60 }
 0x803   :  { %v10659_v58 = vmul.f32 %v21818_v24, %v10621_v50  ;;  %v10661_v32 = vmul.f32 %v21818_v24, %v10623_v36  ;;  %v10664_v54 = vmul.f32 %v21818_v24, %v10626_v37  ;;  %v10665_v57 = vmul.f32 %v21818_v24, %v10627_v27 }
 0x804   :  { %v10666_v56 = vmul.f32 %v21818_v24, %v10628_v12  ;;  %v10667_v3 = vmul.f32 %v21818_v24, %v10629_v25  ;;  %v10668_v1 = vmul.f32 %v21818_v24, %v10630_v18  ;;  %v10669_v39 = vmul.f32 %v21818_v24, %v10631_v16 }
 0x805   :  { %v10670_v14 = vmul.f32 %v21818_v24, %v10632_v61  ;;  %v10671_v38 = vmul.f32 %v21818_v24, %v10633_v0  ;;  %v10672_v55 = vmul.f32 %v21818_v24, %v10634_v7  ;;  %v10673_v5 = vmul.f32 %v21818_v24, %v10635_v48 }
 0x806   :  { %v10674_v45 = vmul.f32 %v21818_v24, %v10636_v47  ;;  %v10675_v13 = vmul.f32 %v21818_v24, %v10637_v44  ;;  %v10676_v15 = vmul.f32 %v21818_v24, %v10638_v52  ;;  %v10677_v29 = vmul.f32 %v21818_v24, %v10639_v28 }
 0x807   :  { %v10678_v8 = vmul.f32 %v21818_v24, %v10640_v59  ;;  %v10679_v63 = vmul.f32 %v21818_v24, %v10641_v6  ;;  %v10680_v46 = vmul.f32 %v21818_v24, %v10642_v26  ;;  %v10681_v17 = vmul.f32 %v21818_v24, %v10643_v31 }
 0x808   :  { %v10682_v20 = vmul.f32 %v21818_v24, %v10644_v10  ;;  %v21913_v35 = vadd.f32 %v21825_v49, %v10656_v2  ;;  %v21916_v4 = vadd.f32 %v21825_v49, %v10657_v21  ;;  %v10692_v41 = vadd.f32 %v21825_v49, %v10654_v62 }
 0x809   :  { %v10693_v11 = vadd.f32 %v21825_v49, %v10655_v9  ;;  %v21921_v34 = vadd.f32 %v21825_v49, %v10660_v22  ;;  %v21924_v40 = vadd.f32 %v21825_v49, %v10661_v32  ;;  %v10696_v53 = vadd.f32 %v21825_v49, %v10658_v33  ;;  %v23233_v9 = vld [vmem:[#allocation71_spill] sm:$0xff] }
 0x80a   :  { %v10697_v60 = vadd.f32 %v21825_v49, %v10659_v58  ;;  %v21929_v50 = vadd.f32 %v21825_v49, %v10664_v54  ;;  %v21932_v23 = vadd.f32 %v21825_v49, %v10665_v57  ;;  %v21935_v36 = vadd.f32 %v21825_v49, %v10666_v56  ;;  %v17510_v56 = vld [vmem:[%s22604_s7 + $0x38] sm:$0xff]  }
 0x80b   :  { %v21938_v37 = vadd.f32 %v21825_v49, %v10667_v3  ;;  %v21941_v27 = vadd.f32 %v21825_v49, %v10668_v1  ;;  %v21944_v12 = vadd.f32 %v21825_v49, %v10669_v39  ;;  %v21947_v25 = vadd.f32 %v21825_v49, %v10670_v14 }
 0x80c   :  { %v21950_v18 = vadd.f32 %v21825_v49, %v10671_v38  ;;  %v21953_v16 = vadd.f32 %v21825_v49, %v10672_v55  ;;  %v21956_v61 = vadd.f32 %v21825_v49, %v10673_v5  ;;  %v21959_v0 = vadd.f32 %v21825_v49, %v10674_v45  ;;  %v17511_v38 = vld [vmem:[%s22604_s7 + $0x178] sm:$0xff]  }
 0x80d   :  { %v21962_v7 = vadd.f32 %v21825_v49, %v10675_v13  ;;  %v21965_v48 = vadd.f32 %v21825_v49, %v10676_v15  ;;  %v21968_v47 = vadd.f32 %v21825_v49, %v10677_v29  ;;  %v21971_v44 = vadd.f32 %v21825_v49, %v10678_v8 }
 0x80e   :  { %v21974_v52 = vadd.f32 %v21825_v49, %v10679_v63  ;;  %v21977_v28 = vadd.f32 %v21825_v49, %v10680_v46  ;;  %v21980_v59 = vadd.f32 %v21825_v49, %v10681_v17  ;;  %v21983_v6 = vadd.f32 %v21825_v49, %v10682_v20 }
 0x80f   :  { %v10724_v26 = vmul.f32 0.2, %v10692_v41  ;;  %v10725_v31 = vmul.f32 0.2, %v10693_v11  ;;  %v10728_v10 = vmul.f32 0.2, %v10696_v53  ;;  %v21990_v21 = vmul.f32 %v21813_v42, %v23233_v9 }
 0x810   :  { %v10729_v2 = vmul.f32 0.2, %v10697_v60  ;;  %v21986_v62 = vmul.f32 0.2, %v21839_v51  ;;  %v10726_v22 = vmul.f32 0.2, %v21913_v35 }
 0x811   :  { %v10756_v33 = vmax.f32 %v10692_v41, %v10724_v26  ;;  %v10727_v58 = vmul.f32 0.2, %v21916_v4  ;;  %v10730_v32 = vmul.f32 0.2, %v21921_v34  ;;  %v10731_v54 = vmul.f32 0.2, %v21924_v40 }
 0x812   :  { %v10757_v57 = vmax.f32 %v10693_v11, %v10725_v31  ;;  %v10734_v3 = vmul.f32 0.2, %v21929_v50  ;;  %v10735_v1 = vmul.f32 0.2, %v21932_v23  ;;  %v10736_v39 = vmul.f32 0.2, %v21935_v36 }
 0x813   :  { %v10760_v14 = vmax.f32 %v10696_v53, %v10728_v10  ;;  %v10737_v55 = vmul.f32 0.2, %v21938_v37  ;;  %v10738_v5 = vmul.f32 0.2, %v21941_v27  ;;  %v10739_v45 = vmul.f32 0.2, %v21944_v12 }
 0x814   :  { %v10761_v13 = vmax.f32 %v10697_v60, %v10729_v2  ;;  %v10740_v15 = vmul.f32 0.2, %v21947_v25  ;;  %v10741_v29 = vmul.f32 0.2, %v21950_v18  ;;  %v22011_v8 = vmul.f32 0.2, %v21953_v16 }
 0x815   :  { %v10787_v63 = vpack.c.bf16 %v10757_v57, %v10756_v33  ;;  %v22014_v46 = vmul.f32 0.2, %v21956_v61  ;;  %v10744_v17 = vmul.f32 0.2, %v21959_v0  ;;  %v10745_v20 = vmul.f32 0.2, %v21962_v7 }
 0x816   :  { %v10789_v41 = vpack.c.bf16 %v10761_v13, %v10760_v14  ;;  %v22019_v11 = vmul.f32 0.2, %v21965_v48  ;;  %v22022_v53 = vmul.f32 0.2, %v21968_v47  ;;  %v10748_v60 = vmul.f32 0.2, %v21971_v44 }
 0x817   :  { %16646 = vmatmul.mubr.bf16.vlgmr.msra.gmra.mxu1 %v10787_v63  ;;  %v10785_v26 = vmax.f32 %v21839_v51, %v21986_v62  ;;  %v10749_v31 = vmul.f32 0.2, %v21974_v52  ;;  %v17512_v10 = vld [vmem:[%s22604_s7 + $0x30] sm:$0xff]   ;;  %v10758_v2 = vmax.f32 %v21913_v35, %v10726_v22  ;;  %v10759_v9 = vmax.f32 %v21916_v4, %v10727_v58 }
 0x818   :  { %16650 = vmatpush3.bf16.msra.mxu1 %v17510_v56  ;;  %16706 = vmatmul.mubr.bf16.vlgmr.msra.gmra.mxu0 %v10789_v41  ;;  %v10768_v33 = vmax.f32 %v21935_v36, %v10736_v39  ;;  %v10750_v57 = vmul.f32 0.2, %v21977_v28  ;;  %v10751_v14 = vmul.f32 0.2, %v21980_v59  ;;  %v17513_v51 = vld [vmem:[%s22604_s7 + $0x170] sm:$0xff]   ;;  %v10769_v62 = vmax.f32 %v21938_v37, %v10737_v55  ;;  %v17514_v39 = vld [vmem:[%s22604_s7 + $0x28] sm:$0xff]  }
 0x819   :  { %16730 = vmatpush3.bf16.msra.mxu0 %v17511_v38  ;;  %16651 = vmatprep.subr.bf16.mxu1 %v23199_v19  ;;  %v10762_v56 = vmax.f32 %v21921_v34, %v10730_v32  ;;  %v10752_v35 = vmul.f32 0.2, %v21983_v6  ;;  %v22046_v4 = vpack.c.bf16 %v10759_v9, %v10758_v2  ;;  %v10763_v36 = vmax.f32 %v21924_v40, %v10731_v54  ;;  %v17523_v2 = vld [vmem:[%s22604_s7 + $0x148] sm:$0xff]  }
 0x81a   :  { %16731 = vmatprep.subr.bf16.mxu0 %v23199_v19  ;;  %16665 = vmatprep.mubr.msk.bf16.mxu1 %vm17630_vm0, %v23199_v19  ;;  %v10772_v22 = vmax.f32 %v21947_v25, %v10740_v15  ;;  %v22052_v58 = vpack.c.bf16 %v10769_v62, %v10768_v33  ;;  %v10773_v34 = vmax.f32 %v21950_v18, %v10741_v29 }
 0x81b   :  { %16745 = vmatprep.mubr.msk.bf16.mxu0 %vm17630_vm0, %v23199_v19  ;;  %v10766_v37 = vmax.f32 %v21929_v50, %v10734_v3  ;;  %v10767_v32 = vmax.f32 %v21932_v23, %v10735_v1  ;;  %v22060_v38 = vpack.c.bf16 %v10763_v36, %v10762_v56  ;;  %v10776_v40 = vmax.f32 %v21959_v0, %v10744_v17  ;;  %v17515_v50 = vld [vmem:[%s22604_s7 + $0x168] sm:$0xff]  }
 0x81c   :  { %16652 = vmatpush3.bf16.msra.mxu1 %v17512_v10  ;;  %v10777_v25 = vmax.f32 %v21962_v7, %v10745_v20  ;;  %v10770_v54 = vmax.f32 %v21941_v27, %v10738_v5  ;;  %v22069_v23 = vpack.c.bf16 %v10773_v34, %v10772_v22  ;;  %v10771_v3 = vmax.f32 %v21944_v12, %v10739_v45  ;;  %v17527_v22 = vld [vmem:[%s22604_s7 + $0x1f8] sm:$0xff]  }
 0x81d   :  { %16732 = vmatpush3.bf16.msra.mxu0 %v17513_v51  ;;  %16653 = vmatprep.subr.bf16.mxu1 %v23199_v19  ;;  %v22071_v18 = vpack.c.bf16 %v10767_v32, %v10766_v37  ;;  %v10780_v7 = vmax.f32 %v21971_v44, %v10748_v60  ;;  %v10781_v27 = vmax.f32 %v21974_v52, %v10749_v31  ;;  %v17516_v44 = vld [vmem:[%s22604_s7 + $0x20] sm:$0xff]   ;;  %v17528_v37 = vld [vmem:[%s22604_s7 + $0xb0] sm:$0xff]  }
 0x81e   :  { %16733 = vmatprep.subr.bf16.mxu0 %v23199_v19  ;;  %v22075_v0 = vpack.c.bf16 %v10777_v25, %v10776_v40  ;;  %v10774_v1 = vmax.f32 %v21953_v16, %v22011_v8  ;;  %v22081_v55 = vpack.c.bf16 %v10771_v3, %v10770_v54  ;;  %v10775_v5 = vmax.f32 %v21956_v61, %v22014_v46  ;;  %v23234_v61 = vld [vmem:[#allocation22_spill] sm:$0xff]  ;;  %v17525_v51 = vld [vmem:[%s22604_s7 + $0x140] sm:$0xff]   ;;  %v17529_v32 = vld [vmem:[%s22604_s7 + $0x1f0] sm:$0xff]  }
 0x81f   :  { %v10784_v13 = vmax.f32 %v21983_v6, %v10752_v35  ;;  %v10778_v12 = vmax.f32 %v21965_v48, %v22019_v11  ;;  %v22091_v45 = vpack.c.bf16 %v10781_v27, %v10780_v7  ;;  %v10779_v16 = vmax.f32 %v21968_v47, %v22022_v53  ;;  %v17517_v48 = vld [vmem:[%s22604_s7 + $0x160] sm:$0xff]   ;;  %v17518_v46 = vld [vmem:[%s22604_s7 + $0x18] sm:$0xff]   ;;  %v17521_v53 = vld [vmem:[%s22604_s7 + $0x150] sm:$0xff]  }
 0x820   :  { %16654 = vmatpush3.bf16.msra.mxu1 %v17514_v39  ;;  %v10782_v52 = vmax.f32 %v21977_v28, %v10750_v57  ;;  %v10783_v15 = vmax.f32 %v21980_v59, %v10751_v14  ;;  %v10615_v6 = vmul.f32 %v21813_v42, %v23234_v61  ;;  %v22103_v29 = vpack.c.bf16 %v10775_v5, %v10774_v1  ;;  %v17526_v35 = vld [vmem:[%s22604_s7 + $0xb8] sm:$0xff]   ;;  %v17530_v39 = vld [vmem:[%s22604_s7 + $0xa8] sm:$0xff]   ;;  %v17532_v25 = vld [vmem:[%s22604_s7 + $0xa0] sm:$0xff]  }
 0x821   :  { %16734 = vmatpush3.bf16.msra.mxu0 %v17515_v50  ;;  %16655 = vmatprep.subr.bf16.mxu1 %v23199_v19  ;;  %v22105_v8 = vpack.c.bf16 %v10785_v26, %v10784_v13  ;;  %v10624_v47 = vmul.f32 %v21813_v42, %v21675_v43  ;;  %v10625_v28 = vmul.f32 %v21813_v42, %v21683_v30  ;;  %v17519_v43 = vld [vmem:[%s22604_s7 + $0x158] sm:$0xff]   ;;  %v17522_v26 = vld [vmem:[%s22604_s7 + $0x8] sm:$0xff]   ;;  %v17533_v54 = vld [vmem:[%s22604_s7 + $0x1e0] sm:$0xff]  }
 0x822   :  { %16735 = vmatprep.subr.bf16.mxu0 %v23199_v19  ;;  %v22112_v59 = vpack.c.bf16 %v10779_v16, %v10778_v12  ;;  %v22114_v63 = vpack.c.bf16 %v10783_v15, %v10782_v52  ;;  %v10652_v17 = vmul.f32 %v21818_v24, %v21990_v21  ;;  %v10653_v20 = vmul.f32 %v21818_v24, %v10615_v6  ;;  %v17520_v21 = vld [vmem:[%s22604_s7 + $0x10] sm:$0xff]   ;;  %v17531_v40 = vld [vmem:[%s22604_s7 + $0x1e8] sm:$0xff]   ;;  %v17534_v50 = vld [vmem:[%s22604_s7 + $0x98] sm:$0xff]  }
 0x823   :  { %v10662_v30 = vmul.f32 %v21818_v24, %v10624_v47  ;;  %v10663_v42 = vmul.f32 %v21818_v24, %v10625_v28  ;;  %v17535_v3 = vld [vmem:[%s22604_s7 + $0x1d8] sm:$0xff]   ;;  %v17536_v7 = vld [vmem:[%s22604_s7 + $0x90] sm:$0xff]   ;;  %v17538_v1 = vld [vmem:[%s22604_s7 + $0x88] sm:$0xff]  }
 0x824   :  { %16656 = vmatpush3.bf16.msra.mxu1 %v17516_v44  ;;  %v10690_v41 = vadd.f32 %v21825_v49, %v10652_v17  ;;  %v10691_v11 = vadd.f32 %v21825_v49, %v10653_v20  ;;  %v17537_v27 = vld [vmem:[%s22604_s7 + $0x1d0] sm:$0xff]   ;;  %v17539_v5 = vld [vmem:[%s22604_s7 + $0x1c8] sm:$0xff]   ;;  %v17540_v13 = vld [vmem:[%s22604_s7 + $0x80] sm:$0xff]  }
 0x825   :  { %16736 = vmatpush3.bf16.msra.mxu0 %v17517_v48  ;;  %16657 = vmatprep.subr.bf16.mxu1 %v23199_v19  ;;  %v10700_v24 = vadd.f32 %v21825_v49, %v10662_v30  ;;  %v10701_v60 = vadd.f32 %v21825_v49, %v10663_v42  ;;  %v17524_v49 = vld [vmem:[%s22604_s7] sm:$0xff]   ;;  %v17542_v44 = vld [vmem:[%s22604_s7 + $0x138] sm:$0xff]   ;;  %v17544_v52 = vld [vmem:[%s22604_s7 + $0x130] sm:$0xff]  }
 0x826   :  { %16737 = vmatprep.subr.bf16.mxu0 %v23199_v19  ;;  %v10722_v31 = vmul.f32 0.2, %v10690_v41  ;;  %v10723_v10 = vmul.f32 0.2, %v10691_v11  ;;  %v17541_v12 = vld [vmem:[%s22604_s7 + $0x1c0] sm:$0xff]   ;;  %v17543_v16 = vld [vmem:[%s22604_s7 + $0x278] sm:$0xff]  }
 0x827   :  { %v10732_v9 = vmul.f32 0.2, %v10700_v24  ;;  %v10733_v33 = vmul.f32 0.2, %v10701_v60  ;;  %v17545_v15 = vld [vmem:[%s22604_s7 + $0x270] sm:$0xff]   ;;  %v17548_v61 = vld [vmem:[%s22604_s7 + $0x120] sm:$0xff]  }
 0x828   :  { %16658 = vmatpush3.bf16.msra.mxu1 %v17518_v46  ;;  %v10754_v57 = vmax.f32 %v10690_v41, %v10722_v31  ;;  %v10755_v14 = vmax.f32 %v10691_v11, %v10723_v10  ;;  %v17549_v6 = vld [vmem:[%s22604_s7 + $0x260] sm:$0xff]   ;;  %v17550_v48 = vld [vmem:[%s22604_s7 + $0x118] sm:$0xff]   ;;  %v17552_v28 = vld [vmem:[%s22604_s7 + $0x110] sm:$0xff]  }
 0x829   :  { %16738 = vmatpush3.bf16.msra.mxu0 %v17519_v43  ;;  %16659 = vmatprep.subr.bf16.mxu1 %v23199_v19  ;;  %v10764_v62 = vmax.f32 %v10700_v24, %v10732_v9  ;;  %v10765_v56 = vmax.f32 %v10701_v60, %v10733_v33  ;;  %v17551_v47 = vld [vmem:[%s22604_s7 + $0x258] sm:$0xff]   ;;  %v17553_v46 = vld [vmem:[%s22604_s7 + $0x250] sm:$0xff]   ;;  %v17554_v17 = vld [vmem:[%s22604_s7 + $0x108] sm:$0xff]  }
 0x82a   :  { %16739 = vmatprep.subr.bf16.mxu0 %v23199_v19  ;;  %v10786_v36 = vpack.c.bf16 %v10755_v14, %v10754_v57  ;;  %v17555_v20 = vld [vmem:[%s22604_s7 + $0x248] sm:$0xff]   ;;  %v17556_v43 = vld [vmem:[%s22604_s7 + $0x100] sm:$0xff]   ;;  %v17558_v42 = vld [vmem:[%s22604_s7 + $0x1b8] sm:$0xff]  }
 0x82b   :  { %v10791_v34 = vpack.c.bf16 %v10765_v56, %v10764_v62  ;;  %v17557_v30 = vld [vmem:[%s22604_s7 + $0x240] sm:$0xff]   ;;  %v17560_v41 = vld [vmem:[%s22604_s7 + $0x1b0] sm:$0xff]   ;;  %v17566_v60 = vld [vmem:[%s22604_s7 + $0x198] sm:$0xff]  }
 0x82c   :  { %16660 = vmatpush3.bf16.msra.mxu1 %v17520_v21  ;;  %v17559_v21 = vld [vmem:[%s22604_s7 + $0x2f8] sm:$0xff]   ;;  %v17561_v11 = vld [vmem:[%s22604_s7 + $0x2f0] sm:$0xff]   ;;  %v17565_v24 = vld [vmem:[%s22604_s7 + $0x2e0] sm:$0xff]  }
 0x82d   :  { %16740 = vmatpush3.bf16.msra.mxu0 %v17521_v53  ;;  %16661 = vmatprep.subr.bf16.mxu1 %v23199_v19  ;;  %v17564_v53 = vld [vmem:[%s22604_s7 + $0x1a0] sm:$0xff]   ;;  %v17568_v31 = vld [vmem:[%s22604_s7 + $0x190] sm:$0xff]   ;;  %v17571_v9 = vld [vmem:[%s22604_s7 + $0x2c8] sm:$0xff]  }
 0x82e   :  { %16741 = vmatprep.subr.bf16.mxu0 %v23199_v19  ;;  %v17569_v10 = vld [vmem:[%s22604_s7 + $0x2d0] sm:$0xff]   ;;  %v17572_v33 = vld [vmem:[%s22604_s7 + $0x180] sm:$0xff]   ;;  %v17574_v57 = vld [vmem:[%s22604_s7 + $0x238] sm:$0xff]  }
 0x82f   :  { %v17575_v14 = vld [vmem:[%s22604_s7 + $0x378] sm:$0xff]   ;;  %v17577_v62 = vld [vmem:[%s22604_s7 + $0x370] sm:$0xff]   ;;  %v17580_v56 = vld [vmem:[%s22604_s7 + $0x220] sm:$0xff]  }
 0x830   :  { %16662 = vmatpush3.bf16.msra.mxu1 %v17522_v26  ;;  %v17567_v26 = vld [vmem:[%s22604_s7 + $0x2d8] sm:$0xff]  }
 0x831   :  { %16742 = vmatpush3.bf16.msra.mxu0 %v17523_v2  ;;  %16663 = vmatprep.subr.bf16.mxu1 %v23199_v19  ;;  %v17570_v2 = vld [vmem:[%s22604_s7 + $0x188] sm:$0xff]  }
 0x832   :  { %16743 = vmatprep.subr.bf16.mxu0 %v23199_v19 }
 0x834   :  { %16664 = vmatpush3.bf16.msra.mxu1 %v17524_v49  ;;  %v17573_v49 = vld [vmem:[%s22604_s7 + $0x2c0] sm:$0xff]  }
 0x835   :  { %16744 = vmatpush3.bf16.msra.mxu0 %v17525_v51  ;;  %16669 = vmatprep.subr.bf16.mxu1 %v23199_v19  ;;  %v17576_v51 = vld [vmem:[%s22604_s7 + $0x230] sm:$0xff]  }
 0x836   :  { %16769 = vmatprep.subr.bf16.mxu0 %v23199_v19 }
 0x837   :  { %16666 = vmatmul.mubr.bf16.vlgmr.msra.gmra.mxu1 %v10786_v36  ;;  %v17582_v36 = vld [vmem:[%s22604_s7 + $0x218] sm:$0xff]  }
 0x838   :  { %16746 = vmatmul.mubr.bf16.vlgmr.msra.gmra.mxu0 %v10791_v34  ;;  %16670 = vmatpush3.bf16.msra.mxu1 %v17526_v35  ;;  %v17581_v35 = vld [vmem:[%s22604_s7 + $0x360] sm:$0xff]   ;;  %v17584_v34 = vld [vmem:[%s22604_s7 + $0x210] sm:$0xff]  }
 0x839   :  { %16770 = vmatpush3.bf16.msra.mxu0 %v17527_v22  ;;  %16671 = vmatprep.subr.bf16.mxu1 %v23199_v19  ;;  %v17583_v22 = vld [vmem:[%s22604_s7 + $0x358] sm:$0xff]  }
 0x83a   :  { %16771 = vmatprep.subr.bf16.mxu0 %v23199_v19  ;;  %16685 = vmatprep.mubr.msk.bf16.mxu1 %vm17630_vm0, %v23199_v19 }
 0x83b   :  { %16785 = vmatprep.mubr.msk.bf16.mxu0 %vm17630_vm0, %v23199_v19 }
 0x83c   :  { %16672 = vmatpush3.bf16.msra.mxu1 %v17528_v37  ;;  %v17585_v37 = vld [vmem:[%s22604_s7 + $0x350] sm:$0xff]  }
 0x83d   :  { %16772 = vmatpush3.bf16.msra.mxu0 %v17529_v32  ;;  %16673 = vmatprep.subr.bf16.mxu1 %v23199_v19  ;;  %v17586_v32 = vld [vmem:[%s22604_s7 + $0x208] sm:$0xff]  }
 0x83e   :  { %16773 = vmatprep.subr.bf16.mxu0 %v23199_v19 }
 0x840   :  { %16674 = vmatpush3.bf16.msra.mxu1 %v17530_v39  ;;  %v17587_v39 = vld [vmem:[%s22604_s7 + $0x348] sm:$0xff]  }
 0x841   :  { %16774 = vmatpush3.bf16.msra.mxu0 %v17531_v40  ;;  %16675 = vmatprep.subr.bf16.mxu1 %v23199_v19  ;;  %v17588_v40 = vld [vmem:[%s22604_s7 + $0x200] sm:$0xff]  }
 0x842   :  { %16775 = vmatprep.subr.bf16.mxu0 %v23199_v19 }
 0x844   :  { %16676 = vmatpush3.bf16.msra.mxu1 %v17532_v25  ;;  %v17589_v25 = vld [vmem:[%s22604_s7 + $0x340] sm:$0xff]  }
 0x845   :  { %16776 = vmatpush3.bf16.msra.mxu0 %v17533_v54  ;;  %16677 = vmatprep.subr.bf16.mxu1 %v23199_v19  ;;  %v17590_v54 = vld [vmem:[%s22604_s7 + $0x2b8] sm:$0xff]  }
 0x846   :  { %16777 = vmatprep.subr.bf16.mxu0 %v23199_v19 }
 0x848   :  { %16678 = vmatpush3.bf16.msra.mxu1 %v17534_v50  ;;  %v17591_v50 = vld [vmem:[%s22604_s7 + $0x3f8] sm:$0xff]  }
 0x849   :  { %16778 = vmatpush3.bf16.msra.mxu0 %v17535_v3  ;;  %16679 = vmatprep.subr.bf16.mxu1 %v23199_v19  ;;  %v17592_v3 = vld [vmem:[%s22604_s7 + $0x2b0] sm:$0xff]  }
 0x84a   :  { %16779 = vmatprep.subr.bf16.mxu0 %v23199_v19 }
 0x84c   :  { %16680 = vmatpush3.bf16.msra.mxu1 %v17536_v7  ;;  %v17593_v7 = vld [vmem:[%s22604_s7 + $0x3f0] sm:$0xff]  }
 0x84d   :  { %16780 = vmatpush3.bf16.msra.mxu0 %v17537_v27  ;;  %16681 = vmatprep.subr.bf16.mxu1 %v23199_v19  ;;  %v17596_v27 = vld [vmem:[%s22604_s7 + $0x2a0] sm:$0xff]  }
 0x84e   :  { %16781 = vmatprep.subr.bf16.mxu0 %v23199_v19 }
 0x850   :  { %16682 = vmatpush3.bf16.msra.mxu1 %v17538_v1  ;;  %v17597_v1 = vld [vmem:[%s22604_s7 + $0x3e0] sm:$0xff]  }
 0x851   :  { %16782 = vmatpush3.bf16.msra.mxu0 %v17539_v5  ;;  %16683 = vmatprep.subr.bf16.mxu1 %v23199_v19  ;;  %v17598_v5 = vld [vmem:[%s22604_s7 + $0x298] sm:$0xff]  }
 0x852   :  { %16783 = vmatprep.subr.bf16.mxu0 %v23199_v19 }
 0x854   :  { %16684 = vmatpush3.bf16.msra.mxu1 %v17540_v13  ;;  %v17599_v13 = vld [vmem:[%s22604_s7 + $0x3d8] sm:$0xff]  }
 0x855   :  { %16784 = vmatpush3.bf16.msra.mxu0 %v17541_v12  ;;  %16709 = vmatprep.subr.bf16.mxu1 %v23199_v19  ;;  %v17600_v12 = vld [vmem:[%s22604_s7 + $0x290] sm:$0xff]  }
 0x856   :  { %16809 = vmatprep.subr.bf16.mxu0 %v23199_v19 }
 0x857   :  { %16686 = vmatmul.mubr.bf16.vlgmr.msra.gmra.mxu1 %v22046_v4  ;;  %v17546_v4 = vld [vmem:[%s22604_s7 + $0x128] sm:$0xff]  }
 0x858   :  { %16786 = vmatmul.mubr.bf16.vlgmr.msra.gmra.mxu0 %v22052_v58  ;;  %16710 = vmatpush3.bf16.msra.mxu1 %v17542_v44  ;;  %v17547_v58 = vld [vmem:[%s22604_s7 + $0x268] sm:$0xff]   ;;  %v17601_v44 = vld [vmem:[%s22604_s7 + $0x3d0] sm:$0xff]  }
 0x859   :  { %16810 = vmatpush3.bf16.msra.mxu0 %v17543_v16  ;;  %16711 = vmatprep.subr.bf16.mxu1 %v23199_v19  ;;  %v17602_v16 = vld [vmem:[%s22604_s7 + $0x288] sm:$0xff]  }
 0x85a   :  { %16811 = vmatprep.subr.bf16.mxu0 %v23199_v19  ;;  %16725 = vmatprep.mubr.msk.bf16.mxu1 %vm17630_vm0, %v23199_v19 }
 0x85b   :  { %16825 = vmatprep.mubr.msk.bf16.mxu0 %vm17630_vm0, %v23199_v19 }
 0x85c   :  { %16712 = vmatpush3.bf16.msra.mxu1 %v17544_v52  ;;  %v17603_v52 = vld [vmem:[%s22604_s7 + $0x3c8] sm:$0xff]  }
 0x85d   :  { %16812 = vmatpush3.bf16.msra.mxu0 %v17545_v15  ;;  %16713 = vmatprep.subr.bf16.mxu1 %v23199_v19  ;;  %v17604_v15 = vld [vmem:[%s22604_s7 + $0x280] sm:$0xff]  }
 0x85e   :  { %16813 = vmatprep.subr.bf16.mxu0 %v23199_v19 }
 0x860   :  { %16714 = vmatpush3.bf16.msra.mxu1 %v17546_v4  ;;  %v17605_v4 = vld [vmem:[%s22604_s7 + $0x3c0] sm:$0xff]  }
 0x861   :  { %16814 = vmatpush3.bf16.msra.mxu0 %v17547_v58  ;;  %16715 = vmatprep.subr.bf16.mxu1 %v23199_v19  ;;  %v17606_v58 = vld [vmem:[%s22604_s7 + $0x338] sm:$0xff]  }
 0x862   :  { %16815 = vmatprep.subr.bf16.mxu0 %v23199_v19 }
 0x864   :  { %16716 = vmatpush3.bf16.msra.mxu1 %v17548_v61 }
 0x865   :  { %16816 = vmatpush3.bf16.msra.mxu0 %v17549_v6  ;;  %16717 = vmatprep.subr.bf16.mxu1 %v23199_v19 }
 0x866   :  { %16817 = vmatprep.subr.bf16.mxu0 %v23199_v19 }
 0x868   :  { %16718 = vmatpush3.bf16.msra.mxu1 %v17550_v48  ;;  %v17607_v48 = vld [vmem:[%s22604_s7 + $0x330] sm:$0xff]  }
 0x869   :  { %16818 = vmatpush3.bf16.msra.mxu0 %v17551_v47  ;;  %16719 = vmatprep.subr.bf16.mxu1 %v23199_v19 }
 0x86a   :  { %16819 = vmatprep.subr.bf16.mxu0 %v23199_v19 }
 0x86c   :  { %16720 = vmatpush3.bf16.msra.mxu1 %v17552_v28 }
 0x86d   :  { %16820 = vmatpush3.bf16.msra.mxu0 %v17553_v46  ;;  %16721 = vmatprep.subr.bf16.mxu1 %v23199_v19 }
 0x86e   :  { %16821 = vmatprep.subr.bf16.mxu0 %v23199_v19 }
 0x870   :  { %16722 = vmatpush3.bf16.msra.mxu1 %v17554_v17 }
 0x871   :  { %16822 = vmatpush3.bf16.msra.mxu0 %v17555_v20  ;;  %16723 = vmatprep.subr.bf16.mxu1 %v23199_v19 }
 0x872   :  { %16823 = vmatprep.subr.bf16.mxu0 %v23199_v19 }
 0x874   :  { %16724 = vmatpush3.bf16.msra.mxu1 %v17556_v43  ;;  %v17609_v43 = vld [vmem:[%s22604_s7 + $0x320] sm:$0xff]  }
 0x875   :  { %16824 = vmatpush3.bf16.msra.mxu0 %v17557_v30  ;;  %16749 = vmatprep.subr.bf16.mxu1 %v23199_v19  ;;  %v17610_v30 = vld [vmem:[%s22604_s7 + $0x318] sm:$0xff]  }
 0x876   :  { %16849 = vmatprep.subr.bf16.mxu0 %v23199_v19 }
 0x877   :  { %16726 = vmatmul.mubr.bf16.vlgmr.msra.gmra.mxu1 %v22060_v38  ;;  %v17562_v38 = vld [vmem:[%s22604_s7 + $0x1a8] sm:$0xff]  }
 0x878   :  { %16826 = vmatmul.mubr.bf16.vlgmr.msra.gmra.mxu0 %v22069_v23  ;;  %16750 = vmatpush3.bf16.msra.mxu1 %v17558_v42  ;;  %v17563_v23 = vld [vmem:[%s22604_s7 + $0x2e8] sm:$0xff]   ;;  %v17611_v42 = vld [vmem:[%s22604_s7 + $0x310] sm:$0xff]  }
 0x879   :  { %16850 = vmatpush3.bf16.msra.mxu0 %v17559_v21  ;;  %16751 = vmatprep.subr.bf16.mxu1 %v23199_v19  ;;  %v17612_v21 = vld [vmem:[%s22604_s7 + $0x308] sm:$0xff]  }
 0x87a   :  { %16851 = vmatprep.subr.bf16.mxu0 %v23199_v19  ;;  %16765 = vmatprep.mubr.msk.bf16.mxu1 %vm17630_vm0, %v23199_v19 }
 0x87b   :  { %16865 = vmatprep.mubr.msk.bf16.mxu0 %vm17630_vm0, %v23199_v19 }
 0x87c   :  { %16752 = vmatpush3.bf16.msra.mxu1 %v17560_v41  ;;  %v17613_v41 = vld [vmem:[%s22604_s7 + $0x300] sm:$0xff]  }
 0x87d   :  { %16852 = vmatpush3.bf16.msra.mxu0 %v17561_v11  ;;  %16753 = vmatprep.subr.bf16.mxu1 %v23199_v19  ;;  %v17614_v11 = vld [vmem:[%s22604_s7 + $0x3b8] sm:$0xff]  }
 0x87e   :  { %16853 = vmatprep.subr.bf16.mxu0 %v23199_v19 }
 0x880   :  { %16754 = vmatpush3.bf16.msra.mxu1 %v17562_v38 }
 0x881   :  { %16854 = vmatpush3.bf16.msra.mxu0 %v17563_v23  ;;  %16755 = vmatprep.subr.bf16.mxu1 %v23199_v19 }
 0x882   :  { %16855 = vmatprep.subr.bf16.mxu0 %v23199_v19 }
 0x884   :  { %16756 = vmatpush3.bf16.msra.mxu1 %v17564_v53 }
 0x885   :  { %16856 = vmatpush3.bf16.msra.mxu0 %v17565_v24  ;;  %16757 = vmatprep.subr.bf16.mxu1 %v23199_v19  ;;  %v17615_v24 = vld [vmem:[%s22604_s7 + $0x3b0] sm:$0xff]  }
 0x886   :  { %16857 = vmatprep.subr.bf16.mxu0 %v23199_v19 }
 0x888   :  { %16758 = vmatpush3.bf16.msra.mxu1 %v17566_v60 }
 0x889   :  { %16858 = vmatpush3.bf16.msra.mxu0 %v17567_v26  ;;  %16759 = vmatprep.subr.bf16.mxu1 %v23199_v19 }
 0x88a   :  { %16859 = vmatprep.subr.bf16.mxu0 %v23199_v19 }
 0x88c   :  { %16760 = vmatpush3.bf16.msra.mxu1 %v17568_v31 }
 0x88d   :  { %16860 = vmatpush3.bf16.msra.mxu0 %v17569_v10  ;;  %16761 = vmatprep.subr.bf16.mxu1 %v23199_v19 }
 0x88e   :  { %16861 = vmatprep.subr.bf16.mxu0 %v23199_v19 }
 0x890   :  { %16762 = vmatpush3.bf16.msra.mxu1 %v17570_v2 }
 0x891   :  { %16862 = vmatpush3.bf16.msra.mxu0 %v17571_v9  ;;  %16763 = vmatprep.subr.bf16.mxu1 %v23199_v19 }
 0x892   :  { %16863 = vmatprep.subr.bf16.mxu0 %v23199_v19 }
 0x894   :  { %16764 = vmatpush3.bf16.msra.mxu1 %v17572_v33 }
 0x895   :  { %16864 = vmatpush3.bf16.msra.mxu0 %v17573_v49  ;;  %16789 = vmatprep.subr.bf16.mxu1 %v23199_v19  ;;  %v17617_v49 = vld [vmem:[%s22604_s7 + $0x3a0] sm:$0xff]  }
 0x896   :  { %16889 = vmatprep.subr.bf16.mxu0 %v23199_v19 }
 0x897   :  { %16766 = vmatmul.mubr.bf16.vlgmr.msra.gmra.mxu1 %v22071_v18  ;;  %v17578_v18 = vld [vmem:[%s22604_s7 + $0x228] sm:$0xff]  }
 0x898   :  { %16866 = vmatmul.mubr.bf16.vlgmr.msra.gmra.mxu0 %v22075_v0  ;;  %16790 = vmatpush3.bf16.msra.mxu1 %v17574_v57  ;;  %v17579_v0 = vld [vmem:[%s22604_s7 + $0x368] sm:$0xff]   ;;  %v17618_v57 = vld [vmem:[%s22604_s7 + $0x398] sm:$0xff]  }
 0x899   :  { %16890 = vmatpush3.bf16.msra.mxu0 %v17575_v14  ;;  %16791 = vmatprep.subr.bf16.mxu1 %v23199_v19  ;;  %v17619_v14 = vld [vmem:[%s22604_s7 + $0x390] sm:$0xff]  }
 0x89a   :  { %16891 = vmatprep.subr.bf16.mxu0 %v23199_v19  ;;  %16805 = vmatprep.mubr.msk.bf16.mxu1 %vm17630_vm0, %v23199_v19 }
 0x89b   :  { %16905 = vmatprep.mubr.msk.bf16.mxu0 %vm17630_vm0, %v23199_v19 }
 0x89c   :  { %16792 = vmatpush3.bf16.msra.mxu1 %v17576_v51  ;;  %v17620_v51 = vld [vmem:[%s22604_s7 + $0x388] sm:$0xff]  }
 0x89d   :  { %16892 = vmatpush3.bf16.msra.mxu0 %v17577_v62  ;;  %16793 = vmatprep.subr.bf16.mxu1 %v23199_v19  ;;  %v17621_v62 = vld [vmem:[%s22604_s7 + $0x380] sm:$0xff]  }
 0x89e   :  { %16893 = vmatprep.subr.bf16.mxu0 %v23199_v19 }
 0x8a0   :  { %16794 = vmatpush3.bf16.msra.mxu1 %v17578_v18 }
 0x8a1   :  { %16894 = vmatpush3.bf16.msra.mxu0 %v17579_v0  ;;  %16795 = vmatprep.subr.bf16.mxu1 %v23199_v19 }
 0x8a2   :  { %16895 = vmatprep.subr.bf16.mxu0 %v23199_v19 }
 0x8a4   :  { %16796 = vmatpush3.bf16.msra.mxu1 %v17580_v56 }
 0x8a5   :  { %16896 = vmatpush3.bf16.msra.mxu0 %v17581_v35  ;;  %16797 = vmatprep.subr.bf16.mxu1 %v23199_v19 }
 0x8a6   :  { %16897 = vmatprep.subr.bf16.mxu0 %v23199_v19 }
 0x8a8   :  { %16798 = vmatpush3.bf16.msra.mxu1 %v17582_v36 }
 0x8a9   :  { %16898 = vmatpush3.bf16.msra.mxu0 %v17583_v22  ;;  %16799 = vmatprep.subr.bf16.mxu1 %v23199_v19 }
 0x8aa   :  { %16899 = vmatprep.subr.bf16.mxu0 %v23199_v19 }
 0x8ac   :  { %16800 = vmatpush3.bf16.msra.mxu1 %v17584_v34 }
 0x8ad   :  { %16900 = vmatpush3.bf16.msra.mxu0 %v17585_v37  ;;  %16801 = vmatprep.subr.bf16.mxu1 %v23199_v19 }
 0x8ae   :  { %16901 = vmatprep.subr.bf16.mxu0 %v23199_v19 }
 0x8b0   :  { %16802 = vmatpush3.bf16.msra.mxu1 %v17586_v32 }
 0x8b1   :  { %16902 = vmatpush3.bf16.msra.mxu0 %v17587_v39  ;;  %16803 = vmatprep.subr.bf16.mxu1 %v23199_v19 }
 0x8b2   :  { %16903 = vmatprep.subr.bf16.mxu0 %v23199_v19 }
 0x8b4   :  { %16804 = vmatpush3.bf16.msra.mxu1 %v17588_v40 }
 0x8b5   :  { %16904 = vmatpush3.bf16.msra.mxu0 %v17589_v25  ;;  %16829 = vmatprep.subr.bf16.mxu1 %v23199_v19 }
 0x8b6   :  { %16929 = vmatprep.subr.bf16.mxu0 %v23199_v19 }
 0x8b7   :  { %16806 = vmatmul.mubr.bf16.vlgmr.msra.gmra.mxu1 %v22081_v55  ;;  %v17594_v55 = vld [vmem:[%s22604_s7 + $0x2a8] sm:$0xff]  }
 0x8b8   :  { %16906 = vmatmul.mubr.bf16.vlgmr.msra.gmra.mxu0 %v22091_v45  ;;  %16830 = vmatpush3.bf16.msra.mxu1 %v17590_v54  ;;  %v17595_v45 = vld [vmem:[%s22604_s7 + $0x3e8] sm:$0xff]  }
 0x8b9   :  { %16930 = vmatpush3.bf16.msra.mxu0 %v17591_v50  ;;  %16831 = vmatprep.subr.bf16.mxu1 %v23199_v19 }
 0x8ba   :  { %16931 = vmatprep.subr.bf16.mxu0 %v23199_v19  ;;  %16845 = vmatprep.mubr.msk.bf16.mxu1 %vm17630_vm0, %v23199_v19 }
 0x8bb   :  { %16945 = vmatprep.mubr.msk.bf16.mxu0 %vm17630_vm0, %v23199_v19 }
 0x8bc   :  { %16832 = vmatpush3.bf16.msra.mxu1 %v17592_v3 }
 0x8bd   :  { %16932 = vmatpush3.bf16.msra.mxu0 %v17593_v7  ;;  %16833 = vmatprep.subr.bf16.mxu1 %v23199_v19 }
 0x8be   :  { %16933 = vmatprep.subr.bf16.mxu0 %v23199_v19 }
 0x8c0   :  { %16834 = vmatpush3.bf16.msra.mxu1 %v17594_v55 }
 0x8c1   :  { %16934 = vmatpush3.bf16.msra.mxu0 %v17595_v45  ;;  %16835 = vmatprep.subr.bf16.mxu1 %v23199_v19 }
 0x8c2   :  { %16935 = vmatprep.subr.bf16.mxu0 %v23199_v19 }
 0x8c4   :  { %16836 = vmatpush3.bf16.msra.mxu1 %v17596_v27 }
 0x8c5   :  { %16936 = vmatpush3.bf16.msra.mxu0 %v17597_v1  ;;  %16837 = vmatprep.subr.bf16.mxu1 %v23199_v19 }
 0x8c6   :  { %16937 = vmatprep.subr.bf16.mxu0 %v23199_v19 }
 0x8c8   :  { %16838 = vmatpush3.bf16.msra.mxu1 %v17598_v5 }
 0x8c9   :  { %16938 = vmatpush3.bf16.msra.mxu0 %v17599_v13  ;;  %16839 = vmatprep.subr.bf16.mxu1 %v23199_v19 }
 0x8ca   :  { %16939 = vmatprep.subr.bf16.mxu0 %v23199_v19 }
 0x8cc   :  { %16840 = vmatpush3.bf16.msra.mxu1 %v17600_v12 }
 0x8cd   :  { %16940 = vmatpush3.bf16.msra.mxu0 %v17601_v44  ;;  %16841 = vmatprep.subr.bf16.mxu1 %v23199_v19 }
 0x8ce   :  { %16941 = vmatprep.subr.bf16.mxu0 %v23199_v19 }
 0x8d0   :  { %16842 = vmatpush3.bf16.msra.mxu1 %v17602_v16 }
 0x8d1   :  { %16942 = vmatpush3.bf16.msra.mxu0 %v17603_v52  ;;  %16843 = vmatprep.subr.bf16.mxu1 %v23199_v19 }
 0x8d2   :  { %16943 = vmatprep.subr.bf16.mxu0 %v23199_v19 }
 0x8d4   :  { %16844 = vmatpush3.bf16.msra.mxu1 %v17604_v15 }
 0x8d5   :  { %16944 = vmatpush3.bf16.msra.mxu0 %v17605_v4  ;;  %16869 = vmatprep.subr.bf16.mxu1 %v23199_v19 }
 0x8d7   :  { %16846 = vmatmul.mubr.bf16.vlgmr.msra.gmra.mxu1 %v22103_v29  ;;  %v10916_v61 = vpop.f32.mrf.mxu1  ;;  %v17608_v29 = vld [vmem:[%s22604_s7 + $0x328] sm:$0xff]  }
 0x8d8   :  { %16946 = vmatmul.mubr.bf16.vlgmr.msra.gmra.mxu0 %v22105_v8  ;;  %v22511_v6 = vpop.f32.mrf.mxu0  ;;  %16870 = vmatpush3.bf16.msra.mxu1 %v17606_v58 }
 0x8d9   :  { %v16647_v47 = vpop.f32.mrf.mxu1  ;;  %16871 = vmatprep.subr.bf16.mxu1 %v23199_v19  ;;  %16885 = vmatprep.mubr.msk.bf16.mxu1 %vm17630_vm0, %v23199_v19 }
 0x8da   :  { %v16707_v28 = vpop.f32.mrf.mxu0 }
 0x8db   :  { %v10919_v46 = vpop.f32.mrf.mxu1 }
 0x8dc   :  { %v22519_v17 = vpop.f32.mrf.mxu0  ;;  %16872 = vmatpush3.bf16.msra.mxu1 %v17607_v48 }
 0x8dd   :  { %v16648_v8 = vpop.f32.mrf.mxu1  ;;  %16873 = vmatprep.subr.bf16.mxu1 %v23199_v19 }
 0x8de   :  { %v16708_v20 = vpop.f32.mrf.mxu0 }
 0x8e0   :  { %16874 = vmatpush3.bf16.msra.mxu1 %v17608_v29 }
 0x8e1   :  { %16875 = vmatprep.subr.bf16.mxu1 %v23199_v19 }
 0x8e4   :  { %16876 = vmatpush3.bf16.msra.mxu1 %v17609_v43 }
 0x8e5   :  { %16877 = vmatprep.subr.bf16.mxu1 %v23199_v19 }
 0x8e8   :  { %16878 = vmatpush3.bf16.msra.mxu1 %v17610_v30 }
 0x8e9   :  { %16879 = vmatprep.subr.bf16.mxu1 %v23199_v19 }
 0x8ec   :  { %16880 = vmatpush3.bf16.msra.mxu1 %v17611_v42 }
 0x8ed   :  { %16881 = vmatprep.subr.bf16.mxu1 %v23199_v19 }
 0x8f0   :  { %16882 = vmatpush3.bf16.msra.mxu1 %v17612_v21 }
 0x8f1   :  { %16883 = vmatprep.subr.bf16.mxu1 %v23199_v19 }
 0x8f4   :  { %16884 = vmatpush3.bf16.msra.mxu1 %v17613_v41 }
 0x8f5   :  { %16909 = vmatprep.subr.bf16.mxu1 %v23199_v19 }
 0x8f7   :  { %v11005_v38 = vpop.f32.mrf.mxu1  ;;  %16886 = vmatmul.mubr.bf16.vlgmr.msra.gmra.mxu1 %v22112_v59  ;;  %v17616_v59 = vld [vmem:[%s22604_s7 + $0x3a8] sm:$0xff]  }
 0x8f8   :  { %v11006_v23 = vadd.f32 %v11005_v38, %v10916_v61  ;;  %v11431_v53 = vpop.f32.mrf.mxu0  ;;  %16910 = vmatpush3.bf16.msra.mxu1 %v17614_v11  ;;  %16925 = vmatprep.mubr.msk.bf16.mxu1 %vm17630_vm0, %v23199_v19 }
 0x8f9   :  { %v16667_v60 = vpop.f32.mrf.mxu1  ;;  %16911 = vmatprep.subr.bf16.mxu1 %v23199_v19 }
 0x8fa   :  { %v16747_v26 = vpop.f32.mrf.mxu0 }
 0x8fb   :  { %v11008_v31 = vpop.f32.mrf.mxu1 }
 0x8fc   :  { %v11009_v10 = vadd.f32 %v11008_v31, %v10919_v46  ;;  %v11434_v2 = vpop.f32.mrf.mxu0  ;;  %16912 = vmatpush3.bf16.msra.mxu1 %v17615_v24 }
 0x8fd   :  { %v16668_v9 = vpop.f32.mrf.mxu1  ;;  %16913 = vmatprep.subr.bf16.mxu1 %v23199_v19 }
 0x8fe   :  { %v16748_v33 = vpop.f32.mrf.mxu0 }
 0x900   :  { %16914 = vmatpush3.bf16.msra.mxu1 %v17616_v59 }
 0x901   :  { %16915 = vmatprep.subr.bf16.mxu1 %v23199_v19 }
 0x904   :  { %16916 = vmatpush3.bf16.msra.mxu1 %v17617_v49 }
 0x905   :  { %16917 = vmatprep.subr.bf16.mxu1 %v23199_v19 }
 0x908   :  { %16918 = vmatpush3.bf16.msra.mxu1 %v17618_v57 }
 0x909   :  { %16919 = vmatprep.subr.bf16.mxu1 %v23199_v19 }
 0x90c   :  { %16920 = vmatpush3.bf16.msra.mxu1 %v17619_v14 }
 0x90d   :  { %16921 = vmatprep.subr.bf16.mxu1 %v23199_v19 }
 0x910   :  { %16922 = vmatpush3.bf16.msra.mxu1 %v17620_v51 }
 0x911   :  { %16923 = vmatprep.subr.bf16.mxu1 %v23199_v19 }
 0x914   :  { %16924 = vmatpush3.bf16.msra.mxu1 %v17621_v62 }
 0x917   :  { %v11110_v18 = vpop.f32.mrf.mxu1  ;;  %16926 = vmatmul.mubr.bf16.vlgmr.msra.gmra.mxu1 %v22114_v63 }
 0x918   :  { %v11117_v0 = vadd.f32 %v11110_v18, %v11006_v23  ;;  %v11645_v56 = vpop.f32.mrf.mxu0 }
 0x919   :  { %v16687_v35 = vpop.f32.mrf.mxu1 }
 0x91a   :  { %v16787_v36 = vpop.f32.mrf.mxu0  ;;  %v11224_v22 = vadd.f32 %v22511_v6, %v11117_v0 }
 0x91b   :  { %v11113_v34 = vpop.f32.mrf.mxu1 }
 0x91c   :  { %v11118_v37 = vadd.f32 %v11113_v34, %v11009_v10  ;;  %v11648_v32 = vpop.f32.mrf.mxu0 }
 0x91d   :  { %v16688_v39 = vpop.f32.mrf.mxu1 }
 0x91e   :  { %v16788_v40 = vpop.f32.mrf.mxu0  ;;  %v11225_v25 = vadd.f32 %v22519_v17, %v11118_v37 }
 0x937   :  { %v11324_v54 = vpop.f32.mrf.mxu1 }
 0x938   :  { %v11331_v50 = vadd.f32 %v11324_v54, %v11224_v22  ;;  %v11859_v19 = vpop.f32.mrf.mxu0 }
 0x939   :  { %v16727_v3 = vpop.f32.mrf.mxu1 }
 0x93a   :  { %v16827_v7 = vpop.f32.mrf.mxu0  ;;  %v11438_v55 = vadd.f32 %v11431_v53, %v11331_v50  ;;  %v12526_v3 = vpop.permute.xlu0 %12525 }
 0x93b   :  { %v11327_v63 = vpop.f32.mrf.mxu1  ;;  %v12531_v7 = vpop.permute.xlu1 %12530 }
 0x93c   :  { %v11332_v45 = vadd.f32 %v11327_v63, %v11225_v25  ;;  %v11862_v27 = vpop.f32.mrf.mxu0 }
 0x93d   :  { %v16728_v1 = vpop.f32.mrf.mxu1 }
 0x93e   :  { %v16828_v5 = vpop.f32.mrf.mxu0  ;;  %v11439_v13 = vadd.f32 %v11434_v2, %v11332_v45 }
 0x957   :  { %v11538_v12 = vpop.f32.mrf.mxu1 }
 0x958   :  { %v11545_v44 = vadd.f32 %v11538_v12, %v11438_v55  ;;  %v12073_v16 = vpop.f32.mrf.mxu0 }
 0x959   :  { %v16767_v52 = vpop.f32.mrf.mxu1 }
 0x95a   :  { %v16867_v15 = vpop.f32.mrf.mxu0  ;;  %v11652_v4 = vadd.f32 %v11645_v56, %v11545_v44 }
 0x95b   :  { %v11541_v58 = vpop.f32.mrf.mxu1 }
 0x95c   :  { %v11546_v61 = vadd.f32 %v11541_v58, %v11439_v13  ;;  %v12076_v6 = vpop.f32.mrf.mxu0 }
 0x95d   :  { %v16768_v48 = vpop.f32.mrf.mxu1 }
 0x95e   :  { %v16868_v47 = vpop.f32.mrf.mxu0  ;;  %v11653_v28 = vadd.f32 %v11648_v32, %v11546_v61  ;;  %v13455_v32 = vld [vmem:[%s22608_s8] ss:$0 sm:$0xff] }
 0x977   :  { %v11752_v46 = vpop.f32.mrf.mxu1 }
 0x978   :  { %v11759_v17 = vadd.f32 %v11752_v46, %v11652_v4  ;;  %v12287_v29 = vpop.f32.mrf.mxu0 }
 0x979   :  { %v16807_v8 = vpop.f32.mrf.mxu1 }
 0x97a   :  { %v16907_v20 = vpop.f32.mrf.mxu0  ;;  %v11866_v43 = vadd.f32 %v11859_v19, %v11759_v17 }
 0x97b   :  { %v11755_v30 = vpop.f32.mrf.mxu1 }
 0x97c   :  { %v11760_v42 = vadd.f32 %v11755_v30, %v11653_v28  ;;  %v12290_v21 = vpop.f32.mrf.mxu0 }
 0x97d   :  { %v16808_v41 = vpop.f32.mrf.mxu1 }
 0x97e   :  { %v16908_v11 = vpop.f32.mrf.mxu0  ;;  %v11867_v38 = vadd.f32 %v11862_v27, %v11760_v42  ;;  %v13456_v42 = vld [vmem:[%s22609_s9] ss:$0 sm:$0xff] }
 0x97f   :  { %v13457_v11 = vld [vmem:[%s22610_s10] ss:$0 sm:$0xff] }
 0x997   :  { %v11966_v23 = vpop.f32.mrf.mxu1 }
 0x998   :  { %v11973_v53 = vadd.f32 %v11966_v23, %v11866_v43  ;;  %v12501_v24 = vpop.f32.mrf.mxu0 }
 0x999   :  { %v16847_v60 = vpop.f32.mrf.mxu1 }
 0x99a   :  { %v16947_v26 = vpop.f32.mrf.mxu0  ;;  %v12080_v31 = vadd.f32 %v12073_v16, %v11973_v53 }
 0x99b   :  { %v11969_v10 = vpop.f32.mrf.mxu1 }
 0x99c   :  { %v11974_v2 = vadd.f32 %v11969_v10, %v11867_v38  ;;  %v12504_v59 = vpop.f32.mrf.mxu0 }
 0x99d   :  { %v16848_v9 = vpop.f32.mrf.mxu1 }
 0x99e   :  { %v16948_v33 = vpop.f32.mrf.mxu0  ;;  %v12081_v49 = vadd.f32 %v12076_v6, %v11974_v2 }
 0x9b7   :  { %v12180_v57 = vpop.f32.mrf.mxu1 }
 0x9b8   :  { %v12187_v14 = vadd.f32 %v12180_v57, %v12080_v31 }
 0x9b9   :  { %v16887_v51 = vpop.f32.mrf.mxu1 }
 0x9ba   :  { %v12294_v62 = vadd.f32 %v12287_v29, %v12187_v14 }
 0x9bb   :  { %v12183_v18 = vpop.f32.mrf.mxu1 }
 0x9bc   :  { %v12188_v0 = vadd.f32 %v12183_v18, %v12081_v49 }
 0x9bd   :  { %v16888_v56 = vpop.f32.mrf.mxu1 }
 0x9be   :  { %v12295_v35 = vadd.f32 %v12290_v21, %v12188_v0 }
 0x9d7   :  { %v12394_v36 = vpop.f32.mrf.mxu1 }
 0x9d8   :  { %v12401_v22 = vadd.f32 %v12394_v36, %v12294_v62 }
 0x9d9   :  { %v16927_v34 = vpop.f32.mrf.mxu1 }
 0x9da   :  { %v12508_v37 = vadd.f32 %v12501_v24, %v12401_v22 }
 0x9db   :  { %v12397_v39 = vpop.f32.mrf.mxu1 }
 0x9dc   :  { %v12402_v40 = vadd.f32 %v12397_v39, %v12295_v35  ;;  %v12517_v54 = vadd.f32 %v13455_v32, %v12508_v37 }
 0x9dd   :  { %v16928_v25 = vpop.f32.mrf.mxu1 }
 0x9de   :  { %v12509_v50 = vadd.f32 %v12504_v59, %v12402_v40  ;;  %v12533_v55 = vmul.f32 %v12526_v3, %v12517_v54 }
 0x9e0   :  { %v12518_v19 = vadd.f32 %v13455_v32, %v12509_v50 }
 0x9e2   :  { %v12534_v63 = vmul.f32 %v12531_v7, %v12518_v19 }
 0x9e4   :  { %v12535_v45 = vadd.f32 %v12534_v63, %v12533_v55 }
 0x9e6   :  { %v12536_v27 = vrot.slane %v12535_v45, 4 }
 0x9e8   :  { %v12537_v1 = vadd.f32 %v12536_v27, %v12535_v45 }
 0x9ea   :  { %v12538_v5 = vrot.slane %v12537_v1, 2 }
 0x9ec   :  { %v12539_v13 = vadd.f32 %v12538_v5, %v12537_v1 }
 0x9ee   :  { %v12540_v12 = vrot.slane %v12539_v13, 1 }
 0x9f0   :  { %v12541_v44 = vadd.f32 %v12540_v12, %v12539_v13 }
 0x9f2   :  { %v12542_v16 = vmul.f32 0.5, %v12541_v44 }
 0x9f4   :  { %v12543_v52 = vsub.f32 %v12517_v54, %v12542_v16  ;;  %v12544_v15 = vsub.f32 %v12518_v19, %v12542_v16 }
 0x9f6   :  { %v12545_v4 = vmul.f32 %v12543_v52, %v12543_v52  ;;  %v12546_v58 = vmul.f32 %v12544_v15, %v12544_v15 }
 0x9f8   :  { %v12547_v61 = vmul.f32 %v12545_v4, %v12526_v3  ;;  %v12548_v6 = vmul.f32 %v12546_v58, %v12531_v7 }
 0x9fa   :  { %v12549_v48 = vadd.f32 %v12548_v6, %v12547_v61 }
 0x9fc   :  { %v12550_v47 = vrot.slane %v12549_v48, 4 }
 0x9fe   :  { %v12551_v28 = vadd.f32 %v12550_v47, %v12549_v48 }
 0xa00   :  { %v12552_v46 = vrot.slane %v12551_v28, 2 }
 0xa02   :  { %v12553_v17 = vadd.f32 %v12552_v46, %v12551_v28 }
 0xa04   :  { %v12554_v29 = vrot.slane %v12553_v17, 1 }
 0xa06   :  { %v12555_v8 = vadd.f32 %v12554_v29, %v12553_v17 }
 0xa08   :  { %v12556_v20 = vmul.f32 0.5, %v12555_v8 }
 0xa0a   :  { %v12557_v43 = vadd.f32 1e-05, %v12556_v20 }
 0xa0c   :  { %17624 = vrsqrt.f32 %v12557_v43 }
 0xa19   :  { %v17625_v30 = vpop.eup %17624 }
 0xa1a   :  { %v12559_v21 = vmul.f32 %v17625_v30, %v12543_v52  ;;  %v12560_v41 = vmul.f32 %v17625_v30, %v12544_v15 }
 0xa1c   :  { %v12567_v38 = vmul.f32 %v13456_v42, %v12559_v21  ;;  %v12568_v23 = vmul.f32 %v13456_v42, %v12560_v41 }
 0xa1e   :  { %v12575_v53 = vadd.f32 %v13457_v11, %v12567_v38  ;;  %v12576_v24 = vadd.f32 %v13457_v11, %v12568_v23 }
 0xa20   :  { %12577 = vst [vmem:[%s22611_s13] sm:$0xff] %v12575_v53  ;;  %12578 = vst [vmem:[%s22611_s13 + $0x8] sm:$0xff] %v12576_v24 }

</bundles_post_ra>
